<compile_context>
chip_gen: v7x
topology: tpu7x:2x2x1
jax: 0.10.0
libtpu: 0.0.40
codegen_flags: <defaults>
</compile_context>

<pallas_src>
import functools

import numpy as np
import jax
import jax.numpy as jnp
from jax import lax
from jax.experimental import pallas as pl
from jax.experimental.pallas import tpu as pltpu

# ----------------------------- configuration -----------------------------
BATCH = 2
IN_CHANS = 2
IMG = 32
PATCH = 4
EMBED_DIM = 32
DEPTHS = (2, 2)
HEADS = (2, 4)
WINDOW = 4
MLP_RATIO = 4
NUM_CLASSES = 3
LN_EPS = 1e-5
_INV_SQRT2 = 0.7071067811865476
_NEG_INF = -1e9


# ----------------------------- in-kernel helpers -----------------------------
def _ln(x, g, b, eps=LN_EPS):
    mu = jnp.mean(x, axis=-1, keepdims=True)
    xc = x - mu
    var = jnp.mean(xc * xc, axis=-1, keepdims=True)
    return xc * lax.rsqrt(var + eps) * g + b


def _erf(x):
    # Abramowitz & Stegun 7.1.26 polynomial erf (|err| <= 1.5e-7): exp on the
    # EUP, divide on the EUP approx-reciprocal path (free VLIW slots).
    a1, a2, a3, a4, a5 = (0.254829592, -0.284496736, 1.421413741,
                          -1.453152027, 1.061405429)
    p = 0.3275911
    ax = jnp.abs(x)
    t = pl.reciprocal(1.0 + p * ax, approx=True)
    poly = t * (a1 + t * (a2 + t * (a3 + t * (a4 + t * a5))))
    y = 1.0 - poly * jnp.exp(-ax * ax)
    return jnp.where(x < 0.0, -y, y)


def _gelu(x):
    return 0.5 * x * (1.0 + _erf(x * _INV_SQRT2))


def _mm(a, b):
    # bf16 MXU inputs, f32 accumulation.
    return jnp.dot(a.astype(jnp.bfloat16), b.astype(jnp.bfloat16),
                   preferred_element_type=jnp.float32)


def _mmf32(a, b):
    # f32 matmul (token permutations / final head).
    return jnp.dot(a, b, preferred_element_type=jnp.float32)


def _attn_core(x, g1, b1, qkv_w, qkv_b, bias, proj_w, proj_b, heads, scale):
    """LN1 + QKV + dense multi-window multi-head attention + proj + residual.

    x is (T, C) with tokens in window order (window-major); `bias` is the
    precombined (heads, T, T) additive bias: block-diagonal rel-pos bias +
    shift mask, -1e9 on cross-window entries so the dense softmax equals the
    per-window softmax exactly.
    """
    T, C = x.shape
    hd = C // heads
    xn = _ln(x, g1, b1)
    qkv = _mm(xn, qkv_w) + qkv_b                             # (T, 3C)
    acc = None
    for h in range(heads):                                   # static unroll (2/4)
        q = qkv[:, h * hd:(h + 1) * hd] * scale
        k = qkv[:, C + h * hd:C + (h + 1) * hd]
        v = qkv[:, 2 * C + h * hd:2 * C + (h + 1) * hd]
        s = lax.dot_general(q.astype(jnp.bfloat16), k.astype(jnp.bfloat16),
                            (((1,), (1,)), ((), ())),
                            preferred_element_type=jnp.float32)   # (T, T)
        s = s + bias[h]
        s = s - jnp.max(s, axis=-1, keepdims=True)
        p = jnp.exp(s)
        p = p * pl.reciprocal(jnp.sum(p, axis=-1, keepdims=True), approx=True)
        o_h = _mm(p, v)                                           # (T, hd)
        # per-head slice of the projection weight: concat(heads) @ W == sum_h
        term = _mm(o_h, proj_w[h * hd:(h + 1) * hd, :])
        acc = term if acc is None else acc + term
    return x + acc + proj_b


def _mlp_core(x, g2, b2, w1, b1, w2, b2b):
    xn = _ln(x, g2, b2)
    h = _gelu(_mm(xn, w1) + b1)
    return x + _mm(h, w2) + b2b


def _swin_block_refs(x, r, heads, scale):
    (n1g, n1b, qkvw, qkvb, bias, projw, projb,
     n2g, n2b, w1, b1, w2, b2) = r
    y = _attn_core(x, n1g[...], n1b[...], qkvw[...], qkvb[...], bias[...],
                   projw[...], projb[...], heads, scale)
    return _mlp_core(y, n2g[...], n2b[...], w1[...], b1[...], w2[...], b2[...])


# ----------------------------- Pallas kernels -----------------------------
def _embed_block_kernel(*refs, heads, scale):
    # patch-embed (matmul + bias + LN) + window-partition perm + Swin block.
    xp_ref, pew, peb, peg, pebn, perm, iperm = refs[:7]
    blk = refs[7:20]
    o_ref = refs[20]

    xp = xp_ref[0].astype(jnp.float32)                       # (T, Cin*P*P)
    x = _ln(_mm(xp, pew[...]) + peb[...], peg[...], pebn[...])   # raster tokens
    xw = _mmf32(perm[...], x)                                # -> window order
    yw = _swin_block_refs(xw, blk, heads, scale)
    o_ref[0] = _mmf32(iperm[...], yw).astype(o_ref.dtype)    # -> raster order


def _shift_block_kernel(*refs, heads, scale):
    # shifted-window block: roll + window partition folded into one static
    # permutation matmul (and its inverse on the way out).
    x_ref, perm, iperm = refs[:3]
    blk = refs[3:16]
    o_ref = refs[16]

    x = x_ref[0].astype(jnp.float32)
    xw = _mmf32(perm[...], x)
    yw = _swin_block_refs(xw, blk, heads, scale)
    o_ref[0] = _mmf32(iperm[...], yw).astype(o_ref.dtype)


def _merge_block_kernel(*refs, heads, scale):
    # patch merging (2x2 neighbor gather + LN(4C) + reduction) + Swin block.
    # The 4C concat + LN is decomposed over the 4 neighbor groups so no
    # in-kernel reshape/concat is needed (only dots, adds and row reductions).
    x_ref, sel, mg, mb, mw = refs[:5]
    blk = refs[5:18]
    o_ref = refs[18]

    x = x_ref[0].astype(jnp.float32)                         # (T_in, C_in) raster
    cin = x.shape[1]
    parts = [_mmf32(sel[k], x) for k in range(4)]            # 4 x (T_out, C_in)
    inv4c = 1.0 / float(4 * cin)
    mu = (jnp.sum(parts[0], axis=-1, keepdims=True)
          + jnp.sum(parts[1], axis=-1, keepdims=True)
          + jnp.sum(parts[2], axis=-1, keepdims=True)
          + jnp.sum(parts[3], axis=-1, keepdims=True)) * inv4c
    xc = [p - mu for p in parts]
    var = (jnp.sum(xc[0] * xc[0], axis=-1, keepdims=True)
           + jnp.sum(xc[1] * xc[1], axis=-1, keepdims=True)
           + jnp.sum(xc[2] * xc[2], axis=-1, keepdims=True)
           + jnp.sum(xc[3] * xc[3], axis=-1, keepdims=True)) * inv4c
    rs = lax.rsqrt(var + LN_EPS)
    y = None
    for k in range(4):
        term = _mm(xc[k] * rs * mg[k] + mb[k], mw[k])        # (T_out, 2C)
        y = term if y is None else y + term

    yb = _swin_block_refs(y, blk, heads, scale)
    o_ref[0] = yb.astype(o_ref.dtype)


def _block_head_kernel(*refs, heads, scale):
    # last Swin block + final LayerNorm + global average pool + classifier.
    x_ref = refs[0]
    blk = refs[1:14]
    fg, fb, hw, hb = refs[14:18]
    o_ref = refs[18]

    x = x_ref[0].astype(jnp.float32)
    y = _swin_block_refs(x, blk, heads, scale)
    yn = _ln(y, fg[...], fb[...])
    pooled = jnp.mean(yn, axis=0, keepdims=True)             # (1, Cf)
    logits = _mmf32(pooled, hw[...]) + hb[...]               # (1, num_classes)
    o_ref[0] = logits.astype(o_ref.dtype)


# ----------------------------- pallas_call wrapper -----------------------------
def _rep(a):
    zeros = (0,) * a.ndim
    return pl.BlockSpec(a.shape, lambda b, _z=zeros: _z)


def _per_image(tail):
    tail = tuple(tail)
    zeros = (0,) * len(tail)
    return pl.BlockSpec((1,) + tail, lambda b, _z=zeros: (b,) + _z)


def _call_block(kernel, x, weights, out_tail, out_dtype=jnp.float32):
    B = x.shape[0]
    return pl.pallas_call(
        kernel,
        out_shape=jax.ShapeDtypeStruct((B,) + tuple(out_tail), out_dtype),
        grid=(B,),
        in_specs=[_per_image(x.shape[1:])] + [_rep(w) for w in weights],
        out_specs=_per_image(out_tail),
        compiler_params=pltpu.CompilerParams(dimension_semantics=("parallel",)),
    )(x, *weights)


# ----------------------------- static (numpy) helpers -----------------------------
def _rel_position_index_np(ws):
    coords = np.stack(np.meshgrid(np.arange(ws), np.arange(ws), indexing="ij"))
    cf = coords.reshape(2, -1)
    rel = (cf[:, :, None] - cf[:, None, :]).transpose(1, 2, 0).astype(np.int64)
    rel[..., 0] += ws - 1
    rel[..., 1] += ws - 1
    rel[..., 0] *= 2 * ws - 1
    return rel.sum(-1)                                   # (N, N)


def _shift_mask_np(H, W, ws, shift):
    img = np.zeros((H, W), np.float32)
    cnt = 0
    for hs in (slice(0, -ws), slice(-ws, -shift), slice(-shift, None)):
        for wsl in (slice(0, -ws), slice(-ws, -shift), slice(-shift, None)):
            img[hs, wsl] = cnt
            cnt += 1
    mw = img.reshape(H // ws, ws, W // ws, ws).transpose(0, 2, 1, 3)
    mw = mw.reshape(-1, ws * ws)
    diff = mw[:, None, :] - mw[:, :, None]
    return np.where(diff != 0, -100.0, 0.0).astype(np.float32)   # (nW, N, N)


def _window_perm_np(H, W, ws, shift):
    # x_window_order = P @ x_raster (roll by -shift + window partition).
    idx = np.arange(H * W).reshape(H, W)
    if shift > 0:
        idx = np.roll(idx, (-shift, -shift), axis=(0, 1))
    src = idx.reshape(H // ws, ws, W // ws, ws).transpose(0, 2, 1, 3).reshape(-1)
    P = np.zeros((H * W, H * W), np.float32)
    P[np.arange(H * W), src] = 1.0
    return P


def _merge_select_np(H, W):
    # sel[k] selects the k-th 2x2 neighbor (x0,x1,x2,x3 order) for every
    # output token of the downsampled grid.
    Ho, Wo = H // 2, W // 2
    sel = np.zeros((4, Ho * Wo, H * W), np.float32)
    for k, (dh, dw) in enumerate(((0, 0), (1, 0), (0, 1), (1, 1))):
        for oh in range(Ho):
            for ow in range(Wo):
                sel[k, oh * Wo + ow, (2 * oh + dh) * W + (2 * ow + dw)] = 1.0
    return sel


def _dense_attn_bias(rel_table, ws, heads, nW, shift_mask):
    # Precombined additive attention bias for the dense per-image attention:
    # block-diagonal rel-pos bias (+ shift mask), -1e9 on cross-window entries.
    N = ws * ws
    ridx = _rel_position_index_np(ws).reshape(-1)
    rb = rel_table[ridx].reshape(N, N, heads).transpose(2, 0, 1)   # (heads,N,N)
    if nW == 1:
        return rb
    T = nW * N
    bid = np.repeat(np.arange(nW), N)
    same = (bid[:, None] == bid[None, :]).astype(np.float32)
    add = np.where(same > 0, 0.0, _NEG_INF).astype(np.float32)
    if shift_mask is not None:
        for w in range(nW):
            add[w * N:(w + 1) * N, w * N:(w + 1) * N] += shift_mask[w]
    return jnp.tile(rb, (1, nW, nW)) * jnp.asarray(same) + jnp.asarray(add)


# ----------------------------- parameters -----------------------------
def _tn(key, shape, std=0.02):
    return std * jax.random.normal(key, shape, dtype=jnp.float32)


def make_params(key):
    keys = iter(jax.random.split(key, 64))
    nk = lambda: next(keys)
    P = {}
    C = EMBED_DIM
    P["patch_w"] = _tn(nk(), (IN_CHANS * PATCH * PATCH, C))
    P["patch_b"] = jnp.zeros((C,), jnp.float32)
    P["patch_norm_g"] = jnp.ones((C,), jnp.float32)
    P["patch_norm_b"] = jnp.zeros((C,), jnp.float32)
    P["stages"] = []

    dim = C
    H = W = IMG // PATCH
    for si, (depth, heads) in enumerate(zip(DEPTHS, HEADS)):
        stage = {}
        if si > 0:
            stage["merge_norm_g"] = jnp.ones((4 * dim,), jnp.float32)
            stage["merge_norm_b"] = jnp.zeros((4 * dim,), jnp.float32)
            stage["merge_w"] = _tn(nk(), (4 * dim, 2 * dim))   # bias=False
            dim *= 2
            H //= 2
            W //= 2
        ws = min(WINDOW, H, W)
        nW = (H // ws) * (W // ws)
        blocks = []
        for bi in range(depth):
            shift = (ws // 2) if (bi % 2 == 1 and ws < min(H, W)) else 0
            rel_table = _tn(nk(), ((2 * ws - 1) ** 2, heads))
            mask_np = _shift_mask_np(H, W, ws, shift) if shift > 0 else None
            blocks.append({
                "norm1_g": jnp.ones((dim,), jnp.float32),
                "norm1_b": jnp.zeros((dim,), jnp.float32),
                "qkv_w": _tn(nk(), (dim, 3 * dim)),
                "qkv_b": jnp.zeros((3 * dim,), jnp.float32),
                "attn_bias": _dense_attn_bias(rel_table, ws, heads, nW, mask_np),
                "proj_w": _tn(nk(), (dim, dim)),
                "proj_b": jnp.zeros((dim,), jnp.float32),
                "norm2_g": jnp.ones((dim,), jnp.float32),
                "norm2_b": jnp.zeros((dim,), jnp.float32),
                "fc1_w": _tn(nk(), (dim, MLP_RATIO * dim)),
                "fc1_b": jnp.zeros((MLP_RATIO * dim,), jnp.float32),
                "fc2_w": _tn(nk(), (MLP_RATIO * dim, dim)),
                "fc2_b": jnp.zeros((dim,), jnp.float32),
            })
        stage["blocks"] = blocks
        P["stages"].append(stage)

    P["norm_g"] = jnp.ones((dim,), jnp.float32)
    P["norm_b"] = jnp.zeros((dim,), jnp.float32)
    P["head_w"] = _tn(nk(), (dim, NUM_CLASSES))
    P["head_b"] = jnp.zeros((NUM_CLASSES,), jnp.float32)

    # Static token-permutation / neighbor-selection constants (stage 0 grid).
    Hp = Wp = IMG // PATCH
    ws0 = min(WINDOW, Hp, Wp)
    p0 = _window_perm_np(Hp, Wp, ws0, 0)
    p1 = _window_perm_np(Hp, Wp, ws0, ws0 // 2)
    P["consts"] = {
        "perm0": jnp.asarray(p0), "perm0_inv": jnp.asarray(p0.T),
        "perm1": jnp.asarray(p1), "perm1_inv": jnp.asarray(p1.T),
        "merge_sel": jnp.asarray(_merge_select_np(Hp, Wp)),
    }
    return P


# ----------------------------- forward pass -----------------------------
def _block_weight_list(blk, C):
    return [blk["norm1_g"].reshape(1, C), blk["norm1_b"].reshape(1, C),
            blk["qkv_w"], blk["qkv_b"].reshape(1, 3 * C),
            blk["attn_bias"],
            blk["proj_w"], blk["proj_b"].reshape(1, C),
            blk["norm2_g"].reshape(1, C), blk["norm2_b"].reshape(1, C),
            blk["fc1_w"], blk["fc1_b"].reshape(1, MLP_RATIO * C),
            blk["fc2_w"], blk["fc2_b"].reshape(1, C)]


def swin_forward(params, x_nchw):
    # Forward is written out for the fixed (2, 2)-depth config.
    assert DEPTHS == (2, 2)
    B = x_nchw.shape[0]
    Hp, Wp = IMG // PATCH, IMG // PATCH
    C0, C1 = EMBED_DIM, 2 * EMBED_DIM
    T0, T1 = Hp * Wp, (Hp // 2) * (Wp // 2)
    heads0, heads1 = HEADS
    scale0 = (C0 // heads0) ** -0.5
    scale1 = (C1 // heads1) ** -0.5
    cst = params["consts"]
    s0, s1 = params["stages"]
    b00, b01 = s0["blocks"]
    b10, b11 = s1["blocks"]

    # Patch extraction (the only XLA op in the pipeline): NCHW -> (B, T0, Cin*P*P).
    xp = x_nchw.reshape(B, IN_CHANS, Hp, PATCH, Wp, PATCH)
    xp = xp.transpose(0, 2, 4, 1, 3, 5).reshape(B, T0, IN_CHANS * PATCH * PATCH)

    # Stage 0, block 0: patch-embed + LN fused in front of the block.
    w = [params["patch_w"], params["patch_b"].reshape(1, C0),
         params["patch_norm_g"].reshape(1, C0), params["patch_norm_b"].reshape(1, C0),
         cst["perm0"], cst["perm0_inv"]] + _block_weight_list(b00, C0)
    x = _call_block(functools.partial(_embed_block_kernel, heads=heads0, scale=scale0),
                    xp, w, (T0, C0))

    # Stage 0, block 1: shifted windows (shift folded into the permutation).
    w = [cst["perm1"], cst["perm1_inv"]] + _block_weight_list(b01, C0)
    x = _call_block(functools.partial(_shift_block_kernel, heads=heads0, scale=scale0),
                    x, w, (T0, C0))

    # Stage 1, block 0: patch-merging fused in front of the block.
    w = [cst["merge_sel"],
         s1["merge_norm_g"].reshape(4, 1, C0), s1["merge_norm_b"].reshape(4, 1, C0),
         s1["merge_w"].reshape(4, C0, C1)] + _block_weight_list(b10, C1)
    x = _call_block(functools.partial(_merge_block_kernel, heads=heads1, scale=scale1),
                    x, w, (T1, C1))

    # Stage 1, block 1: final LN + global average pool + head fused behind it.
    w = _block_weight_list(b11, C1) + [
        params["norm_g"].reshape(1, C1), params["norm_b"].reshape(1, C1),
        params["head_w"], params["head_b"].reshape(1, NUM_CLASSES)]
    out = _call_block(functools.partial(_block_head_kernel, heads=heads1, scale=scale1),
                      x, w, (1, NUM_CLASSES))
    return out.reshape(B, NUM_CLASSES)


# ----------------------------- main -----------------------------
if __name__ == "__main__":
    key = jax.random.PRNGKey(0)
    pkey, xkey = jax.random.split(key)
    params = make_params(pkey)
    x = jax.random.normal(xkey, (BATCH, IN_CHANS, IMG, IMG), dtype=jnp.float32)

    fwd = jax.jit(swin_forward)
    out = fwd(params, x)
    jax.block_until_ready(out)
    assert out.shape == (BATCH, NUM_CLASSES) and out.dtype == jnp.float32
    print("KERNEL_OK")
</pallas_src>

<mosaic_0001>
module attributes {stable_mosaic.version = 11 : i64} {
  func.func @_shift_block_kernel(%arg0: i32, %arg1: memref<1x64x32xf32, #tpu.memory_space<vmem>>, %arg2: memref<64x64xf32, #tpu.memory_space<vmem>>, %arg3: memref<64x64xf32, #tpu.memory_space<vmem>>, %arg4: memref<1x32xf32, #tpu.memory_space<vmem>>, %arg5: memref<1x32xf32, #tpu.memory_space<vmem>>, %arg6: memref<32x96xf32, #tpu.memory_space<vmem>>, %arg7: memref<1x96xf32, #tpu.memory_space<vmem>>, %arg8: memref<2x64x64xf32, #tpu.memory_space<vmem>>, %arg9: memref<32x32xf32, #tpu.memory_space<vmem>>, %arg10: memref<1x32xf32, #tpu.memory_space<vmem>>, %arg11: memref<1x32xf32, #tpu.memory_space<vmem>>, %arg12: memref<1x32xf32, #tpu.memory_space<vmem>>, %arg13: memref<32x128xf32, #tpu.memory_space<vmem>>, %arg14: memref<1x128xf32, #tpu.memory_space<vmem>>, %arg15: memref<128x32xf32, #tpu.memory_space<vmem>>, %arg16: memref<1x32xf32, #tpu.memory_space<vmem>>, %arg17: memref<1x64x32xf32, #tpu.memory_space<vmem>>) attributes {dimension_semantics = [#tpu.dimension_semantics<parallel>], iteration_bounds = array<i64: 2>, scalar_prefetch = 0 : i64, scratch_operands = 0 : i64, tpu.core_type = #tpu.core_type<tc>, window_params = [{transform_indices = @transform_0, window_bounds = array<i64: 1, 64, 32>}, {pipeline_mode = #tpu.pipeline_mode<synchronous>, transform_indices = @transform_1, window_bounds = array<i64: 64, 64>}, {pipeline_mode = #tpu.pipeline_mode<synchronous>, transform_indices = @transform_2, window_bounds = array<i64: 64, 64>}, {pipeline_mode = #tpu.pipeline_mode<synchronous>, transform_indices = @transform_3, window_bounds = array<i64: 1, 32>}, {pipeline_mode = #tpu.pipeline_mode<synchronous>, transform_indices = @transform_4, window_bounds = array<i64: 1, 32>}, {pipeline_mode = #tpu.pipeline_mode<synchronous>, transform_indices = @transform_5, window_bounds = array<i64: 32, 96>}, {pipeline_mode = #tpu.pipeline_mode<synchronous>, transform_indices = @transform_6, window_bounds = array<i64: 1, 96>}, {pipeline_mode = #tpu.pipeline_mode<synchronous>, transform_indices = @transform_7, window_bounds = array<i64: 2, 64, 64>}, {pipeline_mode = #tpu.pipeline_mode<synchronous>, transform_indices = @transform_8, window_bounds = array<i64: 32, 32>}, {pipeline_mode = #tpu.pipeline_mode<synchronous>, transform_indices = @transform_9, window_bounds = array<i64: 1, 32>}, {pipeline_mode = #tpu.pipeline_mode<synchronous>, transform_indices = @transform_10, window_bounds = array<i64: 1, 32>}, {pipeline_mode = #tpu.pipeline_mode<synchronous>, transform_indices = @transform_11, window_bounds = array<i64: 1, 32>}, {pipeline_mode = #tpu.pipeline_mode<synchronous>, transform_indices = @transform_12, window_bounds = array<i64: 32, 128>}, {pipeline_mode = #tpu.pipeline_mode<synchronous>, transform_indices = @transform_13, window_bounds = array<i64: 1, 128>}, {pipeline_mode = #tpu.pipeline_mode<synchronous>, transform_indices = @transform_14, window_bounds = array<i64: 128, 32>}, {pipeline_mode = #tpu.pipeline_mode<synchronous>, transform_indices = @transform_15, window_bounds = array<i64: 1, 32>}, {transform_indices = @transform_16, window_bounds = array<i64: 1, 64, 32>}]} {
    %c0 = arith.constant 0 : index
    %c0_0 = arith.constant 0 : index
    %c0_1 = arith.constant 0 : index
    %0 = vector.load %arg1[%c0, %c0_0, %c0_1] : memref<1x64x32xf32, #tpu.memory_space<vmem>>, vector<1x64x32xf32>
    %1 = vector.shape_cast %0 : vector<1x64x32xf32> to vector<64x32xf32>
    %c0_2 = arith.constant 0 : index
    %c0_3 = arith.constant 0 : index
    %2 = vector.load %arg2[%c0_2, %c0_3] : memref<64x64xf32, #tpu.memory_space<vmem>>, vector<64x64xf32>
    %cst = arith.constant dense<0.000000e+00> : vector<64x32xf32>
    %3 = tpu.matmul %2, %1, %cst {dimension_numbers = #tpu.dot_dimension_numbers<[1], [0], [0], [1], [0, 0, 1, 1], [], []>} : vector<64x64xf32>, vector<64x32xf32>, vector<64x32xf32> -> vector<64x32xf32>
    %c0_4 = arith.constant 0 : index
    %c0_5 = arith.constant 0 : index
    %4 = vector.load %arg4[%c0_4, %c0_5] : memref<1x32xf32, #tpu.memory_space<vmem>>, vector<1x32xf32>
    %c0_6 = arith.constant 0 : index
    %c0_7 = arith.constant 0 : index
    %5 = vector.load %arg5[%c0_6, %c0_7] : memref<1x32xf32, #tpu.memory_space<vmem>>, vector<1x32xf32>
    %c0_8 = arith.constant 0 : index
    %c0_9 = arith.constant 0 : index
    %6 = vector.load %arg6[%c0_8, %c0_9] : memref<32x96xf32, #tpu.memory_space<vmem>>, vector<32x96xf32>
    %c0_10 = arith.constant 0 : index
    %c0_11 = arith.constant 0 : index
    %7 = vector.load %arg7[%c0_10, %c0_11] : memref<1x96xf32, #tpu.memory_space<vmem>>, vector<1x96xf32>
    %c0_12 = arith.constant 0 : index
    %c0_13 = arith.constant 0 : index
    %c0_14 = arith.constant 0 : index
    %8 = vector.load %arg8[%c0_12, %c0_13, %c0_14] : memref<2x64x64xf32, #tpu.memory_space<vmem>>, vector<2x64x64xf32>
    %c0_15 = arith.constant 0 : index
    %c0_16 = arith.constant 0 : index
    %9 = vector.load %arg9[%c0_15, %c0_16] : memref<32x32xf32, #tpu.memory_space<vmem>>, vector<32x32xf32>
    %c0_17 = arith.constant 0 : index
    %c0_18 = arith.constant 0 : index
    %10 = vector.load %arg10[%c0_17, %c0_18] : memref<1x32xf32, #tpu.memory_space<vmem>>, vector<1x32xf32>
    %cst_19 = arith.constant dense<0.000000e+00> : vector<64xf32>
    %11 = vector.multi_reduction <add>, %3, %cst_19 [1] : vector<64x32xf32> to vector<64xf32>
    %12 = vector.shape_cast %11 : vector<64xf32> to vector<64x1xf32>
    %cst_20 = arith.constant 3.200000e+01 : f32
    %13 = vector.broadcast %cst_20 : f32 to vector<64x1xf32>
    %14 = arith.divf %12, %13 : vector<64x1xf32>
    %15 = vector.broadcast %14 : vector<64x1xf32> to vector<64x32xf32>
    %16 = arith.subf %3, %15 : vector<64x32xf32>
    %17 = arith.mulf %16, %16 : vector<64x32xf32>
    %cst_21 = arith.constant dense<0.000000e+00> : vector<64xf32>
    %18 = vector.multi_reduction <add>, %17, %cst_21 [1] : vector<64x32xf32> to vector<64xf32>
    %19 = vector.shape_cast %18 : vector<64xf32> to vector<64x1xf32>
    %cst_22 = arith.constant 3.200000e+01 : f32
    %20 = vector.broadcast %cst_22 : f32 to vector<64x1xf32>
    %21 = arith.divf %19, %20 : vector<64x1xf32>
    %cst_23 = arith.constant 9.99999974E-6 : f32
    %22 = vector.broadcast %cst_23 : f32 to vector<64x1xf32>
    %23 = arith.addf %21, %22 : vector<64x1xf32>
    %24 = math.rsqrt %23 : vector<64x1xf32>
    %25 = vector.broadcast %24 : vector<64x1xf32> to vector<64x32xf32>
    %26 = arith.mulf %16, %25 : vector<64x32xf32>
    %27 = vector.broadcast %4 : vector<1x32xf32> to vector<64x32xf32>
    %28 = arith.mulf %26, %27 : vector<64x32xf32>
    %29 = vector.broadcast %5 : vector<1x32xf32> to vector<64x32xf32>
    %30 = arith.addf %28, %29 : vector<64x32xf32>
    %31 = arith.truncf %30 : vector<64x32xf32> to vector<64x32xbf16>
    %32 = arith.truncf %6 : vector<32x96xf32> to vector<32x96xbf16>
    %cst_24 = arith.constant dense<0.000000e+00> : vector<64x96xf32>
    %33 = tpu.matmul %31, %32, %cst_24 {dimension_numbers = #tpu.dot_dimension_numbers<[1], [0], [0], [1], [0, 0, 1, 1], [], []>} : vector<64x32xbf16>, vector<32x96xbf16>, vector<64x96xf32> -> vector<64x96xf32>
    %34 = vector.broadcast %7 : vector<1x96xf32> to vector<64x96xf32>
    %35 = arith.addf %33, %34 : vector<64x96xf32>
    %36 = vector.extract_strided_slice %35 {offsets = [0, 0], sizes = [64, 16], strides = [1, 1]} : vector<64x96xf32> to vector<64x16xf32>
    %cst_25 = arith.constant 2.500000e-01 : f32
    %37 = vector.broadcast %cst_25 : f32 to vector<64x16xf32>
    %38 = arith.mulf %36, %37 : vector<64x16xf32>
    %39 = vector.extract_strided_slice %35 {offsets = [0, 32], sizes = [64, 16], strides = [1, 1]} : vector<64x96xf32> to vector<64x16xf32>
    %40 = vector.extract_strided_slice %35 {offsets = [0, 64], sizes = [64, 16], strides = [1, 1]} : vector<64x96xf32> to vector<64x16xf32>
    %41 = arith.truncf %38 : vector<64x16xf32> to vector<64x16xbf16>
    %42 = arith.truncf %39 : vector<64x16xf32> to vector<64x16xbf16>
    %cst_26 = arith.constant dense<0.000000e+00> : vector<64x64xf32>
    %43 = tpu.matmul %41, %42, %cst_26 {dimension_numbers = #tpu.dot_dimension_numbers<[1], [1], [0], [0], [0, 0, 1, 0], [], []>} : vector<64x16xbf16>, vector<64x16xbf16>, vector<64x64xf32> -> vector<64x64xf32>
    %44 = vector.extract_strided_slice %8 {offsets = [0, 0, 0], sizes = [1, 64, 64], strides = [1, 1, 1]} : vector<2x64x64xf32> to vector<1x64x64xf32>
    %45 = vector.shape_cast %44 : vector<1x64x64xf32> to vector<64x64xf32>
    %46 = arith.addf %43, %45 : vector<64x64xf32>
    %cst_27 = arith.constant dense<0xFF800000> : vector<64xf32>
    %47 = vector.multi_reduction <maximumf>, %46, %cst_27 [1] : vector<64x64xf32> to vector<64xf32>
    %48 = vector.shape_cast %47 : vector<64xf32> to vector<64x1xf32>
    %49 = vector.broadcast %48 : vector<64x1xf32> to vector<64x64xf32>
    %50 = arith.subf %46, %49 : vector<64x64xf32>
    %51 = math.exp %50 : vector<64x64xf32>
    %cst_28 = arith.constant dense<0.000000e+00> : vector<64xf32>
    %52 = vector.multi_reduction <add>, %51, %cst_28 [1] : vector<64x64xf32> to vector<64xf32>
    %53 = vector.shape_cast %52 : vector<64xf32> to vector<64x1xf32>
    %54 = tpu.reciprocal %53 {approx = true} : vector<64x1xf32> -> vector<64x1xf32>
    %55 = vector.broadcast %54 : vector<64x1xf32> to vector<64x64xf32>
    %56 = arith.mulf %51, %55 : vector<64x64xf32>
    %57 = arith.truncf %56 : vector<64x64xf32> to vector<64x64xbf16>
    %58 = arith.truncf %40 : vector<64x16xf32> to vector<64x16xbf16>
    %cst_29 = arith.constant dense<0.000000e+00> : vector<64x16xf32>
    %59 = tpu.matmul %57, %58, %cst_29 {dimension_numbers = #tpu.dot_dimension_numbers<[1], [0], [0], [1], [0, 0, 1, 1], [], []>} : vector<64x64xbf16>, vector<64x16xbf16>, vector<64x16xf32> -> vector<64x16xf32>
    %60 = vector.extract_strided_slice %9 {offsets = [0, 0], sizes = [16, 32], strides = [1, 1]} : vector<32x32xf32> to vector<16x32xf32>
    %61 = arith.truncf %59 : vector<64x16xf32> to vector<64x16xbf16>
    %62 = arith.truncf %60 : vector<16x32xf32> to vector<16x32xbf16>
    %cst_30 = arith.constant dense<0.000000e+00> : vector<64x32xf32>
    %63 = tpu.matmul %61, %62, %cst_30 {dimension_numbers = #tpu.dot_dimension_numbers<[1], [0], [0], [1], [0, 0, 1, 1], [], []>} : vector<64x16xbf16>, vector<16x32xbf16>, vector<64x32xf32> -> vector<64x32xf32>
    %64 = vector.extract_strided_slice %35 {offsets = [0, 16], sizes = [64, 16], strides = [1, 1]} : vector<64x96xf32> to vector<64x16xf32>
    %cst_31 = arith.constant 2.500000e-01 : f32
    %65 = vector.broadcast %cst_31 : f32 to vector<64x16xf32>
    %66 = arith.mulf %64, %65 : vector<64x16xf32>
    %67 = vector.extract_strided_slice %35 {offsets = [0, 48], sizes = [64, 16], strides = [1, 1]} : vector<64x96xf32> to vector<64x16xf32>
    %68 = vector.extract_strided_slice %35 {offsets = [0, 80], sizes = [64, 16], strides = [1, 1]} : vector<64x96xf32> to vector<64x16xf32>
    %69 = arith.truncf %66 : vector<64x16xf32> to vector<64x16xbf16>
    %70 = arith.truncf %67 : vector<64x16xf32> to vector<64x16xbf16>
    %cst_32 = arith.constant dense<0.000000e+00> : vector<64x64xf32>
    %71 = tpu.matmul %69, %70, %cst_32 {dimension_numbers = #tpu.dot_dimension_numbers<[1], [1], [0], [0], [0, 0, 1, 0], [], []>} : vector<64x16xbf16>, vector<64x16xbf16>, vector<64x64xf32> -> vector<64x64xf32>
    %72 = vector.extract_strided_slice %8 {offsets = [1, 0, 0], sizes = [1, 64, 64], strides = [1, 1, 1]} : vector<2x64x64xf32> to vector<1x64x64xf32>
    %73 = vector.shape_cast %72 : vector<1x64x64xf32> to vector<64x64xf32>
    %74 = arith.addf %71, %73 : vector<64x64xf32>
    %cst_33 = arith.constant dense<0xFF800000> : vector<64xf32>
    %75 = vector.multi_reduction <maximumf>, %74, %cst_33 [1] : vector<64x64xf32> to vector<64xf32>
    %76 = vector.shape_cast %75 : vector<64xf32> to vector<64x1xf32>
    %77 = vector.broadcast %76 : vector<64x1xf32> to vector<64x64xf32>
    %78 = arith.subf %74, %77 : vector<64x64xf32>
    %79 = math.exp %78 : vector<64x64xf32>
    %cst_34 = arith.constant dense<0.000000e+00> : vector<64xf32>
    %80 = vector.multi_reduction <add>, %79, %cst_34 [1] : vector<64x64xf32> to vector<64xf32>
    %81 = vector.shape_cast %80 : vector<64xf32> to vector<64x1xf32>
    %82 = tpu.reciprocal %81 {approx = true} : vector<64x1xf32> -> vector<64x1xf32>
    %83 = vector.broadcast %82 : vector<64x1xf32> to vector<64x64xf32>
    %84 = arith.mulf %79, %83 : vector<64x64xf32>
    %85 = arith.truncf %84 : vector<64x64xf32> to vector<64x64xbf16>
    %86 = arith.truncf %68 : vector<64x16xf32> to vector<64x16xbf16>
    %cst_35 = arith.constant dense<0.000000e+00> : vector<64x16xf32>
    %87 = tpu.matmul %85, %86, %cst_35 {dimension_numbers = #tpu.dot_dimension_numbers<[1], [0], [0], [1], [0, 0, 1, 1], [], []>} : vector<64x64xbf16>, vector<64x16xbf16>, vector<64x16xf32> -> vector<64x16xf32>
    %88 = vector.extract_strided_slice %9 {offsets = [16, 0], sizes = [16, 32], strides = [1, 1]} : vector<32x32xf32> to vector<16x32xf32>
    %89 = arith.truncf %87 : vector<64x16xf32> to vector<64x16xbf16>
    %90 = arith.truncf %88 : vector<16x32xf32> to vector<16x32xbf16>
    %cst_36 = arith.constant dense<0.000000e+00> : vector<64x32xf32>
    %91 = tpu.matmul %89, %90, %cst_36 {dimension_numbers = #tpu.dot_dimension_numbers<[1], [0], [0], [1], [0, 0, 1, 1], [], []>} : vector<64x16xbf16>, vector<16x32xbf16>, vector<64x32xf32> -> vector<64x32xf32>
    %92 = arith.addf %63, %91 : vector<64x32xf32>
    %93 = arith.addf %3, %92 : vector<64x32xf32>
    %94 = vector.broadcast %10 : vector<1x32xf32> to vector<64x32xf32>
    %95 = arith.addf %93, %94 : vector<64x32xf32>
    %c0_37 = arith.constant 0 : index
    %c0_38 = arith.constant 0 : index
    %96 = vector.load %arg11[%c0_37, %c0_38] : memref<1x32xf32, #tpu.memory_space<vmem>>, vector<1x32xf32>
    %c0_39 = arith.constant 0 : index
    %c0_40 = arith.constant 0 : index
    %97 = vector.load %arg12[%c0_39, %c0_40] : memref<1x32xf32, #tpu.memory_space<vmem>>, vector<1x32xf32>
    %c0_41 = arith.constant 0 : index
    %c0_42 = arith.constant 0 : index
    %98 = vector.load %arg13[%c0_41, %c0_42] : memref<32x128xf32, #tpu.memory_space<vmem>>, vector<32x128xf32>
    %c0_43 = arith.constant 0 : index
    %c0_44 = arith.constant 0 : index
    %99 = vector.load %arg14[%c0_43, %c0_44] : memref<1x128xf32, #tpu.memory_space<vmem>>, vector<1x128xf32>
    %c0_45 = arith.constant 0 : index
    %c0_46 = arith.constant 0 : index
    %100 = vector.load %arg15[%c0_45, %c0_46] : memref<128x32xf32, #tpu.memory_space<vmem>>, vector<128x32xf32>
    %c0_47 = arith.constant 0 : index
    %c0_48 = arith.constant 0 : index
    %101 = vector.load %arg16[%c0_47, %c0_48] : memref<1x32xf32, #tpu.memory_space<vmem>>, vector<1x32xf32>
    %cst_49 = arith.constant dense<0.000000e+00> : vector<64xf32>
    %102 = vector.multi_reduction <add>, %95, %cst_49 [1] : vector<64x32xf32> to vector<64xf32>
    %103 = vector.shape_cast %102 : vector<64xf32> to vector<64x1xf32>
    %cst_50 = arith.constant 3.200000e+01 : f32
    %104 = vector.broadcast %cst_50 : f32 to vector<64x1xf32>
    %105 = arith.divf %103, %104 : vector<64x1xf32>
    %106 = vector.broadcast %105 : vector<64x1xf32> to vector<64x32xf32>
    %107 = arith.subf %95, %106 : vector<64x32xf32>
    %108 = arith.mulf %107, %107 : vector<64x32xf32>
    %cst_51 = arith.constant dense<0.000000e+00> : vector<64xf32>
    %109 = vector.multi_reduction <add>, %108, %cst_51 [1] : vector<64x32xf32> to vector<64xf32>
    %110 = vector.shape_cast %109 : vector<64xf32> to vector<64x1xf32>
    %cst_52 = arith.constant 3.200000e+01 : f32
    %111 = vector.broadcast %cst_52 : f32 to vector<64x1xf32>
    %112 = arith.divf %110, %111 : vector<64x1xf32>
    %cst_53 = arith.constant 9.99999974E-6 : f32
    %113 = vector.broadcast %cst_53 : f32 to vector<64x1xf32>
    %114 = arith.addf %112, %113 : vector<64x1xf32>
    %115 = math.rsqrt %114 : vector<64x1xf32>
    %116 = vector.broadcast %115 : vector<64x1xf32> to vector<64x32xf32>
    %117 = arith.mulf %107, %116 : vector<64x32xf32>
    %118 = vector.broadcast %96 : vector<1x32xf32> to vector<64x32xf32>
    %119 = arith.mulf %117, %118 : vector<64x32xf32>
    %120 = vector.broadcast %97 : vector<1x32xf32> to vector<64x32xf32>
    %121 = arith.addf %119, %120 : vector<64x32xf32>
    %122 = arith.truncf %121 : vector<64x32xf32> to vector<64x32xbf16>
    %123 = arith.truncf %98 : vector<32x128xf32> to vector<32x128xbf16>
    %cst_54 = arith.constant dense<0.000000e+00> : vector<64x128xf32>
    %124 = tpu.matmul %122, %123, %cst_54 {dimension_numbers = #tpu.dot_dimension_numbers<[1], [0], [0], [1], [0, 0, 1, 1], [], []>} : vector<64x32xbf16>, vector<32x128xbf16>, vector<64x128xf32> -> vector<64x128xf32>
    %125 = vector.broadcast %99 : vector<1x128xf32> to vector<64x128xf32>
    %126 = arith.addf %124, %125 : vector<64x128xf32>
    %cst_55 = arith.constant 5.000000e-01 : f32
    %127 = vector.broadcast %cst_55 : f32 to vector<64x128xf32>
    %128 = arith.mulf %127, %126 : vector<64x128xf32>
    %cst_56 = arith.constant 0.707106769 : f32
    %129 = vector.broadcast %cst_56 : f32 to vector<64x128xf32>
    %130 = arith.mulf %126, %129 : vector<64x128xf32>
    %131 = math.absf %130 : vector<64x128xf32>
    %cst_57 = arith.constant 0.327591091 : f32
    %132 = vector.broadcast %cst_57 : f32 to vector<64x128xf32>
    %133 = arith.mulf %132, %131 : vector<64x128xf32>
    %cst_58 = arith.constant 1.000000e+00 : f32
    %134 = vector.broadcast %cst_58 : f32 to vector<64x128xf32>
    %135 = arith.addf %134, %133 : vector<64x128xf32>
    %136 = tpu.reciprocal %135 {approx = true} : vector<64x128xf32> -> vector<64x128xf32>
    %cst_59 = arith.constant 1.06140542 : f32
    %137 = vector.broadcast %cst_59 : f32 to vector<64x128xf32>
    %138 = arith.mulf %136, %137 : vector<64x128xf32>
    %cst_60 = arith.constant -1.45315206 : f32
    %139 = vector.broadcast %cst_60 : f32 to vector<64x128xf32>
    %140 = arith.addf %139, %138 : vector<64x128xf32>
    %141 = arith.mulf %136, %140 : vector<64x128xf32>
    %cst_61 = arith.constant 1.42141378 : f32
    %142 = vector.broadcast %cst_61 : f32 to vector<64x128xf32>
    %143 = arith.addf %142, %141 : vector<64x128xf32>
    %144 = arith.mulf %136, %143 : vector<64x128xf32>
    %cst_62 = arith.constant -0.284496725 : f32
    %145 = vector.broadcast %cst_62 : f32 to vector<64x128xf32>
    %146 = arith.addf %145, %144 : vector<64x128xf32>
    %147 = arith.mulf %136, %146 : vector<64x128xf32>
    %cst_63 = arith.constant 0.254829586 : f32
    %148 = vector.broadcast %cst_63 : f32 to vector<64x128xf32>
    %149 = arith.addf %148, %147 : vector<64x128xf32>
    %150 = arith.mulf %136, %149 : vector<64x128xf32>
    %cst_64 = arith.constant 0.000000e+00 : f32
    %151 = vector.broadcast %cst_64 : f32 to vector<64x128xf32>
    %152 = arith.subf %151, %131 : vector<64x128xf32>
    %153 = arith.mulf %152, %131 : vector<64x128xf32>
    %154 = math.exp %153 : vector<64x128xf32>
    %155 = arith.mulf %150, %154 : vector<64x128xf32>
    %cst_65 = arith.constant 1.000000e+00 : f32
    %156 = vector.broadcast %cst_65 : f32 to vector<64x128xf32>
    %157 = arith.subf %156, %155 : vector<64x128xf32>
    %cst_66 = arith.constant 0.000000e+00 : f32
    %158 = vector.broadcast %cst_66 : f32 to vector<64x128xf32>
    %159 = arith.cmpf olt, %130, %158 : vector<64x128xf32>
    %cst_67 = arith.constant 0.000000e+00 : f32
    %160 = vector.broadcast %cst_67 : f32 to vector<64x128xf32>
    %161 = arith.subf %160, %157 : vector<64x128xf32>
    %162 = arith.select %159, %161, %157 : vector<64x128xi1>, vector<64x128xf32>
    %cst_68 = arith.constant 1.000000e+00 : f32
    %163 = vector.broadcast %cst_68 : f32 to vector<64x128xf32>
    %164 = arith.addf %163, %162 : vector<64x128xf32>
    %165 = arith.mulf %128, %164 : vector<64x128xf32>
    %166 = arith.truncf %165 : vector<64x128xf32> to vector<64x128xbf16>
    %167 = arith.truncf %100 : vector<128x32xf32> to vector<128x32xbf16>
    %cst_69 = arith.constant dense<0.000000e+00> : vector<64x32xf32>
    %168 = tpu.matmul %166, %167, %cst_69 {dimension_numbers = #tpu.dot_dimension_numbers<[1], [0], [0], [1], [0, 0, 1, 1], [], []>} : vector<64x128xbf16>, vector<128x32xbf16>, vector<64x32xf32> -> vector<64x32xf32>
    %169 = arith.addf %95, %168 : vector<64x32xf32>
    %170 = vector.broadcast %101 : vector<1x32xf32> to vector<64x32xf32>
    %171 = arith.addf %169, %170 : vector<64x32xf32>
    %c0_70 = arith.constant 0 : index
    %c0_71 = arith.constant 0 : index
    %172 = vector.load %arg3[%c0_70, %c0_71] : memref<64x64xf32, #tpu.memory_space<vmem>>, vector<64x64xf32>
    %cst_72 = arith.constant dense<0.000000e+00> : vector<64x32xf32>
    %173 = tpu.matmul %172, %171, %cst_72 {dimension_numbers = #tpu.dot_dimension_numbers<[1], [0], [0], [1], [0, 0, 1, 1], [], []>} : vector<64x64xf32>, vector<64x32xf32>, vector<64x32xf32> -> vector<64x32xf32>
    %c0_73 = arith.constant 0 : index
    %c0_74 = arith.constant 0 : index
    %c0_75 = arith.constant 0 : index
    %174 = vector.load %arg17[%c0_73, %c0_74, %c0_75] : memref<1x64x32xf32, #tpu.memory_space<vmem>>, vector<1x64x32xf32>
    %175 = vector.shape_cast %174 : vector<1x64x32xf32> to vector<64x32xf32>
    %176 = vector.shape_cast %173 : vector<64x32xf32> to vector<1x64x32xf32>
    tpu.vector_store %arg17[%c0_73, %c0_74, %c0_75], %176 {strides = array<i32>} : memref<1x64x32xf32, #tpu.memory_space<vmem>>, vector<1x64x32xf32>,
    return
  }
  func.func @transform_0(%arg0: i32) -> (i32, i32, i32) {
    %c0_i32 = arith.constant 0 : i32
    %c0_i32_0 = arith.constant 0 : i32
    %c0_i32_1 = arith.constant 0 : i32
    return %arg0, %c0_i32, %c0_i32_0 : i32, i32, i32
  }
  func.func @transform_1(%arg0: i32) -> (i32, i32) {
    %c0_i32 = arith.constant 0 : i32
    %c0_i32_0 = arith.constant 0 : i32
    %c0_i32_1 = arith.constant 0 : i32
    return %c0_i32, %c0_i32_0 : i32, i32
  }
  func.func @transform_2(%arg0: i32) -> (i32, i32) {
    %c0_i32 = arith.constant 0 : i32
    %c0_i32_0 = arith.constant 0 : i32
    %c0_i32_1 = arith.constant 0 : i32
    return %c0_i32, %c0_i32_0 : i32, i32
  }
  func.func @transform_3(%arg0: i32) -> (i32, i32) {
    %c0_i32 = arith.constant 0 : i32
    %c0_i32_0 = arith.constant 0 : i32
    %c0_i32_1 = arith.constant 0 : i32
    return %c0_i32, %c0_i32_0 : i32, i32
  }
  func.func @transform_4(%arg0: i32) -> (i32, i32) {
    %c0_i32 = arith.constant 0 : i32
    %c0_i32_0 = arith.constant 0 : i32
    %c0_i32_1 = arith.constant 0 : i32
    return %c0_i32, %c0_i32_0 : i32, i32
  }
  func.func @transform_5(%arg0: i32) -> (i32, i32) {
    %c0_i32 = arith.constant 0 : i32
    %c0_i32_0 = arith.constant 0 : i32
    %c0_i32_1 = arith.constant 0 : i32
    return %c0_i32, %c0_i32_0 : i32, i32
  }
  func.func @transform_6(%arg0: i32) -> (i32, i32) {
    %c0_i32 = arith.constant 0 : i32
    %c0_i32_0 = arith.constant 0 : i32
    %c0_i32_1 = arith.constant 0 : i32
    return %c0_i32, %c0_i32_0 : i32, i32
  }
  func.func @transform_7(%arg0: i32) -> (i32, i32, i32) {
    %c0_i32 = arith.constant 0 : i32
    %c0_i32_0 = arith.constant 0 : i32
    %c0_i32_1 = arith.constant 0 : i32
    %c0_i32_2 = arith.constant 0 : i32
    return %c0_i32, %c0_i32_0, %c0_i32_1 : i32, i32, i32
  }
  func.func @transform_8(%arg0: i32) -> (i32, i32) {
    %c0_i32 = arith.constant 0 : i32
    %c0_i32_0 = arith.constant 0 : i32
    %c0_i32_1 = arith.constant 0 : i32
    return %c0_i32, %c0_i32_0 : i32, i32
  }
  func.func @transform_9(%arg0: i32) -> (i32, i32) {
    %c0_i32 = arith.constant 0 : i32
    %c0_i32_0 = arith.constant 0 : i32
    %c0_i32_1 = arith.constant 0 : i32
    return %c0_i32, %c0_i32_0 : i32, i32
  }
  func.func @transform_10(%arg0: i32) -> (i32, i32) {
    %c0_i32 = arith.constant 0 : i32
    %c0_i32_0 = arith.constant 0 : i32
    %c0_i32_1 = arith.constant 0 : i32
    return %c0_i32, %c0_i32_0 : i32, i32
  }
  func.func @transform_11(%arg0: i32) -> (i32, i32) {
    %c0_i32 = arith.constant 0 : i32
    %c0_i32_0 = arith.constant 0 : i32
    %c0_i32_1 = arith.constant 0 : i32
    return %c0_i32, %c0_i32_0 : i32, i32
  }
  func.func @transform_12(%arg0: i32) -> (i32, i32) {
    %c0_i32 = arith.constant 0 : i32
    %c0_i32_0 = arith.constant 0 : i32
    %c0_i32_1 = arith.constant 0 : i32
    return %c0_i32, %c0_i32_0 : i32, i32
  }
  func.func @transform_13(%arg0: i32) -> (i32, i32) {
    %c0_i32 = arith.constant 0 : i32
    %c0_i32_0 = arith.constant 0 : i32
    %c0_i32_1 = arith.constant 0 : i32
    return %c0_i32, %c0_i32_0 : i32, i32
  }
  func.func @transform_14(%arg0: i32) -> (i32, i32) {
    %c0_i32 = arith.constant 0 : i32
    %c0_i32_0 = arith.constant 0 : i32
    %c0_i32_1 = arith.constant 0 : i32
    return %c0_i32, %c0_i32_0 : i32, i32
  }
  func.func @transform_15(%arg0: i32) -> (i32, i32) {
    %c0_i32 = arith.constant 0 : i32
    %c0_i32_0 = arith.constant 0 : i32
    %c0_i32_1 = arith.constant 0 : i32
    return %c0_i32, %c0_i32_0 : i32, i32
  }
  func.func @transform_16(%arg0: i32) -> (i32, i32, i32) {
    %c0_i32 = arith.constant 0 : i32
    %c0_i32_0 = arith.constant 0 : i32
    %c0_i32_1 = arith.constant 0 : i32
    return %arg0, %c0_i32, %c0_i32_0 : i32, i32, i32
  }
}

module attributes {stable_mosaic.version = 11 : i64} {
  func.func @_merge_block_kernel(%arg0: i32, %arg1: memref<1x64x32xf32, #tpu.memory_space<vmem>>, %arg2: memref<4x16x64xf32, #tpu.memory_space<vmem>>, %arg3: memref<4x1x32xf32, #tpu.memory_space<vmem>>, %arg4: memref<4x1x32xf32, #tpu.memory_space<vmem>>, %arg5: memref<4x32x64xf32, #tpu.memory_space<vmem>>, %arg6: memref<1x64xf32, #tpu.memory_space<vmem>>, %arg7: memref<1x64xf32, #tpu.memory_space<vmem>>, %arg8: memref<64x192xf32, #tpu.memory_space<vmem>>, %arg9: memref<1x192xf32, #tpu.memory_space<vmem>>, %arg10: memref<4x16x16xf32, #tpu.memory_space<vmem>>, %arg11: memref<64x64xf32, #tpu.memory_space<vmem>>, %arg12: memref<1x64xf32, #tpu.memory_space<vmem>>, %arg13: memref<1x64xf32, #tpu.memory_space<vmem>>, %arg14: memref<1x64xf32, #tpu.memory_space<vmem>>, %arg15: memref<64x256xf32, #tpu.memory_space<vmem>>, %arg16: memref<1x256xf32, #tpu.memory_space<vmem>>, %arg17: memref<256x64xf32, #tpu.memory_space<vmem>>, %arg18: memref<1x64xf32, #tpu.memory_space<vmem>>, %arg19: memref<1x16x64xf32, #tpu.memory_space<vmem>>) attributes {dimension_semantics = [#tpu.dimension_semantics<parallel>], iteration_bounds = array<i64: 2>, scalar_prefetch = 0 : i64, scratch_operands = 0 : i64, tpu.core_type = #tpu.core_type<tc>, window_params = [{transform_indices = @transform_0, window_bounds = array<i64: 1, 64, 32>}, {pipeline_mode = #tpu.pipeline_mode<synchronous>, transform_indices = @transform_1, window_bounds = array<i64: 4, 16, 64>}, {pipeline_mode = #tpu.pipeline_mode<synchronous>, transform_indices = @transform_2, window_bounds = array<i64: 4, 1, 32>}, {pipeline_mode = #tpu.pipeline_mode<synchronous>, transform_indices = @transform_3, window_bounds = array<i64: 4, 1, 32>}, {pipeline_mode = #tpu.pipeline_mode<synchronous>, transform_indices = @transform_4, window_bounds = array<i64: 4, 32, 64>}, {pipeline_mode = #tpu.pipeline_mode<synchronous>, transform_indices = @transform_5, window_bounds = array<i64: 1, 64>}, {pipeline_mode = #tpu.pipeline_mode<synchronous>, transform_indices = @transform_6, window_bounds = array<i64: 1, 64>}, {pipeline_mode = #tpu.pipeline_mode<synchronous>, transform_indices = @transform_7, window_bounds = array<i64: 64, 192>}, {pipeline_mode = #tpu.pipeline_mode<synchronous>, transform_indices = @transform_8, window_bounds = array<i64: 1, 192>}, {pipeline_mode = #tpu.pipeline_mode<synchronous>, transform_indices = @transform_9, window_bounds = array<i64: 4, 16, 16>}, {pipeline_mode = #tpu.pipeline_mode<synchronous>, transform_indices = @transform_10, window_bounds = array<i64: 64, 64>}, {pipeline_mode = #tpu.pipeline_mode<synchronous>, transform_indices = @transform_11, window_bounds = array<i64: 1, 64>}, {pipeline_mode = #tpu.pipeline_mode<synchronous>, transform_indices = @transform_12, window_bounds = array<i64: 1, 64>}, {pipeline_mode = #tpu.pipeline_mode<synchronous>, transform_indices = @transform_13, window_bounds = array<i64: 1, 64>}, {pipeline_mode = #tpu.pipeline_mode<synchronous>, transform_indices = @transform_14, window_bounds = array<i64: 64, 256>}, {pipeline_mode = #tpu.pipeline_mode<synchronous>, transform_indices = @transform_15, window_bounds = array<i64: 1, 256>}, {pipeline_mode = #tpu.pipeline_mode<synchronous>, transform_indices = @transform_16, window_bounds = array<i64: 256, 64>}, {pipeline_mode = #tpu.pipeline_mode<synchronous>, transform_indices = @transform_17, window_bounds = array<i64: 1, 64>}, {transform_indices = @transform_18, window_bounds = array<i64: 1, 16, 64>}]} {
    %c0 = arith.constant 0 : index
    %c0_0 = arith.constant 0 : index
    %c0_1 = arith.constant 0 : index
    %0 = vector.load %arg1[%c0, %c0_0, %c0_1] : memref<1x64x32xf32, #tpu.memory_space<vmem>>, vector<1x64x32xf32>
    %1 = vector.shape_cast %0 : vector<1x64x32xf32> to vector<64x32xf32>
    %c0_2 = arith.constant 0 : index
    %c0_3 = arith.constant 0 : index
    %c0_4 = arith.constant 0 : index
    %2 = vector.load %arg2[%c0_2, %c0_3, %c0_4] : memref<4x16x64xf32, #tpu.memory_space<vmem>>, vector<1x16x64xf32>
    %3 = vector.shape_cast %2 : vector<1x16x64xf32> to vector<16x64xf32>
    %cst = arith.constant dense<0.000000e+00> : vector<16x32xf32>
    %4 = tpu.matmul %3, %1, %cst {dimension_numbers = #tpu.dot_dimension_numbers<[1], [0], [0], [1], [0, 0, 1, 1], [], []>} : vector<16x64xf32>, vector<64x32xf32>, vector<16x32xf32> -> vector<16x32xf32>
    %c1 = arith.constant 1 : index
    %c0_5 = arith.constant 0 : index
    %c0_6 = arith.constant 0 : index
    %5 = vector.load %arg2[%c1, %c0_5, %c0_6] : memref<4x16x64xf32, #tpu.memory_space<vmem>>, vector<1x16x64xf32>
    %6 = vector.shape_cast %5 : vector<1x16x64xf32> to vector<16x64xf32>
    %cst_7 = arith.constant dense<0.000000e+00> : vector<16x32xf32>
    %7 = tpu.matmul %6, %1, %cst_7 {dimension_numbers = #tpu.dot_dimension_numbers<[1], [0], [0], [1], [0, 0, 1, 1], [], []>} : vector<16x64xf32>, vector<64x32xf32>, vector<16x32xf32> -> vector<16x32xf32>
    %c2 = arith.constant 2 : index
    %c0_8 = arith.constant 0 : index
    %c0_9 = arith.constant 0 : index
    %8 = vector.load %arg2[%c2, %c0_8, %c0_9] : memref<4x16x64xf32, #tpu.memory_space<vmem>>, vector<1x16x64xf32>
    %9 = vector.shape_cast %8 : vector<1x16x64xf32> to vector<16x64xf32>
    %cst_10 = arith.constant dense<0.000000e+00> : vector<16x32xf32>
    %10 = tpu.matmul %9, %1, %cst_10 {dimension_numbers = #tpu.dot_dimension_numbers<[1], [0], [0], [1], [0, 0, 1, 1], [], []>} : vector<16x64xf32>, vector<64x32xf32>, vector<16x32xf32> -> vector<16x32xf32>
    %c3 = arith.constant 3 : index
    %c0_11 = arith.constant 0 : index
    %c0_12 = arith.constant 0 : index
    %11 = vector.load %arg2[%c3, %c0_11, %c0_12] : memref<4x16x64xf32, #tpu.memory_space<vmem>>, vector<1x16x64xf32>
    %12 = vector.shape_cast %11 : vector<1x16x64xf32> to vector<16x64xf32>
    %cst_13 = arith.constant dense<0.000000e+00> : vector<16x32xf32>
    %13 = tpu.matmul %12, %1, %cst_13 {dimension_numbers = #tpu.dot_dimension_numbers<[1], [0], [0], [1], [0, 0, 1, 1], [], []>} : vector<16x64xf32>, vector<64x32xf32>, vector<16x32xf32> -> vector<16x32xf32>
    %cst_14 = arith.constant dense<0.000000e+00> : vector<16xf32>
    %14 = vector.multi_reduction <add>, %4, %cst_14 [1] : vector<16x32xf32> to vector<16xf32>
    %15 = vector.shape_cast %14 : vector<16xf32> to vector<16x1xf32>
    %cst_15 = arith.constant dense<0.000000e+00> : vector<16xf32>
    %16 = vector.multi_reduction <add>, %7, %cst_15 [1] : vector<16x32xf32> to vector<16xf32>
    %17 = vector.shape_cast %16 : vector<16xf32> to vector<16x1xf32>
    %18 = arith.addf %15, %17 : vector<16x1xf32>
    %cst_16 = arith.constant dense<0.000000e+00> : vector<16xf32>
    %19 = vector.multi_reduction <add>, %10, %cst_16 [1] : vector<16x32xf32> to vector<16xf32>
    %20 = vector.shape_cast %19 : vector<16xf32> to vector<16x1xf32>
    %21 = arith.addf %18, %20 : vector<16x1xf32>
    %cst_17 = arith.constant dense<0.000000e+00> : vector<16xf32>
    %22 = vector.multi_reduction <add>, %13, %cst_17 [1] : vector<16x32xf32> to vector<16xf32>
    %23 = vector.shape_cast %22 : vector<16xf32> to vector<16x1xf32>
    %24 = arith.addf %21, %23 : vector<16x1xf32>
    %cst_18 = arith.constant 7.812500e-03 : f32
    %25 = vector.broadcast %cst_18 : f32 to vector<16x1xf32>
    %26 = arith.mulf %24, %25 : vector<16x1xf32>
    %27 = vector.broadcast %26 : vector<16x1xf32> to vector<16x32xf32>
    %28 = arith.subf %4, %27 : vector<16x32xf32>
    %29 = vector.broadcast %26 : vector<16x1xf32> to vector<16x32xf32>
    %30 = arith.subf %7, %29 : vector<16x32xf32>
    %31 = vector.broadcast %26 : vector<16x1xf32> to vector<16x32xf32>
    %32 = arith.subf %10, %31 : vector<16x32xf32>
    %33 = vector.broadcast %26 : vector<16x1xf32> to vector<16x32xf32>
    %34 = arith.subf %13, %33 : vector<16x32xf32>
    %35 = arith.mulf %28, %28 : vector<16x32xf32>
    %cst_19 = arith.constant dense<0.000000e+00> : vector<16xf32>
    %36 = vector.multi_reduction <add>, %35, %cst_19 [1] : vector<16x32xf32> to vector<16xf32>
    %37 = vector.shape_cast %36 : vector<16xf32> to vector<16x1xf32>
    %38 = arith.mulf %30, %30 : vector<16x32xf32>
    %cst_20 = arith.constant dense<0.000000e+00> : vector<16xf32>
    %39 = vector.multi_reduction <add>, %38, %cst_20 [1] : vector<16x32xf32> to vector<16xf32>
    %40 = vector.shape_cast %39 : vector<16xf32> to vector<16x1xf32>
    %41 = arith.addf %37, %40 : vector<16x1xf32>
    %42 = arith.mulf %32, %32 : vector<16x32xf32>
    %cst_21 = arith.constant dense<0.000000e+00> : vector<16xf32>
    %43 = vector.multi_reduction <add>, %42, %cst_21 [1] : vector<16x32xf32> to vector<16xf32>
    %44 = vector.shape_cast %43 : vector<16xf32> to vector<16x1xf32>
    %45 = arith.addf %41, %44 : vector<16x1xf32>
    %46 = arith.mulf %34, %34 : vector<16x32xf32>
    %cst_22 = arith.constant dense<0.000000e+00> : vector<16xf32>
    %47 = vector.multi_reduction <add>, %46, %cst_22 [1] : vector<16x32xf32> to vector<16xf32>
    %48 = vector.shape_cast %47 : vector<16xf32> to vector<16x1xf32>
    %49 = arith.addf %45, %48 : vector<16x1xf32>
    %cst_23 = arith.constant 7.812500e-03 : f32
    %50 = vector.broadcast %cst_23 : f32 to vector<16x1xf32>
    %51 = arith.mulf %49, %50 : vector<16x1xf32>
    %cst_24 = arith.constant 9.99999974E-6 : f32
    %52 = vector.broadcast %cst_24 : f32 to vector<16x1xf32>
    %53 = arith.addf %51, %52 : vector<16x1xf32>
    %54 = math.rsqrt %53 : vector<16x1xf32>
    %55 = vector.broadcast %54 : vector<16x1xf32> to vector<16x32xf32>
    %56 = arith.mulf %28, %55 : vector<16x32xf32>
    %c0_25 = arith.constant 0 : index
    %c0_26 = arith.constant 0 : index
    %c0_27 = arith.constant 0 : index
    %57 = vector.load %arg3[%c0_25, %c0_26, %c0_27] : memref<4x1x32xf32, #tpu.memory_space<vmem>>, vector<1x1x32xf32>
    %58 = vector.shape_cast %57 : vector<1x1x32xf32> to vector<1x32xf32>
    %59 = vector.broadcast %58 : vector<1x32xf32> to vector<16x32xf32>
    %60 = arith.mulf %56, %59 : vector<16x32xf32>
    %c0_28 = arith.constant 0 : index
    %c0_29 = arith.constant 0 : index
    %c0_30 = arith.constant 0 : index
    %61 = vector.load %arg4[%c0_28, %c0_29, %c0_30] : memref<4x1x32xf32, #tpu.memory_space<vmem>>, vector<1x1x32xf32>
    %62 = vector.shape_cast %61 : vector<1x1x32xf32> to vector<1x32xf32>
    %63 = vector.broadcast %62 : vector<1x32xf32> to vector<16x32xf32>
    %64 = arith.addf %60, %63 : vector<16x32xf32>
    %c0_31 = arith.constant 0 : index
    %c0_32 = arith.constant 0 : index
    %c0_33 = arith.constant 0 : index
    %65 = vector.load %arg5[%c0_31, %c0_32, %c0_33] : memref<4x32x64xf32, #tpu.memory_space<vmem>>, vector<1x32x64xf32>
    %66 = vector.shape_cast %65 : vector<1x32x64xf32> to vector<32x64xf32>
    %67 = arith.truncf %64 : vector<16x32xf32> to vector<16x32xbf16>
    %68 = arith.truncf %66 : vector<32x64xf32> to vector<32x64xbf16>
    %cst_34 = arith.constant dense<0.000000e+00> : vector<16x64xf32>
    %69 = tpu.matmul %67, %68, %cst_34 {dimension_numbers = #tpu.dot_dimension_numbers<[1], [0], [0], [1], [0, 0, 1, 1], [], []>} : vector<16x32xbf16>, vector<32x64xbf16>, vector<16x64xf32> -> vector<16x64xf32>
    %70 = vector.broadcast %54 : vector<16x1xf32> to vector<16x32xf32>
    %71 = arith.mulf %30, %70 : vector<16x32xf32>
    %c1_35 = arith.constant 1 : index
    %c0_36 = arith.constant 0 : index
    %c0_37 = arith.constant 0 : index
    %72 = vector.load %arg3[%c1_35, %c0_36, %c0_37] : memref<4x1x32xf32, #tpu.memory_space<vmem>>, vector<1x1x32xf32>
    %73 = vector.shape_cast %72 : vector<1x1x32xf32> to vector<1x32xf32>
    %74 = vector.broadcast %73 : vector<1x32xf32> to vector<16x32xf32>
    %75 = arith.mulf %71, %74 : vector<16x32xf32>
    %c1_38 = arith.constant 1 : index
    %c0_39 = arith.constant 0 : index
    %c0_40 = arith.constant 0 : index
    %76 = vector.load %arg4[%c1_38, %c0_39, %c0_40] : memref<4x1x32xf32, #tpu.memory_space<vmem>>, vector<1x1x32xf32>
    %77 = vector.shape_cast %76 : vector<1x1x32xf32> to vector<1x32xf32>
    %78 = vector.broadcast %77 : vector<1x32xf32> to vector<16x32xf32>
    %79 = arith.addf %75, %78 : vector<16x32xf32>
    %c1_41 = arith.constant 1 : index
    %c0_42 = arith.constant 0 : index
    %c0_43 = arith.constant 0 : index
    %80 = vector.load %arg5[%c1_41, %c0_42, %c0_43] : memref<4x32x64xf32, #tpu.memory_space<vmem>>, vector<1x32x64xf32>
    %81 = vector.shape_cast %80 : vector<1x32x64xf32> to vector<32x64xf32>
    %82 = arith.truncf %79 : vector<16x32xf32> to vector<16x32xbf16>
    %83 = arith.truncf %81 : vector<32x64xf32> to vector<32x64xbf16>
    %cst_44 = arith.constant dense<0.000000e+00> : vector<16x64xf32>
    %84 = tpu.matmul %82, %83, %cst_44 {dimension_numbers = #tpu.dot_dimension_numbers<[1], [0], [0], [1], [0, 0, 1, 1], [], []>} : vector<16x32xbf16>, vector<32x64xbf16>, vector<16x64xf32> -> vector<16x64xf32>
    %85 = arith.addf %69, %84 : vector<16x64xf32>
    %86 = vector.broadcast %54 : vector<16x1xf32> to vector<16x32xf32>
    %87 = arith.mulf %32, %86 : vector<16x32xf32>
    %c2_45 = arith.constant 2 : index
    %c0_46 = arith.constant 0 : index
    %c0_47 = arith.constant 0 : index
    %88 = vector.load %arg3[%c2_45, %c0_46, %c0_47] : memref<4x1x32xf32, #tpu.memory_space<vmem>>, vector<1x1x32xf32>
    %89 = vector.shape_cast %88 : vector<1x1x32xf32> to vector<1x32xf32>
    %90 = vector.broadcast %89 : vector<1x32xf32> to vector<16x32xf32>
    %91 = arith.mulf %87, %90 : vector<16x32xf32>
    %c2_48 = arith.constant 2 : index
    %c0_49 = arith.constant 0 : index
    %c0_50 = arith.constant 0 : index
    %92 = vector.load %arg4[%c2_48, %c0_49, %c0_50] : memref<4x1x32xf32, #tpu.memory_space<vmem>>, vector<1x1x32xf32>
    %93 = vector.shape_cast %92 : vector<1x1x32xf32> to vector<1x32xf32>
    %94 = vector.broadcast %93 : vector<1x32xf32> to vector<16x32xf32>
    %95 = arith.addf %91, %94 : vector<16x32xf32>
    %c2_51 = arith.constant 2 : index
    %c0_52 = arith.constant 0 : index
    %c0_53 = arith.constant 0 : index
    %96 = vector.load %arg5[%c2_51, %c0_52, %c0_53] : memref<4x32x64xf32, #tpu.memory_space<vmem>>, vector<1x32x64xf32>
    %97 = vector.shape_cast %96 : vector<1x32x64xf32> to vector<32x64xf32>
    %98 = arith.truncf %95 : vector<16x32xf32> to vector<16x32xbf16>
    %99 = arith.truncf %97 : vector<32x64xf32> to vector<32x64xbf16>
    %cst_54 = arith.constant dense<0.000000e+00> : vector<16x64xf32>
    %100 = tpu.matmul %98, %99, %cst_54 {dimension_numbers = #tpu.dot_dimension_numbers<[1], [0], [0], [1], [0, 0, 1, 1], [], []>} : vector<16x32xbf16>, vector<32x64xbf16>, vector<16x64xf32> -> vector<16x64xf32>
    %101 = arith.addf %85, %100 : vector<16x64xf32>
    %102 = vector.broadcast %54 : vector<16x1xf32> to vector<16x32xf32>
    %103 = arith.mulf %34, %102 : vector<16x32xf32>
    %c3_55 = arith.constant 3 : index
    %c0_56 = arith.constant 0 : index
    %c0_57 = arith.constant 0 : index
    %104 = vector.load %arg3[%c3_55, %c0_56, %c0_57] : memref<4x1x32xf32, #tpu.memory_space<vmem>>, vector<1x1x32xf32>
    %105 = vector.shape_cast %104 : vector<1x1x32xf32> to vector<1x32xf32>
    %106 = vector.broadcast %105 : vector<1x32xf32> to vector<16x32xf32>
    %107 = arith.mulf %103, %106 : vector<16x32xf32>
    %c3_58 = arith.constant 3 : index
    %c0_59 = arith.constant 0 : index
    %c0_60 = arith.constant 0 : index
    %108 = vector.load %arg4[%c3_58, %c0_59, %c0_60] : memref<4x1x32xf32, #tpu.memory_space<vmem>>, vector<1x1x32xf32>
    %109 = vector.shape_cast %108 : vector<1x1x32xf32> to vector<1x32xf32>
    %110 = vector.broadcast %109 : vector<1x32xf32> to vector<16x32xf32>
    %111 = arith.addf %107, %110 : vector<16x32xf32>
    %c3_61 = arith.constant 3 : index
    %c0_62 = arith.constant 0 : index
    %c0_63 = arith.constant 0 : index
    %112 = vector.load %arg5[%c3_61, %c0_62, %c0_63] : memref<4x32x64xf32, #tpu.memory_space<vmem>>, vector<1x32x64xf32>
    %113 = vector.shape_cast %112 : vector<1x32x64xf32> to vector<32x64xf32>
    %114 = arith.truncf %111 : vector<16x32xf32> to vector<16x32xbf16>
    %115 = arith.truncf %113 : vector<32x64xf32> to vector<32x64xbf16>
    %cst_64 = arith.constant dense<0.000000e+00> : vector<16x64xf32>
    %116 = tpu.matmul %114, %115, %cst_64 {dimension_numbers = #tpu.dot_dimension_numbers<[1], [0], [0], [1], [0, 0, 1, 1], [], []>} : vector<16x32xbf16>, vector<32x64xbf16>, vector<16x64xf32> -> vector<16x64xf32>
    %117 = arith.addf %101, %116 : vector<16x64xf32>
    %c0_65 = arith.constant 0 : index
    %c0_66 = arith.constant 0 : index
    %118 = vector.load %arg6[%c0_65, %c0_66] : memref<1x64xf32, #tpu.memory_space<vmem>>, vector<1x64xf32>
    %c0_67 = arith.constant 0 : index
    %c0_68 = arith.constant 0 : index
    %119 = vector.load %arg7[%c0_67, %c0_68] : memref<1x64xf32, #tpu.memory_space<vmem>>, vector<1x64xf32>
    %c0_69 = arith.constant 0 : index
    %c0_70 = arith.constant 0 : index
    %120 = vector.load %arg8[%c0_69, %c0_70] : memref<64x192xf32, #tpu.memory_space<vmem>>, vector<64x192xf32>
    %c0_71 = arith.constant 0 : index
    %c0_72 = arith.constant 0 : index
    %121 = vector.load %arg9[%c0_71, %c0_72] : memref<1x192xf32, #tpu.memory_space<vmem>>, vector<1x192xf32>
    %c0_73 = arith.constant 0 : index
    %c0_74 = arith.constant 0 : index
    %c0_75 = arith.constant 0 : index
    %122 = vector.load %arg10[%c0_73, %c0_74, %c0_75] : memref<4x16x16xf32, #tpu.memory_space<vmem>>, vector<4x16x16xf32>
    %c0_76 = arith.constant 0 : index
    %c0_77 = arith.constant 0 : index
    %123 = vector.load %arg11[%c0_76, %c0_77] : memref<64x64xf32, #tpu.memory_space<vmem>>, vector<64x64xf32>
    %c0_78 = arith.constant 0 : index
    %c0_79 = arith.constant 0 : index
    %124 = vector.load %arg12[%c0_78, %c0_79] : memref<1x64xf32, #tpu.memory_space<vmem>>, vector<1x64xf32>
    %cst_80 = arith.constant dense<0.000000e+00> : vector<16xf32>
    %125 = vector.multi_reduction <add>, %117, %cst_80 [1] : vector<16x64xf32> to vector<16xf32>
    %126 = vector.shape_cast %125 : vector<16xf32> to vector<16x1xf32>
    %cst_81 = arith.constant 6.400000e+01 : f32
    %127 = vector.broadcast %cst_81 : f32 to vector<16x1xf32>
    %128 = arith.divf %126, %127 : vector<16x1xf32>
    %129 = vector.broadcast %128 : vector<16x1xf32> to vector<16x64xf32>
    %130 = arith.subf %117, %129 : vector<16x64xf32>
    %131 = arith.mulf %130, %130 : vector<16x64xf32>
    %cst_82 = arith.constant dense<0.000000e+00> : vector<16xf32>
    %132 = vector.multi_reduction <add>, %131, %cst_82 [1] : vector<16x64xf32> to vector<16xf32>
    %133 = vector.shape_cast %132 : vector<16xf32> to vector<16x1xf32>
    %cst_83 = arith.constant 6.400000e+01 : f32
    %134 = vector.broadcast %cst_83 : f32 to vector<16x1xf32>
    %135 = arith.divf %133, %134 : vector<16x1xf32>
    %cst_84 = arith.constant 9.99999974E-6 : f32
    %136 = vector.broadcast %cst_84 : f32 to vector<16x1xf32>
    %137 = arith.addf %135, %136 : vector<16x1xf32>
    %138 = math.rsqrt %137 : vector<16x1xf32>
    %139 = vector.broadcast %138 : vector<16x1xf32> to vector<16x64xf32>
    %140 = arith.mulf %130, %139 : vector<16x64xf32>
    %141 = vector.broadcast %118 : vector<1x64xf32> to vector<16x64xf32>
    %142 = arith.mulf %140, %141 : vector<16x64xf32>
    %143 = vector.broadcast %119 : vector<1x64xf32> to vector<16x64xf32>
    %144 = arith.addf %142, %143 : vector<16x64xf32>
    %145 = arith.truncf %144 : vector<16x64xf32> to vector<16x64xbf16>
    %146 = arith.truncf %120 : vector<64x192xf32> to vector<64x192xbf16>
    %cst_85 = arith.constant dense<0.000000e+00> : vector<16x192xf32>
    %147 = tpu.matmul %145, %146, %cst_85 {dimension_numbers = #tpu.dot_dimension_numbers<[1], [0], [0], [1], [0, 0, 1, 1], [], []>} : vector<16x64xbf16>, vector<64x192xbf16>, vector<16x192xf32> -> vector<16x192xf32>
    %148 = vector.broadcast %121 : vector<1x192xf32> to vector<16x192xf32>
    %149 = arith.addf %147, %148 : vector<16x192xf32>
    %150 = vector.extract_strided_slice %149 {offsets = [0, 0], sizes = [16, 16], strides = [1, 1]} : vector<16x192xf32> to vector<16x16xf32>
    %cst_86 = arith.constant 2.500000e-01 : f32
    %151 = vector.broadcast %cst_86 : f32 to vector<16x16xf32>
    %152 = arith.mulf %150, %151 : vector<16x16xf32>
    %153 = vector.extract_strided_slice %149 {offsets = [0, 64], sizes = [16, 16], strides = [1, 1]} : vector<16x192xf32> to vector<16x16xf32>
    %154 = vector.extract_strided_slice %149 {offsets = [0, 128], sizes = [16, 16], strides = [1, 1]} : vector<16x192xf32> to vector<16x16xf32>
    %155 = arith.truncf %152 : vector<16x16xf32> to vector<16x16xbf16>
    %156 = arith.truncf %153 : vector<16x16xf32> to vector<16x16xbf16>
    %cst_87 = arith.constant dense<0.000000e+00> : vector<16x16xf32>
    %157 = tpu.matmul %155, %156, %cst_87 {dimension_numbers = #tpu.dot_dimension_numbers<[1], [1], [0], [0], [0, 0, 1, 0], [], []>} : vector<16x16xbf16>, vector<16x16xbf16>, vector<16x16xf32> -> vector<16x16xf32>
    %158 = vector.extract_strided_slice %122 {offsets = [0, 0, 0], sizes = [1, 16, 16], strides = [1, 1, 1]} : vector<4x16x16xf32> to vector<1x16x16xf32>
    %159 = vector.shape_cast %158 : vector<1x16x16xf32> to vector<16x16xf32>
    %160 = arith.addf %157, %159 : vector<16x16xf32>
    %cst_88 = arith.constant dense<0xFF800000> : vector<16xf32>
    %161 = vector.multi_reduction <maximumf>, %160, %cst_88 [1] : vector<16x16xf32> to vector<16xf32>
    %162 = vector.shape_cast %161 : vector<16xf32> to vector<16x1xf32>
    %163 = vector.broadcast %162 : vector<16x1xf32> to vector<16x16xf32>
    %164 = arith.subf %160, %163 : vector<16x16xf32>
    %165 = math.exp %164 : vector<16x16xf32>
    %cst_89 = arith.constant dense<0.000000e+00> : vector<16xf32>
    %166 = vector.multi_reduction <add>, %165, %cst_89 [1] : vector<16x16xf32> to vector<16xf32>
    %167 = vector.shape_cast %166 : vector<16xf32> to vector<16x1xf32>
    %168 = tpu.reciprocal %167 {approx = true} : vector<16x1xf32> -> vector<16x1xf32>
    %169 = vector.broadcast %168 : vector<16x1xf32> to vector<16x16xf32>
    %170 = arith.mulf %165, %169 : vector<16x16xf32>
    %171 = arith.truncf %170 : vector<16x16xf32> to vector<16x16xbf16>
    %172 = arith.truncf %154 : vector<16x16xf32> to vector<16x16xbf16>
    %cst_90 = arith.constant dense<0.000000e+00> : vector<16x16xf32>
    %173 = tpu.matmul %171, %172, %cst_90 {dimension_numbers = #tpu.dot_dimension_numbers<[1], [0], [0], [1], [0, 0, 1, 1], [], []>} : vector<16x16xbf16>, vector<16x16xbf16>, vector<16x16xf32> -> vector<16x16xf32>
    %174 = vector.extract_strided_slice %123 {offsets = [0, 0], sizes = [16, 64], strides = [1, 1]} : vector<64x64xf32> to vector<16x64xf32>
    %175 = arith.truncf %173 : vector<16x16xf32> to vector<16x16xbf16>
    %176 = arith.truncf %174 : vector<16x64xf32> to vector<16x64xbf16>
    %cst_91 = arith.constant dense<0.000000e+00> : vector<16x64xf32>
    %177 = tpu.matmul %175, %176, %cst_91 {dimension_numbers = #tpu.dot_dimension_numbers<[1], [0], [0], [1], [0, 0, 1, 1], [], []>} : vector<16x16xbf16>, vector<16x64xbf16>, vector<16x64xf32> -> vector<16x64xf32>
    %178 = vector.extract_strided_slice %149 {offsets = [0, 16], sizes = [16, 16], strides = [1, 1]} : vector<16x192xf32> to vector<16x16xf32>
    %cst_92 = arith.constant 2.500000e-01 : f32
    %179 = vector.broadcast %cst_92 : f32 to vector<16x16xf32>
    %180 = arith.mulf %178, %179 : vector<16x16xf32>
    %181 = vector.extract_strided_slice %149 {offsets = [0, 80], sizes = [16, 16], strides = [1, 1]} : vector<16x192xf32> to vector<16x16xf32>
    %182 = vector.extract_strided_slice %149 {offsets = [0, 144], sizes = [16, 16], strides = [1, 1]} : vector<16x192xf32> to vector<16x16xf32>
    %183 = arith.truncf %180 : vector<16x16xf32> to vector<16x16xbf16>
    %184 = arith.truncf %181 : vector<16x16xf32> to vector<16x16xbf16>
    %cst_93 = arith.constant dense<0.000000e+00> : vector<16x16xf32>
    %185 = tpu.matmul %183, %184, %cst_93 {dimension_numbers = #tpu.dot_dimension_numbers<[1], [1], [0], [0], [0, 0, 1, 0], [], []>} : vector<16x16xbf16>, vector<16x16xbf16>, vector<16x16xf32> -> vector<16x16xf32>
    %186 = vector.extract_strided_slice %122 {offsets = [1, 0, 0], sizes = [1, 16, 16], strides = [1, 1, 1]} : vector<4x16x16xf32> to vector<1x16x16xf32>
    %187 = vector.shape_cast %186 : vector<1x16x16xf32> to vector<16x16xf32>
    %188 = arith.addf %185, %187 : vector<16x16xf32>
    %cst_94 = arith.constant dense<0xFF800000> : vector<16xf32>
    %189 = vector.multi_reduction <maximumf>, %188, %cst_94 [1] : vector<16x16xf32> to vector<16xf32>
    %190 = vector.shape_cast %189 : vector<16xf32> to vector<16x1xf32>
    %191 = vector.broadcast %190 : vector<16x1xf32> to vector<16x16xf32>
    %192 = arith.subf %188, %191 : vector<16x16xf32>
    %193 = math.exp %192 : vector<16x16xf32>
    %cst_95 = arith.constant dense<0.000000e+00> : vector<16xf32>
    %194 = vector.multi_reduction <add>, %193, %cst_95 [1] : vector<16x16xf32> to vector<16xf32>
    %195 = vector.shape_cast %194 : vector<16xf32> to vector<16x1xf32>
    %196 = tpu.reciprocal %195 {approx = true} : vector<16x1xf32> -> vector<16x1xf32>
    %197 = vector.broadcast %196 : vector<16x1xf32> to vector<16x16xf32>
    %198 = arith.mulf %193, %197 : vector<16x16xf32>
    %199 = arith.truncf %198 : vector<16x16xf32> to vector<16x16xbf16>
    %200 = arith.truncf %182 : vector<16x16xf32> to vector<16x16xbf16>
    %cst_96 = arith.constant dense<0.000000e+00> : vector<16x16xf32>
    %201 = tpu.matmul %199, %200, %cst_96 {dimension_numbers = #tpu.dot_dimension_numbers<[1], [0], [0], [1], [0, 0, 1, 1], [], []>} : vector<16x16xbf16>, vector<16x16xbf16>, vector<16x16xf32> -> vector<16x16xf32>
    %202 = vector.extract_strided_slice %123 {offsets = [16, 0], sizes = [16, 64], strides = [1, 1]} : vector<64x64xf32> to vector<16x64xf32>
    %203 = arith.truncf %201 : vector<16x16xf32> to vector<16x16xbf16>
    %204 = arith.truncf %202 : vector<16x64xf32> to vector<16x64xbf16>
    %cst_97 = arith.constant dense<0.000000e+00> : vector<16x64xf32>
    %205 = tpu.matmul %203, %204, %cst_97 {dimension_numbers = #tpu.dot_dimension_numbers<[1], [0], [0], [1], [0, 0, 1, 1], [], []>} : vector<16x16xbf16>, vector<16x64xbf16>, vector<16x64xf32> -> vector<16x64xf32>
    %206 = arith.addf %177, %205 : vector<16x64xf32>
    %207 = vector.extract_strided_slice %149 {offsets = [0, 32], sizes = [16, 16], strides = [1, 1]} : vector<16x192xf32> to vector<16x16xf32>
    %cst_98 = arith.constant 2.500000e-01 : f32
    %208 = vector.broadcast %cst_98 : f32 to vector<16x16xf32>
    %209 = arith.mulf %207, %208 : vector<16x16xf32>
    %210 = vector.extract_strided_slice %149 {offsets = [0, 96], sizes = [16, 16], strides = [1, 1]} : vector<16x192xf32> to vector<16x16xf32>
    %211 = vector.extract_strided_slice %149 {offsets = [0, 160], sizes = [16, 16], strides = [1, 1]} : vector<16x192xf32> to vector<16x16xf32>
    %212 = arith.truncf %209 : vector<16x16xf32> to vector<16x16xbf16>
    %213 = arith.truncf %210 : vector<16x16xf32> to vector<16x16xbf16>
    %cst_99 = arith.constant dense<0.000000e+00> : vector<16x16xf32>
    %214 = tpu.matmul %212, %213, %cst_99 {dimension_numbers = #tpu.dot_dimension_numbers<[1], [1], [0], [0], [0, 0, 1, 0], [], []>} : vector<16x16xbf16>, vector<16x16xbf16>, vector<16x16xf32> -> vector<16x16xf32>
    %215 = vector.extract_strided_slice %122 {offsets = [2, 0, 0], sizes = [1, 16, 16], strides = [1, 1, 1]} : vector<4x16x16xf32> to vector<1x16x16xf32>
    %216 = vector.shape_cast %215 : vector<1x16x16xf32> to vector<16x16xf32>
    %217 = arith.addf %214, %216 : vector<16x16xf32>
    %cst_100 = arith.constant dense<0xFF800000> : vector<16xf32>
    %218 = vector.multi_reduction <maximumf>, %217, %cst_100 [1] : vector<16x16xf32> to vector<16xf32>
    %219 = vector.shape_cast %218 : vector<16xf32> to vector<16x1xf32>
    %220 = vector.broadcast %219 : vector<16x1xf32> to vector<16x16xf32>
    %221 = arith.subf %217, %220 : vector<16x16xf32>
    %222 = math.exp %221 : vector<16x16xf32>
    %cst_101 = arith.constant dense<0.000000e+00> : vector<16xf32>
    %223 = vector.multi_reduction <add>, %222, %cst_101 [1] : vector<16x16xf32> to vector<16xf32>
    %224 = vector.shape_cast %223 : vector<16xf32> to vector<16x1xf32>
    %225 = tpu.reciprocal %224 {approx = true} : vector<16x1xf32> -> vector<16x1xf32>
    %226 = vector.broadcast %225 : vector<16x1xf32> to vector<16x16xf32>
    %227 = arith.mulf %222, %226 : vector<16x16xf32>
    %228 = arith.truncf %227 : vector<16x16xf32> to vector<16x16xbf16>
    %229 = arith.truncf %211 : vector<16x16xf32> to vector<16x16xbf16>
    %cst_102 = arith.constant dense<0.000000e+00> : vector<16x16xf32>
    %230 = tpu.matmul %228, %229, %cst_102 {dimension_numbers = #tpu.dot_dimension_numbers<[1], [0], [0], [1], [0, 0, 1, 1], [], []>} : vector<16x16xbf16>, vector<16x16xbf16>, vector<16x16xf32> -> vector<16x16xf32>
    %231 = vector.extract_strided_slice %123 {offsets = [32, 0], sizes = [16, 64], strides = [1, 1]} : vector<64x64xf32> to vector<16x64xf32>
    %232 = arith.truncf %230 : vector<16x16xf32> to vector<16x16xbf16>
    %233 = arith.truncf %231 : vector<16x64xf32> to vector<16x64xbf16>
    %cst_103 = arith.constant dense<0.000000e+00> : vector<16x64xf32>
    %234 = tpu.matmul %232, %233, %cst_103 {dimension_numbers = #tpu.dot_dimension_numbers<[1], [0], [0], [1], [0, 0, 1, 1], [], []>} : vector<16x16xbf16>, vector<16x64xbf16>, vector<16x64xf32> -> vector<16x64xf32>
    %235 = arith.addf %206, %234 : vector<16x64xf32>
    %236 = vector.extract_strided_slice %149 {offsets = [0, 48], sizes = [16, 16], strides = [1, 1]} : vector<16x192xf32> to vector<16x16xf32>
    %cst_104 = arith.constant 2.500000e-01 : f32
    %237 = vector.broadcast %cst_104 : f32 to vector<16x16xf32>
    %238 = arith.mulf %236, %237 : vector<16x16xf32>
    %239 = vector.extract_strided_slice %149 {offsets = [0, 112], sizes = [16, 16], strides = [1, 1]} : vector<16x192xf32> to vector<16x16xf32>
    %240 = vector.extract_strided_slice %149 {offsets = [0, 176], sizes = [16, 16], strides = [1, 1]} : vector<16x192xf32> to vector<16x16xf32>
    %241 = arith.truncf %238 : vector<16x16xf32> to vector<16x16xbf16>
    %242 = arith.truncf %239 : vector<16x16xf32> to vector<16x16xbf16>
    %cst_105 = arith.constant dense<0.000000e+00> : vector<16x16xf32>
    %243 = tpu.matmul %241, %242, %cst_105 {dimension_numbers = #tpu.dot_dimension_numbers<[1], [1], [0], [0], [0, 0, 1, 0], [], []>} : vector<16x16xbf16>, vector<16x16xbf16>, vector<16x16xf32> -> vector<16x16xf32>
    %244 = vector.extract_strided_slice %122 {offsets = [3, 0, 0], sizes = [1, 16, 16], strides = [1, 1, 1]} : vector<4x16x16xf32> to vector<1x16x16xf32>
    %245 = vector.shape_cast %244 : vector<1x16x16xf32> to vector<16x16xf32>
    %246 = arith.addf %243, %245 : vector<16x16xf32>
    %cst_106 = arith.constant dense<0xFF800000> : vector<16xf32>
    %247 = vector.multi_reduction <maximumf>, %246, %cst_106 [1] : vector<16x16xf32> to vector<16xf32>
    %248 = vector.shape_cast %247 : vector<16xf32> to vector<16x1xf32>
    %249 = vector.broadcast %248 : vector<16x1xf32> to vector<16x16xf32>
    %250 = arith.subf %246, %249 : vector<16x16xf32>
    %251 = math.exp %250 : vector<16x16xf32>
    %cst_107 = arith.constant dense<0.000000e+00> : vector<16xf32>
    %252 = vector.multi_reduction <add>, %251, %cst_107 [1] : vector<16x16xf32> to vector<16xf32>
    %253 = vector.shape_cast %252 : vector<16xf32> to vector<16x1xf32>
    %254 = tpu.reciprocal %253 {approx = true} : vector<16x1xf32> -> vector<16x1xf32>
    %255 = vector.broadcast %254 : vector<16x1xf32> to vector<16x16xf32>
    %256 = arith.mulf %251, %255 : vector<16x16xf32>
    %257 = arith.truncf %256 : vector<16x16xf32> to vector<16x16xbf16>
    %258 = arith.truncf %240 : vector<16x16xf32> to vector<16x16xbf16>
    %cst_108 = arith.constant dense<0.000000e+00> : vector<16x16xf32>
    %259 = tpu.matmul %257, %258, %cst_108 {dimension_numbers = #tpu.dot_dimension_numbers<[1], [0], [0], [1], [0, 0, 1, 1], [], []>} : vector<16x16xbf16>, vector<16x16xbf16>, vector<16x16xf32> -> vector<16x16xf32>
    %260 = vector.extract_strided_slice %123 {offsets = [48, 0], sizes = [16, 64], strides = [1, 1]} : vector<64x64xf32> to vector<16x64xf32>
    %261 = arith.truncf %259 : vector<16x16xf32> to vector<16x16xbf16>
    %262 = arith.truncf %260 : vector<16x64xf32> to vector<16x64xbf16>
    %cst_109 = arith.constant dense<0.000000e+00> : vector<16x64xf32>
    %263 = tpu.matmul %261, %262, %cst_109 {dimension_numbers = #tpu.dot_dimension_numbers<[1], [0], [0], [1], [0, 0, 1, 1], [], []>} : vector<16x16xbf16>, vector<16x64xbf16>, vector<16x64xf32> -> vector<16x64xf32>
    %264 = arith.addf %235, %263 : vector<16x64xf32>
    %265 = arith.addf %117, %264 : vector<16x64xf32>
    %266 = vector.broadcast %124 : vector<1x64xf32> to vector<16x64xf32>
    %267 = arith.addf %265, %266 : vector<16x64xf32>
    %c0_110 = arith.constant 0 : index
    %c0_111 = arith.constant 0 : index
    %268 = vector.load %arg13[%c0_110, %c0_111] : memref<1x64xf32, #tpu.memory_space<vmem>>, vector<1x64xf32>
    %c0_112 = arith.constant 0 : index
    %c0_113 = arith.constant 0 : index
    %269 = vector.load %arg14[%c0_112, %c0_113] : memref<1x64xf32, #tpu.memory_space<vmem>>, vector<1x64xf32>
    %c0_114 = arith.constant 0 : index
    %c0_115 = arith.constant 0 : index
    %270 = vector.load %arg15[%c0_114, %c0_115] : memref<64x256xf32, #tpu.memory_space<vmem>>, vector<64x256xf32>
    %c0_116 = arith.constant 0 : index
    %c0_117 = arith.constant 0 : index
    %271 = vector.load %arg16[%c0_116, %c0_117] : memref<1x256xf32, #tpu.memory_space<vmem>>, vector<1x256xf32>
    %c0_118 = arith.constant 0 : index
    %c0_119 = arith.constant 0 : index
    %272 = vector.load %arg17[%c0_118, %c0_119] : memref<256x64xf32, #tpu.memory_space<vmem>>, vector<256x64xf32>
    %c0_120 = arith.constant 0 : index
    %c0_121 = arith.constant 0 : index
    %273 = vector.load %arg18[%c0_120, %c0_121] : memref<1x64xf32, #tpu.memory_space<vmem>>, vector<1x64xf32>
    %cst_122 = arith.constant dense<0.000000e+00> : vector<16xf32>
    %274 = vector.multi_reduction <add>, %267, %cst_122 [1] : vector<16x64xf32> to vector<16xf32>
    %275 = vector.shape_cast %274 : vector<16xf32> to vector<16x1xf32>
    %cst_123 = arith.constant 6.400000e+01 : f32
    %276 = vector.broadcast %cst_123 : f32 to vector<16x1xf32>
    %277 = arith.divf %275, %276 : vector<16x1xf32>
    %278 = vector.broadcast %277 : vector<16x1xf32> to vector<16x64xf32>
    %279 = arith.subf %267, %278 : vector<16x64xf32>
    %280 = arith.mulf %279, %279 : vector<16x64xf32>
    %cst_124 = arith.constant dense<0.000000e+00> : vector<16xf32>
    %281 = vector.multi_reduction <add>, %280, %cst_124 [1] : vector<16x64xf32> to vector<16xf32>
    %282 = vector.shape_cast %281 : vector<16xf32> to vector<16x1xf32>
    %cst_125 = arith.constant 6.400000e+01 : f32
    %283 = vector.broadcast %cst_125 : f32 to vector<16x1xf32>
    %284 = arith.divf %282, %283 : vector<16x1xf32>
    %cst_126 = arith.constant 9.99999974E-6 : f32
    %285 = vector.broadcast %cst_126 : f32 to vector<16x1xf32>
    %286 = arith.addf %284, %285 : vector<16x1xf32>
    %287 = math.rsqrt %286 : vector<16x1xf32>
    %288 = vector.broadcast %287 : vector<16x1xf32> to vector<16x64xf32>
    %289 = arith.mulf %279, %288 : vector<16x64xf32>
    %290 = vector.broadcast %268 : vector<1x64xf32> to vector<16x64xf32>
    %291 = arith.mulf %289, %290 : vector<16x64xf32>
    %292 = vector.broadcast %269 : vector<1x64xf32> to vector<16x64xf32>
    %293 = arith.addf %291, %292 : vector<16x64xf32>
    %294 = arith.truncf %293 : vector<16x64xf32> to vector<16x64xbf16>
    %295 = arith.truncf %270 : vector<64x256xf32> to vector<64x256xbf16>
    %cst_127 = arith.constant dense<0.000000e+00> : vector<16x256xf32>
    %296 = tpu.matmul %294, %295, %cst_127 {dimension_numbers = #tpu.dot_dimension_numbers<[1], [0], [0], [1], [0, 0, 1, 1], [], []>} : vector<16x64xbf16>, vector<64x256xbf16>, vector<16x256xf32> -> vector<16x256xf32>
    %297 = vector.broadcast %271 : vector<1x256xf32> to vector<16x256xf32>
    %298 = arith.addf %296, %297 : vector<16x256xf32>
    %cst_128 = arith.constant 5.000000e-01 : f32
    %299 = vector.broadcast %cst_128 : f32 to vector<16x256xf32>
    %300 = arith.mulf %299, %298 : vector<16x256xf32>
    %cst_129 = arith.constant 0.707106769 : f32
    %301 = vector.broadcast %cst_129 : f32 to vector<16x256xf32>
    %302 = arith.mulf %298, %301 : vector<16x256xf32>
    %303 = math.absf %302 : vector<16x256xf32>
    %cst_130 = arith.constant 0.327591091 : f32
    %304 = vector.broadcast %cst_130 : f32 to vector<16x256xf32>
    %305 = arith.mulf %304, %303 : vector<16x256xf32>
    %cst_131 = arith.constant 1.000000e+00 : f32
    %306 = vector.broadcast %cst_131 : f32 to vector<16x256xf32>
    %307 = arith.addf %306, %305 : vector<16x256xf32>
    %308 = tpu.reciprocal %307 {approx = true} : vector<16x256xf32> -> vector<16x256xf32>
    %cst_132 = arith.constant 1.06140542 : f32
    %309 = vector.broadcast %cst_132 : f32 to vector<16x256xf32>
    %310 = arith.mulf %308, %309 : vector<16x256xf32>
    %cst_133 = arith.constant -1.45315206 : f32
    %311 = vector.broadcast %cst_133 : f32 to vector<16x256xf32>
    %312 = arith.addf %311, %310 : vector<16x256xf32>
    %313 = arith.mulf %308, %312 : vector<16x256xf32>
    %cst_134 = arith.constant 1.42141378 : f32
    %314 = vector.broadcast %cst_134 : f32 to vector<16x256xf32>
    %315 = arith.addf %314, %313 : vector<16x256xf32>
    %316 = arith.mulf %308, %315 : vector<16x256xf32>
    %cst_135 = arith.constant -0.284496725 : f32
    %317 = vector.broadcast %cst_135 : f32 to vector<16x256xf32>
    %318 = arith.addf %317, %316 : vector<16x256xf32>
    %319 = arith.mulf %308, %318 : vector<16x256xf32>
    %cst_136 = arith.constant 0.254829586 : f32
    %320 = vector.broadcast %cst_136 : f32 to vector<16x256xf32>
    %321 = arith.addf %320, %319 : vector<16x256xf32>
    %322 = arith.mulf %308, %321 : vector<16x256xf32>
    %cst_137 = arith.constant 0.000000e+00 : f32
    %323 = vector.broadcast %cst_137 : f32 to vector<16x256xf32>
    %324 = arith.subf %323, %303 : vector<16x256xf32>
    %325 = arith.mulf %324, %303 : vector<16x256xf32>
    %326 = math.exp %325 : vector<16x256xf32>
    %327 = arith.mulf %322, %326 : vector<16x256xf32>
    %cst_138 = arith.constant 1.000000e+00 : f32
    %328 = vector.broadcast %cst_138 : f32 to vector<16x256xf32>
    %329 = arith.subf %328, %327 : vector<16x256xf32>
    %cst_139 = arith.constant 0.000000e+00 : f32
    %330 = vector.broadcast %cst_139 : f32 to vector<16x256xf32>
    %331 = arith.cmpf olt, %302, %330 : vector<16x256xf32>
    %cst_140 = arith.constant 0.000000e+00 : f32
    %332 = vector.broadcast %cst_140 : f32 to vector<16x256xf32>
    %333 = arith.subf %332, %329 : vector<16x256xf32>
    %334 = arith.select %331, %333, %329 : vector<16x256xi1>, vector<16x256xf32>
    %cst_141 = arith.constant 1.000000e+00 : f32
    %335 = vector.broadcast %cst_141 : f32 to vector<16x256xf32>
    %336 = arith.addf %335, %334 : vector<16x256xf32>
    %337 = arith.mulf %300, %336 : vector<16x256xf32>
    %338 = arith.truncf %337 : vector<16x256xf32> to vector<16x256xbf16>
    %339 = arith.truncf %272 : vector<256x64xf32> to vector<256x64xbf16>
    %cst_142 = arith.constant dense<0.000000e+00> : vector<16x64xf32>
    %340 = tpu.matmul %338, %339, %cst_142 {dimension_numbers = #tpu.dot_dimension_numbers<[1], [0], [0], [1], [0, 0, 1, 1], [], []>} : vector<16x256xbf16>, vector<256x64xbf16>, vector<16x64xf32> -> vector<16x64xf32>
    %341 = arith.addf %267, %340 : vector<16x64xf32>
    %342 = vector.broadcast %273 : vector<1x64xf32> to vector<16x64xf32>
    %343 = arith.addf %341, %342 : vector<16x64xf32>
    %c0_143 = arith.constant 0 : index
    %c0_144 = arith.constant 0 : index
    %c0_145 = arith.constant 0 : index
    %344 = vector.load %arg19[%c0_143, %c0_144, %c0_145] : memref<1x16x64xf32, #tpu.memory_space<vmem>>, vector<1x16x64xf32>
    %345 = vector.shape_cast %344 : vector<1x16x64xf32> to vector<16x64xf32>
    %346 = vector.shape_cast %343 : vector<16x64xf32> to vector<1x16x64xf32>
    tpu.vector_store %arg19[%c0_143, %c0_144, %c0_145], %346 {strides = array<i32>} : memref<1x16x64xf32, #tpu.memory_space<vmem>>, vector<1x16x64xf32>,
    return
  }
  func.func @transform_0(%arg0: i32) -> (i32, i32, i32) {
    %c0_i32 = arith.constant 0 : i32
    %c0_i32_0 = arith.constant 0 : i32
    %c0_i32_1 = arith.constant 0 : i32
    return %arg0, %c0_i32, %c0_i32_0 : i32, i32, i32
  }
  func.func @transform_1(%arg0: i32) -> (i32, i32, i32) {
    %c0_i32 = arith.constant 0 : i32
    %c0_i32_0 = arith.constant 0 : i32
    %c0_i32_1 = arith.constant 0 : i32
    %c0_i32_2 = arith.constant 0 : i32
    return %c0_i32, %c0_i32_0, %c0_i32_1 : i32, i32, i32
  }
  func.func @transform_2(%arg0: i32) -> (i32, i32, i32) {
    %c0_i32 = arith.constant 0 : i32
    %c0_i32_0 = arith.constant 0 : i32
    %c0_i32_1 = arith.constant 0 : i32
    %c0_i32_2 = arith.constant 0 : i32
    return %c0_i32, %c0_i32_0, %c0_i32_1 : i32, i32, i32
  }
  func.func @transform_3(%arg0: i32) -> (i32, i32, i32) {
    %c0_i32 = arith.constant 0 : i32
    %c0_i32_0 = arith.constant 0 : i32
    %c0_i32_1 = arith.constant 0 : i32
    %c0_i32_2 = arith.constant 0 : i32
    return %c0_i32, %c0_i32_0, %c0_i32_1 : i32, i32, i32
  }
  func.func @transform_4(%arg0: i32) -> (i32, i32, i32) {
    %c0_i32 = arith.constant 0 : i32
    %c0_i32_0 = arith.constant 0 : i32
    %c0_i32_1 = arith.constant 0 : i32
    %c0_i32_2 = arith.constant 0 : i32
    return %c0_i32, %c0_i32_0, %c0_i32_1 : i32, i32, i32
  }
  func.func @transform_5(%arg0: i32) -> (i32, i32) {
    %c0_i32 = arith.constant 0 : i32
    %c0_i32_0 = arith.constant 0 : i32
    %c0_i32_1 = arith.constant 0 : i32
    return %c0_i32, %c0_i32_0 : i32, i32
  }
  func.func @transform_6(%arg0: i32) -> (i32, i32) {
    %c0_i32 = arith.constant 0 : i32
    %c0_i32_0 = arith.constant 0 : i32
    %c0_i32_1 = arith.constant 0 : i32
    return %c0_i32, %c0_i32_0 : i32, i32
  }
  func.func @transform_7(%arg0: i32) -> (i32, i32) {
    %c0_i32 = arith.constant 0 : i32
    %c0_i32_0 = arith.constant 0 : i32
    %c0_i32_1 = arith.constant 0 : i32
    return %c0_i32, %c0_i32_0 : i32, i32
  }
  func.func @transform_8(%arg0: i32) -> (i32, i32) {
    %c0_i32 = arith.constant 0 : i32
    %c0_i32_0 = arith.constant 0 : i32
    %c0_i32_1 = arith.constant 0 : i32
    return %c0_i32, %c0_i32_0 : i32, i32
  }
  func.func @transform_9(%arg0: i32) -> (i32, i32, i32) {
    %c0_i32 = arith.constant 0 : i32
    %c0_i32_0 = arith.constant 0 : i32
    %c0_i32_1 = arith.constant 0 : i32
    %c0_i32_2 = arith.constant 0 : i32
    return %c0_i32, %c0_i32_0, %c0_i32_1 : i32, i32, i32
  }
  func.func @transform_10(%arg0: i32) -> (i32, i32) {
    %c0_i32 = arith.constant 0 : i32
    %c0_i32_0 = arith.constant 0 : i32
    %c0_i32_1 = arith.constant 0 : i32
    return %c0_i32, %c0_i32_0 : i32, i32
  }
  func.func @transform_11(%arg0: i32) -> (i32, i32) {
    %c0_i32 = arith.constant 0 : i32
    %c0_i32_0 = arith.constant 0 : i32
    %c0_i32_1 = arith.constant 0 : i32
    return %c0_i32, %c0_i32_0 : i32, i32
  }
  func.func @transform_12(%arg0: i32) -> (i32, i32) {
    %c0_i32 = arith.constant 0 : i32
    %c0_i32_0 = arith.constant 0 : i32
    %c0_i32_1 = arith.constant 0 : i32
    return %c0_i32, %c0_i32_0 : i32, i32
  }
  func.func @transform_13(%arg0: i32) -> (i32, i32) {
    %c0_i32 = arith.constant 0 : i32
    %c0_i32_0 = arith.constant 0 : i32
    %c0_i32_1 = arith.constant 0 : i32
    return %c0_i32, %c0_i32_0 : i32, i32
  }
  func.func @transform_14(%arg0: i32) -> (i32, i32) {
    %c0_i32 = arith.constant 0 : i32
    %c0_i32_0 = arith.constant 0 : i32
    %c0_i32_1 = arith.constant 0 : i32
    return %c0_i32, %c0_i32_0 : i32, i32
  }
  func.func @transform_15(%arg0: i32) -> (i32, i32) {
    %c0_i32 = arith.constant 0 : i32
    %c0_i32_0 = arith.constant 0 : i32
    %c0_i32_1 = arith.constant 0 : i32
    return %c0_i32, %c0_i32_0 : i32, i32
  }
  func.func @transform_16(%arg0: i32) -> (i32, i32) {
    %c0_i32 = arith.constant 0 : i32
    %c0_i32_0 = arith.constant 0 : i32
    %c0_i32_1 = arith.constant 0 : i32
    return %c0_i32, %c0_i32_0 : i32, i32
  }
  func.func @transform_17(%arg0: i32) -> (i32, i32) {
    %c0_i32 = arith.constant 0 : i32
    %c0_i32_0 = arith.constant 0 : i32
    %c0_i32_1 = arith.constant 0 : i32
    return %c0_i32, %c0_i32_0 : i32, i32
  }
  func.func @transform_18(%arg0: i32) -> (i32, i32, i32) {
    %c0_i32 = arith.constant 0 : i32
    %c0_i32_0 = arith.constant 0 : i32
    %c0_i32_1 = arith.constant 0 : i32
    return %arg0, %c0_i32, %c0_i32_0 : i32, i32, i32
  }
}

module attributes {stable_mosaic.version = 11 : i64} {
  func.func @_embed_block_kernel(%arg0: i32, %arg1: memref<1x64x32xf32, #tpu.memory_space<vmem>>, %arg2: memref<32x32xf32, #tpu.memory_space<vmem>>, %arg3: memref<1x32xf32, #tpu.memory_space<vmem>>, %arg4: memref<1x32xf32, #tpu.memory_space<vmem>>, %arg5: memref<1x32xf32, #tpu.memory_space<vmem>>, %arg6: memref<64x64xf32, #tpu.memory_space<vmem>>, %arg7: memref<64x64xf32, #tpu.memory_space<vmem>>, %arg8: memref<1x32xf32, #tpu.memory_space<vmem>>, %arg9: memref<1x32xf32, #tpu.memory_space<vmem>>, %arg10: memref<32x96xf32, #tpu.memory_space<vmem>>, %arg11: memref<1x96xf32, #tpu.memory_space<vmem>>, %arg12: memref<2x64x64xf32, #tpu.memory_space<vmem>>, %arg13: memref<32x32xf32, #tpu.memory_space<vmem>>, %arg14: memref<1x32xf32, #tpu.memory_space<vmem>>, %arg15: memref<1x32xf32, #tpu.memory_space<vmem>>, %arg16: memref<1x32xf32, #tpu.memory_space<vmem>>, %arg17: memref<32x128xf32, #tpu.memory_space<vmem>>, %arg18: memref<1x128xf32, #tpu.memory_space<vmem>>, %arg19: memref<128x32xf32, #tpu.memory_space<vmem>>, %arg20: memref<1x32xf32, #tpu.memory_space<vmem>>, %arg21: memref<1x64x32xf32, #tpu.memory_space<vmem>>) attributes {dimension_semantics = [#tpu.dimension_semantics<parallel>], iteration_bounds = array<i64: 2>, scalar_prefetch = 0 : i64, scratch_operands = 0 : i64, tpu.core_type = #tpu.core_type<tc>, window_params = [{transform_indices = @transform_0, window_bounds = array<i64: 1, 64, 32>}, {pipeline_mode = #tpu.pipeline_mode<synchronous>, transform_indices = @transform_1, window_bounds = array<i64: 32, 32>}, {pipeline_mode = #tpu.pipeline_mode<synchronous>, transform_indices = @transform_2, window_bounds = array<i64: 1, 32>}, {pipeline_mode = #tpu.pipeline_mode<synchronous>, transform_indices = @transform_3, window_bounds = array<i64: 1, 32>}, {pipeline_mode = #tpu.pipeline_mode<synchronous>, transform_indices = @transform_4, window_bounds = array<i64: 1, 32>}, {pipeline_mode = #tpu.pipeline_mode<synchronous>, transform_indices = @transform_5, window_bounds = array<i64: 64, 64>}, {pipeline_mode = #tpu.pipeline_mode<synchronous>, transform_indices = @transform_6, window_bounds = array<i64: 64, 64>}, {pipeline_mode = #tpu.pipeline_mode<synchronous>, transform_indices = @transform_7, window_bounds = array<i64: 1, 32>}, {pipeline_mode = #tpu.pipeline_mode<synchronous>, transform_indices = @transform_8, window_bounds = array<i64: 1, 32>}, {pipeline_mode = #tpu.pipeline_mode<synchronous>, transform_indices = @transform_9, window_bounds = array<i64: 32, 96>}, {pipeline_mode = #tpu.pipeline_mode<synchronous>, transform_indices = @transform_10, window_bounds = array<i64: 1, 96>}, {pipeline_mode = #tpu.pipeline_mode<synchronous>, transform_indices = @transform_11, window_bounds = array<i64: 2, 64, 64>}, {pipeline_mode = #tpu.pipeline_mode<synchronous>, transform_indices = @transform_12, window_bounds = array<i64: 32, 32>}, {pipeline_mode = #tpu.pipeline_mode<synchronous>, transform_indices = @transform_13, window_bounds = array<i64: 1, 32>}, {pipeline_mode = #tpu.pipeline_mode<synchronous>, transform_indices = @transform_14, window_bounds = array<i64: 1, 32>}, {pipeline_mode = #tpu.pipeline_mode<synchronous>, transform_indices = @transform_15, window_bounds = array<i64: 1, 32>}, {pipeline_mode = #tpu.pipeline_mode<synchronous>, transform_indices = @transform_16, window_bounds = array<i64: 32, 128>}, {pipeline_mode = #tpu.pipeline_mode<synchronous>, transform_indices = @transform_17, window_bounds = array<i64: 1, 128>}, {pipeline_mode = #tpu.pipeline_mode<synchronous>, transform_indices = @transform_18, window_bounds = array<i64: 128, 32>}, {pipeline_mode = #tpu.pipeline_mode<synchronous>, transform_indices = @transform_19, window_bounds = array<i64: 1, 32>}, {transform_indices = @transform_20, window_bounds = array<i64: 1, 64, 32>}]} {
    %c0 = arith.constant 0 : index
    %c0_0 = arith.constant 0 : index
    %c0_1 = arith.constant 0 : index
    %0 = vector.load %arg1[%c0, %c0_0, %c0_1] : memref<1x64x32xf32, #tpu.memory_space<vmem>>, vector<1x64x32xf32>
    %1 = vector.shape_cast %0 : vector<1x64x32xf32> to vector<64x32xf32>
    %c0_2 = arith.constant 0 : index
    %c0_3 = arith.constant 0 : index
    %2 = vector.load %arg2[%c0_2, %c0_3] : memref<32x32xf32, #tpu.memory_space<vmem>>, vector<32x32xf32>
    %3 = arith.truncf %1 : vector<64x32xf32> to vector<64x32xbf16>
    %4 = arith.truncf %2 : vector<32x32xf32> to vector<32x32xbf16>
    %cst = arith.constant dense<0.000000e+00> : vector<64x32xf32>
    %5 = tpu.matmul %3, %4, %cst {dimension_numbers = #tpu.dot_dimension_numbers<[1], [0], [0], [1], [0, 0, 1, 1], [], []>} : vector<64x32xbf16>, vector<32x32xbf16>, vector<64x32xf32> -> vector<64x32xf32>
    %c0_4 = arith.constant 0 : index
    %c0_5 = arith.constant 0 : index
    %6 = vector.load %arg3[%c0_4, %c0_5] : memref<1x32xf32, #tpu.memory_space<vmem>>, vector<1x32xf32>
    %7 = vector.broadcast %6 : vector<1x32xf32> to vector<64x32xf32>
    %8 = arith.addf %5, %7 : vector<64x32xf32>
    %c0_6 = arith.constant 0 : index
    %c0_7 = arith.constant 0 : index
    %9 = vector.load %arg4[%c0_6, %c0_7] : memref<1x32xf32, #tpu.memory_space<vmem>>, vector<1x32xf32>
    %c0_8 = arith.constant 0 : index
    %c0_9 = arith.constant 0 : index
    %10 = vector.load %arg5[%c0_8, %c0_9] : memref<1x32xf32, #tpu.memory_space<vmem>>, vector<1x32xf32>
    %cst_10 = arith.constant dense<0.000000e+00> : vector<64xf32>
    %11 = vector.multi_reduction <add>, %8, %cst_10 [1] : vector<64x32xf32> to vector<64xf32>
    %12 = vector.shape_cast %11 : vector<64xf32> to vector<64x1xf32>
    %cst_11 = arith.constant 3.200000e+01 : f32
    %13 = vector.broadcast %cst_11 : f32 to vector<64x1xf32>
    %14 = arith.divf %12, %13 : vector<64x1xf32>
    %15 = vector.broadcast %14 : vector<64x1xf32> to vector<64x32xf32>
    %16 = arith.subf %8, %15 : vector<64x32xf32>
    %17 = arith.mulf %16, %16 : vector<64x32xf32>
    %cst_12 = arith.constant dense<0.000000e+00> : vector<64xf32>
    %18 = vector.multi_reduction <add>, %17, %cst_12 [1] : vector<64x32xf32> to vector<64xf32>
    %19 = vector.shape_cast %18 : vector<64xf32> to vector<64x1xf32>
    %cst_13 = arith.constant 3.200000e+01 : f32
    %20 = vector.broadcast %cst_13 : f32 to vector<64x1xf32>
    %21 = arith.divf %19, %20 : vector<64x1xf32>
    %cst_14 = arith.constant 9.99999974E-6 : f32
    %22 = vector.broadcast %cst_14 : f32 to vector<64x1xf32>
    %23 = arith.addf %21, %22 : vector<64x1xf32>
    %24 = math.rsqrt %23 : vector<64x1xf32>
    %25 = vector.broadcast %24 : vector<64x1xf32> to vector<64x32xf32>
    %26 = arith.mulf %16, %25 : vector<64x32xf32>
    %27 = vector.broadcast %9 : vector<1x32xf32> to vector<64x32xf32>
    %28 = arith.mulf %26, %27 : vector<64x32xf32>
    %29 = vector.broadcast %10 : vector<1x32xf32> to vector<64x32xf32>
    %30 = arith.addf %28, %29 : vector<64x32xf32>
    %c0_15 = arith.constant 0 : index
    %c0_16 = arith.constant 0 : index
    %31 = vector.load %arg6[%c0_15, %c0_16] : memref<64x64xf32, #tpu.memory_space<vmem>>, vector<64x64xf32>
    %cst_17 = arith.constant dense<0.000000e+00> : vector<64x32xf32>
    %32 = tpu.matmul %31, %30, %cst_17 {dimension_numbers = #tpu.dot_dimension_numbers<[1], [0], [0], [1], [0, 0, 1, 1], [], []>} : vector<64x64xf32>, vector<64x32xf32>, vector<64x32xf32> -> vector<64x32xf32>
    %c0_18 = arith.constant 0 : index
    %c0_19 = arith.constant 0 : index
    %33 = vector.load %arg8[%c0_18, %c0_19] : memref<1x32xf32, #tpu.memory_space<vmem>>, vector<1x32xf32>
    %c0_20 = arith.constant 0 : index
    %c0_21 = arith.constant 0 : index
    %34 = vector.load %arg9[%c0_20, %c0_21] : memref<1x32xf32, #tpu.memory_space<vmem>>, vector<1x32xf32>
    %c0_22 = arith.constant 0 : index
    %c0_23 = arith.constant 0 : index
    %35 = vector.load %arg10[%c0_22, %c0_23] : memref<32x96xf32, #tpu.memory_space<vmem>>, vector<32x96xf32>
    %c0_24 = arith.constant 0 : index
    %c0_25 = arith.constant 0 : index
    %36 = vector.load %arg11[%c0_24, %c0_25] : memref<1x96xf32, #tpu.memory_space<vmem>>, vector<1x96xf32>
    %c0_26 = arith.constant 0 : index
    %c0_27 = arith.constant 0 : index
    %c0_28 = arith.constant 0 : index
    %37 = vector.load %arg12[%c0_26, %c0_27, %c0_28] : memref<2x64x64xf32, #tpu.memory_space<vmem>>, vector<2x64x64xf32>
    %c0_29 = arith.constant 0 : index
    %c0_30 = arith.constant 0 : index
    %38 = vector.load %arg13[%c0_29, %c0_30] : memref<32x32xf32, #tpu.memory_space<vmem>>, vector<32x32xf32>
    %c0_31 = arith.constant 0 : index
    %c0_32 = arith.constant 0 : index
    %39 = vector.load %arg14[%c0_31, %c0_32] : memref<1x32xf32, #tpu.memory_space<vmem>>, vector<1x32xf32>
    %cst_33 = arith.constant dense<0.000000e+00> : vector<64xf32>
    %40 = vector.multi_reduction <add>, %32, %cst_33 [1] : vector<64x32xf32> to vector<64xf32>
    %41 = vector.shape_cast %40 : vector<64xf32> to vector<64x1xf32>
    %cst_34 = arith.constant 3.200000e+01 : f32
    %42 = vector.broadcast %cst_34 : f32 to vector<64x1xf32>
    %43 = arith.divf %41, %42 : vector<64x1xf32>
    %44 = vector.broadcast %43 : vector<64x1xf32> to vector<64x32xf32>
    %45 = arith.subf %32, %44 : vector<64x32xf32>
    %46 = arith.mulf %45, %45 : vector<64x32xf32>
    %cst_35 = arith.constant dense<0.000000e+00> : vector<64xf32>
    %47 = vector.multi_reduction <add>, %46, %cst_35 [1] : vector<64x32xf32> to vector<64xf32>
    %48 = vector.shape_cast %47 : vector<64xf32> to vector<64x1xf32>
    %cst_36 = arith.constant 3.200000e+01 : f32
    %49 = vector.broadcast %cst_36 : f32 to vector<64x1xf32>
    %50 = arith.divf %48, %49 : vector<64x1xf32>
    %cst_37 = arith.constant 9.99999974E-6 : f32
    %51 = vector.broadcast %cst_37 : f32 to vector<64x1xf32>
    %52 = arith.addf %50, %51 : vector<64x1xf32>
    %53 = math.rsqrt %52 : vector<64x1xf32>
    %54 = vector.broadcast %53 : vector<64x1xf32> to vector<64x32xf32>
    %55 = arith.mulf %45, %54 : vector<64x32xf32>
    %56 = vector.broadcast %33 : vector<1x32xf32> to vector<64x32xf32>
    %57 = arith.mulf %55, %56 : vector<64x32xf32>
    %58 = vector.broadcast %34 : vector<1x32xf32> to vector<64x32xf32>
    %59 = arith.addf %57, %58 : vector<64x32xf32>
    %60 = arith.truncf %59 : vector<64x32xf32> to vector<64x32xbf16>
    %61 = arith.truncf %35 : vector<32x96xf32> to vector<32x96xbf16>
    %cst_38 = arith.constant dense<0.000000e+00> : vector<64x96xf32>
    %62 = tpu.matmul %60, %61, %cst_38 {dimension_numbers = #tpu.dot_dimension_numbers<[1], [0], [0], [1], [0, 0, 1, 1], [], []>} : vector<64x32xbf16>, vector<32x96xbf16>, vector<64x96xf32> -> vector<64x96xf32>
    %63 = vector.broadcast %36 : vector<1x96xf32> to vector<64x96xf32>
    %64 = arith.addf %62, %63 : vector<64x96xf32>
    %65 = vector.extract_strided_slice %64 {offsets = [0, 0], sizes = [64, 16], strides = [1, 1]} : vector<64x96xf32> to vector<64x16xf32>
    %cst_39 = arith.constant 2.500000e-01 : f32
    %66 = vector.broadcast %cst_39 : f32 to vector<64x16xf32>
    %67 = arith.mulf %65, %66 : vector<64x16xf32>
    %68 = vector.extract_strided_slice %64 {offsets = [0, 32], sizes = [64, 16], strides = [1, 1]} : vector<64x96xf32> to vector<64x16xf32>
    %69 = vector.extract_strided_slice %64 {offsets = [0, 64], sizes = [64, 16], strides = [1, 1]} : vector<64x96xf32> to vector<64x16xf32>
    %70 = arith.truncf %67 : vector<64x16xf32> to vector<64x16xbf16>
    %71 = arith.truncf %68 : vector<64x16xf32> to vector<64x16xbf16>
    %cst_40 = arith.constant dense<0.000000e+00> : vector<64x64xf32>
    %72 = tpu.matmul %70, %71, %cst_40 {dimension_numbers = #tpu.dot_dimension_numbers<[1], [1], [0], [0], [0, 0, 1, 0], [], []>} : vector<64x16xbf16>, vector<64x16xbf16>, vector<64x64xf32> -> vector<64x64xf32>
    %73 = vector.extract_strided_slice %37 {offsets = [0, 0, 0], sizes = [1, 64, 64], strides = [1, 1, 1]} : vector<2x64x64xf32> to vector<1x64x64xf32>
    %74 = vector.shape_cast %73 : vector<1x64x64xf32> to vector<64x64xf32>
    %75 = arith.addf %72, %74 : vector<64x64xf32>
    %cst_41 = arith.constant dense<0xFF800000> : vector<64xf32>
    %76 = vector.multi_reduction <maximumf>, %75, %cst_41 [1] : vector<64x64xf32> to vector<64xf32>
    %77 = vector.shape_cast %76 : vector<64xf32> to vector<64x1xf32>
    %78 = vector.broadcast %77 : vector<64x1xf32> to vector<64x64xf32>
    %79 = arith.subf %75, %78 : vector<64x64xf32>
    %80 = math.exp %79 : vector<64x64xf32>
    %cst_42 = arith.constant dense<0.000000e+00> : vector<64xf32>
    %81 = vector.multi_reduction <add>, %80, %cst_42 [1] : vector<64x64xf32> to vector<64xf32>
    %82 = vector.shape_cast %81 : vector<64xf32> to vector<64x1xf32>
    %83 = tpu.reciprocal %82 {approx = true} : vector<64x1xf32> -> vector<64x1xf32>
    %84 = vector.broadcast %83 : vector<64x1xf32> to vector<64x64xf32>
    %85 = arith.mulf %80, %84 : vector<64x64xf32>
    %86 = arith.truncf %85 : vector<64x64xf32> to vector<64x64xbf16>
    %87 = arith.truncf %69 : vector<64x16xf32> to vector<64x16xbf16>
    %cst_43 = arith.constant dense<0.000000e+00> : vector<64x16xf32>
    %88 = tpu.matmul %86, %87, %cst_43 {dimension_numbers = #tpu.dot_dimension_numbers<[1], [0], [0], [1], [0, 0, 1, 1], [], []>} : vector<64x64xbf16>, vector<64x16xbf16>, vector<64x16xf32> -> vector<64x16xf32>
    %89 = vector.extract_strided_slice %38 {offsets = [0, 0], sizes = [16, 32], strides = [1, 1]} : vector<32x32xf32> to vector<16x32xf32>
    %90 = arith.truncf %88 : vector<64x16xf32> to vector<64x16xbf16>
    %91 = arith.truncf %89 : vector<16x32xf32> to vector<16x32xbf16>
    %cst_44 = arith.constant dense<0.000000e+00> : vector<64x32xf32>
    %92 = tpu.matmul %90, %91, %cst_44 {dimension_numbers = #tpu.dot_dimension_numbers<[1], [0], [0], [1], [0, 0, 1, 1], [], []>} : vector<64x16xbf16>, vector<16x32xbf16>, vector<64x32xf32> -> vector<64x32xf32>
    %93 = vector.extract_strided_slice %64 {offsets = [0, 16], sizes = [64, 16], strides = [1, 1]} : vector<64x96xf32> to vector<64x16xf32>
    %cst_45 = arith.constant 2.500000e-01 : f32
    %94 = vector.broadcast %cst_45 : f32 to vector<64x16xf32>
    %95 = arith.mulf %93, %94 : vector<64x16xf32>
    %96 = vector.extract_strided_slice %64 {offsets = [0, 48], sizes = [64, 16], strides = [1, 1]} : vector<64x96xf32> to vector<64x16xf32>
    %97 = vector.extract_strided_slice %64 {offsets = [0, 80], sizes = [64, 16], strides = [1, 1]} : vector<64x96xf32> to vector<64x16xf32>
    %98 = arith.truncf %95 : vector<64x16xf32> to vector<64x16xbf16>
    %99 = arith.truncf %96 : vector<64x16xf32> to vector<64x16xbf16>
    %cst_46 = arith.constant dense<0.000000e+00> : vector<64x64xf32>
    %100 = tpu.matmul %98, %99, %cst_46 {dimension_numbers = #tpu.dot_dimension_numbers<[1], [1], [0], [0], [0, 0, 1, 0], [], []>} : vector<64x16xbf16>, vector<64x16xbf16>, vector<64x64xf32> -> vector<64x64xf32>
    %101 = vector.extract_strided_slice %37 {offsets = [1, 0, 0], sizes = [1, 64, 64], strides = [1, 1, 1]} : vector<2x64x64xf32> to vector<1x64x64xf32>
    %102 = vector.shape_cast %101 : vector<1x64x64xf32> to vector<64x64xf32>
    %103 = arith.addf %100, %102 : vector<64x64xf32>
    %cst_47 = arith.constant dense<0xFF800000> : vector<64xf32>
    %104 = vector.multi_reduction <maximumf>, %103, %cst_47 [1] : vector<64x64xf32> to vector<64xf32>
    %105 = vector.shape_cast %104 : vector<64xf32> to vector<64x1xf32>
    %106 = vector.broadcast %105 : vector<64x1xf32> to vector<64x64xf32>
    %107 = arith.subf %103, %106 : vector<64x64xf32>
    %108 = math.exp %107 : vector<64x64xf32>
    %cst_48 = arith.constant dense<0.000000e+00> : vector<64xf32>
    %109 = vector.multi_reduction <add>, %108, %cst_48 [1] : vector<64x64xf32> to vector<64xf32>
    %110 = vector.shape_cast %109 : vector<64xf32> to vector<64x1xf32>
    %111 = tpu.reciprocal %110 {approx = true} : vector<64x1xf32> -> vector<64x1xf32>
    %112 = vector.broadcast %111 : vector<64x1xf32> to vector<64x64xf32>
    %113 = arith.mulf %108, %112 : vector<64x64xf32>
    %114 = arith.truncf %113 : vector<64x64xf32> to vector<64x64xbf16>
    %115 = arith.truncf %97 : vector<64x16xf32> to vector<64x16xbf16>
    %cst_49 = arith.constant dense<0.000000e+00> : vector<64x16xf32>
    %116 = tpu.matmul %114, %115, %cst_49 {dimension_numbers = #tpu.dot_dimension_numbers<[1], [0], [0], [1], [0, 0, 1, 1], [], []>} : vector<64x64xbf16>, vector<64x16xbf16>, vector<64x16xf32> -> vector<64x16xf32>
    %117 = vector.extract_strided_slice %38 {offsets = [16, 0], sizes = [16, 32], strides = [1, 1]} : vector<32x32xf32> to vector<16x32xf32>
    %118 = arith.truncf %116 : vector<64x16xf32> to vector<64x16xbf16>
    %119 = arith.truncf %117 : vector<16x32xf32> to vector<16x32xbf16>
    %cst_50 = arith.constant dense<0.000000e+00> : vector<64x32xf32>
    %120 = tpu.matmul %118, %119, %cst_50 {dimension_numbers = #tpu.dot_dimension_numbers<[1], [0], [0], [1], [0, 0, 1, 1], [], []>} : vector<64x16xbf16>, vector<16x32xbf16>, vector<64x32xf32> -> vector<64x32xf32>
    %121 = arith.addf %92, %120 : vector<64x32xf32>
    %122 = arith.addf %32, %121 : vector<64x32xf32>
    %123 = vector.broadcast %39 : vector<1x32xf32> to vector<64x32xf32>
    %124 = arith.addf %122, %123 : vector<64x32xf32>
    %c0_51 = arith.constant 0 : index
    %c0_52 = arith.constant 0 : index
    %125 = vector.load %arg15[%c0_51, %c0_52] : memref<1x32xf32, #tpu.memory_space<vmem>>, vector<1x32xf32>
    %c0_53 = arith.constant 0 : index
    %c0_54 = arith.constant 0 : index
    %126 = vector.load %arg16[%c0_53, %c0_54] : memref<1x32xf32, #tpu.memory_space<vmem>>, vector<1x32xf32>
    %c0_55 = arith.constant 0 : index
    %c0_56 = arith.constant 0 : index
    %127 = vector.load %arg17[%c0_55, %c0_56] : memref<32x128xf32, #tpu.memory_space<vmem>>, vector<32x128xf32>
    %c0_57 = arith.constant 0 : index
    %c0_58 = arith.constant 0 : index
    %128 = vector.load %arg18[%c0_57, %c0_58] : memref<1x128xf32, #tpu.memory_space<vmem>>, vector<1x128xf32>
    %c0_59 = arith.constant 0 : index
    %c0_60 = arith.constant 0 : index
    %129 = vector.load %arg19[%c0_59, %c0_60] : memref<128x32xf32, #tpu.memory_space<vmem>>, vector<128x32xf32>
    %c0_61 = arith.constant 0 : index
    %c0_62 = arith.constant 0 : index
    %130 = vector.load %arg20[%c0_61, %c0_62] : memref<1x32xf32, #tpu.memory_space<vmem>>, vector<1x32xf32>
    %cst_63 = arith.constant dense<0.000000e+00> : vector<64xf32>
    %131 = vector.multi_reduction <add>, %124, %cst_63 [1] : vector<64x32xf32> to vector<64xf32>
    %132 = vector.shape_cast %131 : vector<64xf32> to vector<64x1xf32>
    %cst_64 = arith.constant 3.200000e+01 : f32
    %133 = vector.broadcast %cst_64 : f32 to vector<64x1xf32>
    %134 = arith.divf %132, %133 : vector<64x1xf32>
    %135 = vector.broadcast %134 : vector<64x1xf32> to vector<64x32xf32>
    %136 = arith.subf %124, %135 : vector<64x32xf32>
    %137 = arith.mulf %136, %136 : vector<64x32xf32>
    %cst_65 = arith.constant dense<0.000000e+00> : vector<64xf32>
    %138 = vector.multi_reduction <add>, %137, %cst_65 [1] : vector<64x32xf32> to vector<64xf32>
    %139 = vector.shape_cast %138 : vector<64xf32> to vector<64x1xf32>
    %cst_66 = arith.constant 3.200000e+01 : f32
    %140 = vector.broadcast %cst_66 : f32 to vector<64x1xf32>
    %141 = arith.divf %139, %140 : vector<64x1xf32>
    %cst_67 = arith.constant 9.99999974E-6 : f32
    %142 = vector.broadcast %cst_67 : f32 to vector<64x1xf32>
    %143 = arith.addf %141, %142 : vector<64x1xf32>
    %144 = math.rsqrt %143 : vector<64x1xf32>
    %145 = vector.broadcast %144 : vector<64x1xf32> to vector<64x32xf32>
    %146 = arith.mulf %136, %145 : vector<64x32xf32>
    %147 = vector.broadcast %125 : vector<1x32xf32> to vector<64x32xf32>
    %148 = arith.mulf %146, %147 : vector<64x32xf32>
    %149 = vector.broadcast %126 : vector<1x32xf32> to vector<64x32xf32>
    %150 = arith.addf %148, %149 : vector<64x32xf32>
    %151 = arith.truncf %150 : vector<64x32xf32> to vector<64x32xbf16>
    %152 = arith.truncf %127 : vector<32x128xf32> to vector<32x128xbf16>
    %cst_68 = arith.constant dense<0.000000e+00> : vector<64x128xf32>
    %153 = tpu.matmul %151, %152, %cst_68 {dimension_numbers = #tpu.dot_dimension_numbers<[1], [0], [0], [1], [0, 0, 1, 1], [], []>} : vector<64x32xbf16>, vector<32x128xbf16>, vector<64x128xf32> -> vector<64x128xf32>
    %154 = vector.broadcast %128 : vector<1x128xf32> to vector<64x128xf32>
    %155 = arith.addf %153, %154 : vector<64x128xf32>
    %cst_69 = arith.constant 5.000000e-01 : f32
    %156 = vector.broadcast %cst_69 : f32 to vector<64x128xf32>
    %157 = arith.mulf %156, %155 : vector<64x128xf32>
    %cst_70 = arith.constant 0.707106769 : f32
    %158 = vector.broadcast %cst_70 : f32 to vector<64x128xf32>
    %159 = arith.mulf %155, %158 : vector<64x128xf32>
    %160 = math.absf %159 : vector<64x128xf32>
    %cst_71 = arith.constant 0.327591091 : f32
    %161 = vector.broadcast %cst_71 : f32 to vector<64x128xf32>
    %162 = arith.mulf %161, %160 : vector<64x128xf32>
    %cst_72 = arith.constant 1.000000e+00 : f32
    %163 = vector.broadcast %cst_72 : f32 to vector<64x128xf32>
    %164 = arith.addf %163, %162 : vector<64x128xf32>
    %165 = tpu.reciprocal %164 {approx = true} : vector<64x128xf32> -> vector<64x128xf32>
    %cst_73 = arith.constant 1.06140542 : f32
    %166 = vector.broadcast %cst_73 : f32 to vector<64x128xf32>
    %167 = arith.mulf %165, %166 : vector<64x128xf32>
    %cst_74 = arith.constant -1.45315206 : f32
    %168 = vector.broadcast %cst_74 : f32 to vector<64x128xf32>
    %169 = arith.addf %168, %167 : vector<64x128xf32>
    %170 = arith.mulf %165, %169 : vector<64x128xf32>
    %cst_75 = arith.constant 1.42141378 : f32
    %171 = vector.broadcast %cst_75 : f32 to vector<64x128xf32>
    %172 = arith.addf %171, %170 : vector<64x128xf32>
    %173 = arith.mulf %165, %172 : vector<64x128xf32>
    %cst_76 = arith.constant -0.284496725 : f32
    %174 = vector.broadcast %cst_76 : f32 to vector<64x128xf32>
    %175 = arith.addf %174, %173 : vector<64x128xf32>
    %176 = arith.mulf %165, %175 : vector<64x128xf32>
    %cst_77 = arith.constant 0.254829586 : f32
    %177 = vector.broadcast %cst_77 : f32 to vector<64x128xf32>
    %178 = arith.addf %177, %176 : vector<64x128xf32>
    %179 = arith.mulf %165, %178 : vector<64x128xf32>
    %cst_78 = arith.constant 0.000000e+00 : f32
    %180 = vector.broadcast %cst_78 : f32 to vector<64x128xf32>
    %181 = arith.subf %180, %160 : vector<64x128xf32>
    %182 = arith.mulf %181, %160 : vector<64x128xf32>
    %183 = math.exp %182 : vector<64x128xf32>
    %184 = arith.mulf %179, %183 : vector<64x128xf32>
    %cst_79 = arith.constant 1.000000e+00 : f32
    %185 = vector.broadcast %cst_79 : f32 to vector<64x128xf32>
    %186 = arith.subf %185, %184 : vector<64x128xf32>
    %cst_80 = arith.constant 0.000000e+00 : f32
    %187 = vector.broadcast %cst_80 : f32 to vector<64x128xf32>
    %188 = arith.cmpf olt, %159, %187 : vector<64x128xf32>
    %cst_81 = arith.constant 0.000000e+00 : f32
    %189 = vector.broadcast %cst_81 : f32 to vector<64x128xf32>
    %190 = arith.subf %189, %186 : vector<64x128xf32>
    %191 = arith.select %188, %190, %186 : vector<64x128xi1>, vector<64x128xf32>
    %cst_82 = arith.constant 1.000000e+00 : f32
    %192 = vector.broadcast %cst_82 : f32 to vector<64x128xf32>
    %193 = arith.addf %192, %191 : vector<64x128xf32>
    %194 = arith.mulf %157, %193 : vector<64x128xf32>
    %195 = arith.truncf %194 : vector<64x128xf32> to vector<64x128xbf16>
    %196 = arith.truncf %129 : vector<128x32xf32> to vector<128x32xbf16>
    %cst_83 = arith.constant dense<0.000000e+00> : vector<64x32xf32>
    %197 = tpu.matmul %195, %196, %cst_83 {dimension_numbers = #tpu.dot_dimension_numbers<[1], [0], [0], [1], [0, 0, 1, 1], [], []>} : vector<64x128xbf16>, vector<128x32xbf16>, vector<64x32xf32> -> vector<64x32xf32>
    %198 = arith.addf %124, %197 : vector<64x32xf32>
    %199 = vector.broadcast %130 : vector<1x32xf32> to vector<64x32xf32>
    %200 = arith.addf %198, %199 : vector<64x32xf32>
    %c0_84 = arith.constant 0 : index
    %c0_85 = arith.constant 0 : index
    %201 = vector.load %arg7[%c0_84, %c0_85] : memref<64x64xf32, #tpu.memory_space<vmem>>, vector<64x64xf32>
    %cst_86 = arith.constant dense<0.000000e+00> : vector<64x32xf32>
    %202 = tpu.matmul %201, %200, %cst_86 {dimension_numbers = #tpu.dot_dimension_numbers<[1], [0], [0], [1], [0, 0, 1, 1], [], []>} : vector<64x64xf32>, vector<64x32xf32>, vector<64x32xf32> -> vector<64x32xf32>
    %c0_87 = arith.constant 0 : index
    %c0_88 = arith.constant 0 : index
    %c0_89 = arith.constant 0 : index
    %203 = vector.load %arg21[%c0_87, %c0_88, %c0_89] : memref<1x64x32xf32, #tpu.memory_space<vmem>>, vector<1x64x32xf32>
    %204 = vector.shape_cast %203 : vector<1x64x32xf32> to vector<64x32xf32>
    %205 = vector.shape_cast %202 : vector<64x32xf32> to vector<1x64x32xf32>
    tpu.vector_store %arg21[%c0_87, %c0_88, %c0_89], %205 {strides = array<i32>} : memref<1x64x32xf32, #tpu.memory_space<vmem>>, vector<1x64x32xf32>,
    return
  }
  func.func @transform_0(%arg0: i32) -> (i32, i32, i32) {
    %c0_i32 = arith.constant 0 : i32
    %c0_i32_0 = arith.constant 0 : i32
    %c0_i32_1 = arith.constant 0 : i32
    return %arg0, %c0_i32, %c0_i32_0 : i32, i32, i32
  }
  func.func @transform_1(%arg0: i32) -> (i32, i32) {
    %c0_i32 = arith.constant 0 : i32
    %c0_i32_0 = arith.constant 0 : i32
    %c0_i32_1 = arith.constant 0 : i32
    return %c0_i32, %c0_i32_0 : i32, i32
  }
  func.func @transform_2(%arg0: i32) -> (i32, i32) {
    %c0_i32 = arith.constant 0 : i32
    %c0_i32_0 = arith.constant 0 : i32
    %c0_i32_1 = arith.constant 0 : i32
    return %c0_i32, %c0_i32_0 : i32, i32
  }
  func.func @transform_3(%arg0: i32) -> (i32, i32) {
    %c0_i32 = arith.constant 0 : i32
    %c0_i32_0 = arith.constant 0 : i32
    %c0_i32_1 = arith.constant 0 : i32
    return %c0_i32, %c0_i32_0 : i32, i32
  }
  func.func @transform_4(%arg0: i32) -> (i32, i32) {
    %c0_i32 = arith.constant 0 : i32
    %c0_i32_0 = arith.constant 0 : i32
    %c0_i32_1 = arith.constant 0 : i32
    return %c0_i32, %c0_i32_0 : i32, i32
  }
  func.func @transform_5(%arg0: i32) -> (i32, i32) {
    %c0_i32 = arith.constant 0 : i32
    %c0_i32_0 = arith.constant 0 : i32
    %c0_i32_1 = arith.constant 0 : i32
    return %c0_i32, %c0_i32_0 : i32, i32
  }
  func.func @transform_6(%arg0: i32) -> (i32, i32) {
    %c0_i32 = arith.constant 0 : i32
    %c0_i32_0 = arith.constant 0 : i32
    %c0_i32_1 = arith.constant 0 : i32
    return %c0_i32, %c0_i32_0 : i32, i32
  }
  func.func @transform_7(%arg0: i32) -> (i32, i32) {
    %c0_i32 = arith.constant 0 : i32
    %c0_i32_0 = arith.constant 0 : i32
    %c0_i32_1 = arith.constant 0 : i32
    return %c0_i32, %c0_i32_0 : i32, i32
  }
  func.func @transform_8(%arg0: i32) -> (i32, i32) {
    %c0_i32 = arith.constant 0 : i32
    %c0_i32_0 = arith.constant 0 : i32
    %c0_i32_1 = arith.constant 0 : i32
    return %c0_i32, %c0_i32_0 : i32, i32
  }
  func.func @transform_9(%arg0: i32) -> (i32, i32) {
    %c0_i32 = arith.constant 0 : i32
    %c0_i32_0 = arith.constant 0 : i32
    %c0_i32_1 = arith.constant 0 : i32
    return %c0_i32, %c0_i32_0 : i32, i32
  }
  func.func @transform_10(%arg0: i32) -> (i32, i32) {
    %c0_i32 = arith.constant 0 : i32
    %c0_i32_0 = arith.constant 0 : i32
    %c0_i32_1 = arith.constant 0 : i32
    return %c0_i32, %c0_i32_0 : i32, i32
  }
  func.func @transform_11(%arg0: i32) -> (i32, i32, i32) {
    %c0_i32 = arith.constant 0 : i32
    %c0_i32_0 = arith.constant 0 : i32
    %c0_i32_1 = arith.constant 0 : i32
    %c0_i32_2 = arith.constant 0 : i32
    return %c0_i32, %c0_i32_0, %c0_i32_1 : i32, i32, i32
  }
  func.func @transform_12(%arg0: i32) -> (i32, i32) {
    %c0_i32 = arith.constant 0 : i32
    %c0_i32_0 = arith.constant 0 : i32
    %c0_i32_1 = arith.constant 0 : i32
    return %c0_i32, %c0_i32_0 : i32, i32
  }
  func.func @transform_13(%arg0: i32) -> (i32, i32) {
    %c0_i32 = arith.constant 0 : i32
    %c0_i32_0 = arith.constant 0 : i32
    %c0_i32_1 = arith.constant 0 : i32
    return %c0_i32, %c0_i32_0 : i32, i32
  }
  func.func @transform_14(%arg0: i32) -> (i32, i32) {
    %c0_i32 = arith.constant 0 : i32
    %c0_i32_0 = arith.constant 0 : i32
    %c0_i32_1 = arith.constant 0 : i32
    return %c0_i32, %c0_i32_0 : i32, i32
  }
  func.func @transform_15(%arg0: i32) -> (i32, i32) {
    %c0_i32 = arith.constant 0 : i32
    %c0_i32_0 = arith.constant 0 : i32
    %c0_i32_1 = arith.constant 0 : i32
    return %c0_i32, %c0_i32_0 : i32, i32
  }
  func.func @transform_16(%arg0: i32) -> (i32, i32) {
    %c0_i32 = arith.constant 0 : i32
    %c0_i32_0 = arith.constant 0 : i32
    %c0_i32_1 = arith.constant 0 : i32
    return %c0_i32, %c0_i32_0 : i32, i32
  }
  func.func @transform_17(%arg0: i32) -> (i32, i32) {
    %c0_i32 = arith.constant 0 : i32
    %c0_i32_0 = arith.constant 0 : i32
    %c0_i32_1 = arith.constant 0 : i32
    return %c0_i32, %c0_i32_0 : i32, i32
  }
  func.func @transform_18(%arg0: i32) -> (i32, i32) {
    %c0_i32 = arith.constant 0 : i32
    %c0_i32_0 = arith.constant 0 : i32
    %c0_i32_1 = arith.constant 0 : i32
    return %c0_i32, %c0_i32_0 : i32, i32
  }
  func.func @transform_19(%arg0: i32) -> (i32, i32) {
    %c0_i32 = arith.constant 0 : i32
    %c0_i32_0 = arith.constant 0 : i32
    %c0_i32_1 = arith.constant 0 : i32
    return %c0_i32, %c0_i32_0 : i32, i32
  }
  func.func @transform_20(%arg0: i32) -> (i32, i32, i32) {
    %c0_i32 = arith.constant 0 : i32
    %c0_i32_0 = arith.constant 0 : i32
    %c0_i32_1 = arith.constant 0 : i32
    return %arg0, %c0_i32, %c0_i32_0 : i32, i32, i32
  }
}

module attributes {stable_mosaic.version = 11 : i64} {
  func.func @_block_head_kernel(%arg0: i32, %arg1: memref<1x16x64xf32, #tpu.memory_space<vmem>>, %arg2: memref<1x64xf32, #tpu.memory_space<vmem>>, %arg3: memref<1x64xf32, #tpu.memory_space<vmem>>, %arg4: memref<64x192xf32, #tpu.memory_space<vmem>>, %arg5: memref<1x192xf32, #tpu.memory_space<vmem>>, %arg6: memref<4x16x16xf32, #tpu.memory_space<vmem>>, %arg7: memref<64x64xf32, #tpu.memory_space<vmem>>, %arg8: memref<1x64xf32, #tpu.memory_space<vmem>>, %arg9: memref<1x64xf32, #tpu.memory_space<vmem>>, %arg10: memref<1x64xf32, #tpu.memory_space<vmem>>, %arg11: memref<64x256xf32, #tpu.memory_space<vmem>>, %arg12: memref<1x256xf32, #tpu.memory_space<vmem>>, %arg13: memref<256x64xf32, #tpu.memory_space<vmem>>, %arg14: memref<1x64xf32, #tpu.memory_space<vmem>>, %arg15: memref<1x64xf32, #tpu.memory_space<vmem>>, %arg16: memref<1x64xf32, #tpu.memory_space<vmem>>, %arg17: memref<64x3xf32, #tpu.memory_space<vmem>>, %arg18: memref<1x3xf32, #tpu.memory_space<vmem>>, %arg19: memref<1x1x3xf32, #tpu.memory_space<vmem>>) attributes {dimension_semantics = [#tpu.dimension_semantics<parallel>], iteration_bounds = array<i64: 2>, scalar_prefetch = 0 : i64, scratch_operands = 0 : i64, tpu.core_type = #tpu.core_type<tc>, window_params = [{transform_indices = @transform_0, window_bounds = array<i64: 1, 16, 64>}, {pipeline_mode = #tpu.pipeline_mode<synchronous>, transform_indices = @transform_1, window_bounds = array<i64: 1, 64>}, {pipeline_mode = #tpu.pipeline_mode<synchronous>, transform_indices = @transform_2, window_bounds = array<i64: 1, 64>}, {pipeline_mode = #tpu.pipeline_mode<synchronous>, transform_indices = @transform_3, window_bounds = array<i64: 64, 192>}, {pipeline_mode = #tpu.pipeline_mode<synchronous>, transform_indices = @transform_4, window_bounds = array<i64: 1, 192>}, {pipeline_mode = #tpu.pipeline_mode<synchronous>, transform_indices = @transform_5, window_bounds = array<i64: 4, 16, 16>}, {pipeline_mode = #tpu.pipeline_mode<synchronous>, transform_indices = @transform_6, window_bounds = array<i64: 64, 64>}, {pipeline_mode = #tpu.pipeline_mode<synchronous>, transform_indices = @transform_7, window_bounds = array<i64: 1, 64>}, {pipeline_mode = #tpu.pipeline_mode<synchronous>, transform_indices = @transform_8, window_bounds = array<i64: 1, 64>}, {pipeline_mode = #tpu.pipeline_mode<synchronous>, transform_indices = @transform_9, window_bounds = array<i64: 1, 64>}, {pipeline_mode = #tpu.pipeline_mode<synchronous>, transform_indices = @transform_10, window_bounds = array<i64: 64, 256>}, {pipeline_mode = #tpu.pipeline_mode<synchronous>, transform_indices = @transform_11, window_bounds = array<i64: 1, 256>}, {pipeline_mode = #tpu.pipeline_mode<synchronous>, transform_indices = @transform_12, window_bounds = array<i64: 256, 64>}, {pipeline_mode = #tpu.pipeline_mode<synchronous>, transform_indices = @transform_13, window_bounds = array<i64: 1, 64>}, {pipeline_mode = #tpu.pipeline_mode<synchronous>, transform_indices = @transform_14, window_bounds = array<i64: 1, 64>}, {pipeline_mode = #tpu.pipeline_mode<synchronous>, transform_indices = @transform_15, window_bounds = array<i64: 1, 64>}, {pipeline_mode = #tpu.pipeline_mode<synchronous>, transform_indices = @transform_16, window_bounds = array<i64: 64, 3>}, {pipeline_mode = #tpu.pipeline_mode<synchronous>, transform_indices = @transform_17, window_bounds = array<i64: 1, 3>}, {transform_indices = @transform_18, window_bounds = array<i64: 1, 1, 3>}]} {
    %c0 = arith.constant 0 : index
    %c0_0 = arith.constant 0 : index
    %c0_1 = arith.constant 0 : index
    %0 = vector.load %arg1[%c0, %c0_0, %c0_1] : memref<1x16x64xf32, #tpu.memory_space<vmem>>, vector<1x16x64xf32>
    %1 = vector.shape_cast %0 : vector<1x16x64xf32> to vector<16x64xf32>
    %c0_2 = arith.constant 0 : index
    %c0_3 = arith.constant 0 : index
    %2 = vector.load %arg2[%c0_2, %c0_3] : memref<1x64xf32, #tpu.memory_space<vmem>>, vector<1x64xf32>
    %c0_4 = arith.constant 0 : index
    %c0_5 = arith.constant 0 : index
    %3 = vector.load %arg3[%c0_4, %c0_5] : memref<1x64xf32, #tpu.memory_space<vmem>>, vector<1x64xf32>
    %c0_6 = arith.constant 0 : index
    %c0_7 = arith.constant 0 : index
    %4 = vector.load %arg4[%c0_6, %c0_7] : memref<64x192xf32, #tpu.memory_space<vmem>>, vector<64x192xf32>
    %c0_8 = arith.constant 0 : index
    %c0_9 = arith.constant 0 : index
    %5 = vector.load %arg5[%c0_8, %c0_9] : memref<1x192xf32, #tpu.memory_space<vmem>>, vector<1x192xf32>
    %c0_10 = arith.constant 0 : index
    %c0_11 = arith.constant 0 : index
    %c0_12 = arith.constant 0 : index
    %6 = vector.load %arg6[%c0_10, %c0_11, %c0_12] : memref<4x16x16xf32, #tpu.memory_space<vmem>>, vector<4x16x16xf32>
    %c0_13 = arith.constant 0 : index
    %c0_14 = arith.constant 0 : index
    %7 = vector.load %arg7[%c0_13, %c0_14] : memref<64x64xf32, #tpu.memory_space<vmem>>, vector<64x64xf32>
    %c0_15 = arith.constant 0 : index
    %c0_16 = arith.constant 0 : index
    %8 = vector.load %arg8[%c0_15, %c0_16] : memref<1x64xf32, #tpu.memory_space<vmem>>, vector<1x64xf32>
    %cst = arith.constant dense<0.000000e+00> : vector<16xf32>
    %9 = vector.multi_reduction <add>, %1, %cst [1] : vector<16x64xf32> to vector<16xf32>
    %10 = vector.shape_cast %9 : vector<16xf32> to vector<16x1xf32>
    %cst_17 = arith.constant 6.400000e+01 : f32
    %11 = vector.broadcast %cst_17 : f32 to vector<16x1xf32>
    %12 = arith.divf %10, %11 : vector<16x1xf32>
    %13 = vector.broadcast %12 : vector<16x1xf32> to vector<16x64xf32>
    %14 = arith.subf %1, %13 : vector<16x64xf32>
    %15 = arith.mulf %14, %14 : vector<16x64xf32>
    %cst_18 = arith.constant dense<0.000000e+00> : vector<16xf32>
    %16 = vector.multi_reduction <add>, %15, %cst_18 [1] : vector<16x64xf32> to vector<16xf32>
    %17 = vector.shape_cast %16 : vector<16xf32> to vector<16x1xf32>
    %cst_19 = arith.constant 6.400000e+01 : f32
    %18 = vector.broadcast %cst_19 : f32 to vector<16x1xf32>
    %19 = arith.divf %17, %18 : vector<16x1xf32>
    %cst_20 = arith.constant 9.99999974E-6 : f32
    %20 = vector.broadcast %cst_20 : f32 to vector<16x1xf32>
    %21 = arith.addf %19, %20 : vector<16x1xf32>
    %22 = math.rsqrt %21 : vector<16x1xf32>
    %23 = vector.broadcast %22 : vector<16x1xf32> to vector<16x64xf32>
    %24 = arith.mulf %14, %23 : vector<16x64xf32>
    %25 = vector.broadcast %2 : vector<1x64xf32> to vector<16x64xf32>
    %26 = arith.mulf %24, %25 : vector<16x64xf32>
    %27 = vector.broadcast %3 : vector<1x64xf32> to vector<16x64xf32>
    %28 = arith.addf %26, %27 : vector<16x64xf32>
    %29 = arith.truncf %28 : vector<16x64xf32> to vector<16x64xbf16>
    %30 = arith.truncf %4 : vector<64x192xf32> to vector<64x192xbf16>
    %cst_21 = arith.constant dense<0.000000e+00> : vector<16x192xf32>
    %31 = tpu.matmul %29, %30, %cst_21 {dimension_numbers = #tpu.dot_dimension_numbers<[1], [0], [0], [1], [0, 0, 1, 1], [], []>} : vector<16x64xbf16>, vector<64x192xbf16>, vector<16x192xf32> -> vector<16x192xf32>
    %32 = vector.broadcast %5 : vector<1x192xf32> to vector<16x192xf32>
    %33 = arith.addf %31, %32 : vector<16x192xf32>
    %34 = vector.extract_strided_slice %33 {offsets = [0, 0], sizes = [16, 16], strides = [1, 1]} : vector<16x192xf32> to vector<16x16xf32>
    %cst_22 = arith.constant 2.500000e-01 : f32
    %35 = vector.broadcast %cst_22 : f32 to vector<16x16xf32>
    %36 = arith.mulf %34, %35 : vector<16x16xf32>
    %37 = vector.extract_strided_slice %33 {offsets = [0, 64], sizes = [16, 16], strides = [1, 1]} : vector<16x192xf32> to vector<16x16xf32>
    %38 = vector.extract_strided_slice %33 {offsets = [0, 128], sizes = [16, 16], strides = [1, 1]} : vector<16x192xf32> to vector<16x16xf32>
    %39 = arith.truncf %36 : vector<16x16xf32> to vector<16x16xbf16>
    %40 = arith.truncf %37 : vector<16x16xf32> to vector<16x16xbf16>
    %cst_23 = arith.constant dense<0.000000e+00> : vector<16x16xf32>
    %41 = tpu.matmul %39, %40, %cst_23 {dimension_numbers = #tpu.dot_dimension_numbers<[1], [1], [0], [0], [0, 0, 1, 0], [], []>} : vector<16x16xbf16>, vector<16x16xbf16>, vector<16x16xf32> -> vector<16x16xf32>
    %42 = vector.extract_strided_slice %6 {offsets = [0, 0, 0], sizes = [1, 16, 16], strides = [1, 1, 1]} : vector<4x16x16xf32> to vector<1x16x16xf32>
    %43 = vector.shape_cast %42 : vector<1x16x16xf32> to vector<16x16xf32>
    %44 = arith.addf %41, %43 : vector<16x16xf32>
    %cst_24 = arith.constant dense<0xFF800000> : vector<16xf32>
    %45 = vector.multi_reduction <maximumf>, %44, %cst_24 [1] : vector<16x16xf32> to vector<16xf32>
    %46 = vector.shape_cast %45 : vector<16xf32> to vector<16x1xf32>
    %47 = vector.broadcast %46 : vector<16x1xf32> to vector<16x16xf32>
    %48 = arith.subf %44, %47 : vector<16x16xf32>
    %49 = math.exp %48 : vector<16x16xf32>
    %cst_25 = arith.constant dense<0.000000e+00> : vector<16xf32>
    %50 = vector.multi_reduction <add>, %49, %cst_25 [1] : vector<16x16xf32> to vector<16xf32>
    %51 = vector.shape_cast %50 : vector<16xf32> to vector<16x1xf32>
    %52 = tpu.reciprocal %51 {approx = true} : vector<16x1xf32> -> vector<16x1xf32>
    %53 = vector.broadcast %52 : vector<16x1xf32> to vector<16x16xf32>
    %54 = arith.mulf %49, %53 : vector<16x16xf32>
    %55 = arith.truncf %54 : vector<16x16xf32> to vector<16x16xbf16>
    %56 = arith.truncf %38 : vector<16x16xf32> to vector<16x16xbf16>
    %cst_26 = arith.constant dense<0.000000e+00> : vector<16x16xf32>
    %57 = tpu.matmul %55, %56, %cst_26 {dimension_numbers = #tpu.dot_dimension_numbers<[1], [0], [0], [1], [0, 0, 1, 1], [], []>} : vector<16x16xbf16>, vector<16x16xbf16>, vector<16x16xf32> -> vector<16x16xf32>
    %58 = vector.extract_strided_slice %7 {offsets = [0, 0], sizes = [16, 64], strides = [1, 1]} : vector<64x64xf32> to vector<16x64xf32>
    %59 = arith.truncf %57 : vector<16x16xf32> to vector<16x16xbf16>
    %60 = arith.truncf %58 : vector<16x64xf32> to vector<16x64xbf16>
    %cst_27 = arith.constant dense<0.000000e+00> : vector<16x64xf32>
    %61 = tpu.matmul %59, %60, %cst_27 {dimension_numbers = #tpu.dot_dimension_numbers<[1], [0], [0], [1], [0, 0, 1, 1], [], []>} : vector<16x16xbf16>, vector<16x64xbf16>, vector<16x64xf32> -> vector<16x64xf32>
    %62 = vector.extract_strided_slice %33 {offsets = [0, 16], sizes = [16, 16], strides = [1, 1]} : vector<16x192xf32> to vector<16x16xf32>
    %cst_28 = arith.constant 2.500000e-01 : f32
    %63 = vector.broadcast %cst_28 : f32 to vector<16x16xf32>
    %64 = arith.mulf %62, %63 : vector<16x16xf32>
    %65 = vector.extract_strided_slice %33 {offsets = [0, 80], sizes = [16, 16], strides = [1, 1]} : vector<16x192xf32> to vector<16x16xf32>
    %66 = vector.extract_strided_slice %33 {offsets = [0, 144], sizes = [16, 16], strides = [1, 1]} : vector<16x192xf32> to vector<16x16xf32>
    %67 = arith.truncf %64 : vector<16x16xf32> to vector<16x16xbf16>
    %68 = arith.truncf %65 : vector<16x16xf32> to vector<16x16xbf16>
    %cst_29 = arith.constant dense<0.000000e+00> : vector<16x16xf32>
    %69 = tpu.matmul %67, %68, %cst_29 {dimension_numbers = #tpu.dot_dimension_numbers<[1], [1], [0], [0], [0, 0, 1, 0], [], []>} : vector<16x16xbf16>, vector<16x16xbf16>, vector<16x16xf32> -> vector<16x16xf32>
    %70 = vector.extract_strided_slice %6 {offsets = [1, 0, 0], sizes = [1, 16, 16], strides = [1, 1, 1]} : vector<4x16x16xf32> to vector<1x16x16xf32>
    %71 = vector.shape_cast %70 : vector<1x16x16xf32> to vector<16x16xf32>
    %72 = arith.addf %69, %71 : vector<16x16xf32>
    %cst_30 = arith.constant dense<0xFF800000> : vector<16xf32>
    %73 = vector.multi_reduction <maximumf>, %72, %cst_30 [1] : vector<16x16xf32> to vector<16xf32>
    %74 = vector.shape_cast %73 : vector<16xf32> to vector<16x1xf32>
    %75 = vector.broadcast %74 : vector<16x1xf32> to vector<16x16xf32>
    %76 = arith.subf %72, %75 : vector<16x16xf32>
    %77 = math.exp %76 : vector<16x16xf32>
    %cst_31 = arith.constant dense<0.000000e+00> : vector<16xf32>
    %78 = vector.multi_reduction <add>, %77, %cst_31 [1] : vector<16x16xf32> to vector<16xf32>
    %79 = vector.shape_cast %78 : vector<16xf32> to vector<16x1xf32>
    %80 = tpu.reciprocal %79 {approx = true} : vector<16x1xf32> -> vector<16x1xf32>
    %81 = vector.broadcast %80 : vector<16x1xf32> to vector<16x16xf32>
    %82 = arith.mulf %77, %81 : vector<16x16xf32>
    %83 = arith.truncf %82 : vector<16x16xf32> to vector<16x16xbf16>
    %84 = arith.truncf %66 : vector<16x16xf32> to vector<16x16xbf16>
    %cst_32 = arith.constant dense<0.000000e+00> : vector<16x16xf32>
    %85 = tpu.matmul %83, %84, %cst_32 {dimension_numbers = #tpu.dot_dimension_numbers<[1], [0], [0], [1], [0, 0, 1, 1], [], []>} : vector<16x16xbf16>, vector<16x16xbf16>, vector<16x16xf32> -> vector<16x16xf32>
    %86 = vector.extract_strided_slice %7 {offsets = [16, 0], sizes = [16, 64], strides = [1, 1]} : vector<64x64xf32> to vector<16x64xf32>
    %87 = arith.truncf %85 : vector<16x16xf32> to vector<16x16xbf16>
    %88 = arith.truncf %86 : vector<16x64xf32> to vector<16x64xbf16>
    %cst_33 = arith.constant dense<0.000000e+00> : vector<16x64xf32>
    %89 = tpu.matmul %87, %88, %cst_33 {dimension_numbers = #tpu.dot_dimension_numbers<[1], [0], [0], [1], [0, 0, 1, 1], [], []>} : vector<16x16xbf16>, vector<16x64xbf16>, vector<16x64xf32> -> vector<16x64xf32>
    %90 = arith.addf %61, %89 : vector<16x64xf32>
    %91 = vector.extract_strided_slice %33 {offsets = [0, 32], sizes = [16, 16], strides = [1, 1]} : vector<16x192xf32> to vector<16x16xf32>
    %cst_34 = arith.constant 2.500000e-01 : f32
    %92 = vector.broadcast %cst_34 : f32 to vector<16x16xf32>
    %93 = arith.mulf %91, %92 : vector<16x16xf32>
    %94 = vector.extract_strided_slice %33 {offsets = [0, 96], sizes = [16, 16], strides = [1, 1]} : vector<16x192xf32> to vector<16x16xf32>
    %95 = vector.extract_strided_slice %33 {offsets = [0, 160], sizes = [16, 16], strides = [1, 1]} : vector<16x192xf32> to vector<16x16xf32>
    %96 = arith.truncf %93 : vector<16x16xf32> to vector<16x16xbf16>
    %97 = arith.truncf %94 : vector<16x16xf32> to vector<16x16xbf16>
    %cst_35 = arith.constant dense<0.000000e+00> : vector<16x16xf32>
    %98 = tpu.matmul %96, %97, %cst_35 {dimension_numbers = #tpu.dot_dimension_numbers<[1], [1], [0], [0], [0, 0, 1, 0], [], []>} : vector<16x16xbf16>, vector<16x16xbf16>, vector<16x16xf32> -> vector<16x16xf32>
    %99 = vector.extract_strided_slice %6 {offsets = [2, 0, 0], sizes = [1, 16, 16], strides = [1, 1, 1]} : vector<4x16x16xf32> to vector<1x16x16xf32>
    %100 = vector.shape_cast %99 : vector<1x16x16xf32> to vector<16x16xf32>
    %101 = arith.addf %98, %100 : vector<16x16xf32>
    %cst_36 = arith.constant dense<0xFF800000> : vector<16xf32>
    %102 = vector.multi_reduction <maximumf>, %101, %cst_36 [1] : vector<16x16xf32> to vector<16xf32>
    %103 = vector.shape_cast %102 : vector<16xf32> to vector<16x1xf32>
    %104 = vector.broadcast %103 : vector<16x1xf32> to vector<16x16xf32>
    %105 = arith.subf %101, %104 : vector<16x16xf32>
    %106 = math.exp %105 : vector<16x16xf32>
    %cst_37 = arith.constant dense<0.000000e+00> : vector<16xf32>
    %107 = vector.multi_reduction <add>, %106, %cst_37 [1] : vector<16x16xf32> to vector<16xf32>
    %108 = vector.shape_cast %107 : vector<16xf32> to vector<16x1xf32>
    %109 = tpu.reciprocal %108 {approx = true} : vector<16x1xf32> -> vector<16x1xf32>
    %110 = vector.broadcast %109 : vector<16x1xf32> to vector<16x16xf32>
    %111 = arith.mulf %106, %110 : vector<16x16xf32>
    %112 = arith.truncf %111 : vector<16x16xf32> to vector<16x16xbf16>
    %113 = arith.truncf %95 : vector<16x16xf32> to vector<16x16xbf16>
    %cst_38 = arith.constant dense<0.000000e+00> : vector<16x16xf32>
    %114 = tpu.matmul %112, %113, %cst_38 {dimension_numbers = #tpu.dot_dimension_numbers<[1], [0], [0], [1], [0, 0, 1, 1], [], []>} : vector<16x16xbf16>, vector<16x16xbf16>, vector<16x16xf32> -> vector<16x16xf32>
    %115 = vector.extract_strided_slice %7 {offsets = [32, 0], sizes = [16, 64], strides = [1, 1]} : vector<64x64xf32> to vector<16x64xf32>
    %116 = arith.truncf %114 : vector<16x16xf32> to vector<16x16xbf16>
    %117 = arith.truncf %115 : vector<16x64xf32> to vector<16x64xbf16>
    %cst_39 = arith.constant dense<0.000000e+00> : vector<16x64xf32>
    %118 = tpu.matmul %116, %117, %cst_39 {dimension_numbers = #tpu.dot_dimension_numbers<[1], [0], [0], [1], [0, 0, 1, 1], [], []>} : vector<16x16xbf16>, vector<16x64xbf16>, vector<16x64xf32> -> vector<16x64xf32>
    %119 = arith.addf %90, %118 : vector<16x64xf32>
    %120 = vector.extract_strided_slice %33 {offsets = [0, 48], sizes = [16, 16], strides = [1, 1]} : vector<16x192xf32> to vector<16x16xf32>
    %cst_40 = arith.constant 2.500000e-01 : f32
    %121 = vector.broadcast %cst_40 : f32 to vector<16x16xf32>
    %122 = arith.mulf %120, %121 : vector<16x16xf32>
    %123 = vector.extract_strided_slice %33 {offsets = [0, 112], sizes = [16, 16], strides = [1, 1]} : vector<16x192xf32> to vector<16x16xf32>
    %124 = vector.extract_strided_slice %33 {offsets = [0, 176], sizes = [16, 16], strides = [1, 1]} : vector<16x192xf32> to vector<16x16xf32>
    %125 = arith.truncf %122 : vector<16x16xf32> to vector<16x16xbf16>
    %126 = arith.truncf %123 : vector<16x16xf32> to vector<16x16xbf16>
    %cst_41 = arith.constant dense<0.000000e+00> : vector<16x16xf32>
    %127 = tpu.matmul %125, %126, %cst_41 {dimension_numbers = #tpu.dot_dimension_numbers<[1], [1], [0], [0], [0, 0, 1, 0], [], []>} : vector<16x16xbf16>, vector<16x16xbf16>, vector<16x16xf32> -> vector<16x16xf32>
    %128 = vector.extract_strided_slice %6 {offsets = [3, 0, 0], sizes = [1, 16, 16], strides = [1, 1, 1]} : vector<4x16x16xf32> to vector<1x16x16xf32>
    %129 = vector.shape_cast %128 : vector<1x16x16xf32> to vector<16x16xf32>
    %130 = arith.addf %127, %129 : vector<16x16xf32>
    %cst_42 = arith.constant dense<0xFF800000> : vector<16xf32>
    %131 = vector.multi_reduction <maximumf>, %130, %cst_42 [1] : vector<16x16xf32> to vector<16xf32>
    %132 = vector.shape_cast %131 : vector<16xf32> to vector<16x1xf32>
    %133 = vector.broadcast %132 : vector<16x1xf32> to vector<16x16xf32>
    %134 = arith.subf %130, %133 : vector<16x16xf32>
    %135 = math.exp %134 : vector<16x16xf32>
    %cst_43 = arith.constant dense<0.000000e+00> : vector<16xf32>
    %136 = vector.multi_reduction <add>, %135, %cst_43 [1] : vector<16x16xf32> to vector<16xf32>
    %137 = vector.shape_cast %136 : vector<16xf32> to vector<16x1xf32>
    %138 = tpu.reciprocal %137 {approx = true} : vector<16x1xf32> -> vector<16x1xf32>
    %139 = vector.broadcast %138 : vector<16x1xf32> to vector<16x16xf32>
    %140 = arith.mulf %135, %139 : vector<16x16xf32>
    %141 = arith.truncf %140 : vector<16x16xf32> to vector<16x16xbf16>
    %142 = arith.truncf %124 : vector<16x16xf32> to vector<16x16xbf16>
    %cst_44 = arith.constant dense<0.000000e+00> : vector<16x16xf32>
    %143 = tpu.matmul %141, %142, %cst_44 {dimension_numbers = #tpu.dot_dimension_numbers<[1], [0], [0], [1], [0, 0, 1, 1], [], []>} : vector<16x16xbf16>, vector<16x16xbf16>, vector<16x16xf32> -> vector<16x16xf32>
    %144 = vector.extract_strided_slice %7 {offsets = [48, 0], sizes = [16, 64], strides = [1, 1]} : vector<64x64xf32> to vector<16x64xf32>
    %145 = arith.truncf %143 : vector<16x16xf32> to vector<16x16xbf16>
    %146 = arith.truncf %144 : vector<16x64xf32> to vector<16x64xbf16>
    %cst_45 = arith.constant dense<0.000000e+00> : vector<16x64xf32>
    %147 = tpu.matmul %145, %146, %cst_45 {dimension_numbers = #tpu.dot_dimension_numbers<[1], [0], [0], [1], [0, 0, 1, 1], [], []>} : vector<16x16xbf16>, vector<16x64xbf16>, vector<16x64xf32> -> vector<16x64xf32>
    %148 = arith.addf %119, %147 : vector<16x64xf32>
    %149 = arith.addf %1, %148 : vector<16x64xf32>
    %150 = vector.broadcast %8 : vector<1x64xf32> to vector<16x64xf32>
    %151 = arith.addf %149, %150 : vector<16x64xf32>
    %c0_46 = arith.constant 0 : index
    %c0_47 = arith.constant 0 : index
    %152 = vector.load %arg9[%c0_46, %c0_47] : memref<1x64xf32, #tpu.memory_space<vmem>>, vector<1x64xf32>
    %c0_48 = arith.constant 0 : index
    %c0_49 = arith.constant 0 : index
    %153 = vector.load %arg10[%c0_48, %c0_49] : memref<1x64xf32, #tpu.memory_space<vmem>>, vector<1x64xf32>
    %c0_50 = arith.constant 0 : index
    %c0_51 = arith.constant 0 : index
    %154 = vector.load %arg11[%c0_50, %c0_51] : memref<64x256xf32, #tpu.memory_space<vmem>>, vector<64x256xf32>
    %c0_52 = arith.constant 0 : index
    %c0_53 = arith.constant 0 : index
    %155 = vector.load %arg12[%c0_52, %c0_53] : memref<1x256xf32, #tpu.memory_space<vmem>>, vector<1x256xf32>
    %c0_54 = arith.constant 0 : index
    %c0_55 = arith.constant 0 : index
    %156 = vector.load %arg13[%c0_54, %c0_55] : memref<256x64xf32, #tpu.memory_space<vmem>>, vector<256x64xf32>
    %c0_56 = arith.constant 0 : index
    %c0_57 = arith.constant 0 : index
    %157 = vector.load %arg14[%c0_56, %c0_57] : memref<1x64xf32, #tpu.memory_space<vmem>>, vector<1x64xf32>
    %cst_58 = arith.constant dense<0.000000e+00> : vector<16xf32>
    %158 = vector.multi_reduction <add>, %151, %cst_58 [1] : vector<16x64xf32> to vector<16xf32>
    %159 = vector.shape_cast %158 : vector<16xf32> to vector<16x1xf32>
    %cst_59 = arith.constant 6.400000e+01 : f32
    %160 = vector.broadcast %cst_59 : f32 to vector<16x1xf32>
    %161 = arith.divf %159, %160 : vector<16x1xf32>
    %162 = vector.broadcast %161 : vector<16x1xf32> to vector<16x64xf32>
    %163 = arith.subf %151, %162 : vector<16x64xf32>
    %164 = arith.mulf %163, %163 : vector<16x64xf32>
    %cst_60 = arith.constant dense<0.000000e+00> : vector<16xf32>
    %165 = vector.multi_reduction <add>, %164, %cst_60 [1] : vector<16x64xf32> to vector<16xf32>
    %166 = vector.shape_cast %165 : vector<16xf32> to vector<16x1xf32>
    %cst_61 = arith.constant 6.400000e+01 : f32
    %167 = vector.broadcast %cst_61 : f32 to vector<16x1xf32>
    %168 = arith.divf %166, %167 : vector<16x1xf32>
    %cst_62 = arith.constant 9.99999974E-6 : f32
    %169 = vector.broadcast %cst_62 : f32 to vector<16x1xf32>
    %170 = arith.addf %168, %169 : vector<16x1xf32>
    %171 = math.rsqrt %170 : vector<16x1xf32>
    %172 = vector.broadcast %171 : vector<16x1xf32> to vector<16x64xf32>
    %173 = arith.mulf %163, %172 : vector<16x64xf32>
    %174 = vector.broadcast %152 : vector<1x64xf32> to vector<16x64xf32>
    %175 = arith.mulf %173, %174 : vector<16x64xf32>
    %176 = vector.broadcast %153 : vector<1x64xf32> to vector<16x64xf32>
    %177 = arith.addf %175, %176 : vector<16x64xf32>
    %178 = arith.truncf %177 : vector<16x64xf32> to vector<16x64xbf16>
    %179 = arith.truncf %154 : vector<64x256xf32> to vector<64x256xbf16>
    %cst_63 = arith.constant dense<0.000000e+00> : vector<16x256xf32>
    %180 = tpu.matmul %178, %179, %cst_63 {dimension_numbers = #tpu.dot_dimension_numbers<[1], [0], [0], [1], [0, 0, 1, 1], [], []>} : vector<16x64xbf16>, vector<64x256xbf16>, vector<16x256xf32> -> vector<16x256xf32>
    %181 = vector.broadcast %155 : vector<1x256xf32> to vector<16x256xf32>
    %182 = arith.addf %180, %181 : vector<16x256xf32>
    %cst_64 = arith.constant 5.000000e-01 : f32
    %183 = vector.broadcast %cst_64 : f32 to vector<16x256xf32>
    %184 = arith.mulf %183, %182 : vector<16x256xf32>
    %cst_65 = arith.constant 0.707106769 : f32
    %185 = vector.broadcast %cst_65 : f32 to vector<16x256xf32>
    %186 = arith.mulf %182, %185 : vector<16x256xf32>
    %187 = math.absf %186 : vector<16x256xf32>
    %cst_66 = arith.constant 0.327591091 : f32
    %188 = vector.broadcast %cst_66 : f32 to vector<16x256xf32>
    %189 = arith.mulf %188, %187 : vector<16x256xf32>
    %cst_67 = arith.constant 1.000000e+00 : f32
    %190 = vector.broadcast %cst_67 : f32 to vector<16x256xf32>
    %191 = arith.addf %190, %189 : vector<16x256xf32>
    %192 = tpu.reciprocal %191 {approx = true} : vector<16x256xf32> -> vector<16x256xf32>
    %cst_68 = arith.constant 1.06140542 : f32
    %193 = vector.broadcast %cst_68 : f32 to vector<16x256xf32>
    %194 = arith.mulf %192, %193 : vector<16x256xf32>
    %cst_69 = arith.constant -1.45315206 : f32
    %195 = vector.broadcast %cst_69 : f32 to vector<16x256xf32>
    %196 = arith.addf %195, %194 : vector<16x256xf32>
    %197 = arith.mulf %192, %196 : vector<16x256xf32>
    %cst_70 = arith.constant 1.42141378 : f32
    %198 = vector.broadcast %cst_70 : f32 to vector<16x256xf32>
    %199 = arith.addf %198, %197 : vector<16x256xf32>
    %200 = arith.mulf %192, %199 : vector<16x256xf32>
    %cst_71 = arith.constant -0.284496725 : f32
    %201 = vector.broadcast %cst_71 : f32 to vector<16x256xf32>
    %202 = arith.addf %201, %200 : vector<16x256xf32>
    %203 = arith.mulf %192, %202 : vector<16x256xf32>
    %cst_72 = arith.constant 0.254829586 : f32
    %204 = vector.broadcast %cst_72 : f32 to vector<16x256xf32>
    %205 = arith.addf %204, %203 : vector<16x256xf32>
    %206 = arith.mulf %192, %205 : vector<16x256xf32>
    %cst_73 = arith.constant 0.000000e+00 : f32
    %207 = vector.broadcast %cst_73 : f32 to vector<16x256xf32>
    %208 = arith.subf %207, %187 : vector<16x256xf32>
    %209 = arith.mulf %208, %187 : vector<16x256xf32>
    %210 = math.exp %209 : vector<16x256xf32>
    %211 = arith.mulf %206, %210 : vector<16x256xf32>
    %cst_74 = arith.constant 1.000000e+00 : f32
    %212 = vector.broadcast %cst_74 : f32 to vector<16x256xf32>
    %213 = arith.subf %212, %211 : vector<16x256xf32>
    %cst_75 = arith.constant 0.000000e+00 : f32
    %214 = vector.broadcast %cst_75 : f32 to vector<16x256xf32>
    %215 = arith.cmpf olt, %186, %214 : vector<16x256xf32>
    %cst_76 = arith.constant 0.000000e+00 : f32
    %216 = vector.broadcast %cst_76 : f32 to vector<16x256xf32>
    %217 = arith.subf %216, %213 : vector<16x256xf32>
    %218 = arith.select %215, %217, %213 : vector<16x256xi1>, vector<16x256xf32>
    %cst_77 = arith.constant 1.000000e+00 : f32
    %219 = vector.broadcast %cst_77 : f32 to vector<16x256xf32>
    %220 = arith.addf %219, %218 : vector<16x256xf32>
    %221 = arith.mulf %184, %220 : vector<16x256xf32>
    %222 = arith.truncf %221 : vector<16x256xf32> to vector<16x256xbf16>
    %223 = arith.truncf %156 : vector<256x64xf32> to vector<256x64xbf16>
    %cst_78 = arith.constant dense<0.000000e+00> : vector<16x64xf32>
    %224 = tpu.matmul %222, %223, %cst_78 {dimension_numbers = #tpu.dot_dimension_numbers<[1], [0], [0], [1], [0, 0, 1, 1], [], []>} : vector<16x256xbf16>, vector<256x64xbf16>, vector<16x64xf32> -> vector<16x64xf32>
    %225 = arith.addf %151, %224 : vector<16x64xf32>
    %226 = vector.broadcast %157 : vector<1x64xf32> to vector<16x64xf32>
    %227 = arith.addf %225, %226 : vector<16x64xf32>
    %c0_79 = arith.constant 0 : index
    %c0_80 = arith.constant 0 : index
    %228 = vector.load %arg15[%c0_79, %c0_80] : memref<1x64xf32, #tpu.memory_space<vmem>>, vector<1x64xf32>
    %c0_81 = arith.constant 0 : index
    %c0_82 = arith.constant 0 : index
    %229 = vector.load %arg16[%c0_81, %c0_82] : memref<1x64xf32, #tpu.memory_space<vmem>>, vector<1x64xf32>
    %cst_83 = arith.constant dense<0.000000e+00> : vector<16xf32>
    %230 = vector.multi_reduction <add>, %227, %cst_83 [1] : vector<16x64xf32> to vector<16xf32>
    %231 = vector.shape_cast %230 : vector<16xf32> to vector<16x1xf32>
    %cst_84 = arith.constant 6.400000e+01 : f32
    %232 = vector.broadcast %cst_84 : f32 to vector<16x1xf32>
    %233 = arith.divf %231, %232 : vector<16x1xf32>
    %234 = vector.broadcast %233 : vector<16x1xf32> to vector<16x64xf32>
    %235 = arith.subf %227, %234 : vector<16x64xf32>
    %236 = arith.mulf %235, %235 : vector<16x64xf32>
    %cst_85 = arith.constant dense<0.000000e+00> : vector<16xf32>
    %237 = vector.multi_reduction <add>, %236, %cst_85 [1] : vector<16x64xf32> to vector<16xf32>
    %238 = vector.shape_cast %237 : vector<16xf32> to vector<16x1xf32>
    %cst_86 = arith.constant 6.400000e+01 : f32
    %239 = vector.broadcast %cst_86 : f32 to vector<16x1xf32>
    %240 = arith.divf %238, %239 : vector<16x1xf32>
    %cst_87 = arith.constant 9.99999974E-6 : f32
    %241 = vector.broadcast %cst_87 : f32 to vector<16x1xf32>
    %242 = arith.addf %240, %241 : vector<16x1xf32>
    %243 = math.rsqrt %242 : vector<16x1xf32>
    %244 = vector.broadcast %243 : vector<16x1xf32> to vector<16x64xf32>
    %245 = arith.mulf %235, %244 : vector<16x64xf32>
    %246 = vector.broadcast %228 : vector<1x64xf32> to vector<16x64xf32>
    %247 = arith.mulf %245, %246 : vector<16x64xf32>
    %248 = vector.broadcast %229 : vector<1x64xf32> to vector<16x64xf32>
    %249 = arith.addf %247, %248 : vector<16x64xf32>
    %cst_88 = arith.constant dense<0.000000e+00> : vector<64xf32>
    %250 = vector.multi_reduction <add>, %249, %cst_88 [0] : vector<16x64xf32> to vector<64xf32>
    %251 = vector.shape_cast %250 : vector<64xf32> to vector<1x64xf32>
    %cst_89 = arith.constant 1.600000e+01 : f32
    %252 = vector.broadcast %cst_89 : f32 to vector<1x64xf32>
    %253 = arith.divf %251, %252 : vector<1x64xf32>
    %c0_90 = arith.constant 0 : index
    %c0_91 = arith.constant 0 : index
    %254 = vector.load %arg17[%c0_90, %c0_91] : memref<64x3xf32, #tpu.memory_space<vmem>>, vector<64x3xf32>
    %cst_92 = arith.constant dense<0.000000e+00> : vector<1x3xf32>
    %255 = tpu.matmul %253, %254, %cst_92 {dimension_numbers = #tpu.dot_dimension_numbers<[1], [0], [0], [1], [0, 0, 1, 1], [], []>} : vector<1x64xf32>, vector<64x3xf32>, vector<1x3xf32> -> vector<1x3xf32>
    %c0_93 = arith.constant 0 : index
    %c0_94 = arith.constant 0 : index
    %256 = vector.load %arg18[%c0_93, %c0_94] : memref<1x3xf32, #tpu.memory_space<vmem>>, vector<1x3xf32>
    %257 = arith.addf %255, %256 : vector<1x3xf32>
    %c0_95 = arith.constant 0 : index
    %c0_96 = arith.constant 0 : index
    %c0_97 = arith.constant 0 : index
    %258 = vector.load %arg19[%c0_95, %c0_96, %c0_97] : memref<1x1x3xf32, #tpu.memory_space<vmem>>, vector<1x1x3xf32>
    %259 = vector.shape_cast %258 : vector<1x1x3xf32> to vector<1x3xf32>
    %260 = vector.shape_cast %257 : vector<1x3xf32> to vector<1x1x3xf32>
    tpu.vector_store %arg19[%c0_95, %c0_96, %c0_97], %260 {strides = array<i32>} : memref<1x1x3xf32, #tpu.memory_space<vmem>>, vector<1x1x3xf32>,
    return
  }
  func.func @transform_0(%arg0: i32) -> (i32, i32, i32) {
    %c0_i32 = arith.constant 0 : i32
    %c0_i32_0 = arith.constant 0 : i32
    %c0_i32_1 = arith.constant 0 : i32
    return %arg0, %c0_i32, %c0_i32_0 : i32, i32, i32
  }
  func.func @transform_1(%arg0: i32) -> (i32, i32) {
    %c0_i32 = arith.constant 0 : i32
    %c0_i32_0 = arith.constant 0 : i32
    %c0_i32_1 = arith.constant 0 : i32
    return %c0_i32, %c0_i32_0 : i32, i32
  }
  func.func @transform_2(%arg0: i32) -> (i32, i32) {
    %c0_i32 = arith.constant 0 : i32
    %c0_i32_0 = arith.constant 0 : i32
    %c0_i32_1 = arith.constant 0 : i32
    return %c0_i32, %c0_i32_0 : i32, i32
  }
  func.func @transform_3(%arg0: i32) -> (i32, i32) {
    %c0_i32 = arith.constant 0 : i32
    %c0_i32_0 = arith.constant 0 : i32
    %c0_i32_1 = arith.constant 0 : i32
    return %c0_i32, %c0_i32_0 : i32, i32
  }
  func.func @transform_4(%arg0: i32) -> (i32, i32) {
    %c0_i32 = arith.constant 0 : i32
    %c0_i32_0 = arith.constant 0 : i32
    %c0_i32_1 = arith.constant 0 : i32
    return %c0_i32, %c0_i32_0 : i32, i32
  }
  func.func @transform_5(%arg0: i32) -> (i32, i32, i32) {
    %c0_i32 = arith.constant 0 : i32
    %c0_i32_0 = arith.constant 0 : i32
    %c0_i32_1 = arith.constant 0 : i32
    %c0_i32_2 = arith.constant 0 : i32
    return %c0_i32, %c0_i32_0, %c0_i32_1 : i32, i32, i32
  }
  func.func @transform_6(%arg0: i32) -> (i32, i32) {
    %c0_i32 = arith.constant 0 : i32
    %c0_i32_0 = arith.constant 0 : i32
    %c0_i32_1 = arith.constant 0 : i32
    return %c0_i32, %c0_i32_0 : i32, i32
  }
  func.func @transform_7(%arg0: i32) -> (i32, i32) {
    %c0_i32 = arith.constant 0 : i32
    %c0_i32_0 = arith.constant 0 : i32
    %c0_i32_1 = arith.constant 0 : i32
    return %c0_i32, %c0_i32_0 : i32, i32
  }
  func.func @transform_8(%arg0: i32) -> (i32, i32) {
    %c0_i32 = arith.constant 0 : i32
    %c0_i32_0 = arith.constant 0 : i32
    %c0_i32_1 = arith.constant 0 : i32
    return %c0_i32, %c0_i32_0 : i32, i32
  }
  func.func @transform_9(%arg0: i32) -> (i32, i32) {
    %c0_i32 = arith.constant 0 : i32
    %c0_i32_0 = arith.constant 0 : i32
    %c0_i32_1 = arith.constant 0 : i32
    return %c0_i32, %c0_i32_0 : i32, i32
  }
  func.func @transform_10(%arg0: i32) -> (i32, i32) {
    %c0_i32 = arith.constant 0 : i32
    %c0_i32_0 = arith.constant 0 : i32
    %c0_i32_1 = arith.constant 0 : i32
    return %c0_i32, %c0_i32_0 : i32, i32
  }
  func.func @transform_11(%arg0: i32) -> (i32, i32) {
    %c0_i32 = arith.constant 0 : i32
    %c0_i32_0 = arith.constant 0 : i32
    %c0_i32_1 = arith.constant 0 : i32
    return %c0_i32, %c0_i32_0 : i32, i32
  }
  func.func @transform_12(%arg0: i32) -> (i32, i32) {
    %c0_i32 = arith.constant 0 : i32
    %c0_i32_0 = arith.constant 0 : i32
    %c0_i32_1 = arith.constant 0 : i32
    return %c0_i32, %c0_i32_0 : i32, i32
  }
  func.func @transform_13(%arg0: i32) -> (i32, i32) {
    %c0_i32 = arith.constant 0 : i32
    %c0_i32_0 = arith.constant 0 : i32
    %c0_i32_1 = arith.constant 0 : i32
    return %c0_i32, %c0_i32_0 : i32, i32
  }
  func.func @transform_14(%arg0: i32) -> (i32, i32) {
    %c0_i32 = arith.constant 0 : i32
    %c0_i32_0 = arith.constant 0 : i32
    %c0_i32_1 = arith.constant 0 : i32
    return %c0_i32, %c0_i32_0 : i32, i32
  }
  func.func @transform_15(%arg0: i32) -> (i32, i32) {
    %c0_i32 = arith.constant 0 : i32
    %c0_i32_0 = arith.constant 0 : i32
    %c0_i32_1 = arith.constant 0 : i32
    return %c0_i32, %c0_i32_0 : i32, i32
  }
  func.func @transform_16(%arg0: i32) -> (i32, i32) {
    %c0_i32 = arith.constant 0 : i32
    %c0_i32_0 = arith.constant 0 : i32
    %c0_i32_1 = arith.constant 0 : i32
    return %c0_i32, %c0_i32_0 : i32, i32
  }
  func.func @transform_17(%arg0: i32) -> (i32, i32) {
    %c0_i32 = arith.constant 0 : i32
    %c0_i32_0 = arith.constant 0 : i32
    %c0_i32_1 = arith.constant 0 : i32
    return %c0_i32, %c0_i32_0 : i32, i32
  }
  func.func @transform_18(%arg0: i32) -> (i32, i32, i32) {
    %c0_i32 = arith.constant 0 : i32
    %c0_i32_0 = arith.constant 0 : i32
    %c0_i32_1 = arith.constant 0 : i32
    return %arg0, %c0_i32, %c0_i32_0 : i32, i32, i32
  }
}

</mosaic_0001>

<bundles_post_ra>
// kernel: swin_forward.5
= control target key start
LH: loop header
LB: loop body
LE: loop exit
PB: predicated region body
PF: predicated region fallthrough
CT: control target
= control target key end

     0   :  { %s3089_s21 = smov 0   ;;  %s3866_s0 = inlined_call_operand.vmem [shape: f32[2,64,32], index: 0, kind: input, shape index: {}]   ;;  %s3867_s1 = inlined_call_operand.vmem [shape: f32[64,64], index: 1, kind: input, shape index: {}]   ;;  %s3868_s2 = inlined_call_operand.vmem [shape: f32[64,64], index: 2, kind: input, shape index: {}]   ;;  %s3869_s3 = inlined_call_operand.vmem [shape: f32[1,32], index: 3, kind: input, shape index: {}]   ;;  %s3870_s4 = inlined_call_operand.vmem [shape: f32[1,32], index: 4, kind: input, shape index: {}]   ;;  %s3871_s5 = inlined_call_operand.vmem [shape: f32[32,96], index: 5, kind: input, shape index: {}]   ;;  %s3872_s6 = inlined_call_operand.vmem [shape: f32[1,96], index: 6, kind: input, shape index: {}]   ;;  %s3873_s7 = inlined_call_operand.vmem [shape: f32[2,64,64], index: 7, kind: input, shape index: {}]   ;;  %s3874_s8 = inlined_call_operand.vmem [shape: f32[32,32], index: 8, kind: input, shape index: {}]   ;;  %s3875_s9 = inlined_call_operand.vmem [shape: f32[1,32], index: 9, kind: input, shape index: {}]   ;;  %s3876_s10 = inlined_call_operand.vmem [shape: f32[1,32], index: 10, kind: input, shape index: {}]   ;;  %s3877_s11 = inlined_call_operand.vmem [shape: f32[1,32], index: 11, kind: input, shape index: {}]   ;;  %s3878_s12 = inlined_call_operand.vmem [shape: f32[32,128], index: 12, kind: input, shape index: {}]   ;;  %s3879_s13 = inlined_call_operand.vmem [shape: f32[1,128], index: 13, kind: input, shape index: {}]   ;;  %s3880_s14 = inlined_call_operand.vmem [shape: f32[128,32], index: 14, kind: input, shape index: {}]   ;;  %s3881_s15 = inlined_call_operand.vmem [shape: f32[1,32], index: 15, kind: input, shape index: {}]   ;;  %s3882_s16 = inlined_call_operand.vmem [shape: f32[2,64,32], index: 16, kind: output, shape index: {}]  }
   0x1   :  { %3883 = sst [smem:[#allocation2_spill]] %s3866_s0 }
   0x2 LB: > { %s2447_s22 = sadd.s32 4294967295, %s2997_s21   ;;  %p2451_p0 = scmp.ge.s32.totalorder %s2997_s21, 1  ;;  %s2997_s21 = sphi %s3089_s21, %s26_s21  }
   0x3   : > { %p462_p1 = scmp.lt.s32.totalorder %s2997_s21, 3 }
   0x5   : > { %p463_p2 = pnand %p2451_p0, %p462_p1 }
   0x6   : > { %p512_p3 = scmp.lt.s32.totalorder (!%p463_p2), %s2447_s22, 1  ;;  %v531_v0 = vld [vmem:[%s3867_s1] sm:$0xff] (!%p463_p2)  ;;  %vm539_vm0 = vcmask (!%p463_p2), 523264   ;;  %s3884_s28 = sld [smem:[#allocation2_spill]] (!%p463_p2)  ;;  %v532_v13 = vld [vmem:[%s3867_s1 + $0x8] sm:$0xff] (!%p463_p2)  ;;  %v533_v14 = vld [vmem:[%s3867_s1 + $0x10] sm:$0xff] (!%p463_p2) }
   0x7   : > { %466 = sbr.rel (%p463_p2) target bundleno = 3658 (0xe4a), region = 84  ;;  %2630 = vmatprep.mubr.msk.f32.mxu0 (!%p463_p2), %vm539_vm0, %v531_v0  ;;  %v534_v15 = vld [vmem:[%s3867_s1 + $0x18] sm:$0xff] (!%p463_p2)  ;;  %v535_v16 = vld [vmem:[%s3867_s1 + $0x20] sm:$0xff] (!%p463_p2)  ;;  %v536_v17 = vld [vmem:[%s3867_s1 + $0x28] sm:$0xff] (!%p463_p2)  ;;  %vm697_vm1 = vcmask (!%p463_p2), 261120   ;;  %s2999_s19 = smov (!%p463_p2), 96  }
   0x8   : > { %v537_v18 = vld [vmem:[%s3867_s1 + $0x30] sm:$0xff] (!%p463_p2)  ;;  %v538_v19 = vld [vmem:[%s3867_s1 + $0x38] sm:$0xff] (!%p463_p2)  ;;  %vm948_vm2 = vcmask (!%p463_p2), 130048   ;;  %s3000_s20 = smov (!%p463_p2), 64  }
   0xe   : > { %s3886_s22 = smov (!%p512_p3, %s2447_s22), 1 }
   0xf   : > { %s2514_s25 = sshll.u32 %s3886_s22, 6 }
  0x10   : > { %s516_s29 = scalar_lea.vmem %s3884_s28, %s2514_s25  ;;  %s3001_s28 = smov 80  }
  0x11   : > { %v523_v1 = vld [vmem:[%s516_s29] sm:$0xff]  ;;  %v524_v2 = vld [vmem:[%s516_s29 + $0x8] sm:$0xff]  ;;  %v525_v3 = vld [vmem:[%s516_s29 + $0x10] sm:$0xff]  ;;  %s521_s27 = scalar_lea.vmem %s3882_s16, %s2514_s25 }
  0x12   : > { %v2802_v4 = vpack.c.bf16 %v524_v2, %v523_v1  ;;  %v526_v5 = vld [vmem:[%s516_s29 + $0x18] sm:$0xff]  ;;  %v527_v7 = vld [vmem:[%s516_s29 + $0x20] sm:$0xff]  ;;  %v528_v8 = vld [vmem:[%s516_s29 + $0x28] sm:$0xff] }
  0x13   : > { %v2806_v6 = vpack.c.bf16 %v526_v5, %v525_v3  ;;  %v2810_v9 = vpack.c.bf16 %v528_v8, %v527_v7  ;;  %v529_v10 = vld [vmem:[%s516_s29 + $0x30] sm:$0xff]  ;;  %v530_v11 = vld [vmem:[%s516_s29 + $0x38] sm:$0xff]  ;;  %s3002_s29 = smov 112  }
  0x14   : > { %2803 = vmatprep.subr.bf16.mxu0 %v2802_v4  ;;  %v2814_v12 = vpack.c.bf16 %v530_v11, %v529_v10 }
  0x15   : > { %2805 = vmatpush3.bf16.msra.mxu0 %v2802_v4 }
  0x16   : > { %2807 = vmatprep.subr.bf16.mxu0 %v2806_v6 }
  0x19   : > { %2809 = vmatpush3.bf16.msra.mxu0 %v2806_v6 }
  0x1a   : > { %2811 = vmatprep.subr.bf16.mxu0 %v2810_v9 }
  0x1d   : > { %2813 = vmatpush3.bf16.msra.mxu0 %v2810_v9 }
  0x1e   : > { %2815 = vmatprep.subr.bf16.mxu0 %v2814_v12 }
  0x21   : > { %2817 = vmatpush3.bf16.msra.mxu0 %v2814_v12  ;;  %v671_v12 = vld [vmem:[%s3871_s5] sm:$0xff] }
  0x24   : > { %2631 = vmatmul.mubr.msk.f32.vlgmr.msra.gmra.mrb[0].mxu0 %vm539_vm0, %v532_v13  ;;  %v672_v13 = vld [vmem:[%s3871_s5 + $0x8] sm:$0xff] }
  0x25   : > { %2633 = vmatprep.mubr.msk.f32.mxu0 %vm539_vm0, %v533_v14  ;;  %v835_v14 = vpack.c.bf16 %v672_v13, %v671_v12 }
  0x27   : > { %2642 = vmatprep.subr.bf16.mxu1 %v835_v14 }
  0x28   : > { %2634 = vmatmul.mubr.msk.f32.gmra.mrb[2].mxu0 %vm539_vm0, %v534_v15  ;;  %2643 = vmatpush3.bf16.msra.mxu1 %v835_v14  ;;  %v673_v15 = vld [vmem:[%s3871_s5 + $0x10] sm:$0xff] }
  0x29   : > { %2636 = vmatprep.mubr.msk.f32.mxu0 %vm539_vm0, %v535_v16  ;;  %v674_v16 = vld [vmem:[%s3871_s5 + $0x18] sm:$0xff] }
  0x2c   : > { %2637 = vmatmul.mubr.msk.f32.gmra.mrb[4].mxu0 %vm539_vm0, %v536_v17  ;;  %v836_v17 = vpack.c.bf16 %v674_v16, %v673_v15 }
  0x2d   : > { %2639 = vmatprep.mubr.msk.f32.mxu0 %vm539_vm0, %v537_v18 }
  0x2e   : > { %2644 = vmatprep.subr.bf16.mxu1 %v836_v17 }
  0x2f   : > { %2645 = vmatpush3.bf16.msra.mxu1 %v836_v17 }
  0x30   : > { %2640 = vmatmul.mubr.msk.f32.gmra.mrb[6].mxu0 %vm539_vm0, %v538_v19 }
  0xf7   : > { %v3137_v20 = vpop.f32.mrb[0].mxu0 }
  0xf8   : > { %v3139_v21 = vpop.f32.mrb[1].mxu0  ;;  %v701_v25 = vsel %vm697_vm1, %v3137_v20, 0.0 }
  0xf9   : > { %v698_v22 = vsel %vm697_vm1, %v3139_v21, 0.0 }
  0xfa   : > { %699 = vadd.xlane.f32.xlu0 %v698_v22 }
  0xfb   : > { %v3143_v23 = vpop.f32.mrb[2].mxu0 }
  0xfc   : > { %v3145_v24 = vpop.f32.mrb[3].mxu0  ;;  %v707_v29 = vsel %vm697_vm1, %v3143_v23, 0.0 }
  0xfd   : > { %v704_v26 = vsel %vm697_vm1, %v3145_v24, 0.0 }
  0xfe   : > { %702 = vadd.xlane.f32.xlu0 %v701_v25  ;;  %705 = vadd.xlane.f32.xlu1 %v704_v26 }
  0xff   : > { %v3151_v27 = vpop.f32.mrb[4].mxu0 }
 0x100   : > { %v3153_v28 = vpop.f32.mrb[5].mxu0  ;;  %v713_v32 = vsel %vm697_vm1, %v3151_v27, 0.0 }
 0x101   : > { %v710_v30 = vsel %vm697_vm1, %v3153_v28, 0.0 }
 0x102   : > { %708 = vadd.xlane.f32.xlu1 %v707_v29  ;;  %711 = vadd.xlane.f32.xlu0 %v710_v30 }
 0x103   : > { %v3159_v31 = vpop.f32.mrb[6].mxu0 }
 0x104   : > { %v3163_v33 = vpop.f32.mrb[7].mxu0  ;;  %v719_v35 = vsel %vm697_vm1, %v3159_v31, 0.0 }
 0x105   : > { %v716_v34 = vsel %vm697_vm1, %v3163_v33, 0.0 }
 0x106   : > { %714 = vadd.xlane.f32.xlu1 %v713_v32  ;;  %717 = vadd.xlane.f32.xlu0 %v716_v34 }
 0x10a   : > { %720 = vadd.xlane.f32.xlu1 %v719_v35 }
 0x187   : > { %v700_v36 = vpop.xlane.xlu0 %699 }
 0x188   : > { %v723_v37 = vmul.f32 0.03125, %v700_v36 }
 0x18a   : > { %v3170_v38 = vsub.f32 %v3139_v21, %v723_v37 }
 0x18b   : > { %v703_v39 = vpop.xlane.xlu0 %702  ;;  %v706_v40 = vpop.xlane.xlu1 %705 }
 0x18c   : > { %v724_v41 = vmul.f32 0.03125, %v703_v39  ;;  %v725_v42 = vmul.f32 0.03125, %v706_v40  ;;  %v739_v43 = vmul.f32 %v3170_v38, %v3170_v38 }
 0x18e   : > { %v3175_v44 = vsub.f32 %v3137_v20, %v724_v41  ;;  %v3178_v45 = vsub.f32 %v3145_v24, %v725_v42  ;;  %v747_v46 = vsel %vm697_vm1, %v739_v43, 0.0 }
 0x18f   : > { %v709_v47 = vpop.xlane.xlu1 %708  ;;  %v712_v48 = vpop.xlane.xlu0 %711  ;;  %748 = vadd.xlane.f32.xlu0 %v747_v46 }
 0x190   : > { %v726_v49 = vmul.f32 0.03125, %v709_v47  ;;  %v727_v50 = vmul.f32 0.03125, %v712_v48  ;;  %v740_v51 = vmul.f32 %v3175_v44, %v3175_v44  ;;  %v741_v52 = vmul.f32 %v3178_v45, %v3178_v45 }
 0x192   : > { %v3186_v53 = vsub.f32 %v3143_v23, %v726_v49  ;;  %v3189_v54 = vsub.f32 %v3153_v28, %v727_v50  ;;  %v750_v55 = vsel %vm697_vm1, %v740_v51, 0.0  ;;  %v753_v56 = vsel %vm697_vm1, %v741_v52, 0.0 }
 0x193   : > { %v715_v57 = vpop.xlane.xlu1 %714  ;;  %751 = vadd.xlane.f32.xlu1 %v750_v55  ;;  %754 = vadd.xlane.f32.xlu0 %v753_v56  ;;  %v718_v58 = vpop.xlane.xlu0 %717  ;;  %v2464_v56 = vld [vmem:[%s3869_s3] ss:$0 sm:$0xff] }
 0x194   : > { %v728_v59 = vmul.f32 0.03125, %v715_v57  ;;  %v729_v60 = vmul.f32 0.03125, %v718_v58  ;;  %v742_v61 = vmul.f32 %v3186_v53, %v3186_v53  ;;  %v743_v62 = vmul.f32 %v3189_v54, %v3189_v54 }
 0x196   : > { %v3198_v63 = vsub.f32 %v3151_v27, %v728_v59  ;;  %v3201_v0 = vsub.f32 %v3163_v33, %v729_v60  ;;  %v756_v1 = vsel %vm697_vm1, %v742_v61, 0.0  ;;  %v759_v2 = vsel %vm697_vm1, %v743_v62, 0.0 }
 0x197   : > { %757 = vadd.xlane.f32.xlu1 %v756_v1  ;;  %v721_v3 = vpop.xlane.xlu1 %720  ;;  %760 = vadd.xlane.f32.xlu0 %v759_v2 }
 0x198   : > { %v730_v4 = vmul.f32 0.03125, %v721_v3  ;;  %v744_v5 = vmul.f32 %v3198_v63, %v3198_v63  ;;  %v745_v6 = vmul.f32 %v3201_v0, %v3201_v0 }
 0x19a   : > { %v3210_v7 = vsub.f32 %v3159_v31, %v730_v4  ;;  %v762_v8 = vsel %vm697_vm1, %v744_v5, 0.0  ;;  %v765_v9 = vsel %vm697_vm1, %v745_v6, 0.0 }
 0x19b   : > { %763 = vadd.xlane.f32.xlu1 %v762_v8  ;;  %766 = vadd.xlane.f32.xlu0 %v765_v9 }
 0x19c   : > { %v746_v10 = vmul.f32 %v3210_v7, %v3210_v7 }
 0x19e   : > { %v768_v11 = vsel %vm697_vm1, %v746_v10, 0.0 }
 0x19f   : > { %769 = vadd.xlane.f32.xlu1 %v768_v11 }
 0x21c   : > { %v749_v18 = vpop.xlane.xlu0 %748 }
 0x21d   : > { %v771_v19 = vmul.f32 0.03125, %v749_v18 }
 0x21f   : > { %v779_v22 = vadd.f32 1e-05, %v771_v19 }
 0x220   : > { %v752_v25 = vpop.xlane.xlu1 %751  ;;  %v755_v26 = vpop.xlane.xlu0 %754 }
 0x221   : > { %2863 = vrsqrt.f32 %v779_v22  ;;  %v772_v29 = vmul.f32 0.03125, %v752_v25  ;;  %v773_v30 = vmul.f32 0.03125, %v755_v26 }
 0x223   : > { %v780_v32 = vadd.f32 1e-05, %v772_v29  ;;  %v781_v34 = vadd.f32 1e-05, %v773_v30 }
 0x224   : > { %v758_v35 = vpop.xlane.xlu1 %757  ;;  %v761_v36 = vpop.xlane.xlu0 %760 }
 0x225   : > { %2865 = vrsqrt.f32 %v780_v32  ;;  %v774_v37 = vmul.f32 0.03125, %v758_v35  ;;  %v775_v39 = vmul.f32 0.03125, %v761_v36 }
 0x226   : > { %2867 = vrsqrt.f32 %v781_v34 }
 0x227   : > { %v782_v40 = vadd.f32 1e-05, %v774_v37  ;;  %v783_v41 = vadd.f32 1e-05, %v775_v39 }
 0x228   : > { %v764_v42 = vpop.xlane.xlu1 %763  ;;  %v767_v43 = vpop.xlane.xlu0 %766 }
 0x229   : > { %2869 = vrsqrt.f32 %v782_v40  ;;  %v776_v46 = vmul.f32 0.03125, %v764_v42  ;;  %v777_v47 = vmul.f32 0.03125, %v767_v43 }
 0x22a   : > { %2871 = vrsqrt.f32 %v783_v41 }
 0x22b   : > { %v2864_v48 = vpop.eup %2863  ;;  %v784_v49 = vadd.f32 1e-05, %v776_v46  ;;  %v785_v50 = vadd.f32 1e-05, %v777_v47 }
 0x22c   : > { %v770_v51 = vpop.xlane.xlu1 %769  ;;  %v795_v52 = vmul.f32 %v2864_v48, %v3170_v38  ;;  %v2465_v38 = vld [vmem:[%s3870_s4] ss:$0 sm:$0xff] }
 0x22d   : > { %2873 = vrsqrt.f32 %v784_v49  ;;  %v778_v55 = vmul.f32 0.03125, %v770_v51 }
 0x22e   : > { %2875 = vrsqrt.f32 %v785_v50  ;;  %v809_v61 = vmul.f32 %v2464_v56, %v795_v52 }
 0x22f   : > { %v2866_v57 = vpop.eup %2865  ;;  %v786_v58 = vadd.f32 1e-05, %v778_v55 }
 0x230   : > { %v2868_v59 = vpop.eup %2867  ;;  %v796_v60 = vmul.f32 %v2866_v57, %v3175_v44  ;;  %v823_v5 = vadd.f32 %v2465_v38, %v809_v61 }
 0x231   : > { %v797_v62 = vmul.f32 %v2868_v59, %v3178_v45  ;;  %2877 = vrsqrt.f32 %v786_v58 }
 0x232   : > { %v810_v1 = vmul.f32 %v2464_v56, %v796_v60 }
 0x233   : > { %v2870_v2 = vpop.eup %2869  ;;  %v811_v8 = vmul.f32 %v2464_v56, %v797_v62 }
 0x234   : > { %v2872_v3 = vpop.eup %2871  ;;  %v798_v4 = vmul.f32 %v2870_v2, %v3186_v53  ;;  %v824_v6 = vadd.f32 %v2465_v38, %v810_v1 }
 0x235   : > { %v799_v9 = vmul.f32 %v2872_v3, %v3189_v54  ;;  %v825_v13 = vadd.f32 %v2465_v38, %v811_v8 }
 0x236   : > { %v831_v10 = vpack.c.bf16 %v824_v6, %v823_v5  ;;  %v812_v44 = vmul.f32 %v2464_v56, %v798_v4 }
 0x237   : > { %v2874_v11 = vpop.eup %2873  ;;  %v813_v15 = vmul.f32 %v2464_v56, %v799_v9 }
 0x238   : > { %v2876_v12 = vpop.eup %2875  ;;  %v800_v45 = vmul.f32 %v2874_v11, %v3198_v63  ;;  %2646 = vmatprep.mubr.msk.bf16.mxu1 %vm697_vm1, %v831_v10  ;;  %v826_v14 = vadd.f32 %v2465_v38, %v812_v44 }
 0x239   : > { %v801_v16 = vmul.f32 %v2876_v12, %v3201_v0  ;;  %v827_v54 = vadd.f32 %v2465_v38, %v813_v15  ;;  %v2466_v0 = vld [vmem:[%s3872_s6] ss:$0 sm:$0xff] }
 0x23a   : > { %v832_v17 = vpack.c.bf16 %v826_v14, %v825_v13  ;;  %v814_v53 = vmul.f32 %v2464_v56, %v800_v45  ;;  %v678_v14 = vld [vmem:[%s3873_s7 + $0x10] sm:$0xff] }
 0x23b   : > { %v2878_v18 = vpop.eup %2877  ;;  %v815_v25 = vmul.f32 %v2464_v56, %v801_v16  ;;  %v676_v16 = vld [vmem:[%s3873_s7] sm:$0xff] }
 0x23c   : > { %v802_v19 = vmul.f32 %v2878_v18, %v3210_v7  ;;  %2647 = vmatmul.mubr.msk.bf16.vlgmr.msra.gmra.mrb[0].mxu1 %vm697_vm1, %v832_v17  ;;  %v828_v22 = vadd.f32 %v2465_v38, %v814_v53  ;;  %v677_v18 = vld [vmem:[%s3873_s7 + $0x8] sm:$0xff] }
 0x23d   : > { %v829_v63 = vadd.f32 %v2465_v38, %v815_v25 }
 0x23e   : > { %v833_v26 = vpack.c.bf16 %v828_v22, %v827_v54  ;;  %v816_v29 = vmul.f32 %v2464_v56, %v802_v19 }
 0x240   : > { %2650 = vmatprep.mubr.msk.bf16.mxu1 %vm697_vm1, %v833_v26  ;;  %v830_v30 = vadd.f32 %v2465_v38, %v816_v29  ;;  %v679_v26 = vld [vmem:[%s3873_s7 + $0x18] sm:$0xff] }
 0x242   : > { %v834_v32 = vpack.c.bf16 %v830_v30, %v829_v63 }
 0x244   : > { %2651 = vmatmul.mubr.msk.bf16.gmra.mrb[4].mxu1 %vm697_vm1, %v834_v32 }
 0x30f   : > { %v2648_v34 = vpop.f32.mrb[0].mxu1 }
 0x310   : > { %v898_v7 = vadd.f32 %v2648_v34, %v2466_v0  ;;  %v889_v35 = vpop.f32.mrb[1].mxu1 }
 0x311   : > { %v890_v36 = vadd.f32 %v2466_v0, %v889_v35  ;;  %v2649_v37 = vpop.f32.mrb[2].mxu1 }
 0x312   : > { %v901_v39 = vadd.f32 %v2649_v37, %v2466_v0  ;;  %v892_v40 = vpop.f32.mrb[3].mxu1  ;;  %v922_v42 = vmul.f32 0.25, %v898_v7 }
 0x313   : > { %v893_v41 = vadd.f32 %v2466_v0, %v892_v40  ;;  %v920_v47 = vmul.f32 0.25, %v890_v36  ;;  %v680_v40 = vld [vmem:[%s3873_s7 + $0x20] sm:$0xff] }
 0x314   : > { %v923_v43 = vmul.f32 0.25, %v901_v39  ;;  %v3250_v46 = vpack.c.bf16 %v901_v39, %v898_v7 }
 0x315   : > { %v921_v48 = vmul.f32 0.25, %v893_v41  ;;  %v3252_v49 = vpack.c.bf16 %v893_v41, %v890_v36 }
 0x316   : > { %v3254_v50 = vpack.c.bf16 %v923_v43, %v922_v42  ;;  %942 = vrot.lane.b32.xlu1 %v3250_v46, %s2999_s19 }
 0x317   : > { %v3257_v51 = vpack.c.bf16 %v921_v48, %v920_v47  ;;  %940 = vrot.lane.b32.xlu0 %v3252_v49, %s2999_s19  ;;  %v2652_v52 = vpop.f32.mrb[4].mxu1  ;;  %v683_v47 = vld [vmem:[%s3873_s7 + $0x38] sm:$0xff] }
 0x318   : > { %v914_v55 = vadd.f32 %v2652_v52, %v2466_v0  ;;  %v905_v56 = vpop.f32.mrb[5].mxu1  ;;  %v681_v52 = vld [vmem:[%s3873_s7 + $0x28] sm:$0xff] }
 0x319   : > { %v906_v57 = vadd.f32 %v2466_v0, %v905_v56  ;;  %v2653_v58 = vpop.f32.mrb[6].mxu1  ;;  %2662 = vmatprep.mubr.msk.bf16.mxu1 %vm948_vm2, %v3257_v51 }
 0x31a   : > { %v917_v59 = vadd.f32 %v2653_v58, %v2466_v0  ;;  %v908_v60 = vpop.f32.mrb[7].mxu1  ;;  %v926_v62 = vmul.f32 0.25, %v914_v55 }
 0x31b   : > { %v909_v61 = vadd.f32 %v2466_v0, %v908_v60  ;;  %v924_v2 = vmul.f32 0.25, %v906_v57  ;;  %v682_v0 = vld [vmem:[%s3873_s7 + $0x30] sm:$0xff] }
 0x31c   : > { %v927_v38 = vmul.f32 0.25, %v917_v59  ;;  %v3262_v1 = vpack.c.bf16 %v917_v59, %v914_v55 }
 0x31d   : > { %v925_v3 = vmul.f32 0.25, %v909_v61  ;;  %v3264_v4 = vpack.c.bf16 %v909_v61, %v906_v57 }
 0x31e   : > { %v3266_v5 = vpack.c.bf16 %v927_v38, %v926_v62 }
 0x31f   : > { %v3268_v6 = vpack.c.bf16 %v925_v3, %v924_v2  ;;  %944 = vrot.lane.b32.xlu1 %v3264_v4, %s2999_s19 }
 0x323   : > { %946 = vrot.lane.b32.xlu1 %v3262_v1, %s2999_s19  ;;  %s3003_s19 = smov 48  }
 0x388   : > { %v943_v10 = vpop.permute.xlu1 %942 }
 0x389   : > { %v941_v8 = vpop.permute.xlu0 %940  ;;  %v965_v44 = vsel %vm948_vm2, %v943_v10, 0 }
 0x38a   : > { %v962_v9 = vsel %vm948_vm2, %v941_v8, 0  ;;  %2842 = vmatprep.subr.msk.bf16.mxu1 %vm948_vm2, %v941_v8 }
 0x38b   : > { %2655 = vmatpush3.bf16.xpose.msra.mxu1 %v962_v9 }
 0x38c   : > { %2843 = vmatprep.subr.msk.bf16.mxu1 %vm948_vm2, %v943_v10 }
 0x391   : > { %v945_v11 = vpop.permute.xlu1 %944 }
 0x392   : > { %v968_v12 = vsel %vm948_vm2, %v945_v11, 0 }
 0x393   : > { %2657 = vmatpush3.bf16.xpose.msra.mxu1 %v965_v44 }
 0x394   : > { %2844 = vmatprep.subr.msk.bf16.mxu1 %vm948_vm2, %v945_v11 }
 0x395   : > { %v947_v45 = vpop.permute.xlu1 %946 }
 0x396   : > { %v971_v13 = vsel %vm948_vm2, %v947_v45, 0 }
 0x39b   : > { %2659 = vmatpush3.bf16.xpose.msra.mxu1 %v968_v12 }
 0x39c   : > { %2845 = vmatprep.subr.msk.bf16.mxu1 %vm948_vm2, %v947_v45 }
 0x3a3   : > { %2661 = vmatpush3.bf16.xpose.msra.mxu1 %v971_v13 }
 0x3aa   : > { %2663 = vmatmul.mubr.msk.bf16.vlgmr.msra.gmra.mrb[8].mxu1 %vm948_vm2, %v3254_v50 }
 0x3ab   : > { %2666 = vmatprep.mubr.msk.bf16.mxu1 %vm948_vm2, %v3268_v6 }
 0x3b2   : > { %2667 = vmatmul.mubr.msk.bf16.gmra.mrb[12].mxu1 %vm948_vm2, %v3266_v5 }
 0x47d   : > { %v2664_v15 = vpop.f32.mrb[8].mxu1 }
 0x47e   : > { %v1016_v17 = vadd.f32 %v2664_v15, %v678_v14  ;;  %v1007_v53 = vpop.f32.mrb[9].mxu1 }
 0x47f   : > { %v2665_v19 = vpop.f32.mrb[10].mxu1  ;;  %v1008_v54 = vadd.f32 %v1007_v53, %v676_v16 }
 0x480   : > { %v1010_v22 = vpop.f32.mrb[11].mxu1  ;;  %v1044_v25 = vsel %vm539_vm0, %v1016_v17, -inf  ;;  %v1019_v30 = vadd.f32 %v2665_v19, %v679_v26 }
 0x481   : > { %v1011_v29 = vadd.f32 %v1010_v22, %v677_v18  ;;  %1045 = vmax.xlane.f32.xlu0 %v1044_v25  ;;  %v1038_v32 = vsel %vm539_vm0, %v1008_v54, -inf }
 0x482   : > { %v1047_v39 = vsel %vm539_vm0, %v1019_v30, -inf }
 0x483   : > { %v1041_v63 = vsel %vm539_vm0, %v1011_v29, -inf }
 0x484   : > { %1042 = vmax.xlane.f32.xlu1 %v1041_v63 }
 0x485   : > { %v2668_v34 = vpop.f32.mrb[12].mxu1  ;;  %1039 = vmax.xlane.f32.xlu0 %v1038_v32 }
 0x486   : > { %v1023_v7 = vpop.f32.mrb[13].mxu1  ;;  %v1032_v36 = vadd.f32 %v2668_v34, %v682_v0 }
 0x487   : > { %v2669_v35 = vpop.f32.mrb[14].mxu1  ;;  %v1024_v41 = vadd.f32 %v1023_v7, %v680_v40 }
 0x488   : > { %v1026_v37 = vpop.f32.mrb[15].mxu1  ;;  %v1056_v42 = vsel %vm539_vm0, %v1032_v36, -inf  ;;  %v3316_v48 = vadd.f32 %v2669_v35, %v683_v47 }
 0x489   : > { %1048 = vmax.xlane.f32.xlu0 %v1047_v39  ;;  %v1050_v43 = vsel %vm539_vm0, %v1024_v41, -inf  ;;  %v3321_v55 = vadd.f32 %v1026_v37, %v681_v52 }
 0x48a   : > { %v1059_v56 = vsel %vm539_vm0, %v3316_v48, -inf }
 0x48b   : > { %v1053_v57 = vsel %vm539_vm0, %v3321_v55, -inf }
 0x48d   : > { %1057 = vmax.xlane.f32.xlu0 %v1056_v42 }
 0x491   : > { %1051 = vmax.xlane.f32.xlu0 %v1050_v43 }
 0x495   : > { %1132 = vrot.lane.b32.xlu1 %v3250_v46, %s3000_s20 }
 0x499   : > { %1134 = vrot.lane.b32.xlu1 %v3264_v4, %s3000_s20 }
 0x4a7   : > { %1130 = vrot.lane.b32.xlu0 %v3252_v49, %s3000_s20 }
 0x4bd   : > { %1060 = vmax.xlane.f32.xlu1 %v1059_v56 }
 0x4c1   : > { %1054 = vmax.xlane.f32.xlu1 %v1053_v57 }
 0x4d2   : > { %1136 = vrot.lane.b32.xlu1 %v3262_v1, %s3000_s20 }
 0x50e   : > { %v1046_v58 = vpop.xlane.xlu0 %1045 }
 0x50f   : > { %v1064_v59 = vsub.f32 %v1016_v17, %v1046_v58 }
 0x511   : > { %v1074_v60 = vmul.f32 1.442695, %v1064_v59  ;;  %v1043_v61 = vpop.xlane.xlu1 %1042 }
 0x512   : > { %v1040_v62 = vpop.xlane.xlu0 %1039  ;;  %v1063_v2 = vsub.f32 %v1011_v29, %v1043_v61 }
 0x513   : > { %2879 = vpow2.f32 %v1074_v60  ;;  %v1062_v38 = vsub.f32 %v1008_v54, %v1040_v62 }
 0x514   : > { %v1072_v10 = vmul.f32 1.442695, %v1063_v2 }
 0x515   : > { %v1070_v3 = vmul.f32 1.442695, %v1062_v38  ;;  %v1133_v18 = vpop.permute.xlu1 %1132 }
 0x516   : > { %v1049_v8 = vpop.xlane.xlu0 %1048 }
 0x517   : > { %2881 = vpow2.f32 %v1070_v3  ;;  %v1065_v9 = vsub.f32 %v1019_v30, %v1049_v8 }
 0x519   : > { %v1076_v44 = vmul.f32 1.442695, %v1065_v9  ;;  %v1135_v29 = vpop.permute.xlu1 %1134 }
 0x51a   : > { %v1058_v11 = vpop.xlane.xlu0 %1057 }
 0x51b   : > { %2883 = vpow2.f32 %v1076_v44  ;;  %v1068_v12 = vsub.f32 %v1032_v36, %v1058_v11 }
 0x51c   : > { %2885 = vpow2.f32 %v1072_v10 }
 0x51d   : > { %v3328_v45 = vpop.eup %2879  ;;  %v1082_v13 = vmul.f32 1.442695, %v1068_v12 }
 0x51e   : > { %v1052_v14 = vpop.xlane.xlu0 %1051  ;;  %v1092_v15 = vsel %vm539_vm0, %v3328_v45, 0.0 }
 0x51f   : > { %2887 = vpow2.f32 %v1082_v13  ;;  %v1066_v16 = vsub.f32 %v1024_v41, %v1052_v14  ;;  %1093 = vadd.xlane.f32.xlu0 %v1092_v15 }
 0x521   : > { %v3332_v17 = vpop.eup %2881  ;;  %v1078_v53 = vmul.f32 1.442695, %v1066_v16 }
 0x522   : > { %v1131_v19 = vpop.permute.xlu0 %1130  ;;  %v1086_v54 = vsel %vm539_vm0, %v3332_v17, 0.0 }
 0x523   : > { %2889 = vpow2.f32 %v1078_v53  ;;  %1087 = vadd.xlane.f32.xlu0 %v1086_v54  ;;  %2670 = vmatprep.subr.bf16.mxu0 %v1131_v19 }
 0x524   : > { %2671 = vmatpush3.bf16.msra.mxu0 %v1131_v19 }
 0x525   : > { %v2884_v22 = vpop.eup %2883  ;;  %2672 = vmatprep.subr.bf16.mxu0 %v1133_v18 }
 0x526   : > { %v1095_v25 = vsel %vm539_vm0, %v2884_v22, 0.0  ;;  %v2886_v26 = vpop.eup %2885 }
 0x527   : > { %1096 = vadd.xlane.f32.xlu1 %v1095_v25  ;;  %v1089_v30 = vsel %vm539_vm0, %v2886_v26, 0.0 }
 0x528   : > { %2673 = vmatpush3.bf16.msra.mxu0 %v1133_v18 }
 0x529   : > { %v3337_v63 = vpop.eup %2887  ;;  %2674 = vmatprep.subr.bf16.mxu0 %v1135_v29 }
 0x52a   : > { %v1104_v32 = vsel %vm539_vm0, %v3337_v63, 0.0 }
 0x52b   : > { %1090 = vadd.xlane.f32.xlu1 %v1089_v30  ;;  %1105 = vadd.xlane.f32.xlu0 %v1104_v32 }
 0x52c   : > { %2675 = vmatpush3.bf16.msra.mxu0 %v1135_v29 }
 0x52d   : > { %v3342_v0 = vpop.eup %2889 }
 0x52e   : > { %v1098_v34 = vsel %vm539_vm0, %v3342_v0, 0.0 }
 0x52f   : > { %1099 = vadd.xlane.f32.xlu0 %v1098_v34 }
 0x53c   : > { %1238 = vrot.lane.b32.xlu1 %v3250_v46, %s3001_s28 }
 0x540   : > { %1240 = vrot.lane.b32.xlu1 %v3264_v4, %s3001_s28 }
 0x54a   : > { %v1061_v7 = vpop.xlane.xlu1 %1060 }
 0x54b   : > { %v1069_v35 = vsub.f32 %v3316_v48, %v1061_v7 }
 0x54d   : > { %v1084_v36 = vmul.f32 1.442695, %v1069_v35 }
 0x54e   : > { %v1055_v37 = vpop.xlane.xlu1 %1054 }
 0x54f   : > { %2891 = vpow2.f32 %v1084_v36  ;;  %v1067_v39 = vsub.f32 %v3321_v55, %v1055_v37 }
 0x551   : > { %v1080_v40 = vmul.f32 1.442695, %v1067_v39 }
 0x552   : > { %v1137_v41 = vpop.permute.xlu1 %1136 }
 0x553   : > { %2676 = vmatprep.subr.bf16.mxu0 %v1137_v41  ;;  %2893 = vpow2.f32 %v1080_v40 }
 0x554   : > { %2677 = vmatpush3.bf16.msra.mxu0 %v1137_v41 }
 0x559   : > { %v2892_v42 = vpop.eup %2891 }
 0x55a   : > { %v1107_v43 = vsel %vm539_vm0, %v2892_v42, 0.0 }
 0x55b   : > { %1108 = vadd.xlane.f32.xlu0 %v1107_v43 }
 0x55d   : > { %v2894_v47 = vpop.eup %2893 }
 0x55e   : > { %v1101_v52 = vsel %vm539_vm0, %v2894_v47, 0.0 }
 0x564   : > { %1102 = vadd.xlane.f32.xlu1 %v1101_v52 }
 0x571   : > { %1236 = vrot.lane.b32.xlu0 %v3252_v49, %s3001_s28 }
 0x575   : > { %1242 = vrot.lane.b32.xlu1 %v3262_v1, %s3001_s28  ;;  %1228 = vrot.lane.b32.xlu0 %v3257_v51, %s3002_s29 }
 0x579   : > { %1230 = vrot.lane.b32.xlu1 %v3254_v50, %s3002_s29  ;;  %1232 = vrot.lane.b32.xlu0 %v3268_v6, %s3002_s29 }
 0x57d   : > { %1234 = vrot.lane.b32.xlu1 %v3266_v5, %s3002_s29 }
 0x5ac   : > { %v1094_v48 = vpop.xlane.xlu0 %1093 }
 0x5b0   : > { %v1088_v55 = vpop.xlane.xlu0 %1087 }
 0x5b4   : > { %v1097_v56 = vpop.xlane.xlu1 %1096 }
 0x5b5   : > { %2895 = vrcp.f32 %v1097_v56  ;;  %v686_v56 = vld [vmem:[%s3873_s7 + $0x50] sm:$0xff] }
 0x5b6   : > { %2897 = vrcp.f32 %v1088_v55 }
 0x5b7   : > { %2899 = vrcp.f32 %v1094_v48  ;;  %v684_v48 = vld [vmem:[%s3873_s7 + $0x40] sm:$0xff] }
 0x5b8   : > { %v1091_v57 = vpop.xlane.xlu1 %1090  ;;  %v1106_v2 = vpop.xlane.xlu0 %1105 }
 0x5b9   : > { %2901 = vrcp.f32 %v1091_v57 }
 0x5bc   : > { %v1100_v3 = vpop.xlane.xlu0 %1099  ;;  %v1239_v8 = vpop.permute.xlu1 %1238 }
 0x5bf   : > { %v2896_v58 = vpop.eup %2895 }
 0x5c0   : > { %v2898_v59 = vpop.eup %2897  ;;  %v1121_v62 = vmul.f32 %v2896_v58, %v2884_v22  ;;  %v1241_v44 = vpop.permute.xlu1 %1240  ;;  %v685_v58 = vld [vmem:[%s3873_s7 + $0x48] sm:$0xff] }
 0x5c1   : > { %v2900_v60 = vpop.eup %2899  ;;  %v1118_v51 = vmul.f32 %v2898_v59, %v3332_v17  ;;  %v1263_v53 = vsel %vm948_vm2, %v1241_v44, 0 }
 0x5c2   : > { %v1120_v6 = vmul.f32 %v2900_v60, %v3328_v45  ;;  %v1260_v45 = vsel %vm948_vm2, %v1239_v8, 0 }
 0x5c3   : > { %v2902_v61 = vpop.eup %2901 }
 0x5c4   : > { %v1119_v50 = vmul.f32 %v2902_v61, %v2886_v26  ;;  %v1127_v5 = vpack.c.bf16 %v1121_v62, %v1120_v6  ;;  %v687_v6 = vld [vmem:[%s3873_s7 + $0x58] sm:$0xff] }
 0x5c6   : > { %v1126_v38 = vpack.c.bf16 %v1119_v50, %v1118_v51 }
 0x5c8   : > { %2678 = vmatprep.mubr.msk.bf16.mxu0 %vm539_vm0, %v1126_v38 }
 0x5c9   : > { %2679 = vmatmul.mubr.msk.bf16.vlgmr.msra.gmra.mrb[8].mxu0 %vm539_vm0, %v1127_v5 }
 0x5e8   : > { %v1109_v9 = vpop.xlane.xlu0 %1108 }
 0x5e9   : > { %2903 = vrcp.f32 %v1109_v9  ;;  %v688_v9 = vld [vmem:[%s3873_s7 + $0x60] sm:$0xff] }
 0x5ea   : > { %2905 = vrcp.f32 %v1100_v3 }
 0x5eb   : > { %2907 = vrcp.f32 %v1106_v2 }
 0x5ec   : > { %v1237_v10 = vpop.permute.xlu0 %1236 }
 0x5ed   : > { %v1257_v11 = vsel %vm948_vm2, %v1237_v10, 0  ;;  %2846 = vmatprep.subr.msk.bf16.mxu0 %vm948_vm2, %v1237_v10  ;;  %v689_v10 = vld [vmem:[%s3873_s7 + $0x68] sm:$0xff] }
 0x5ee   : > { %2687 = vmatpush3.bf16.xpose.msra.mxu0 %v1257_v11  ;;  %v691_v11 = vld [vmem:[%s3873_s7 + $0x78] sm:$0xff] }
 0x5ef   : > { %2847 = vmatprep.subr.msk.bf16.mxu0 %vm948_vm2, %v1239_v8 }
 0x5f0   : > { %v1229_v29 = vpop.permute.xlu0 %1228 }
 0x5f1   : > { %v1103_v12 = vpop.xlane.xlu1 %1102 }
 0x5f2   : > { %2909 = vrcp.f32 %v1103_v12 }
 0x5f3   : > { %v2904_v13 = vpop.eup %2903 }
 0x5f4   : > { %v2906_v14 = vpop.eup %2905  ;;  %v1125_v17 = vmul.f32 %v2904_v13, %v2892_v42 }
 0x5f5   : > { %v2908_v15 = vpop.eup %2907  ;;  %v1122_v18 = vmul.f32 %v2906_v14, %v3342_v0  ;;  %v1243_v54 = vpop.permute.xlu1 %1242 }
 0x5f6   : > { %2689 = vmatpush3.bf16.xpose.msra.mxu0 %v1260_v45  ;;  %v1124_v22 = vmul.f32 %v2908_v15, %v3337_v63  ;;  %v1266_v30 = vsel %vm948_vm2, %v1243_v54, 0  ;;  %v1233_v0 = vpop.permute.xlu0 %1232  ;;  %v690_v15 = vld [vmem:[%s3873_s7 + $0x70] sm:$0xff] }
 0x5f7   : > { %2848 = vmatprep.subr.msk.bf16.mxu0 %vm948_vm2, %v1241_v44 }
 0x5f8   : > { %v1129_v26 = vpack.c.bf16 %v1125_v17, %v1124_v22 }
 0x5f9   : > { %v1231_v32 = vpop.permute.xlu1 %1230 }
 0x5fc   : > { %v2910_v16 = vpop.eup %2909 }
 0x5fd   : > { %v1123_v19 = vmul.f32 %v2910_v16, %v2894_v47  ;;  %v1235_v63 = vpop.permute.xlu1 %1234 }
 0x5fe   : > { %2691 = vmatpush3.bf16.xpose.msra.mxu0 %v1263_v53 }
 0x5ff   : > { %2849 = vmatprep.subr.msk.bf16.mxu0 %vm948_vm2, %v1243_v54  ;;  %v1128_v25 = vpack.c.bf16 %v1123_v19, %v1122_v18 }
 0x601   : > { %2682 = vmatprep.mubr.msk.bf16.mxu0 %vm539_vm0, %v1128_v25 }
 0x602   : > { %2683 = vmatmul.mubr.msk.bf16.gmra.mrb[12].mxu0 %vm539_vm0, %v1129_v26 }
 0x603   : > { %2694 = vmatprep.mubr.msk.bf16.mxu0 %vm948_vm2, %v1229_v29 }
 0x606   : > { %2693 = vmatpush3.bf16.xpose.msra.mxu0 %v1266_v30 }
 0x60d   : > { %2695 = vmatmul.mubr.msk.bf16.vlgmr.msra.gmra.mrb[16].mxu0 %vm948_vm2, %v1231_v32 }
 0x60e   : > { %2698 = vmatprep.mubr.msk.bf16.mxu0 %vm948_vm2, %v1233_v0 }
 0x615   : > { %2699 = vmatmul.mubr.msk.bf16.gmra.mrb[20].mxu0 %vm948_vm2, %v1235_v63 }
 0x69c   : > { %v3378_v34 = vpop.f32.mrb[8].mxu0 }
 0x69d   : > { %v3380_v7 = vpop.f32.mrb[9].mxu0 }
 0x69e   : > { %v3382_v35 = vpop.f32.mrb[10].mxu0 }
 0x69f   : > { %v1220_v36 = vpack.c.bf16 %v3382_v35, %v3378_v34  ;;  %v3386_v37 = vpop.f32.mrb[11].mxu0 }
 0x6a0   : > { %v1219_v39 = vpack.c.bf16 %v3386_v37, %v3380_v7  ;;  %v2495_v7 = vld [vmem:[%s3875_s9] ss:$0 sm:$0xff] }
 0x6d5   : > { %v3390_v40 = vpop.f32.mrb[12].mxu0 }
 0x6d6   : > { %v3392_v41 = vpop.f32.mrb[13].mxu0 }
 0x6d7   : > { %v3394_v42 = vpop.f32.mrb[14].mxu0 }
 0x6d8   : > { %v1222_v43 = vpack.c.bf16 %v3394_v42, %v3390_v40  ;;  %v3398_v47 = vpop.f32.mrb[15].mxu0 }
 0x6d9   : > { %v1221_v52 = vpack.c.bf16 %v3398_v47, %v3392_v41 }
 0x6e0   : > { %v2696_v55 = vpop.f32.mrb[16].mxu0 }
 0x6e1   : > { %v1302_v57 = vpop.f32.mrb[17].mxu0  ;;  %v1311_v62 = vadd.f32 %v2696_v55, %v686_v56 }
 0x6e2   : > { %v1303_v59 = vadd.f32 %v1302_v57, %v684_v48  ;;  %v2697_v60 = vpop.f32.mrb[18].mxu0 }
 0x6e3   : > { %v1305_v61 = vpop.f32.mrb[19].mxu0  ;;  %v1314_v5 = vadd.f32 %v2697_v60, %v687_v6  ;;  %v1339_v3 = vsel %vm539_vm0, %v1311_v62, -inf }
 0x6e4   : > { %v1306_v51 = vadd.f32 %v1305_v61, %v685_v58  ;;  %v1333_v50 = vsel %vm539_vm0, %v1303_v59, -inf }
 0x6e5   : > { %1334 = vmax.xlane.f32.xlu0 %v1333_v50  ;;  %v1342_v14 = vsel %vm539_vm0, %v1314_v5, -inf }
 0x6e6   : > { %v1336_v38 = vsel %vm539_vm0, %v1306_v51, -inf }
 0x6e7   : > { %1337 = vmax.xlane.f32.xlu1 %v1336_v38 }
 0x6e8   : > { %v2700_v2 = vpop.f32.mrb[20].mxu0 }
 0x6e9   : > { %1340 = vmax.xlane.f32.xlu0 %v1339_v3  ;;  %v1318_v8 = vpop.f32.mrb[21].mxu0  ;;  %v1327_v53 = vadd.f32 %v2700_v2, %v690_v15 }
 0x6ea   : > { %v2701_v44 = vpop.f32.mrb[22].mxu0  ;;  %v1319_v45 = vadd.f32 %v1318_v8, %v688_v9 }
 0x6eb   : > { %v1321_v12 = vpop.f32.mrb[23].mxu0  ;;  %v1330_v16 = vadd.f32 %v2701_v44, %v691_v11  ;;  %v1351_v54 = vsel %vm539_vm0, %v1327_v53, -inf }
 0x6ec   : > { %v3426_v13 = vadd.f32 %v1321_v12, %v689_v10  ;;  %v1345_v18 = vsel %vm539_vm0, %v1319_v45, -inf }
 0x6ed   : > { %1343 = vmax.xlane.f32.xlu0 %v1342_v14  ;;  %v1354_v19 = vsel %vm539_vm0, %v1330_v16, -inf }
 0x6ee   : > { %v1348_v17 = vsel %vm539_vm0, %v3426_v13, -inf }
 0x6ef   : > { %1349 = vmax.xlane.f32.xlu1 %v1348_v17 }
 0x6f1   : > { %1346 = vmax.xlane.f32.xlu0 %v1345_v18 }
 0x6f3   : > { %1355 = vmax.xlane.f32.xlu1 %v1354_v19 }
 0x6f5   : > { %1352 = vmax.xlane.f32.xlu0 %v1351_v54 }
 0x772   : > { %v1335_v22 = vpop.xlane.xlu0 %1334 }
 0x773   : > { %v1357_v25 = vsub.f32 %v1303_v59, %v1335_v22 }
 0x774   : > { %v1338_v26 = vpop.xlane.xlu1 %1337 }
 0x775   : > { %v1365_v32 = vmul.f32 1.442695, %v1357_v25  ;;  %v1358_v0 = vsub.f32 %v1306_v51, %v1338_v26 }
 0x776   : > { %v1341_v29 = vpop.xlane.xlu0 %1340 }
 0x777   : > { %v1359_v30 = vsub.f32 %v1311_v62, %v1341_v29  ;;  %v1367_v56 = vmul.f32 1.442695, %v1358_v0 }
 0x779   : > { %v1369_v63 = vmul.f32 1.442695, %v1359_v30 }
 0x77a   : > { %v1344_v48 = vpop.xlane.xlu0 %1343 }
 0x77b   : > { %2911 = vpow2.f32 %v1369_v63  ;;  %v1360_v55 = vsub.f32 %v1314_v5, %v1344_v48 }
 0x77c   : > { %2913 = vpow2.f32 %v1365_v32 }
 0x77d   : > { %v1371_v57 = vmul.f32 1.442695, %v1360_v55 }
 0x77e   : > { %v1347_v58 = vpop.xlane.xlu0 %1346 }
 0x77f   : > { %2915 = vpow2.f32 %v1371_v57  ;;  %v1361_v60 = vsub.f32 %v1319_v45, %v1347_v58  ;;  %v1350_v45 = vpop.xlane.xlu1 %1349 }
 0x780   : > { %2917 = vpow2.f32 %v1367_v56  ;;  %v1362_v17 = vsub.f32 %v3426_v13, %v1350_v45 }
 0x781   : > { %v1373_v59 = vmul.f32 1.442695, %v1361_v60  ;;  %v694_v60 = vld [vmem:[%s3874_s8 + $0x10] sm:$0xff] }
 0x782   : > { %v1353_v61 = vpop.xlane.xlu0 %1352  ;;  %v1375_v18 = vmul.f32 1.442695, %v1362_v17 }
 0x783   : > { %v1363_v50 = vsub.f32 %v1327_v53, %v1353_v61  ;;  %v1356_v14 = vpop.xlane.xlu1 %1355  ;;  %v695_v61 = vld [vmem:[%s3874_s8 + $0x18] sm:$0xff] }
 0x784   : > { %v1364_v15 = vsub.f32 %v1330_v16, %v1356_v14 }
 0x785   : > { %v3437_v6 = vpop.eup %2911  ;;  %v1377_v38 = vmul.f32 1.442695, %v1363_v50 }
 0x786   : > { %v1387_v62 = vsel %vm539_vm0, %v3437_v6, 0.0  ;;  %v2914_v51 = vpop.eup %2913  ;;  %v1379_v53 = vmul.f32 1.442695, %v1364_v15 }
 0x787   : > { %2919 = vpow2.f32 %v1377_v38  ;;  %1388 = vadd.xlane.f32.xlu0 %v1387_v62  ;;  %v1381_v2 = vsel %vm539_vm0, %v2914_v51, 0.0  ;;  %v1518_v38 = vpack.c.bf16 %v695_v61, %v694_v60 }
 0x788   : > { %2921 = vpow2.f32 %v1373_v59 }
 0x789   : > { %v3441_v5 = vpop.eup %2915  ;;  %2923 = vpow2.f32 %v1379_v53  ;;  %v693_v53 = vld [vmem:[%s3874_s8 + $0x8] sm:$0xff] }
 0x78a   : > { %v1390_v3 = vsel %vm539_vm0, %v3441_v5, 0.0  ;;  %v2918_v8 = vpop.eup %2917  ;;  %2925 = vpow2.f32 %v1375_v18 }
 0x78b   : > { %1382 = vadd.xlane.f32.xlu0 %v1381_v2  ;;  %1391 = vadd.xlane.f32.xlu1 %v1390_v3  ;;  %v1384_v9 = vsel %vm539_vm0, %v2918_v8, 0.0 }
 0x78f   : > { %1385 = vadd.xlane.f32.xlu1 %v1384_v9 }
 0x791   : > { %v3447_v10 = vpop.eup %2919 }
 0x792   : > { %v1399_v44 = vsel %vm539_vm0, %v3447_v10, 0.0  ;;  %v3451_v11 = vpop.eup %2921 }
 0x793   : > { %1400 = vadd.xlane.f32.xlu0 %v1399_v44  ;;  %v1393_v12 = vsel %vm539_vm0, %v3451_v11, 0.0  ;;  %v2924_v19 = vpop.eup %2923 }
 0x794   : > { %v1402_v54 = vsel %vm539_vm0, %v2924_v19, 0.0  ;;  %v2926_v22 = vpop.eup %2925 }
 0x797   : > { %1394 = vadd.xlane.f32.xlu0 %v1393_v12 }
 0x7a0   : > { %1427 = vrot.lane.b32.xlu1 %v3250_v46, %s3003_s19  ;;  %v1396_v46 = vsel %vm539_vm0, %v2926_v22, 0.0 }
 0x7a4   : > { %1429 = vrot.lane.b32.xlu1 %v3264_v4, %s3003_s19 }
 0x7ad   : > { %1425 = vrot.lane.b32.xlu0 %v3252_v49, %s3003_s19 }
 0x7c8   : > { %1403 = vadd.xlane.f32.xlu1 %v1402_v54 }
 0x7cc   : > { %1397 = vadd.xlane.f32.xlu1 %v1396_v46 }
 0x7dd   : > { %1431 = vrot.lane.b32.xlu1 %v3262_v1, %s3003_s19 }
 0x814   : > { %v1389_v4 = vpop.xlane.xlu0 %1388 }
 0x818   : > { %v1392_v49 = vpop.xlane.xlu1 %1391  ;;  %v1383_v25 = vpop.xlane.xlu0 %1382 }
 0x819   : > { %2927 = vrcp.f32 %v1383_v25 }
 0x81c   : > { %v1386_v16 = vpop.xlane.xlu1 %1385 }
 0x81d   : > { %2929 = vrcp.f32 %v1386_v16 }
 0x81e   : > { %2931 = vrcp.f32 %v1392_v49 }
 0x81f   : > { %2933 = vrcp.f32 %v1389_v4 }
 0x820   : > { %v1401_v13 = vpop.xlane.xlu0 %1400  ;;  %v1428_v32 = vpop.permute.xlu1 %1427 }
 0x823   : > { %v2928_v29 = vpop.eup %2927 }
 0x824   : > { %v1395_v26 = vpop.xlane.xlu0 %1394  ;;  %v1413_v63 = vmul.f32 %v2928_v29, %v2914_v51  ;;  %v1430_v1 = vpop.permute.xlu1 %1429 }
 0x827   : > { %v2930_v30 = vpop.eup %2929 }
 0x828   : > { %v1426_v0 = vpop.permute.xlu0 %1425  ;;  %v1414_v48 = vmul.f32 %v2930_v30, %v2918_v8  ;;  %v2932_v57 = vpop.eup %2931 }
 0x829   : > { %2702 = vmatprep.subr.bf16.mxu1 %v1426_v0  ;;  %v2934_v50 = vpop.eup %2933  ;;  %v1416_v59 = vmul.f32 %v2932_v57, %v3441_v5 }
 0x82a   : > { %2703 = vmatpush3.bf16.msra.mxu1 %v1426_v0  ;;  %v1421_v55 = vpack.c.bf16 %v1414_v48, %v1413_v63  ;;  %v1415_v51 = vmul.f32 %v2934_v50, %v3437_v6  ;;  %v692_v6 = vld [vmem:[%s3874_s8] sm:$0xff] }
 0x82b   : > { %2704 = vmatprep.subr.bf16.mxu1 %v1428_v32  ;;  %v1223_v18 = vpack.c.bf16 %v693_v53, %v692_v6 }
 0x82c   : > { %2710 = vmatprep.mubr.msk.bf16.mxu1 %vm539_vm0, %v1421_v55  ;;  %v1422_v2 = vpack.c.bf16 %v1416_v59, %v1415_v51 }
 0x82e   : > { %2705 = vmatpush3.bf16.msra.mxu1 %v1428_v32 }
 0x82f   : > { %2706 = vmatprep.subr.bf16.mxu1 %v1430_v1 }
 0x832   : > { %2707 = vmatpush3.bf16.msra.mxu1 %v1430_v1 }
 0x855   : > { %v1404_v56 = vpop.xlane.xlu1 %1403 }
 0x856   : > { %2935 = vrcp.f32 %v1404_v56 }
 0x857   : > { %2937 = vrcp.f32 %v1395_v26 }
 0x858   : > { %2939 = vrcp.f32 %v1401_v13 }
 0x859   : > { %v1398_v58 = vpop.xlane.xlu1 %1397 }
 0x85a   : > { %2941 = vrcp.f32 %v1398_v58 }
 0x85d   : > { %v1432_v62 = vpop.permute.xlu1 %1431 }
 0x85e   : > { %2708 = vmatprep.subr.bf16.mxu1 %v1432_v62 }
 0x85f   : > { %2709 = vmatpush3.bf16.msra.mxu1 %v1432_v62 }
 0x860   : > { %2718 = vmatprep.subr.bf16.mxu1 %v1518_v38  ;;  %v2936_v3 = vpop.eup %2935 }
 0x861   : > { %v2938_v8 = vpop.eup %2937  ;;  %v1420_v12 = vmul.f32 %v2936_v3, %v2924_v19 }
 0x862   : > { %2711 = vmatmul.mubr.msk.bf16.vlgmr.msra.gmra.mrb[16].mxu1 %vm539_vm0, %v1422_v2  ;;  %v2940_v9 = vpop.eup %2939  ;;  %v1417_v45 = vmul.f32 %v2938_v8, %v3451_v11 }
 0x863   : > { %2719 = vmatpush3.bf16.msra.mxu1 %v1518_v38  ;;  %v1419_v5 = vmul.f32 %v2940_v9, %v3447_v10 }
 0x864   : > { %v2942_v44 = vpop.eup %2941  ;;  %2728 = vmatprep.subr.bf16.mxu1 %v1223_v18 }
 0x865   : > { %v1418_v14 = vmul.f32 %v2942_v44, %v2926_v22  ;;  %v1424_v17 = vpack.c.bf16 %v1420_v12, %v1419_v5 }
 0x867   : > { %v1423_v15 = vpack.c.bf16 %v1418_v14, %v1417_v45 }
 0x869   : > { %2714 = vmatprep.mubr.msk.bf16.mxu1 %vm539_vm0, %v1423_v15 }
 0x86a   : > { %2715 = vmatmul.mubr.msk.bf16.gmra.mrb[20].mxu1 %vm539_vm0, %v1424_v17 }
 0x935   : > { %v2712_v11 = vpop.f32.mrb[16].mxu1 }
 0x936   : > { %v1483_v19 = vpop.f32.mrb[17].mxu1 }
 0x937   : > { %v2713_v54 = vpop.f32.mrb[18].mxu1 }
 0x938   : > { %v1515_v10 = vpack.c.bf16 %v2713_v54, %v2712_v11  ;;  %v1486_v22 = vpop.f32.mrb[19].mxu1 }
 0x939   : > { %v1514_v46 = vpack.c.bf16 %v1486_v22, %v1483_v19 }
 0x93b   : > { %2720 = vmatprep.mubr.msk.bf16.mxu1 %vm948_vm2, %v1514_v46 }
 0x93c   : > { %2721 = vmatmul.mubr.msk.bf16.vlgmr.msra.gmra.mrb[24].mxu1 %vm948_vm2, %v1515_v10 }
 0x93d   : > { %v2716_v4 = vpop.f32.mrb[20].mxu1  ;;  %2729 = vmatpush3.bf16.msra.mxu1 %v1223_v18 }
 0x93e   : > { %v1499_v49 = vpop.f32.mrb[21].mxu1 }
 0x93f   : > { %v2717_v25 = vpop.f32.mrb[22].mxu1 }
 0x940   : > { %v1517_v16 = vpack.c.bf16 %v2717_v25, %v2716_v4  ;;  %v1502_v13 = vpop.f32.mrb[23].mxu1 }
 0x941   : > { %v1516_v26 = vpack.c.bf16 %v1502_v13, %v1499_v49 }
 0x943   : > { %2724 = vmatprep.mubr.msk.bf16.mxu1 %vm948_vm2, %v1516_v26 }
 0x944   : > { %2725 = vmatmul.mubr.msk.bf16.gmra.mrb[28].mxu1 %vm948_vm2, %v1517_v16 }
 0x945   : > { %2730 = vmatprep.mubr.msk.bf16.mxu1 %vm948_vm2, %v1219_v39 }
 0x94c   : > { %2731 = vmatmul.mubr.msk.bf16.vlgmr.msra.gmra.mrb[24].mxu1 %vm948_vm2, %v1220_v36 }
 0x94d   : > { %2734 = vmatprep.mubr.msk.bf16.mxu1 %vm948_vm2, %v1221_v52 }
 0x954   : > { %2735 = vmatmul.mubr.msk.bf16.gmra.mrb[28].mxu1 %vm948_vm2, %v1222_v43 }
 0xa1f   : > { %v2732_v29 = vpop.f32.mrb[24].mxu1 }
 0xa20   : > { %v1675_v37 = vadd.f32 %v2732_v29, %v3145_v24  ;;  %v1642_v34 = vpop.f32.mrb[25].mxu1 }
 0xa21   : > { %v1673_v35 = vadd.f32 %v1642_v34, %v3139_v21  ;;  %v2733_v36 = vpop.f32.mrb[26].mxu1 }
 0xa22   : > { %v1676_v39 = vadd.f32 %v2733_v36, %v3143_v23  ;;  %v1645_v41 = vpop.f32.mrb[27].mxu1  ;;  %v3511_v42 = vadd.f32 %v2495_v7, %v1675_v37 }
 0xa23   : > { %v3508_v47 = vadd.f32 %v2495_v7, %v1673_v35  ;;  %v1674_v40 = vadd.f32 %v3137_v20, %v1645_v41 }
 0xa24   : > { %v3520_v32 = vadd.f32 %v2495_v7, %v1676_v39  ;;  %v1725_v63 = vsel %vm697_vm1, %v3511_v42, 0.0 }
 0xa25   : > { %v3513_v43 = vadd.f32 %v2495_v7, %v1674_v40  ;;  %v1719_v52 = vsel %vm697_vm1, %v3508_v47, 0.0 }
 0xa26   : > { %1720 = vadd.xlane.f32.xlu0 %v1719_v52  ;;  %v1697_v52 = vld [vmem:[%s3878_s12] sm:$0xff] }
 0xa27   : > { %v2736_v24 = vpop.f32.mrb[28].mxu1  ;;  %v1722_v21 = vsel %vm697_vm1, %v3513_v43, 0.0 }
 0xa28   : > { %v1679_v30 = vadd.f32 %v2736_v24, %v3163_v33  ;;  %1723 = vadd.xlane.f32.xlu1 %v1722_v21  ;;  %v1658_v23 = vpop.f32.mrb[29].mxu1  ;;  %v1728_v33 = vsel %vm697_vm1, %v3520_v32, 0.0  ;;  %v1698_v24 = vld [vmem:[%s3878_s12 + $0x8] sm:$0xff] }
 0xa29   : > { %v1677_v20 = vadd.f32 %v1658_v23, %v3153_v28  ;;  %v2737_v0 = vpop.f32.mrb[30].mxu1  ;;  %v1855_v21 = vpack.c.bf16 %v1698_v24, %v1697_v52  ;;  %v1700_v23 = vld [vmem:[%s3878_s12 + $0x18] sm:$0xff] }
 0xa2a   : > { %v1680_v48 = vadd.f32 %v2737_v0, %v3159_v31  ;;  %1726 = vadd.xlane.f32.xlu0 %v1725_v63  ;;  %v1661_v55 = vpop.f32.mrb[31].mxu1  ;;  %v3537_v60 = vadd.f32 %v2495_v7, %v1679_v30  ;;  %v1699_v30 = vld [vmem:[%s3878_s12 + $0x10] sm:$0xff] }
 0xa2b   : > { %v1678_v1 = vadd.f32 %v3151_v27, %v1661_v55  ;;  %v3527_v56 = vadd.f32 %v2495_v7, %v1677_v20  ;;  %2738 = vmatprep.subr.bf16.mxu0 %v1855_v21  ;;  %v1856_v20 = vpack.c.bf16 %v1700_v23, %v1699_v30 }
 0xa2c   : > { %v3533_v58 = vadd.f32 %v2495_v7, %v1680_v48  ;;  %v1737_v61 = vsel %vm697_vm1, %v3537_v60, 0.0  ;;  %2739 = vmatpush3.bf16.msra.mxu0 %v1855_v21 }
 0xa2d   : > { %v3529_v57 = vadd.f32 %v2495_v7, %v1678_v1  ;;  %v1731_v31 = vsel %vm697_vm1, %v3527_v56, 0.0  ;;  %2740 = vmatprep.subr.bf16.mxu0 %v1856_v20 }
 0xa2e   : > { %1729 = vadd.xlane.f32.xlu0 %v1728_v33  ;;  %v1740_v27 = vsel %vm697_vm1, %v3533_v58, 0.0 }
 0xa2f   : > { %v1734_v28 = vsel %vm697_vm1, %v3529_v57, 0.0 }
 0xa30   : > { %1735 = vadd.xlane.f32.xlu1 %v1734_v28  ;;  %2741 = vmatpush3.bf16.msra.mxu0 %v1856_v20 }
 0xa32   : > { %1732 = vadd.xlane.f32.xlu0 %v1731_v31 }
 0xa34   : > { %1741 = vadd.xlane.f32.xlu1 %v1740_v27 }
 0xa36   : > { %1738 = vadd.xlane.f32.xlu0 %v1737_v61 }
 0xab3   : > { %v1721_v50 = vpop.xlane.xlu0 %1720 }
 0xab4   : > { %v1743_v59 = vmul.f32 0.03125, %v1721_v50 }
 0xab5   : > { %v1724_v38 = vpop.xlane.xlu1 %1723 }
 0xab6   : > { %v3546_v62 = vsub.f32 %v3508_v47, %v1743_v59  ;;  %v1744_v51 = vmul.f32 0.03125, %v1724_v38 }
 0xab7   : > { %v1727_v2 = vpop.xlane.xlu0 %1726 }
 0xab8   : > { %v3549_v3 = vsub.f32 %v3513_v43, %v1744_v51  ;;  %v1745_v8 = vmul.f32 0.03125, %v1727_v2  ;;  %v1759_v9 = vmul.f32 %v3546_v62, %v3546_v62 }
 0xaba   : > { %v3554_v44 = vsub.f32 %v3511_v42, %v1745_v8  ;;  %v1767_v12 = vsel %vm697_vm1, %v1759_v9, 0.0  ;;  %v1760_v45 = vmul.f32 %v3549_v3, %v3549_v3 }
 0xabb   : > { %v1730_v14 = vpop.xlane.xlu0 %1729  ;;  %1768 = vadd.xlane.f32.xlu0 %v1767_v12  ;;  %v2496_v12 = vld [vmem:[%s3876_s10] ss:$0 sm:$0xff] }
 0xabc   : > { %v1746_v5 = vmul.f32 0.03125, %v1730_v14  ;;  %v1770_v15 = vsel %vm697_vm1, %v1760_v45, 0.0  ;;  %v1761_v17 = vmul.f32 %v3554_v44, %v3554_v44 }
 0xabd   : > { %1771 = vadd.xlane.f32.xlu1 %v1770_v15  ;;  %v1736_v6 = vpop.xlane.xlu1 %1735 }
 0xabe   : > { %v3563_v53 = vsub.f32 %v3520_v32, %v1746_v5  ;;  %v1748_v18 = vmul.f32 0.03125, %v1736_v6  ;;  %v1773_v11 = vsel %vm697_vm1, %v1761_v17, 0.0 }
 0xabf   : > { %1774 = vadd.xlane.f32.xlu0 %v1773_v11  ;;  %v1733_v19 = vpop.xlane.xlu0 %1732 }
 0xac0   : > { %v3567_v54 = vsub.f32 %v3529_v57, %v1748_v18  ;;  %v1747_v10 = vmul.f32 0.03125, %v1733_v19  ;;  %v1762_v22 = vmul.f32 %v3563_v53, %v3563_v53 }
 0xac1   : > { %v1742_v46 = vpop.xlane.xlu1 %1741 }
 0xac2   : > { %v3572_v4 = vsub.f32 %v3527_v56, %v1747_v10  ;;  %v1750_v49 = vmul.f32 0.03125, %v1742_v46  ;;  %v1776_v25 = vsel %vm697_vm1, %v1762_v22, 0.0  ;;  %v1764_v16 = vmul.f32 %v3567_v54, %v3567_v54  ;;  %v2497_v46 = vld [vmem:[%s3877_s11] ss:$0 sm:$0xff] }
 0xac3   : > { %v1739_v13 = vpop.xlane.xlu0 %1738  ;;  %1777 = vadd.xlane.f32.xlu1 %v1776_v25 }
 0xac4   : > { %v3578_v26 = vsub.f32 %v3533_v58, %v1750_v49  ;;  %v1749_v29 = vmul.f32 0.03125, %v1739_v13  ;;  %v1763_v7 = vmul.f32 %v3572_v4, %v3572_v4  ;;  %v1782_v35 = vsel %vm697_vm1, %v1764_v16, 0.0 }
 0xac6   : > { %v3583_v37 = vsub.f32 %v3537_v60, %v1749_v29  ;;  %v1779_v34 = vsel %vm697_vm1, %v1763_v7, 0.0  ;;  %v1766_v36 = vmul.f32 %v3578_v26, %v3578_v26 }
 0xac7   : > { %1780 = vadd.xlane.f32.xlu0 %v1779_v34  ;;  %1783 = vadd.xlane.f32.xlu1 %v1782_v35 }
 0xac8   : > { %v1765_v39 = vmul.f32 %v3583_v37, %v3583_v37  ;;  %v1788_v40 = vsel %vm697_vm1, %v1766_v36, 0.0 }
 0xaca   : > { %v1785_v41 = vsel %vm697_vm1, %v1765_v39, 0.0 }
 0xacb   : > { %1786 = vadd.xlane.f32.xlu0 %v1785_v41  ;;  %1789 = vadd.xlane.f32.xlu1 %v1788_v40 }
 0xb48   : > { %v1769_v0 = vpop.xlane.xlu0 %1768 }
 0xb49   : > { %v1791_v63 = vmul.f32 0.03125, %v1769_v0 }
 0xb4a   : > { %v1772_v48 = vpop.xlane.xlu1 %1771 }
 0xb4b   : > { %v1799_v55 = vadd.f32 1e-05, %v1791_v63  ;;  %v1792_v1 = vmul.f32 0.03125, %v1772_v48 }
 0xb4c   : > { %v1775_v33 = vpop.xlane.xlu0 %1774 }
 0xb4d   : > { %2943 = vrsqrt.f32 %v1799_v55  ;;  %v1800_v28 = vadd.f32 1e-05, %v1792_v1  ;;  %v1793_v31 = vmul.f32 0.03125, %v1775_v33 }
 0xb4f   : > { %2945 = vrsqrt.f32 %v1800_v28  ;;  %v1801_v27 = vadd.f32 1e-05, %v1793_v31 }
 0xb50   : > { %v1778_v61 = vpop.xlane.xlu1 %1777 }
 0xb51   : > { %2947 = vrsqrt.f32 %v1801_v27  ;;  %v1794_v50 = vmul.f32 0.03125, %v1778_v61  ;;  %v1703_v27 = vld [vmem:[%s3880_s14 + $0x8] sm:$0xff]  ;;  %v1704_v61 = vld [vmem:[%s3880_s14 + $0x10] sm:$0xff] }
 0xb53   : > { %v1802_v59 = vadd.f32 1e-05, %v1794_v50  ;;  %v1705_v50 = vld [vmem:[%s3880_s14 + $0x18] sm:$0xff] }
 0xb54   : > { %v1781_v38 = vpop.xlane.xlu0 %1780  ;;  %v1784_v51 = vpop.xlane.xlu1 %1783 }
 0xb55   : > { %2949 = vrsqrt.f32 %v1802_v59  ;;  %v1795_v2 = vmul.f32 0.03125, %v1781_v38  ;;  %v1796_v8 = vmul.f32 0.03125, %v1784_v51  ;;  %v2153_v59 = vpack.c.bf16 %v1705_v50, %v1704_v61  ;;  %v1706_v38 = vld [vmem:[%s3880_s14 + $0x20] sm:$0xff]  ;;  %v1707_v51 = vld [vmem:[%s3880_s14 + $0x28] sm:$0xff] }
 0xb57   : > { %v2944_v9 = vpop.eup %2943  ;;  %v1803_v45 = vadd.f32 1e-05, %v1795_v2  ;;  %v1804_v14 = vadd.f32 1e-05, %v1796_v8  ;;  %v2154_v2 = vpack.c.bf16 %v1707_v51, %v1706_v38  ;;  %v1708_v8 = vld [vmem:[%s3880_s14 + $0x30] sm:$0xff] }
 0xb58   : > { %v1815_v5 = vmul.f32 %v2944_v9, %v3546_v62  ;;  %v1787_v15 = vpop.xlane.xlu0 %1786  ;;  %v1790_v17 = vpop.xlane.xlu1 %1789  ;;  %v1709_v9 = vld [vmem:[%s3880_s14 + $0x38] sm:$0xff] }
 0xb59   : > { %v2946_v6 = vpop.eup %2945  ;;  %2951 = vrsqrt.f32 %v1803_v45  ;;  %v1797_v18 = vmul.f32 0.03125, %v1787_v15  ;;  %v1798_v11 = vmul.f32 0.03125, %v1790_v17  ;;  %v1710_v45 = vld [vmem:[%s3880_s14 + $0x40] sm:$0xff]  ;;  %v1712_v15 = vld [vmem:[%s3880_s14 + $0x50] sm:$0xff]  ;;  %v1713_v17 = vld [vmem:[%s3880_s14 + $0x58] sm:$0xff] }
 0xb5a   : > { %v1816_v19 = vmul.f32 %v2946_v6, %v3549_v3  ;;  %2953 = vrsqrt.f32 %v1804_v14  ;;  %v1829_v10 = vmul.f32 %v2496_v12, %v1815_v5  ;;  %v1711_v14 = vld [vmem:[%s3880_s14 + $0x48] sm:$0xff]  ;;  %v2157_v6 = vpack.c.bf16 %v1713_v17, %v1712_v15 }
 0xb5b   : > { %v2948_v22 = vpop.eup %2947  ;;  %v1805_v49 = vadd.f32 1e-05, %v1797_v18  ;;  %v1806_v25 = vadd.f32 1e-05, %v1798_v11  ;;  %v2156_v5 = vpack.c.bf16 %v1711_v14, %v1710_v45  ;;  %v1714_v18 = vld [vmem:[%s3880_s14 + $0x60] sm:$0xff]  ;;  %v1715_v11 = vld [vmem:[%s3880_s14 + $0x68] sm:$0xff] }
 0xb5c   : > { %v1817_v16 = vmul.f32 %v2948_v22, %v3554_v44  ;;  %v1830_v62 = vmul.f32 %v2496_v12, %v1816_v19  ;;  %v1843_v13 = vadd.f32 %v2497_v46, %v1829_v10  ;;  %v2158_v19 = vpack.c.bf16 %v1715_v11, %v1714_v18  ;;  %v1716_v10 = vld [vmem:[%s3880_s14 + $0x70] sm:$0xff]  ;;  %v1717_v22 = vld [vmem:[%s3880_s14 + $0x78] sm:$0xff] }
 0xb5d   : > { %2955 = vrsqrt.f32 %v1805_v49  ;;  %v2498_v49 = vld [vmem:[%s3879_s13] ss:$0 sm:$0xff] }
 0xb5e   : > { %2957 = vrsqrt.f32 %v1806_v25  ;;  %v1844_v29 = vadd.f32 %v2497_v46, %v1830_v62  ;;  %v1831_v34 = vmul.f32 %v2496_v12, %v1817_v16 }
 0xb5f   : > { %v2950_v7 = vpop.eup %2949 }
 0xb60   : > { %v1818_v3 = vmul.f32 %v2950_v7, %v3563_v53  ;;  %v1851_v35 = vpack.c.bf16 %v1844_v29, %v1843_v13  ;;  %v1845_v40 = vadd.f32 %v2497_v46, %v1831_v34 }
 0xb62   : > { %v1832_v36 = vmul.f32 %v2496_v12, %v1818_v3  ;;  %2742 = vmatprep.mubr.msk.bf16.mxu0 %vm697_vm1, %v1851_v35 }
 0xb63   : > { %v2952_v39 = vpop.eup %2951 }
 0xb64   : > { %v2954_v41 = vpop.eup %2953  ;;  %v1846_v52 = vadd.f32 %v2497_v46, %v1832_v36  ;;  %v1819_v24 = vmul.f32 %v2952_v39, %v3572_v4 }
 0xb65   : > { %v1820_v44 = vmul.f32 %v2954_v41, %v3567_v54 }
 0xb66   : > { %v1852_v21 = vpack.c.bf16 %v1846_v52, %v1845_v40  ;;  %v1833_v30 = vmul.f32 %v2496_v12, %v1819_v24 }
 0xb67   : > { %v2956_v23 = vpop.eup %2955  ;;  %v1834_v20 = vmul.f32 %v2496_v12, %v1820_v44 }
 0xb68   : > { %v2958_v0 = vpop.eup %2957  ;;  %v1821_v63 = vmul.f32 %v2956_v23, %v3583_v37  ;;  %2743 = vmatmul.mubr.msk.bf16.vlgmr.msra.gmra.mrb[24].mxu0 %vm697_vm1, %v1852_v21  ;;  %v1847_v53 = vadd.f32 %v2497_v46, %v1833_v30  ;;  %v1702_v37 = vld [vmem:[%s3880_s14] sm:$0xff] }
 0xb69   : > { %v1822_v48 = vmul.f32 %v2958_v0, %v3578_v26  ;;  %v1848_v55 = vadd.f32 %v2497_v46, %v1834_v20  ;;  %v2152_v26 = vpack.c.bf16 %v1703_v27, %v1702_v37 }
 0xb6a   : > { %v1835_v1 = vmul.f32 %v2496_v12, %v1821_v63 }
 0xb6b   : > { %v1853_v33 = vpack.c.bf16 %v1848_v55, %v1847_v53  ;;  %v1836_v28 = vmul.f32 %v2496_v12, %v1822_v48  ;;  %2750 = vmatprep.subr.bf16.mxu0 %v2152_v26  ;;  %v2155_v12 = vpack.c.bf16 %v1709_v9, %v1708_v8 }
 0xb6c   : > { %v1849_v31 = vadd.f32 %v2497_v46, %v1835_v1  ;;  %2751 = vmatpush3.bf16.msra.mxu0 %v2152_v26 }
 0xb6d   : > { %2746 = vmatprep.mubr.msk.bf16.mxu0 %vm697_vm1, %v1853_v33  ;;  %v1850_v54 = vadd.f32 %v2497_v46, %v1836_v28  ;;  %2752 = vmatprep.subr.bf16.mxu0 %v2153_v59  ;;  %v2159_v46 = vpack.c.bf16 %v1717_v22, %v1716_v10 }
 0xb6f   : > { %v1854_v4 = vpack.c.bf16 %v1850_v54, %v1849_v31 }
 0xb70   : > { %2753 = vmatpush3.bf16.msra.mxu0 %v2153_v59 }
 0xb71   : > { %2747 = vmatmul.mubr.msk.bf16.gmra.mrb[28].mxu0 %vm697_vm1, %v1854_v4  ;;  %2754 = vmatprep.subr.bf16.mxu0 %v2154_v2 }
 0xb74   : > { %2755 = vmatpush3.bf16.msra.mxu0 %v2154_v2 }
 0xb75   : > { %2756 = vmatprep.subr.bf16.mxu0 %v2155_v12 }
 0xb78   : > { %2757 = vmatpush3.bf16.msra.mxu0 %v2155_v12 }
 0xb79   : > { %2758 = vmatprep.subr.bf16.mxu0 %v2156_v5 }
 0xb7c   : > { %2759 = vmatpush3.bf16.msra.mxu0 %v2156_v5 }
 0xb7d   : > { %2760 = vmatprep.subr.bf16.mxu0 %v2157_v6 }
 0xb80   : > { %2761 = vmatpush3.bf16.msra.mxu0 %v2157_v6 }
 0xb81   : > { %2762 = vmatprep.subr.bf16.mxu0 %v2158_v19 }
 0xb84   : > { %2763 = vmatpush3.bf16.msra.mxu0 %v2158_v19 }
 0xb85   : > { %2764 = vmatprep.subr.bf16.mxu0 %v2159_v46 }
 0xb88   : > { %2765 = vmatpush3.bf16.msra.mxu0 %v2159_v46 }
 0xc3b   : > { %v2744_v25 = vpop.f32.mrb[24].mxu0 }
 0xc3c   : > { %v1918_v16 = vadd.f32 %v2744_v25, %v2498_v49  ;;  %v1909_v62 = vpop.f32.mrb[25].mxu0 }
 0xc3d   : > { %v3674_v13 = vadd.f32 %v2498_v49, %v1909_v62  ;;  %v2745_v29 = vpop.f32.mrb[26].mxu0 }
 0xc3e   : > { %v3676_v7 = vmul.f32 0.70710677, %v1918_v16  ;;  %v3678_v34 = vadd.f32 %v2745_v29, %v2498_v49  ;;  %v1912_v3 = vpop.f32.mrb[27].mxu0  ;;  %v3718_v14 = vmul.f32 0.5, %v1918_v16 }
 0xc3f   : > { %v3681_v35 = vmul.f32 0.70710677, %v3674_v13  ;;  %v3683_v36 = vadd.f32 %v2498_v49, %v1912_v3 }
 0xc40   : > { %v1958_v39 = vand.u32 2147483647, %v3676_v7  ;;  %v3687_v41 = vmul.f32 0.70710677, %v3678_v34  ;;  %vm2110_vm3 = vcmp.lt.f32.partialorder %v3676_v7, 0.0 }
 0xc41   : > { %v1956_v40 = vand.u32 2147483647, %v3681_v35  ;;  %v3691_v52 = vmul.f32 0.70710677, %v3683_v36  ;;  %vm2108_vm4 = vcmp.lt.f32.partialorder %v3681_v35, 0.0 }
 0xc42   : > { %v1966_v24 = vmul.f32 0.3275911, %v1958_v39  ;;  %v1959_v44 = vand.u32 2147483647, %v3687_v41  ;;  %v2062_v26 = vsub.f32 0.0, %v1958_v39  ;;  %vm2111_vm5 = vcmp.lt.f32.partialorder %v3687_v41, 0.0 }
 0xc43   : > { %v1964_v21 = vmul.f32 0.3275911, %v1956_v40  ;;  %v1957_v30 = vand.u32 2147483647, %v3691_v52  ;;  %v2060_v59 = vsub.f32 0.0, %v1956_v40  ;;  %vm2109_vm6 = vcmp.lt.f32.partialorder %v3691_v52, 0.0 }
 0xc44   : > { %v1974_v23 = vadd.f32 1.0, %v1966_v24  ;;  %v1967_v20 = vmul.f32 0.3275911, %v1959_v44  ;;  %v2748_v0 = vpop.f32.mrb[28].mxu0  ;;  %v2063_v51 = vsub.f32 0.0, %v1959_v44  ;;  %v2070_v5 = vmul.f32 %v2062_v26, %v1958_v39 }
 0xc45   : > { %v1972_v63 = vadd.f32 1.0, %v1964_v21  ;;  %v1965_v53 = vmul.f32 0.3275911, %v1957_v30  ;;  %v1925_v48 = vpop.f32.mrb[29].mxu0  ;;  %v3695_v31 = vadd.f32 %v2748_v0, %v2498_v49  ;;  %v2061_v2 = vsub.f32 0.0, %v1957_v30 }
 0xc46   : > { %2959 = vrcp.f32 %v1974_v23  ;;  %v1975_v55 = vadd.f32 1.0, %v1967_v20  ;;  %v2749_v1 = vpop.f32.mrb[30].mxu0  ;;  %v3697_v54 = vadd.f32 %v2498_v49, %v1925_v48  ;;  %v2068_v18 = vmul.f32 %v2060_v59, %v1956_v40 }
 0xc47   : > { %2961 = vrcp.f32 %v1972_v63  ;;  %v1928_v33 = vpop.f32.mrb[31].mxu0  ;;  %v1973_v28 = vadd.f32 1.0, %v1965_v53  ;;  %v3699_v4 = vadd.f32 %v2749_v1, %v2498_v49  ;;  %v3702_v37 = vmul.f32 0.70710677, %v3695_v31 }
 0xc48   : > { %2963 = vrcp.f32 %v1975_v55  ;;  %v3704_v27 = vadd.f32 %v2498_v49, %v1928_v33  ;;  %v3707_v61 = vmul.f32 0.70710677, %v3697_v54  ;;  %v2071_v49 = vmul.f32 %v2063_v51, %v1959_v44 }
 0xc49   : > { %v3710_v50 = vmul.f32 0.70710677, %v3699_v4  ;;  %2965 = vrcp.f32 %v1973_v28  ;;  %v1962_v38 = vand.u32 2147483647, %v3702_v37  ;;  %v2069_v25 = vmul.f32 %v2061_v2, %v1957_v30 }
 0xc4a   : > { %v1960_v8 = vand.u32 2147483647, %v3707_v61  ;;  %v3716_v45 = vmul.f32 0.70710677, %v3704_v27  ;;  %v2080_v24 = vmul.f32 1.442695, %v2070_v5 }
 0xc4b   : > { %v1963_v9 = vand.u32 2147483647, %v3710_v50  ;;  %v1970_v12 = vmul.f32 0.3275911, %v1962_v38  ;;  %v2066_v19 = vsub.f32 0.0, %v1962_v38  ;;  %vm2114_vm7 = vcmp.lt.f32.partialorder %v3702_v37, 0.0 }
 0xc4c   : > { %v1968_v15 = vmul.f32 0.3275911, %v1960_v8  ;;  %v1961_v10 = vand.u32 2147483647, %v3716_v45  ;;  %v2064_v29 = vsub.f32 0.0, %v1960_v8  ;;  %vm2115_vm8 = vcmp.lt.f32.partialorder %v3710_v50, 0.0 }
 0xc4d   : > { %v1971_v17 = vmul.f32 0.3275911, %v1963_v9  ;;  %v1978_v11 = vadd.f32 1.0, %v1970_v12  ;;  %v2076_v20 = vmul.f32 1.442695, %v2068_v18  ;;  %v2074_v0 = vmul.f32 %v2066_v19, %v1962_v38 }
 0xc4e   : > { %v1976_v62 = vadd.f32 1.0, %v1968_v15  ;;  %v1969_v40 = vmul.f32 0.3275911, %v1961_v10  ;;  %v2067_v63 = vsub.f32 0.0, %v1963_v9  ;;  %v2082_v30 = vmul.f32 1.442695, %v2071_v49 }
 0xc4f   : > { %2967 = vrcp.f32 %v1978_v11  ;;  %v1979_v3 = vadd.f32 1.0, %v1971_v17  ;;  %v2078_v33 = vmul.f32 1.442695, %v2069_v25  ;;  %v2072_v28 = vmul.f32 %v2064_v29, %v1960_v8 }
 0xc50   : > { %v3720_v6 = vpop.eup %2959  ;;  %2969 = vrcp.f32 %v1976_v62  ;;  %v1977_v48 = vadd.f32 1.0, %v1969_v40  ;;  %v2088_v2 = vmul.f32 1.442695, %v2074_v0  ;;  %v2075_v12 = vmul.f32 %v2067_v63, %v1963_v9 }
 0xc51   : > { %v3723_v22 = vpop.eup %2961  ;;  %v1990_v46 = vmul.f32 1.0614054, %v3720_v6  ;;  %2971 = vrcp.f32 %v1979_v3  ;;  %v2084_v8 = vmul.f32 1.442695, %v2072_v28  ;;  %v2065_v11 = vsub.f32 0.0, %v1961_v10 }
 0xc52   : > { %v1988_v16 = vmul.f32 1.0614054, %v3723_v22  ;;  %v3727_v21 = vpop.eup %2963  ;;  %2973 = vpow2.f32 %v2080_v24  ;;  %v3742_v9 = vmul.f32 0.5, %v3674_v13  ;;  %vm2112_vm9 = vcmp.lt.f32.partialorder %v3707_v61, 0.0 }
 0xc53   : > { %v1998_v39 = vadd.f32 -1.4531521, %v1990_v46  ;;  %v1991_v44 = vmul.f32 1.0614054, %v3727_v21  ;;  %v3731_v55 = vpop.eup %2965  ;;  %2975 = vrcp.f32 %v1977_v48  ;;  %v2073_v0 = vmul.f32 %v2065_v11, %v1961_v10 }
 0xc54   : > { %v1996_v23 = vadd.f32 -1.4531521, %v1988_v16  ;;  %v1989_v51 = vmul.f32 1.0614054, %v3731_v55  ;;  %2977 = vpow2.f32 %v2076_v20  ;;  %v2090_v16 = vmul.f32 1.442695, %v2075_v12 }
 0xc55   : > { %v2006_v53 = vmul.f32 %v3720_v6, %v1998_v39  ;;  %v1999_v59 = vadd.f32 -1.4531521, %v1991_v44  ;;  %2979 = vpow2.f32 %v2082_v30  ;;  %vm2113_vm10 = vcmp.lt.f32.partialorder %v3716_v45, 0.0 }
 0xc56   : > { %v2004_v1 = vmul.f32 %v3723_v22, %v1996_v23  ;;  %v1997_v17 = vadd.f32 -1.4531521, %v1989_v51  ;;  %2981 = vpow2.f32 %v2078_v33  ;;  %v1944_v50 = vmul.f32 0.5, %v3697_v54  ;;  %v2503_v54 = vld [vmem:[%s3881_s15] ss:$0 sm:$0xff] }
 0xc57   : > { %v2014_v26 = vadd.f32 1.4214138, %v2006_v53  ;;  %v2007_v15 = vmul.f32 %v3727_v21, %v1999_v59  ;;  %2983 = vpow2.f32 %v2088_v2 }
 0xc58   : > { %v2012_v38 = vadd.f32 1.4214138, %v2004_v1  ;;  %v2005_v49 = vmul.f32 %v3731_v55, %v1997_v17  ;;  %2985 = vpow2.f32 %v2084_v8  ;;  %v3756_v1 = vmul.f32 0.5, %v3678_v34 }
 0xc59   : > { %v2022_v5 = vmul.f32 %v3720_v6, %v2014_v26  ;;  %v2015_v46 = vadd.f32 1.4214138, %v2007_v15  ;;  %v3739_v25 = vpop.eup %2967  ;;  %2987 = vpow2.f32 %v2090_v16 }
 0xc5a   : > { %v2020_v18 = vmul.f32 %v3723_v22, %v2012_v38  ;;  %v3744_v29 = vpop.eup %2969  ;;  %v2013_v24 = vadd.f32 1.4214138, %v2005_v49  ;;  %v1994_v40 = vmul.f32 1.0614054, %v3739_v25 }
 0xc5b   : > { %v2030_v19 = vadd.f32 -0.28449672, %v2022_v5  ;;  %v2023_v39 = vmul.f32 %v3727_v21, %v2015_v46  ;;  %v1992_v20 = vmul.f32 1.0614054, %v3744_v29  ;;  %v3752_v30 = vpop.eup %2971  ;;  %v2086_v5 = vmul.f32 1.442695, %v2073_v0 }
 0xc5c   : > { %v2028_v62 = vadd.f32 -0.28449672, %v2020_v18  ;;  %v2021_v53 = vmul.f32 %v3731_v55, %v2013_v24  ;;  %v2002_v44 = vadd.f32 -1.4531521, %v1994_v40  ;;  %v2974_v28 = vpop.eup %2973  ;;  %v1995_v34 = vmul.f32 1.0614054, %v3752_v30 }
 0xc5d   : > { %v2038_v3 = vmul.f32 %v3720_v6, %v2030_v19  ;;  %v2031_v63 = vadd.f32 -0.28449672, %v2023_v39  ;;  %v2000_v33 = vadd.f32 -1.4531521, %v1992_v20  ;;  %v3762_v38 = vpop.eup %2975  ;;  %2989 = vpow2.f32 %v2086_v5 }
 0xc5e   : > { %v2036_v23 = vmul.f32 %v3723_v22, %v2028_v62  ;;  %v2029_v59 = vadd.f32 -0.28449672, %v2021_v53  ;;  %v2010_v51 = vmul.f32 %v3739_v25, %v2002_v44  ;;  %v2978_v15 = vpop.eup %2977  ;;  %v2003_v49 = vadd.f32 -1.4531521, %v1995_v34 }
 0xc5f   : > { %v2046_v13 = vadd.f32 0.2548296, %v2038_v3  ;;  %v2039_v10 = vmul.f32 %v3727_v21, %v2031_v63  ;;  %v2008_v12 = vmul.f32 %v3744_v29, %v2000_v33  ;;  %v2980_v11 = vpop.eup %2979  ;;  %v1993_v62 = vmul.f32 1.0614054, %v3762_v38 }
 0xc60   : > { %v2044_v48 = vadd.f32 0.2548296, %v2036_v23  ;;  %v2018_v8 = vadd.f32 1.4214138, %v2010_v51  ;;  %v2011_v0 = vmul.f32 %v3752_v30, %v2003_v49 }
 0xc61   : > { %v2054_v26 = vmul.f32 %v3720_v6, %v2046_v13  ;;  %v2047_v18 = vadd.f32 0.2548296, %v2039_v10  ;;  %v2037_v6 = vmul.f32 %v3731_v55, %v2029_v59  ;;  %v2016_v46 = vadd.f32 1.4214138, %v2008_v12 }
 0xc62   : > { %v2052_v2 = vmul.f32 %v3723_v22, %v2044_v48  ;;  %v2982_v22 = vpop.eup %2981  ;;  %v2026_v24 = vmul.f32 %v3739_v25, %v2018_v8  ;;  %v2001_v13 = vadd.f32 -1.4531521, %v1993_v62  ;;  %v2019_v10 = vadd.f32 1.4214138, %v2011_v0 }
 0xc63   : > { %v2094_v17 = vmul.f32 %v2974_v28, %v2054_v26  ;;  %v2055_v3 = vmul.f32 %v3727_v21, %v2047_v18  ;;  %v2045_v39 = vadd.f32 0.2548296, %v2037_v6  ;;  %v2984_v40 = vpop.eup %2983  ;;  %v2024_v20 = vmul.f32 %v3744_v29, %v2016_v46 }
 0xc64   : > { %v2092_v19 = vmul.f32 %v2978_v15, %v2052_v2  ;;  %v2034_v48 = vadd.f32 -0.28449672, %v2026_v24  ;;  %v2986_v33 = vpop.eup %2985  ;;  %v2009_v21 = vmul.f32 %v3762_v38, %v2001_v13 }
 0xc65   : > { %v2102_v16 = vsub.f32 1.0, %v2094_v17  ;;  %v2095_v53 = vmul.f32 %v2980_v11, %v2055_v3  ;;  %v2053_v44 = vmul.f32 %v3731_v55, %v2045_v39  ;;  %v2032_v26 = vadd.f32 -0.28449672, %v2024_v20  ;;  %v2988_v34 = vpop.eup %2987 }
 0xc66   : > { %v2100_v23 = vsub.f32 1.0, %v2092_v19  ;;  %v2042_v12 = vmul.f32 %v3739_v25, %v2034_v48  ;;  %v2027_v17 = vmul.f32 %v3752_v30, %v2019_v10  ;;  %v2017_v46 = vadd.f32 1.4214138, %v2009_v21 }
 0xc67   : > { %v2118_v63 = vsub.f32 0.0, %v2102_v16  ;;  %v2103_v51 = vsub.f32 1.0, %v2095_v53  ;;  %v2093_v2 = vmul.f32 %v2982_v22, %v2053_v44  ;;  %v2040_v55 = vmul.f32 %v3744_v29, %v2032_v26 }
 0xc68   : > { %v2116_v28 = vsub.f32 0.0, %v2100_v23  ;;  %v2050_v11 = vadd.f32 0.2548296, %v2042_v12  ;;  %v2035_v19 = vadd.f32 -0.28449672, %v2027_v17  ;;  %v2025_v24 = vmul.f32 %v3762_v38, %v2017_v46 }
 0xc69   : > { %v2126_v59 = vsel %vm2110_vm3, %v2118_v63, %v2102_v16  ;;  %v2119_v6 = vsub.f32 0.0, %v2103_v51  ;;  %v2101_v8 = vsub.f32 1.0, %v2093_v2  ;;  %v2048_v7 = vadd.f32 0.2548296, %v2040_v55 }
 0xc6a   : > { %v2124_v15 = vsel %vm2108_vm4, %v2116_v28, %v2100_v23  ;;  %v2134_v18 = vadd.f32 1.0, %v2126_v59  ;;  %v2058_v22 = vmul.f32 %v3739_v25, %v2050_v11  ;;  %v2043_v39 = vmul.f32 %v3752_v30, %v2035_v19 }
 0xc6b   : > { %v2132_v49 = vadd.f32 1.0, %v2124_v15  ;;  %v2127_v62 = vsel %vm2111_vm5, %v2119_v6, %v2103_v51  ;;  %v2117_v35 = vsub.f32 0.0, %v2101_v8  ;;  %v2056_v3 = vmul.f32 %v3744_v29, %v2048_v7 }
 0xc6c   : > { %v2135_v16 = vadd.f32 1.0, %v2127_v62  ;;  %v2142_v23 = vmul.f32 %v2134_v18, %v3718_v14  ;;  %v1941_v20 = vmul.f32 0.5, %v3683_v36  ;;  %v2098_v0 = vmul.f32 %v2984_v40, %v2058_v22  ;;  %v2990_v40 = vpop.eup %2989 }
 0xc6d   : > { %v2125_v5 = vsel %vm2109_vm6, %v2117_v35, %v2101_v8  ;;  %v2096_v63 = vmul.f32 %v2986_v33, %v2056_v3  ;;  %v2051_v25 = vadd.f32 0.2548296, %v2043_v39  ;;  %v2033_v44 = vadd.f32 -0.28449672, %v2025_v24 }
 0xc6e   : > { %v2143_v41 = vmul.f32 %v2135_v16, %v3756_v1  ;;  %v2133_v13 = vadd.f32 1.0, %v2125_v5  ;;  %v2106_v53 = vsub.f32 1.0, %v2098_v0  ;;  %v2140_v29 = vmul.f32 %v2132_v49, %v3742_v9 }
 0xc6f   : > { %v2059_v26 = vmul.f32 %v3752_v30, %v2051_v25  ;;  %v2104_v10 = vsub.f32 1.0, %v2096_v63  ;;  %v2041_v36 = vmul.f32 %v3762_v38, %v2033_v44  ;;  %v1946_v15 = vmul.f32 0.5, %v3695_v31 }
 0xc70   : > { %v2149_v48 = vpack.c.bf16 %v2143_v41, %v2142_v23  ;;  %v2141_v28 = vmul.f32 %v2133_v13, %v1941_v20  ;;  %v2122_v14 = vsub.f32 0.0, %v2106_v53  ;;  %v1947_v55 = vmul.f32 0.5, %v3699_v4  ;;  %v2247_v4 = vld [vmem:[%s3868_s2] sm:$0xff] }
 0xc71   : > { %v2099_v52 = vmul.f32 %v2988_v34, %v2059_v26  ;;  %v2049_v1 = vadd.f32 0.2548296, %v2041_v36  ;;  %v2120_v51 = vsub.f32 0.0, %v2104_v10  ;;  %v1945_v31 = vmul.f32 0.5, %v3704_v27  ;;  %2790 = vmatprep.mubr.msk.f32.mxu1 %vm539_vm0, %v2247_v4  ;;  %v2252_v36 = vld [vmem:[%s3868_s2 + $0x28] sm:$0xff] }
 0xc72   : > { %v2148_v21 = vpack.c.bf16 %v2141_v28, %v2140_v29  ;;  %v2130_v33 = vsel %vm2114_vm7, %v2122_v14, %v2106_v53 }
 0xc73   : > { %v2107_v59 = vsub.f32 1.0, %v2099_v52  ;;  %v2057_v9 = vmul.f32 %v3762_v38, %v2049_v1  ;;  %v2138_v12 = vadd.f32 1.0, %v2130_v33  ;;  %v2128_v37 = vsel %vm2112_vm9, %v2120_v51, %v2104_v10  ;;  %v2253_v52 = vld [vmem:[%s3868_s2 + $0x30] sm:$0xff] }
 0xc74   : > { %2766 = vmatprep.mubr.bf16.mxu0 %v2148_v21  ;;  %v2136_v38 = vadd.f32 1.0, %v2128_v37  ;;  %v2254_v21 = vld [vmem:[%s3868_s2 + $0x38] sm:$0xff] }
 0xc75   : > { %2767 = vmatmul.mubr.bf16.vlgmr.msra.gmra.mrb[32].mxu0 %v2149_v48  ;;  %v2123_v2 = vsub.f32 0.0, %v2107_v59  ;;  %v2097_v30 = vmul.f32 %v2990_v40, %v2057_v9  ;;  %v2146_v6 = vmul.f32 %v2138_v12, %v1946_v15 }
 0xc76   : > { %v2144_v61 = vmul.f32 %v2136_v38, %v1944_v50 }
 0xc77   : > { %v2131_v34 = vsel %vm2115_vm8, %v2123_v2, %v2107_v59  ;;  %v2105_v18 = vsub.f32 1.0, %v2097_v30 }
 0xc78   : > { %v2139_v17 = vadd.f32 1.0, %v2131_v34 }
 0xc79   : > { %v2121_v11 = vsub.f32 0.0, %v2105_v18 }
 0xc7a   : > { %v2147_v8 = vmul.f32 %v2139_v17, %v1947_v55 }
 0xc7b   : > { %v2129_v7 = vsel %vm2113_vm10, %v2121_v11, %v2105_v18 }
 0xc7c   : > { %v2151_v19 = vpack.c.bf16 %v2147_v8, %v2146_v6  ;;  %v2137_v46 = vadd.f32 1.0, %v2129_v7 }
 0xc7e   : > { %v2145_v49 = vmul.f32 %v2137_v46, %v1945_v31 }
 0xc80   : > { %v2150_v62 = vpack.c.bf16 %v2145_v49, %v2144_v61 }
 0xc82   : > { %2770 = vmatprep.mubr.bf16.mxu0 %v2150_v62 }
 0xc83   : > { %2771 = vmatmul.mubr.bf16.gmra.mrb[36].mxu0 %v2151_v19 }
 0xd48   : > { %v2768_v35 = vpop.f32.mrb[32].mxu0 }
 0xd49   : > { %v2227_v45 = vadd.f32 %v2768_v35, %v3511_v42  ;;  %v2194_v22 = vpop.f32.mrb[33].mxu0 }
 0xd4a   : > { %v2225_v27 = vadd.f32 %v2194_v22, %v3508_v47  ;;  %v2769_v16 = vpop.f32.mrb[34].mxu0 }
 0xd4b   : > { %v2228_v3 = vadd.f32 %v2769_v16, %v3520_v32  ;;  %v2197_v39 = vpop.f32.mrb[35].mxu0  ;;  %v2241_v23 = vadd.f32 %v2503_v54, %v2227_v45 }
 0xd4c   : > { %v2226_v24 = vadd.f32 %v2197_v39, %v3513_v43  ;;  %v2239_v5 = vadd.f32 %v2503_v54, %v2225_v27 }
 0xd4d   : > { %v2242_v20 = vadd.f32 %v2503_v54, %v2228_v3 }
 0xd4e   : > { %v2240_v0 = vadd.f32 %v2503_v54, %v2226_v24 }
 0xd4f   : > { %v2822_v41 = vpack.c.bf16 %v2242_v20, %v2241_v23 }
 0xd50   : > { %v2818_v13 = vpack.c.bf16 %v2240_v0, %v2239_v5 }
 0xd52   : > { %2819 = vmatprep.subr.bf16.mxu1 %v2818_v13 }
 0xd53   : > { %2821 = vmatpush3.bf16.msra.mxu1 %v2818_v13 }
 0xd54   : > { %2823 = vmatprep.subr.bf16.mxu1 %v2822_v41 }
 0xd56   : > { %v2772_v42 = vpop.f32.mrb[36].mxu0 }
 0xd57   : > { %2825 = vmatpush3.bf16.msra.mxu1 %v2822_v41  ;;  %v2231_v63 = vadd.f32 %v2772_v42, %v3537_v60  ;;  %v2210_v47 = vpop.f32.mrb[37].mxu0  ;;  %v2251_v60 = vld [vmem:[%s3868_s2 + $0x20] sm:$0xff] }
 0xd58   : > { %v2229_v25 = vadd.f32 %v2210_v47, %v3527_v56  ;;  %v2773_v32 = vpop.f32.mrb[38].mxu0  ;;  %v2248_v56 = vld [vmem:[%s3868_s2 + $0x8] sm:$0xff] }
 0xd59   : > { %v2232_v53 = vadd.f32 %v2773_v32, %v3533_v58  ;;  %v2213_v43 = vpop.f32.mrb[39].mxu0  ;;  %v2245_v29 = vadd.f32 %v2503_v54, %v2231_v63  ;;  %v2249_v58 = vld [vmem:[%s3868_s2 + $0x10] sm:$0xff] }
 0xd5a   : > { %v2230_v44 = vadd.f32 %v2213_v43, %v3529_v57  ;;  %v2243_v28 = vadd.f32 %v2503_v54, %v2229_v25  ;;  %v2250_v57 = vld [vmem:[%s3868_s2 + $0x18] sm:$0xff] }
 0xd5b   : > { %v2246_v48 = vadd.f32 %v2503_v54, %v2232_v53 }
 0xd5c   : > { %v2244_v26 = vadd.f32 %v2503_v54, %v2230_v44 }
 0xd5d   : > { %v2830_v14 = vpack.c.bf16 %v2246_v48, %v2245_v29 }
 0xd5e   : > { %v2826_v10 = vpack.c.bf16 %v2244_v26, %v2243_v28 }
 0xd60   : > { %2827 = vmatprep.subr.bf16.mxu1 %v2826_v10 }
 0xd61   : > { %2829 = vmatpush3.bf16.msra.mxu1 %v2826_v10 }
 0xd62   : > { %2831 = vmatprep.subr.bf16.mxu1 %v2830_v14 }
 0xd65   : > { %2833 = vmatpush3.bf16.msra.mxu1 %v2830_v14 }
 0xd68   : > { %2791 = vmatmul.mubr.msk.f32.vlgmr.msra.gmra.mrb[32].mxu1 %vm539_vm0, %v2248_v56 }
 0xd69   : > { %2793 = vmatprep.mubr.msk.f32.mxu1 %vm539_vm0, %v2249_v58 }
 0xd6c   : > { %2794 = vmatmul.mubr.msk.f32.gmra.mrb[34].mxu1 %vm539_vm0, %v2250_v57 }
 0xd6d   : > { %2796 = vmatprep.mubr.msk.f32.mxu1 %vm539_vm0, %v2251_v60 }
 0xd70   : > { %2797 = vmatmul.mubr.msk.f32.gmra.mrb[36].mxu1 %vm539_vm0, %v2252_v36 }
 0xd71   : > { %2799 = vmatprep.mubr.msk.f32.mxu1 %vm539_vm0, %v2253_v52 }
 0xd74   : > { %2800 = vmatmul.mubr.msk.f32.gmra.mrb[38].mxu1 %vm539_vm0, %v2254_v21 }
 0xe3b   : > { %v2792_v1 = vpop.f32.mrb[32].mxu1 }
 0xe3c   : > { %2385 = vst.msk [vmem:[%s521_s27 + $0x8] sm:$0xff] %vm697_vm1, %v2792_v1  ;;  %v2345_v40 = vpop.f32.mrb[33].mxu1 }
 0xe3d   : > { %2384 = vst.msk [vmem:[%s521_s27] sm:$0xff] %vm697_vm1, %v2345_v40 }
 0xe3f   : > { %v2795_v33 = vpop.f32.mrb[34].mxu1 }
 0xe40   : > { %2387 = vst.msk [vmem:[%s521_s27 + $0x18] sm:$0xff] %vm697_vm1, %v2795_v33  ;;  %v2355_v59 = vpop.f32.mrb[35].mxu1 }
 0xe41   : > { %2386 = vst.msk [vmem:[%s521_s27 + $0x10] sm:$0xff] %vm697_vm1, %v2355_v59 }
 0xe43   : > { %v2798_v51 = vpop.f32.mrb[36].mxu1 }
 0xe44   : > { %2389 = vst.msk [vmem:[%s521_s27 + $0x28] sm:$0xff] %vm697_vm1, %v2798_v51  ;;  %v2365_v9 = vpop.f32.mrb[37].mxu1 }
 0xe45   : > { %2388 = vst.msk [vmem:[%s521_s27 + $0x20] sm:$0xff] %vm697_vm1, %v2365_v9 }
 0xe47   : > { %v2801_v2 = vpop.f32.mrb[38].mxu1 }
 0xe48   : > { %2391 = vst.msk [vmem:[%s521_s27 + $0x38] sm:$0xff] %vm697_vm1, %v2801_v2  ;;  %v2375_v12 = vpop.f32.mrb[39].mxu1 }
 0xe49   : > { %2390 = vst.msk [vmem:[%s521_s27 + $0x30] sm:$0xff] %vm697_vm1, %v2375_v12 }
 0xe4a PF: > { %s26_s21 = sadd.s32 1, %s2997_s21  }
 0xe4b   : > { %p23_p4 = scmp.ge.s32.totalorder %s26_s21, 4  }
 0xe4d   :  { %25 = sbr.rel (!%p23_p4) target bundleno = 2 (0x2), region = 114 }

// kernel: swin_forward.7
= control target key start
LH: loop header
LB: loop body
LE: loop exit
PB: predicated region body
PF: predicated region fallthrough
CT: control target
= control target key end

     0   :  { %s3000_s0 = inlined_call_operand.vmem [shape: f32[2,16,64], index: 0, kind: input, shape index: {}]   ;;  %s3001_s1 = inlined_call_operand.vmem [shape: f32[1,64], index: 1, kind: input, shape index: {}]   ;;  %s3002_s2 = inlined_call_operand.vmem [shape: f32[1,64], index: 2, kind: input, shape index: {}]   ;;  %s3003_s3 = inlined_call_operand.vmem [shape: f32[64,192], index: 3, kind: input, shape index: {}]   ;;  %s3004_s4 = inlined_call_operand.vmem [shape: f32[1,192], index: 4, kind: input, shape index: {}]   ;;  %s3005_s5 = inlined_call_operand.vmem [shape: f32[4,16,16], index: 5, kind: input, shape index: {}]   ;;  %s3006_s6 = inlined_call_operand.vmem [shape: f32[64,64], index: 6, kind: input, shape index: {}]   ;;  %s3007_s7 = inlined_call_operand.vmem [shape: f32[1,64], index: 7, kind: input, shape index: {}]   ;;  %s3008_s8 = inlined_call_operand.vmem [shape: f32[1,64], index: 8, kind: input, shape index: {}]   ;;  %s3009_s9 = inlined_call_operand.vmem [shape: f32[1,64], index: 9, kind: input, shape index: {}]   ;;  %s3010_s10 = inlined_call_operand.vmem [shape: f32[64,256], index: 10, kind: input, shape index: {}]   ;;  %s3011_s11 = inlined_call_operand.vmem [shape: f32[1,256], index: 11, kind: input, shape index: {}]   ;;  %s3012_s12 = inlined_call_operand.vmem [shape: f32[256,64], index: 12, kind: input, shape index: {}]   ;;  %s3013_s13 = inlined_call_operand.vmem [shape: f32[1,64], index: 13, kind: input, shape index: {}]   ;;  %s3014_s14 = inlined_call_operand.vmem [shape: f32[1,64], index: 14, kind: input, shape index: {}]   ;;  %s3015_s15 = inlined_call_operand.vmem [shape: f32[1,64], index: 15, kind: input, shape index: {}]   ;;  %s3016_s16 = inlined_call_operand.vmem [shape: f32[64,3], index: 16, kind: input, shape index: {}]   ;;  %s3017_s17 = inlined_call_operand.vmem [shape: f32[1,3], index: 17, kind: input, shape index: {}]   ;;  %s3018_s18 = inlined_call_operand.hbm [shape: f32[2,1,3], index: 18, kind: output, shape index: {}]  }
   0x1   :  { %3023 = sst [smem:[#allocation9_spill]] %s3000_s0 }
   0x2   :  { %3024 = sst [smem:[#allocation10_spill]] %s3001_s1 }
   0x3   :  { %3025 = sst [smem:[#allocation11_spill]] %s3002_s2 }
   0x4   :  { %3026 = sst [smem:[#allocation12_spill]] %s3003_s3 }
   0x5   :  { %23 = vsyncpa [#allocation3], 0 }
   0x6   :  { %25 = vsyncpa [#allocation3 + $0x1], 0  ;;  %s2420_s27 = smov 0   ;;  %s2422_s28 = smov 0  }
   0x7   :  { %s2424_s29 = smov 0   ;;  %s2426_s30 = smov 0  }
   0x8 LB: > { %3027 = sst [smem:[#allocation5_spill]] %s2307_s29  ;;  %s2441_s0 = sadd.s32 4294967295, %s2311_s30   ;;  %s2311_s30 = sphi %s2426_s30, %s3038_s30   ;;  %s2307_s29 = sphi %s2424_s29, %s3043_s29   ;;  %s2303_s28 = sphi %s2422_s28, %s3042_s28   ;;  %s2299_s27 = sphi %s2420_s27, %s3041_s27  }
   0x9   : > { %s1948_s19 = sadd.s32 4294967294, %s2311_s30   ;;  %s2445_s1 = sadd.s32 1, %s2311_s30  }
   0xa   : > { %3028 = sst [smem:[#allocation6_spill]] %s2445_s1  ;;  %s421_s20 = sadd.s32 1, %s2307_s29 }
   0xb   : > { %s418_s21 = ssub.s32 %s2311_s30, %s2445_s1  ;;  %p431_p0 = scmp.ne.s32.totalorder %s2307_s29, %s2303_s28 }
   0xc   : > { %p419_p1 = scmp.eq.s32.totalorder %s418_s21, 0  ;;  %p432_p2 = scmp.eq.s32.totalorder %s2441_s0, 1 }
   0xd   : > { %p437_p3 = scmp.ne.s32.totalorder %s2303_s28, %s2299_s27  ;;  %p438_p4 = scmp.eq.s32.totalorder %s1948_s19, 1 }
   0xe   : > { %s2456_s22 = scalar_select %p419_p1, %s2307_s29, %s421_s20  }
   0xf   : > { %p2458_p5 = por %p432_p2, %p431_p0  ;;  %p2462_p6 = por %p438_p4, %p437_p3 }
  0x10   : > { %3029 = sst [smem:[#allocation7_spill]] %s2456_s22  ;;  %p1951_p7 = scmp.ge.s32.totalorder %s2311_s30, 1 }
  0x11   : > { %s3031_s23 = scalar_select %p2462_p6, 1, 0 }
  0x12   : > { %p515_p8 = scmp.lt.s32.totalorder %s2311_s30, 3 }
  0x13   : > { %3032 = sst [smem:[#allocation8_spill]] %s3031_s23 }
  0x14   : > { %p516_p9 = pnand %p1951_p7, %p515_p8 }
  0x15   : > { %p568_p10 = scmp.lt.s32.totalorder (!%p516_p9), %s2441_s0, 1  ;;  %vm612_vm0 = vcmask (!%p516_p9), 523264   ;;  %s3033_s20 = sld [smem:[#allocation9_spill]] (!%p516_p9)  ;;  %v2313_v37 = vmov (!%p516_p9), 0   ;;  %v666_v56 = vlaneseq (!%p516_p9)  ;;  %v594_v59 = vld [vmem:[%s3004_s4] sm:$0x3] (!%p516_p9) }
  0x16   : > { %519 = sbr.rel (%p516_p9) target bundleno = 4334 (0x10ee), region = 92  ;;  %s3034_s3 = sld [smem:[#allocation12_spill]] (!%p516_p9)  ;;  %711 = vmatprep.mubr.bf16.mxu0 (!%p516_p9), %v2313_v37  ;;  %v2314_v60 = vmov (!%p516_p9), 0.0   ;;  %vm2315_vm1 = vmmov (!%p516_p9), 0   ;;  %vm729_vm2 = vcmask (!%p516_p9), 130048   ;;  %vm1878_vm7 = vcmask (!%p516_p9), 16384  }
  0x17   : > { %s3036_s22 = sld [smem:[#allocation11_spill]] (!%p516_p9)  ;;  %v2541_v57 = vshrl.u32 (!%p516_p9), %v666_v56, 7  ;;  %2036 = vmatprep.subr.bf16.mxu1 (!%p516_p9), %v2314_v60  ;;  %2038 = vmatprep.mubr.msk.bf16.mxu1 (!%p516_p9), %vm2315_vm1, %v2314_v60  ;;  %s2318_s26 = smov (!%p516_p9), 112  }
  0x18   : > { %s2320_s19 = smov (!%p516_p9), 32   ;;  %s2321_s29 = smov (!%p516_p9), 16  }
  0x19   : > { %v668_v58 = vsub.s32 (!%p516_p9), 0, %v2541_v57  ;;  %v672_v61 = vsub.s32 (!%p516_p9), 1, %v2541_v57  ;;  %s1977_s1 = sshll.u32 (!%p516_p9), %s2441_s0, 4 }
  0x1b   : > { %v669_v62 = vrot.slane (!%p516_p9), %v594_v59, %v668_v58 }
  0x1c   : > { %v579_v14 = vld [vmem:[%s3034_s3 + $0x8] sm:$0xff] (!%p516_p9)  ;;  %v581_v15 = vld [vmem:[%s3034_s3 + $0x18] sm:$0xff] (!%p516_p9)  ;;  %v578_v17 = vld [vmem:[%s3034_s3] sm:$0xff] (!%p516_p9) }
  0x1d   : > { %s569_s24 = scalar_select %p568_p10, %s2441_s0, 1  ;;  %v658_v16 = vpack.c.bf16 %v581_v15, %v579_v14  ;;  %v580_v18 = vld [vmem:[%s3034_s3 + $0x10] sm:$0xff]  ;;  %v583_v20 = vld [vmem:[%s3034_s3 + $0x28] sm:$0xff]  ;;  %v585_v21 = vld [vmem:[%s3034_s3 + $0x38] sm:$0xff] }
  0x1e   : > { %v657_v19 = vpack.c.bf16 %v580_v18, %v578_v17  ;;  %v660_v22 = vpack.c.bf16 %v585_v21, %v583_v20  ;;  %v582_v23 = vld [vmem:[%s3034_s3 + $0x20] sm:$0xff]  ;;  %v584_v24 = vld [vmem:[%s3034_s3 + $0x30] sm:$0xff]  ;;  %v587_v26 = vld [vmem:[%s3034_s3 + $0x48] sm:$0xff]  ;;  %s2324_s0 = smov [#allocation2]  }
  0x1f   : > { %s1980_s25 = sshll.u32 %s569_s24, 4  ;;  %679 = vmatprep.subr.bf16.mxu0 %v658_v16  ;;  %v659_v25 = vpack.c.bf16 %v584_v24, %v582_v23  ;;  %v589_v27 = vld [vmem:[%s3034_s3 + $0x58] sm:$0xff]  ;;  %v586_v29 = vld [vmem:[%s3034_s3 + $0x40] sm:$0xff]  ;;  %v588_v30 = vld [vmem:[%s3034_s3 + $0x50] sm:$0xff]  ;;  %s2316_s24 = smov 48  }
  0x20   : > { %s572_s21 = scalar_lea.vmem %s3033_s20, %s1980_s25  ;;  %680 = vmatpush1.bf16.msra.mxu0 %v657_v19  ;;  %v662_v28 = vpack.c.bf16 %v589_v27, %v587_v26  ;;  %v661_v31 = vpack.c.bf16 %v588_v30, %v586_v29  ;;  %v591_v32 = vld [vmem:[%s3034_s3 + $0x68] sm:$0xff]  ;;  %v593_v33 = vld [vmem:[%s3034_s3 + $0x78] sm:$0xff]  ;;  %v590_v34 = vld [vmem:[%s3034_s3 + $0x60] sm:$0xff]  ;;  %s3035_s20 = sld [smem:[#allocation10_spill]] }
  0x21   : > { %v2473_v0 = vld [vmem:[%s572_s21] sm:$0xff]  ;;  %v2475_v1 = vld [vmem:[%s572_s21 + $0x8] sm:$0xff]  ;;  %681 = vmatprep.subr.bf16.mxu0 %v660_v22  ;;  %v664_v35 = vpack.c.bf16 %v593_v33, %v591_v32  ;;  %v592_v36 = vld [vmem:[%s3034_s3 + $0x70] sm:$0xff]  ;;  %s2317_s25 = smov 64  }
  0x22   : > { %v613_v2 = vsel %vm612_vm0, %v2473_v0, 0.0  ;;  %v616_v3 = vsel %vm612_vm0, %v2475_v1, 0.0  ;;  %v663_v38 = vpack.c.bf16 %v592_v36, %v590_v34  ;;  %v1955_v51 = vld [vmem:[%s3036_s22] ss:$0 sm:$0xff]  ;;  %v596_v23 = vld [vmem:[%s3005_s5 + $0x8] sm:$0xff]  ;;  %v597_v27 = vld [vmem:[%s3005_s5 + $0x10] sm:$0xff] }
  0x23   : > { %614 = vadd.xlane.f32.xlu0 %v613_v2  ;;  %v673_v2 = vrot.slane %v594_v59, %v672_v61  ;;  %v595_v20 = vld [vmem:[%s3005_s5] sm:$0xff]  ;;  %v598_v36 = vld [vmem:[%s3005_s5 + $0x18] sm:$0xff]  ;;  %s2322_s22 = smov 80  }
  0x24   : > { %682 = vmatpush1.bf16.msra.mxu0 %v659_v25 }
  0x25   : > { %683 = vmatprep.subr.bf16.mxu0 %v662_v28 }
  0x26   : > { %v1954_v47 = vld [vmem:[%s3035_s20] ss:$0 sm:$0xff]  ;;  %s2958_s20 = scalar_lea.hbm %s3018_s18, %s1977_s1 }
  0x27   : > { %617 = vadd.xlane.f32.xlu0 %v616_v3 }
  0x28   : > { %684 = vmatpush1.bf16.msra.mxu0 %v661_v31 }
  0x29   : > { %685 = vmatprep.subr.bf16.mxu0 %v664_v35 }
  0x2c   : > { %686 = vmatpush1.bf16.msra.mxu0 %v663_v38 }
  0x2d   : > { %2048 = vmatprep.subr.bf16.mxu0 %v2314_v60 }
  0xb0   : > { %v615_v4 = vpop.xlane.xlu0 %614 }
  0xb1   : > { %v620_v5 = vmul.f32 0.015625, %v615_v4 }
  0xb3   : > { %v622_v6 = vsub.f32 %v2473_v0, %v620_v5 }
  0xb4   : > { %v618_v7 = vpop.xlane.xlu0 %617 }
  0xb5   : > { %v621_v8 = vmul.f32 0.015625, %v618_v7  ;;  %v624_v9 = vmul.f32 %v622_v6, %v622_v6 }
  0xb7   : > { %v623_v10 = vsub.f32 %v2475_v1, %v621_v8  ;;  %v626_v11 = vsel %vm612_vm0, %v624_v9, 0.0 }
  0xb8   : > { %627 = vadd.xlane.f32.xlu1 %v626_v11 }
  0xb9   : > { %v625_v12 = vmul.f32 %v623_v10, %v623_v10 }
  0xbb   : > { %v629_v13 = vsel %vm612_vm0, %v625_v12, 0.0 }
  0xbc   : > { %630 = vadd.xlane.f32.xlu1 %v629_v13 }
 0x145   : > { %v628_v39 = vpop.xlane.xlu1 %627 }
 0x146   : > { %v632_v40 = vmul.f32 0.015625, %v628_v39 }
 0x148   : > { %v634_v41 = vadd.f32 1e-05, %v632_v40 }
 0x149   : > { %v631_v42 = vpop.xlane.xlu1 %630 }
 0x14a   : > { %2189 = vrsqrt.f32 %v634_v41  ;;  %v633_v43 = vmul.f32 0.015625, %v631_v42 }
 0x14c   : > { %v635_v44 = vadd.f32 1e-05, %v633_v43 }
 0x14e   : > { %2191 = vrsqrt.f32 %v635_v44 }
 0x154   : > { %v2190_v45 = vpop.eup %2189 }
 0x155   : > { %v638_v46 = vmul.f32 %v2190_v45, %v622_v6 }
 0x157   : > { %v646_v50 = vmul.f32 %v1954_v47, %v638_v46 }
 0x158   : > { %v2192_v48 = vpop.eup %2191 }
 0x159   : > { %v639_v49 = vmul.f32 %v2192_v48, %v623_v10  ;;  %v654_v53 = vadd.f32 %v1955_v51, %v646_v50 }
 0x15b   : > { %v647_v52 = vmul.f32 %v1954_v47, %v639_v49 }
 0x15d   : > { %v655_v54 = vadd.f32 %v1955_v51, %v647_v52 }
 0x15f   : > { %v656_v55 = vpack.c.bf16 %v655_v54, %v654_v53 }
 0x161   : > { %1956 = vmatmul.mubr.msk.bf16.vlgmr.msra.gmra.mrb[0].mxu0 %vm612_vm0, %v656_v55 }
 0x162   : > { %2050 = vmatprep.mubr.msk.bf16.mxu0 %vm2315_vm1, %v2314_v60 }
 0x234   : > { %v713_v63 = vpop.f32.mrb[0].mxu0 }
 0x235   : > { %v714_v3 = vadd.f32 %v713_v63, %v669_v62  ;;  %v715_v4 = vpop.f32.mrb[1].mxu0 }
 0x236   : > { %v717_v5 = vpop.f32.mrb[2].mxu0  ;;  %v716_v8 = vadd.f32 %v715_v4, %v673_v2 }
 0x237   : > { %v718_v6 = vadd.f32 %v717_v5, %v669_v62  ;;  %v719_v7 = vpop.f32.mrb[3].mxu0  ;;  %v722_v10 = vmul.f32 0.25, %v714_v3 }
 0x238   : > { %v720_v9 = vadd.f32 %v719_v7, %v673_v2 }
 0x239   : > { %v723_v11 = vmul.f32 0.25, %v718_v6  ;;  %v2558_v12 = vpack.c.bf16 %v718_v6, %v714_v3 }
 0x23a   : > { %v2560_v13 = vpack.c.bf16 %v720_v9, %v716_v8 }
 0x23b   : > { %v2562_v14 = vpack.c.bf16 %v723_v11, %v722_v10  ;;  %850 = vrot.lane.b32.xlu1 %v2558_v12, %s2316_s24  ;;  %727 = vrot.lane.b32.xlu0 %v2558_v12, %s2317_s25  ;;  %s2319_s25 = smov 96  }
 0x23f   : > { %848 = vrot.lane.b32.xlu1 %v2562_v14, %s2318_s26 }
 0x2ad   : > { %v851_v15 = vpop.permute.xlu1 %850  ;;  %v728_v16 = vpop.permute.xlu0 %727 }
 0x2ae   : > { %v856_v17 = vsel %vm729_vm2, %v851_v15, 0  ;;  %v734_v18 = vsel %vm729_vm2, %v728_v16, 0 }
 0x2af   : > { %2037 = vmatpush3.bf16.xpose.msra.mxu1 %v734_v18  ;;  %2049 = vmatpush3.bf16.xpose.msra.mxu0 %v856_v17 }
 0x2b0   : > { %2042 = vmatprep.subr.bf16.mxu1 %v2314_v60  ;;  %2060 = vmatprep.subr.bf16.mxu0 %v2314_v60 }
 0x2b1   : > { %v849_v19 = vpop.permute.xlu1 %848 }
 0x2b6   : > { %2039 = vmatmul.mubr.msk.bf16.vlgmr.msra.gmra.mrb[0].mxu1 %vm729_vm2, %v2562_v14  ;;  %2051 = vmatmul.mubr.msk.bf16.vlgmr.msra.gmra.mrb[4].mxu0 %vm729_vm2, %v849_v19 }
 0x2b7   : > { %2043 = vmatpush3.bf16.msra.mxu1 %v2560_v13  ;;  %2044 = vmatprep.mubr.msk.bf16.mxu1 %vm2315_vm1, %v2314_v60 }
 0x2b8   : > { %2054 = vmatprep.subr.bf16.mxu1 %v2314_v60  ;;  %2062 = vmatprep.mubr.msk.bf16.mxu0 %vm2315_vm1, %v2314_v60 }
 0x389   : > { %v770_v21 = vpop.f32.mrb[0].mxu1  ;;  %v892_v22 = vpop.f32.mrb[4].mxu0 }
 0x38a   : > { %v771_v24 = vadd.f32 %v770_v21, %v595_v20  ;;  %v2040_v25 = vpop.f32.mrb[1].mxu1  ;;  %v2052_v26 = vpop.f32.mrb[5].mxu0  ;;  %v893_v34 = vadd.f32 %v892_v22, %v597_v27  ;;  %v603_v21 = vld [vmem:[%s3006_s6] sm:$0xff]  ;;  %v604_v22 = vld [vmem:[%s3006_s6 + $0x8] sm:$0xff] }
 0x38b   : > { %v773_v28 = vpop.f32.mrb[2].mxu1  ;;  %v895_v29 = vpop.f32.mrb[6].mxu0  ;;  %v606_v25 = vld [vmem:[%s3006_s6 + $0x18] sm:$0xff] }
 0x38c   : > { %v774_v30 = vadd.f32 %v773_v28, %v596_v23  ;;  %v2041_v31 = vpop.f32.mrb[3].mxu1  ;;  %v2053_v32 = vpop.f32.mrb[7].mxu0  ;;  %v777_v33 = vsel %vm729_vm2, %v771_v24, -inf  ;;  %v896_v38 = vadd.f32 %v895_v29, %v598_v36  ;;  %v899_v39 = vsel %vm729_vm2, %v893_v34, -inf }
 0x38d   : > { %778 = vmax.xlane.f32.xlu1 %v777_v33  ;;  %v846_v23 = vpack.c.bf16 %v604_v22, %v603_v21 }
 0x38e   : > { %v780_v35 = vsel %vm729_vm2, %v774_v30, -inf  ;;  %v902_v40 = vsel %vm729_vm2, %v896_v38, -inf }
 0x38f   : > { %781 = vmax.xlane.f32.xlu0 %v780_v35 }
 0x393   : > { %900 = vmax.xlane.f32.xlu0 %v899_v39 }
 0x397   : > { %903 = vmax.xlane.f32.xlu0 %v902_v40 }
 0x41a   : > { %v779_v41 = vpop.xlane.xlu1 %778 }
 0x41b   : > { %v783_v42 = vsub.f32 %v771_v24, %v779_v41  ;;  %v605_v24 = vld [vmem:[%s3006_s6 + $0x10] sm:$0xff] }
 0x41c   : > { %v782_v43 = vpop.xlane.xlu0 %781  ;;  %v971_v26 = vpack.c.bf16 %v606_v25, %v605_v24  ;;  %v607_v25 = vld [vmem:[%s3006_s6 + $0x20] sm:$0xff] }
 0x41d   : > { %v785_v44 = vmul.f32 1.442695, %v783_v42  ;;  %v784_v45 = vsub.f32 %v774_v30, %v782_v43 }
 0x41e   : > { %2061 = vmatpush3.bf16.msra.mxu0 %v971_v26  ;;  %v608_v26 = vld [vmem:[%s3006_s6 + $0x28] sm:$0xff] }
 0x41f   : > { %2193 = vpow2.f32 %v785_v44  ;;  %v787_v46 = vmul.f32 1.442695, %v784_v45  ;;  %2072 = vmatprep.subr.bf16.mxu0 %v2314_v60 }
 0x420   : > { %v901_v47 = vpop.xlane.xlu0 %900 }
 0x421   : > { %2195 = vpow2.f32 %v787_v46  ;;  %v905_v48 = vsub.f32 %v893_v34, %v901_v47 }
 0x423   : > { %v907_v49 = vmul.f32 1.442695, %v905_v48 }
 0x424   : > { %v904_v50 = vpop.xlane.xlu0 %903 }
 0x425   : > { %2197 = vpow2.f32 %v907_v49  ;;  %v906_v51 = vsub.f32 %v896_v38, %v904_v50 }
 0x427   : > { %v909_v52 = vmul.f32 1.442695, %v906_v51  ;;  %v599_v51 = vld [vmem:[%s3005_s5 + $0x20] sm:$0xff] }
 0x429   : > { %v2194_v53 = vpop.eup %2193  ;;  %2199 = vpow2.f32 %v909_v52 }
 0x42a   : > { %v789_v54 = vsel %vm729_vm2, %v2194_v53, 0.0 }
 0x42b   : > { %v2196_v55 = vpop.eup %2195  ;;  %790 = vadd.xlane.f32.xlu1 %v789_v54 }
 0x42c   : > { %v792_v56 = vsel %vm729_vm2, %v2196_v55, 0.0 }
 0x42d   : > { %793 = vadd.xlane.f32.xlu0 %v792_v56 }
 0x42f   : > { %v2198_v59 = vpop.eup %2197 }
 0x430   : > { %v911_v62 = vsel %vm729_vm2, %v2198_v59, 0.0 }
 0x431   : > { %912 = vadd.xlane.f32.xlu1 %v911_v62 }
 0x433   : > { %v2200_v63 = vpop.eup %2199 }
 0x434   : > { %v914_v2 = vsel %vm729_vm2, %v2200_v63, 0.0 }
 0x435   : > { %915 = vadd.xlane.f32.xlu0 %v914_v2 }
 0x442   : > { %923 = vrot.lane.b32.xlu1 %v2560_v13, %s2318_s26 }
 0x446   : > { %1060 = vrot.lane.b32.xlu1 %v2562_v14, %s2319_s25 }
 0x44b   : > { %1062 = vrot.lane.b32.xlu0 %v2558_v12, %s2320_s19 }
 0x4b8   : > { %v791_v3 = vpop.xlane.xlu1 %790 }
 0x4b9   : > { %2201 = vrcp.f32 %v791_v3 }
 0x4ba   : > { %v794_v4 = vpop.xlane.xlu0 %793 }
 0x4bb   : > { %2203 = vrcp.f32 %v794_v4 }
 0x4be   : > { %v913_v5 = vpop.xlane.xlu1 %912 }
 0x4bf   : > { %2205 = vrcp.f32 %v913_v5 }
 0x4c2   : > { %v916_v6 = vpop.xlane.xlu0 %915  ;;  %v924_v15 = vpop.permute.xlu1 %923 }
 0x4c3   : > { %v2202_v7 = vpop.eup %2201  ;;  %2207 = vrcp.f32 %v916_v6 }
 0x4c4   : > { %v797_v9 = vmul.f32 %v2202_v7, %v2194_v53  ;;  %v600_v53 = vld [vmem:[%s3005_s5 + $0x28] sm:$0xff] }
 0x4c5   : > { %v2204_v8 = vpop.eup %2203 }
 0x4c6   : > { %v798_v10 = vmul.f32 %v2204_v8, %v2196_v55  ;;  %v1063_v34 = vpop.permute.xlu0 %1062  ;;  %v1061_v40 = vpop.permute.xlu1 %1060 }
 0x4c7   : > { %v1068_v39 = vsel %vm729_vm2, %v1063_v34, 0 }
 0x4c8   : > { %v799_v11 = vpack.c.bf16 %v798_v10, %v797_v9 }
 0x4c9   : > { %v2206_v16 = vpop.eup %2205 }
 0x4ca   : > { %2045 = vmatmul.mubr.msk.bf16.vlgmr.msra.gmra.mrb[4].mxu1 %vm729_vm2, %v799_v11  ;;  %v919_v18 = vmul.f32 %v2206_v16, %v2198_v59 }
 0x4cb   : > { %2055 = vmatpush3.bf16.msra.mxu1 %v924_v15  ;;  %2056 = vmatprep.mubr.msk.bf16.mxu1 %vm2315_vm1, %v2314_v60 }
 0x4cc   : > { %2066 = vmatprep.subr.bf16.mxu1 %v2314_v60 }
 0x4cd   : > { %v2208_v17 = vpop.eup %2207 }
 0x4ce   : > { %v920_v19 = vmul.f32 %v2208_v17, %v2200_v63 }
 0x4d0   : > { %v921_v20 = vpack.c.bf16 %v920_v19, %v919_v18 }
 0x4d2   : > { %2057 = vmatmul.mubr.msk.bf16.vlgmr.msra.gmra.mrb[8].mxu1 %vm729_vm2, %v921_v20 }
 0x4d3   : > { %2068 = vmatprep.mubr.msk.bf16.mxu1 %vm2315_vm1, %v2314_v60  ;;  %2067 = vmatpush3.bf16.msra.mxu1 %v846_v23 }
 0x4d4   : > { %2078 = vmatprep.subr.bf16.mxu1 %v2314_v60 }
 0x59d   : > { %v838_v27 = vpop.f32.mrb[4].mxu1 }
 0x59e   : > { %v2046_v28 = vpop.f32.mrb[5].mxu1 }
 0x59f   : > { %v841_v29 = vpop.f32.mrb[6].mxu1 }
 0x5a0   : > { %v845_v30 = vpack.c.bf16 %v841_v29, %v838_v27  ;;  %v2047_v31 = vpop.f32.mrb[7].mxu1  ;;  %v1182_v27 = vpack.c.bf16 %v608_v26, %v607_v25 }
 0x5a2   : > { %2069 = vmatmul.mubr.msk.bf16.vlgmr.msra.gmra.mrb[12].mxu1 %vm729_vm2, %v845_v30 }
 0x5a3   : > { %2080 = vmatprep.mubr.msk.bf16.mxu1 %vm2315_vm1, %v2314_v60 }
 0x5a5   : > { %v963_v32 = vpop.f32.mrb[8].mxu1 }
 0x5a6   : > { %v2058_v33 = vpop.f32.mrb[9].mxu1 }
 0x5a7   : > { %v966_v35 = vpop.f32.mrb[10].mxu1  ;;  %v601_v33 = vld [vmem:[%s3005_s5 + $0x30] sm:$0xff] }
 0x5a8   : > { %v970_v36 = vpack.c.bf16 %v966_v35, %v963_v32  ;;  %v2059_v38 = vpop.f32.mrb[11].mxu1  ;;  %v602_v35 = vld [vmem:[%s3005_s5 + $0x38] sm:$0xff] }
 0x5aa   : > { %2063 = vmatmul.mubr.msk.bf16.vlgmr.msra.gmra.mrb[8].mxu0 %vm729_vm2, %v970_v36 }
 0x5ab   : > { %2073 = vmatpush3.bf16.xpose.msra.mxu0 %v1068_v39  ;;  %2074 = vmatprep.mubr.msk.bf16.mxu0 %vm2315_vm1, %v2314_v60 }
 0x5ac   : > { %2084 = vmatprep.subr.bf16.mxu0 %v2314_v60 }
 0x5b2   : > { %2075 = vmatmul.mubr.msk.bf16.vlgmr.msra.gmra.mrb[12].mxu0 %vm729_vm2, %v1061_v40 }
 0x5b3   : > { %2086 = vmatprep.mubr.msk.bf16.mxu0 %vm2315_vm1, %v2314_v60  ;;  %2085 = vmatpush3.bf16.msra.mxu0 %v1182_v27 }
 0x5b4   : > { %2096 = vmatprep.subr.bf16.mxu0 %v2314_v60 }
 0x675   : > { %v1053_v41 = vpop.f32.mrb[12].mxu1 }
 0x676   : > { %v2070_v42 = vpop.f32.mrb[13].mxu1 }
 0x677   : > { %v1056_v43 = vpop.f32.mrb[14].mxu1 }
 0x678   : > { %v2071_v44 = vpop.f32.mrb[15].mxu1 }
 0x67d   : > { %v1009_v45 = vpop.f32.mrb[8].mxu0 }
 0x67e   : > { %v2638_v46 = vadd.f32 %v1053_v41, %v1009_v45  ;;  %v2064_v47 = vpop.f32.mrb[9].mxu0 }
 0x67f   : > { %v1012_v48 = vpop.f32.mrb[10].mxu0 }
 0x680   : > { %v2640_v49 = vadd.f32 %v1056_v43, %v1012_v48  ;;  %v2065_v50 = vpop.f32.mrb[11].mxu0 }
 0x685   : > { %v1104_v52 = vpop.f32.mrb[12].mxu0 }
 0x686   : > { %v1105_v54 = vadd.f32 %v1104_v52, %v599_v51  ;;  %v2076_v55 = vpop.f32.mrb[13].mxu0 }
 0x687   : > { %v1107_v56 = vpop.f32.mrb[14].mxu0 }
 0x688   : > { %v1108_v59 = vadd.f32 %v1107_v56, %v600_v53  ;;  %v2077_v62 = vpop.f32.mrb[15].mxu0  ;;  %v1111_v63 = vsel %vm729_vm2, %v1105_v54, -inf }
 0x689   : > { %1112 = vmax.xlane.f32.xlu1 %v1111_v63 }
 0x68a   : > { %v1114_v2 = vsel %vm729_vm2, %v1108_v59, -inf }
 0x68b   : > { %1115 = vmax.xlane.f32.xlu0 %v1114_v2 }
 0x716   : > { %v1113_v3 = vpop.xlane.xlu1 %1112 }
 0x717   : > { %v1117_v4 = vsub.f32 %v1105_v54, %v1113_v3 }
 0x718   : > { %v1116_v5 = vpop.xlane.xlu0 %1115 }
 0x719   : > { %v1119_v6 = vmul.f32 1.442695, %v1117_v4  ;;  %v1118_v7 = vsub.f32 %v1108_v59, %v1116_v5  ;;  %v610_v59 = vld [vmem:[%s3006_s6 + $0x38] sm:$0xff] }
 0x71b   : > { %2209 = vpow2.f32 %v1119_v6  ;;  %v1121_v8 = vmul.f32 1.442695, %v1118_v7 }
 0x71d   : > { %2211 = vpow2.f32 %v1121_v8 }
 0x725   : > { %v2210_v9 = vpop.eup %2209 }
 0x726   : > { %v1123_v10 = vsel %vm729_vm2, %v2210_v9, 0.0 }
 0x727   : > { %v2212_v11 = vpop.eup %2211  ;;  %1124 = vadd.xlane.f32.xlu0 %v1123_v10 }
 0x728   : > { %v1126_v15 = vsel %vm729_vm2, %v2212_v11, 0.0 }
 0x729   : > { %1127 = vadd.xlane.f32.xlu1 %v1126_v15 }
 0x73a   : > { %1231 = vrot.lane.b32.xlu1 %v2558_v12, %s2321_s29  ;;  %s566_s29 = sand.u32 1, %s2303_s28  }
 0x73b   : > { %s567_s23 = scalar_lea.vmem [#allocation2], %s566_s29  ;;  %s1881_s21 = scalar_lea.sflag [#allocation3], %s566_s29 }
 0x73c   : > { %s1893_s24 = sshll.u32 %s567_s23, 4  ;;  %s2960_s24 = int_to_ptr.vmem [resolvable:$true] %s1893_s24 }
 0x73d   : > { %1134 = vrot.lane.b32.xlu0 %v2560_v13, %s2319_s25  ;;  %s2253_s25 = sshll.u32 %s2324_s0, 4  ;;  %s2254_s25 = int_to_ptr.vmem [resolvable:$false] %s2253_s25 }
 0x73e   : > { %1229 = vrot.lane.b32.xlu1 %v2562_v14, %s2322_s22  ;;  %s2255_s3 = scalar_lea.vmem %s2254_s25, 32  ;;  %p2256_p0 = scmp.lt.s32.totalorder %s2960_s24, %s2254_s25 }
 0x7b4   : > { %v1125_v16 = vpop.xlane.xlu0 %1124 }
 0x7b5   : > { %2213 = vrcp.f32 %v1125_v16 }
 0x7b6   : > { %v1128_v17 = vpop.xlane.xlu1 %1127 }
 0x7b7   : > { %2215 = vrcp.f32 %v1128_v17 }
 0x7b8   : > { %v1135_v18 = vpop.permute.xlu0 %1134 }
 0x7b9   : > { %2079 = vmatpush3.bf16.msra.mxu1 %v1135_v18 }
 0x7ba   : > { %2090 = vmatprep.subr.bf16.mxu1 %v2314_v60  ;;  %v1232_v12 = vpop.permute.xlu1 %1231 }
 0x7bb   : > { %v1237_v24 = vsel %vm729_vm2, %v1232_v12, 0  ;;  %v1969_v12 = vld [vmem:[%s3007_s7] ss:$0 sm:$0xff] }
 0x7be   : > { %v1230_v14 = vpop.permute.xlu1 %1229 }
 0x7bf   : > { %v2214_v19 = vpop.eup %2213 }
 0x7c0   : > { %v1131_v21 = vmul.f32 %v2214_v19, %v2210_v9 }
 0x7c1   : > { %v2216_v20 = vpop.eup %2215 }
 0x7c2   : > { %v1132_v22 = vmul.f32 %v2216_v20, %v2212_v11 }
 0x7c4   : > { %v1133_v23 = vpack.c.bf16 %v1132_v22, %v1131_v21 }
 0x7c6   : > { %2081 = vmatmul.mubr.msk.bf16.vlgmr.msra.gmra.mrb[16].mxu1 %vm729_vm2, %v1133_v23 }
 0x7c7   : > { %2091 = vmatpush3.bf16.xpose.msra.mxu1 %v1237_v24  ;;  %2092 = vmatprep.mubr.msk.bf16.mxu1 %vm2315_vm1, %v2314_v60 }
 0x7c8   : > { %2102 = vmatprep.subr.bf16.mxu1 %v2314_v60 }
 0x7ce   : > { %2093 = vmatmul.mubr.msk.bf16.vlgmr.msra.gmra.mrb[20].mxu1 %vm729_vm2, %v1230_v14 }
 0x7cf   : > { %2104 = vmatprep.mubr.msk.bf16.mxu1 %vm2315_vm1, %v2314_v60 }
 0x899   : > { %v1174_v28 = vpop.f32.mrb[16].mxu1 }
 0x89a   : > { %v2082_v29 = vpop.f32.mrb[17].mxu1 }
 0x89b   : > { %v1177_v30 = vpop.f32.mrb[18].mxu1 }
 0x89c   : > { %v1181_v31 = vpack.c.bf16 %v1177_v30, %v1174_v28  ;;  %v2083_v32 = vpop.f32.mrb[19].mxu1 }
 0x89e   : > { %2087 = vmatmul.mubr.msk.bf16.vlgmr.msra.gmra.mrb[16].mxu0 %vm729_vm2, %v1181_v31 }
 0x89f   : > { %2098 = vmatprep.mubr.msk.bf16.mxu0 %vm2315_vm1, %v2314_v60 }
 0x8a1   : > { %v1273_v34 = vpop.f32.mrb[20].mxu1 }
 0x8a2   : > { %v1274_v36 = vadd.f32 %v1273_v34, %v601_v33  ;;  %v2094_v38 = vpop.f32.mrb[21].mxu1 }
 0x8a3   : > { %v1276_v39 = vpop.f32.mrb[22].mxu1 }
 0x8a4   : > { %v1277_v40 = vadd.f32 %v1276_v39, %v602_v35  ;;  %v2095_v41 = vpop.f32.mrb[23].mxu1  ;;  %v1280_v42 = vsel %vm729_vm2, %v1274_v36, -inf  ;;  %v1411_v39 = vld [vmem:[%s3010_s10 + $0x8] sm:$0xff] }
 0x8a5   : > { %1281 = vmax.xlane.f32.xlu1 %v1280_v42  ;;  %v1410_v42 = vld [vmem:[%s3010_s10] sm:$0xff] }
 0x8a6   : > { %v1283_v43 = vsel %vm729_vm2, %v1277_v40, -inf }
 0x8a7   : > { %1284 = vmax.xlane.f32.xlu0 %v1283_v43  ;;  %v1412_v43 = vld [vmem:[%s3010_s10 + $0x10] sm:$0xff] }
 0x8b6   : > { %1303 = vrot.lane.b32.xlu1 %v2560_v13, %s2322_s22  ;;  %v609_v13 = vld [vmem:[%s3006_s6 + $0x30] sm:$0xff]  ;;  %s2249_s22 = scalar_lea.vmem %s2960_s24, 16 }
 0x8b7   : > { %v1351_v62 = vpack.c.bf16 %v610_v59, %v609_v13  ;;  %v1420_v13 = vld [vmem:[%s3010_s10 + $0x50] sm:$0xff]  ;;  %p2250_p11 = scmp.ne.s32.totalorder %s2960_s24, %s2249_s22  ;;  %p2257_p1 = scmp.lt.s32.totalorder %s2255_s3, %s2249_s22 }
 0x8b9   : > { %2103 = vmatpush3.bf16.msra.mxu1 %v1351_v62  ;;  %v1423_v62 = vld [vmem:[%s3010_s10 + $0x68] sm:$0xff]  ;;  %p2251_p12 = pnand %p2250_p11, %p2458_p5  ;;  %p2258_p2 = por %p2257_p1, %p2256_p0 }
 0x8bb   : > { %p2252_p13 = pneg %p2251_p12 }
 0x8bd   : > { %p2259_p3 = pnand %p2258_p2, %p2252_p13 }
 0x932   : > { %v1282_v44 = vpop.xlane.xlu1 %1281 }
 0x933   : > { %v1286_v45 = vsub.f32 %v1274_v36, %v1282_v44  ;;  %v1503_v44 = vpack.c.bf16 %v1412_v43, %v1410_v42  ;;  %v1433_v42 = vld [vmem:[%s3012_s12 + $0x30] sm:$0xff]  ;;  %v1434_v43 = vld [vmem:[%s3012_s12 + $0x38] sm:$0xff] }
 0x934   : > { %v1285_v47 = vpop.xlane.xlu0 %1284 }
 0x935   : > { %v1288_v48 = vmul.f32 1.442695, %v1286_v45  ;;  %v1287_v50 = vsub.f32 %v1277_v40, %v1285_v47  ;;  %v1413_v40 = vld [vmem:[%s3010_s10 + $0x18] sm:$0xff]  ;;  %v1415_v45 = vld [vmem:[%s3010_s10 + $0x28] sm:$0xff] }
 0x936   : > { %v1304_v51 = vpop.permute.xlu1 %1303  ;;  %v1504_v41 = vpack.c.bf16 %v1413_v40, %v1411_v39  ;;  %v1417_v47 = vld [vmem:[%s3010_s10 + $0x38] sm:$0xff]  ;;  %v1449_v39 = vld [vmem:[%s3012_s12 + $0xb0] sm:$0xff] }
 0x937   : > { %2217 = vpow2.f32 %v1288_v48  ;;  %v1290_v52 = vmul.f32 1.442695, %v1287_v50  ;;  %2097 = vmatpush3.bf16.msra.mxu0 %v1304_v51  ;;  %v1506_v48 = vpack.c.bf16 %v1417_v47, %v1415_v45  ;;  %v1414_v50 = vld [vmem:[%s3010_s10 + $0x20] sm:$0xff]  ;;  %v1416_v51 = vld [vmem:[%s3010_s10 + $0x30] sm:$0xff]  ;;  %v1450_v40 = vld [vmem:[%s3012_s12 + $0xb8] sm:$0xff] }
 0x938   : > { %1525 = vmatprep.subr.bf16.mxu0 %v1504_v41  ;;  %v1685_v41 = vpack.c.bf16 %v1450_v40, %v1449_v39  ;;  %v1451_v45 = vld [vmem:[%s3012_s12 + $0xc0] sm:$0xff]  ;;  %v1452_v47 = vld [vmem:[%s3012_s12 + $0xc8] sm:$0xff] }
 0x939   : > { %2219 = vpow2.f32 %v1290_v52  ;;  %v1505_v52 = vpack.c.bf16 %v1416_v51, %v1414_v50  ;;  %v1435_v50 = vld [vmem:[%s3012_s12 + $0x40] sm:$0xff]  ;;  %v1436_v51 = vld [vmem:[%s3012_s12 + $0x48] sm:$0xff] }
 0x941   : > { %v2218_v53 = vpop.eup %2217 }
 0x942   : > { %v1292_v54 = vsel %vm729_vm2, %v2218_v53, 0.0 }
 0x943   : > { %v2220_v55 = vpop.eup %2219  ;;  %1293 = vadd.xlane.f32.xlu0 %v1292_v54  ;;  %v1421_v54 = vld [vmem:[%s3010_s10 + $0x58] sm:$0xff] }
 0x944   : > { %v1295_v56 = vsel %vm729_vm2, %v2220_v55, 0.0 }
 0x947   : > { %1296 = vadd.xlane.f32.xlu0 %v1295_v56  ;;  %v1418_v56 = vld [vmem:[%s3010_s10 + $0x40] sm:$0xff] }
 0x948   : > { %v1507_v59 = vpack.c.bf16 %v1420_v13, %v1418_v56  ;;  %v1437_v56 = vld [vmem:[%s3012_s12 + $0x50] sm:$0xff]  ;;  %v1438_v13 = vld [vmem:[%s3012_s12 + $0x58] sm:$0xff] }
 0x971   : > { %v1220_v63 = vpop.f32.mrb[16].mxu0 }
 0x972   : > { %v1227_v2 = vadd.f32 %v1220_v63, %v2638_v46  ;;  %v2088_v3 = vpop.f32.mrb[17].mxu0  ;;  %v1425_v63 = vld [vmem:[%s3010_s10 + $0x78] sm:$0xff] }
 0x973   : > { %v1223_v4 = vpop.f32.mrb[18].mxu0  ;;  %v1510_v3 = vpack.c.bf16 %v1425_v63, %v1423_v62  ;;  %v1455_v62 = vld [vmem:[%s3012_s12 + $0xe0] sm:$0xff]  ;;  %v1456_v63 = vld [vmem:[%s3012_s12 + $0xe8] sm:$0xff] }
 0x974   : > { %v1228_v5 = vadd.f32 %v1223_v4, %v2640_v49  ;;  %v2089_v6 = vpop.f32.mrb[19].mxu0  ;;  %v1424_v4 = vld [vmem:[%s3010_s10 + $0x70] sm:$0xff] }
 0x9d0   : > { %v1294_v7 = vpop.xlane.xlu0 %1293 }
 0x9d1   : > { %2221 = vrcp.f32 %v1294_v7 }
 0x9d4   : > { %v1297_v8 = vpop.xlane.xlu0 %1296 }
 0x9d5   : > { %2223 = vrcp.f32 %v1297_v8 }
 0x9db   : > { %v2222_v9 = vpop.eup %2221 }
 0x9dc   : > { %v1300_v11 = vmul.f32 %v2222_v9, %v2218_v53  ;;  %v1419_v53 = vld [vmem:[%s3010_s10 + $0x48] sm:$0xff] }
 0x9df   : > { %v2224_v10 = vpop.eup %2223 }
 0x9e0   : > { %v1301_v15 = vmul.f32 %v2224_v10, %v2220_v55  ;;  %v1508_v55 = vpack.c.bf16 %v1421_v54, %v1419_v53  ;;  %v1453_v53 = vld [vmem:[%s3012_s12 + $0xd0] sm:$0xff]  ;;  %v1454_v54 = vld [vmem:[%s3012_s12 + $0xd8] sm:$0xff] }
 0x9e2   : > { %v1302_v16 = vpack.c.bf16 %v1301_v15, %v1300_v11 }
 0x9e4   : > { %2099 = vmatmul.mubr.msk.bf16.vlgmr.msra.gmra.mrb[20].mxu0 %vm729_vm2, %v1302_v16 }
 0x9e5   : > { %1557 = vmatprep.mubr.bf16.mxu0 %v2313_v37  ;;  %1526 = vmatpush1.bf16.msra.mxu0 %v1503_v44  ;;  %v1677_v44 = vpack.c.bf16 %v1434_v43, %v1433_v42 }
 0x9e6   : > { %1527 = vmatprep.subr.bf16.mxu0 %v1506_v48  ;;  %v1686_v48 = vpack.c.bf16 %v1452_v47, %v1451_v45 }
 0x9e9   : > { %1528 = vmatpush1.bf16.msra.mxu0 %v1505_v52  ;;  %v1678_v52 = vpack.c.bf16 %v1436_v51, %v1435_v50 }
 0x9ea   : > { %1529 = vmatprep.subr.bf16.mxu0 %v1508_v55  ;;  %v1687_v55 = vpack.c.bf16 %v1454_v54, %v1453_v53 }
 0x9ed   : > { %1530 = vmatpush1.bf16.msra.mxu0 %v1507_v59  ;;  %v1679_v59 = vpack.c.bf16 %v1438_v13, %v1437_v56 }
 0x9ee   : > { %1531 = vmatprep.subr.bf16.mxu0 %v1510_v3  ;;  %v1439_v3 = vld [vmem:[%s3012_s12 + $0x60] sm:$0xff] }
 0xab7   : > { %v1343_v17 = vpop.f32.mrb[20].mxu0 }
 0xab8   : > { %v2100_v46 = vpop.f32.mrb[21].mxu0 }
 0xab9   : > { %v1346_v18 = vpop.f32.mrb[22].mxu0 }
 0xaba   : > { %v1350_v19 = vpack.c.bf16 %v1346_v18, %v1343_v17  ;;  %v2101_v20 = vpop.f32.mrb[23].mxu0  ;;  %v1970_v17 = vld [vmem:[%s3008_s8] ss:$0 sm:$0xff] }
 0xabb   : > { %v1971_v20 = vld [vmem:[%s3009_s9] ss:$0 sm:$0xff] }
 0xabc   : > { %2105 = vmatmul.mubr.msk.bf16.vlgmr.msra.gmra.mrb[24].mxu1 %vm729_vm2, %v1350_v19 }
 0xb8f   : > { %v1389_v49 = vpop.f32.mrb[24].mxu1 }
 0xb90   : > { %v1396_v21 = vadd.f32 %v1389_v49, %v1227_v2  ;;  %v2106_v22 = vpop.f32.mrb[25].mxu1  ;;  %v1422_v2 = vld [vmem:[%s3010_s10 + $0x60] sm:$0xff] }
 0xb91   : > { %v1392_v23 = vpop.f32.mrb[26].mxu1 }
 0xb92   : > { %v1398_v24 = vadd.f32 %v1396_v21, %v2473_v0  ;;  %v1397_v14 = vadd.f32 %v1392_v23, %v1228_v5  ;;  %v2107_v25 = vpop.f32.mrb[27].mxu1  ;;  %v1509_v5 = vpack.c.bf16 %v1424_v4, %v1422_v2  ;;  %v1443_v23 = vld [vmem:[%s3012_s12 + $0x80] sm:$0xff]  ;;  %v1688_v2 = vpack.c.bf16 %v1456_v63, %v1455_v62  ;;  %v1440_v4 = vld [vmem:[%s3012_s12 + $0x68] sm:$0xff] }
 0xb93   : > { %v1427_v25 = vld [vmem:[%s3012_s12] sm:$0xff] }
 0xb94   : > { %v2703_v37 = vadd.f32 %v1969_v12, %v1398_v24  ;;  %v1399_v26 = vadd.f32 %v1397_v14, %v2475_v1  ;;  %1532 = vmatpush1.bf16.msra.mxu0 %v1509_v5  ;;  %v1444_v24 = vld [vmem:[%s3012_s12 + $0x88] sm:$0xff]  ;;  %v1680_v5 = vpack.c.bf16 %v1440_v4, %v1439_v3 }
 0xb95   : > { %v1682_v14 = vpack.c.bf16 %v1444_v24, %v1443_v23 }
 0xb96   : > { %v2706_v27 = vadd.f32 %v1969_v12, %v1399_v26  ;;  %v1460_v28 = vsel %vm612_vm0, %v2703_v37, 0.0  ;;  %v1428_v26 = vld [vmem:[%s3012_s12 + $0x8] sm:$0xff] }
 0xb97   : > { %1461 = vadd.xlane.f32.xlu0 %v1460_v28  ;;  %v1674_v28 = vpack.c.bf16 %v1428_v26, %v1427_v25  ;;  %2005 = vmatprep.subr.bf16.mxu1 %v1682_v14 }
 0xb98   : > { %v1463_v29 = vsel %vm612_vm0, %v2706_v27, 0.0 }
 0xb99   : > { %2006 = vmatpush3.bf16.msra.mxu1 %v1674_v28 }
 0xb9b   : > { %1464 = vadd.xlane.f32.xlu0 %v1463_v29  ;;  %v1446_v29 = vld [vmem:[%s3012_s12 + $0x98] sm:$0xff] }
 0xc24   : > { %v1462_v30 = vpop.xlane.xlu0 %1461 }
 0xc25   : > { %v1466_v31 = vmul.f32 0.015625, %v1462_v30 }
 0xc27   : > { %v1468_v0 = vsub.f32 %v2703_v37, %v1466_v31  ;;  %v1429_v31 = vld [vmem:[%s3012_s12 + $0x10] sm:$0xff] }
 0xc28   : > { %v1465_v32 = vpop.xlane.xlu0 %1464 }
 0xc29   : > { %v1467_v33 = vmul.f32 0.015625, %v1465_v32  ;;  %v1470_v34 = vmul.f32 %v1468_v0, %v1468_v0 }
 0xc2b   : > { %v1469_v35 = vsub.f32 %v2706_v27, %v1467_v33  ;;  %v1472_v1 = vsel %vm612_vm0, %v1470_v34, 0.0  ;;  %v1447_v33 = vld [vmem:[%s3012_s12 + $0xa0] sm:$0xff]  ;;  %v1448_v34 = vld [vmem:[%s3012_s12 + $0xa8] sm:$0xff] }
 0xc2c   : > { %1473 = vadd.xlane.f32.xlu0 %v1472_v1  ;;  %v1431_v1 = vld [vmem:[%s3012_s12 + $0x20] sm:$0xff] }
 0xc2d   : > { %v1471_v36 = vmul.f32 %v1469_v35, %v1469_v35 }
 0xc2f   : > { %v1475_v38 = vsel %vm612_vm0, %v1471_v36, 0.0  ;;  %v1432_v36 = vld [vmem:[%s3012_s12 + $0x28] sm:$0xff] }
 0xc30   : > { %1476 = vadd.xlane.f32.xlu0 %v1475_v38  ;;  %v1676_v38 = vpack.c.bf16 %v1432_v36, %v1431_v1 }
 0xcb9   : > { %v1474_v6 = vpop.xlane.xlu0 %1473 }
 0xcba   : > { %v1478_v7 = vmul.f32 0.015625, %v1474_v6  ;;  %v1457_v6 = vld [vmem:[%s3012_s12 + $0xf0] sm:$0xff] }
 0xcbc   : > { %v1480_v8 = vadd.f32 1e-05, %v1478_v7  ;;  %v1458_v7 = vld [vmem:[%s3012_s12 + $0xf8] sm:$0xff] }
 0xcbd   : > { %v1477_v9 = vpop.xlane.xlu0 %1476 }
 0xcbe   : > { %2225 = vrsqrt.f32 %v1480_v8  ;;  %v1479_v10 = vmul.f32 0.015625, %v1477_v9  ;;  %v1689_v8 = vpack.c.bf16 %v1458_v7, %v1457_v6  ;;  %v1441_v9 = vld [vmem:[%s3012_s12 + $0x70] sm:$0xff] }
 0xcc0   : > { %v1481_v11 = vadd.f32 1e-05, %v1479_v10  ;;  %v1442_v10 = vld [vmem:[%s3012_s12 + $0x78] sm:$0xff] }
 0xcc2   : > { %2227 = vrsqrt.f32 %v1481_v11  ;;  %v1681_v11 = vpack.c.bf16 %v1442_v10, %v1441_v9 }
 0xcc8   : > { %v2226_v15 = vpop.eup %2225 }
 0xcc9   : > { %v1484_v16 = vmul.f32 %v2226_v15, %v1468_v0  ;;  %v1430_v0 = vld [vmem:[%s3012_s12 + $0x18] sm:$0xff]  ;;  %v1426_v15 = vld [vmem:[%s3011_s11] sm:$0x3] }
 0xcca   : > { %v1675_v32 = vpack.c.bf16 %v1430_v0, %v1429_v31 }
 0xccb   : > { %v1492_v18 = vmul.f32 %v1970_v17, %v1484_v16  ;;  %v1515_v16 = vrot.slane %v1426_v15, %v668_v58 }
 0xccc   : > { %v2228_v46 = vpop.eup %2227 }
 0xccd   : > { %v1485_v19 = vmul.f32 %v2228_v46, %v1469_v35  ;;  %v1500_v21 = vadd.f32 %v1971_v20, %v1492_v18  ;;  %v1684_v35 = vpack.c.bf16 %v1448_v34, %v1447_v33 }
 0xccf   : > { %v1493_v49 = vmul.f32 %v1970_v17, %v1485_v19  ;;  %v1519_v17 = vrot.slane %v1426_v15, %v672_v61 }
 0xcd1   : > { %v1501_v22 = vadd.f32 %v1971_v20, %v1493_v49 }
 0xcd3   : > { %v1502_v12 = vpack.c.bf16 %v1501_v22, %v1500_v21 }
 0xcd5   : > { %1972 = vmatmul.mubr.msk.bf16.vlgmr.msra.gmra.mrb[24].mxu0 %vm612_vm0, %v1502_v12 }
 0xcd6   : > { %2124 = vmatprep.mubr.msk.f32.mxu0 %vm2315_vm1, %v2314_v60  ;;  %v1445_v60 = vld [vmem:[%s3012_s12 + $0x90] sm:$0xff] }
 0xcd7   : > { %v1683_v30 = vpack.c.bf16 %v1446_v29, %v1445_v60 }
 0xcd9   : > { %2007 = vmatprep.subr.bf16.mxu1 %v1683_v30 }
 0xcda   : > { %2008 = vmatpush3.bf16.msra.mxu1 %v1675_v32 }
 0xcdb   : > { %2009 = vmatprep.subr.bf16.mxu1 %v1684_v35 }
 0xcde   : > { %2010 = vmatpush3.bf16.msra.mxu1 %v1676_v38 }
 0xcdf   : > { %2011 = vmatprep.subr.bf16.mxu1 %v1685_v41 }
 0xce2   : > { %2012 = vmatpush3.bf16.msra.mxu1 %v1677_v44 }
 0xce3   : > { %2013 = vmatprep.subr.bf16.mxu1 %v1686_v48 }
 0xce6   : > { %2014 = vmatpush3.bf16.msra.mxu1 %v1678_v52 }
 0xce7   : > { %2015 = vmatprep.subr.bf16.mxu1 %v1687_v55 }
 0xcea   : > { %2016 = vmatpush3.bf16.msra.mxu1 %v1679_v59 }
 0xceb   : > { %2017 = vmatprep.subr.bf16.mxu1 %v1688_v2 }
 0xcee   : > { %2018 = vmatpush3.bf16.msra.mxu1 %v1680_v5 }
 0xcef   : > { %2019 = vmatprep.subr.bf16.mxu1 %v1689_v8 }
 0xcf2   : > { %2020 = vmatpush3.bf16.msra.mxu1 %v1681_v11 }
 0xda8   : > { %v1559_v46 = vpop.f32.mrb[24].mxu0 }
 0xda9   : > { %v2876_v18 = vadd.f32 %v1559_v46, %v1515_v16  ;;  %v1561_v19 = vpop.f32.mrb[25].mxu0 }
 0xdaa   : > { %v2878_v20 = vadd.f32 %v1561_v19, %v1519_v17  ;;  %v1563_v49 = vpop.f32.mrb[26].mxu0 }
 0xdab   : > { %v2881_v21 = vmul.f32 0.70710677, %v2876_v18  ;;  %v2883_v22 = vadd.f32 %v1563_v49, %v1515_v16  ;;  %v1565_v12 = vpop.f32.mrb[27].mxu0 }
 0xdac   : > { %v2886_v23 = vmul.f32 0.70710677, %v2878_v20  ;;  %v2888_v58 = vadd.f32 %v1565_v12, %v1519_v17 }
 0xdad   : > { %v1576_v57 = vand.u32 2147483647, %v2881_v21  ;;  %v2892_v61 = vmul.f32 0.70710677, %v2883_v22  ;;  %vm1652_vm3 = vcmp.lt.f32.partialorder %v2881_v21, 0.0 }
 0xdae   : > { %v1577_v24 = vand.u32 2147483647, %v2886_v23  ;;  %v2896_v14 = vmul.f32 0.70710677, %v2888_v58  ;;  %vm1653_vm4 = vcmp.lt.f32.partialorder %v2886_v23, 0.0 }
 0xdaf   : > { %v1580_v25 = vmul.f32 0.3275911, %v1576_v57  ;;  %v1578_v26 = vand.u32 2147483647, %v2892_v61  ;;  %v1628_v34 = vsub.f32 0.0, %v1576_v57  ;;  %vm1654_vm5 = vcmp.lt.f32.partialorder %v2892_v61, 0.0 }
 0xdb0   : > { %v1581_v28 = vmul.f32 0.3275911, %v1577_v24  ;;  %v1579_v60 = vand.u32 2147483647, %v2896_v14  ;;  %v1629_v35 = vsub.f32 0.0, %v1577_v24  ;;  %vm1655_vm6 = vcmp.lt.f32.partialorder %v2896_v14, 0.0 }
 0xdb1   : > { %v1584_v29 = vadd.f32 1.0, %v1580_v25  ;;  %v1582_v30 = vmul.f32 0.3275911, %v1578_v26  ;;  %v1632_v36 = vmul.f32 %v1628_v34, %v1576_v57  ;;  %v1630_v38 = vsub.f32 0.0, %v1578_v26 }
 0xdb2   : > { %v1585_v31 = vadd.f32 1.0, %v1581_v28  ;;  %v1583_v0 = vmul.f32 0.3275911, %v1579_v60  ;;  %v1633_v41 = vmul.f32 %v1629_v35, %v1577_v24  ;;  %v1631_v43 = vsub.f32 0.0, %v1579_v60 }
 0xdb3   : > { %2229 = vrcp.f32 %v1584_v29  ;;  %v1586_v32 = vadd.f32 1.0, %v1582_v30  ;;  %v1636_v47 = vmul.f32 1.442695, %v1632_v36  ;;  %v1634_v50 = vmul.f32 %v1630_v38, %v1578_v26 }
 0xdb4   : > { %2231 = vrcp.f32 %v1585_v31  ;;  %v1587_v33 = vadd.f32 1.0, %v1583_v0  ;;  %v1638_v52 = vmul.f32 1.442695, %v1633_v41  ;;  %v1635_v56 = vmul.f32 %v1631_v43, %v1579_v60 }
 0xdb5   : > { %2233 = vrcp.f32 %v1586_v32  ;;  %v1640_v2 = vmul.f32 1.442695, %v1634_v50 }
 0xdb6   : > { %2235 = vrcp.f32 %v1587_v33  ;;  %v1642_v7 = vmul.f32 1.442695, %v1635_v56  ;;  %v1570_v56 = vmul.f32 0.5, %v2883_v22 }
 0xdb7   : > { %2237 = vpow2.f32 %v1636_v47 }
 0xdb8   : > { %2239 = vpow2.f32 %v1638_v52 }
 0xdb9   : > { %2241 = vpow2.f32 %v1640_v2 }
 0xdba   : > { %2243 = vpow2.f32 %v1642_v7 }
 0xdbd   : > { %v2230_v1 = vpop.eup %2229 }
 0xdbe   : > { %v2232_v39 = vpop.eup %2231  ;;  %v1592_v40 = vmul.f32 1.0614054, %v2230_v1 }
 0xdbf   : > { %v1593_v42 = vmul.f32 1.0614054, %v2232_v39  ;;  %v2234_v45 = vpop.eup %2233 }
 0xdc0   : > { %v1596_v44 = vadd.f32 -1.4531521, %v1592_v40  ;;  %v1594_v53 = vmul.f32 1.0614054, %v2234_v45  ;;  %v2236_v54 = vpop.eup %2235 }
 0xdc1   : > { %v1597_v48 = vadd.f32 -1.4531521, %v1593_v42  ;;  %v1595_v62 = vmul.f32 1.0614054, %v2236_v54  ;;  %v2238_v28 = vpop.eup %2237 }
 0xdc2   : > { %v1600_v51 = vmul.f32 %v2230_v1, %v1596_v44  ;;  %v1598_v59 = vadd.f32 -1.4531521, %v1594_v53  ;;  %v2240_v29 = vpop.eup %2239 }
 0xdc3   : > { %v1601_v55 = vmul.f32 %v2232_v39, %v1597_v48  ;;  %v1599_v5 = vadd.f32 -1.4531521, %v1595_v62  ;;  %v2242_v36 = vpop.eup %2241 }
 0xdc4   : > { %v1604_v13 = vadd.f32 1.4214138, %v1600_v51  ;;  %v1602_v4 = vmul.f32 %v2234_v45, %v1598_v59  ;;  %v2244_v43 = vpop.eup %2243 }
 0xdc5   : > { %v1605_v63 = vadd.f32 1.4214138, %v1601_v55  ;;  %v1603_v10 = vmul.f32 %v2236_v54, %v1599_v5 }
 0xdc6   : > { %v1608_v3 = vmul.f32 %v2230_v1, %v1604_v13  ;;  %v1606_v9 = vadd.f32 1.4214138, %v1602_v4  ;;  %v1569_v13 = vmul.f32 0.5, %v2878_v20  ;;  %v1973_v20 = vld [vmem:[%s3013_s13] ss:$0 sm:$0xff] }
 0xdc7   : > { %v1609_v6 = vmul.f32 %v2232_v39, %v1605_v63  ;;  %v1607_v17 = vadd.f32 1.4214138, %v1603_v10  ;;  %v1571_v63 = vmul.f32 0.5, %v2888_v58 }
 0xdc8   : > { %v1612_v8 = vadd.f32 -0.28449672, %v1608_v3  ;;  %v1610_v16 = vmul.f32 %v2234_v45, %v1606_v9 }
 0xdc9   : > { %v1613_v11 = vadd.f32 -0.28449672, %v1609_v6  ;;  %v1611_v12 = vmul.f32 %v2236_v54, %v1607_v17 }
 0xdca   : > { %v1616_v15 = vmul.f32 %v2230_v1, %v1612_v8  ;;  %v1614_v49 = vadd.f32 -0.28449672, %v1610_v16 }
 0xdcb   : > { %v1617_v46 = vmul.f32 %v2232_v39, %v1613_v11  ;;  %v1615_v26 = vadd.f32 -0.28449672, %v1611_v12 }
 0xdcc   : > { %v1620_v19 = vadd.f32 0.2548296, %v1616_v15  ;;  %v1618_v25 = vmul.f32 %v2234_v45, %v1614_v49 }
 0xdcd   : > { %v1621_v57 = vadd.f32 0.2548296, %v1617_v46  ;;  %v1619_v0 = vmul.f32 %v2236_v54, %v1615_v26  ;;  %v1796_v26 = vld [vmem:[%s3016_s16] sm:$0xff] }
 0xdce   : > { %v1624_v24 = vmul.f32 %v2230_v1, %v1620_v19  ;;  %v1622_v31 = vadd.f32 0.2548296, %v1618_v25 }
 0xdcf   : > { %v1625_v60 = vmul.f32 %v2232_v39, %v1621_v57  ;;  %v1623_v35 = vadd.f32 0.2548296, %v1619_v0 }
 0xdd0   : > { %v1644_v30 = vmul.f32 %v2238_v28, %v1624_v24  ;;  %v1626_v34 = vmul.f32 %v2234_v45, %v1622_v31  ;;  %v1568_v45 = vmul.f32 0.5, %v2876_v18  ;;  %v1797_v28 = vld [vmem:[%s3016_s16 + $0x8] sm:$0xff]  ;;  %v2323_v31 = vmov 0.0|0.0  }
 0xdd1   : > { %v1645_v32 = vmul.f32 %v2240_v29, %v1625_v60  ;;  %v1627_v42 = vmul.f32 %v2236_v54, %v1623_v35  ;;  %v2128_v60 = vpack.c.bf16 %v1797_v28, %v1796_v26  ;;  %v1798_v29 = vld [vmem:[%s3016_s16 + $0x10] sm:$0xff]  ;;  %2127 = vmatprep.subr.bf16.mxu0 %v2323_v31 }
 0xdd2   : > { %v1648_v33 = vsub.f32 1.0, %v1644_v30  ;;  %v1646_v41 = vmul.f32 %v2242_v36, %v1626_v34  ;;  %v1799_v30 = vld [vmem:[%s3016_s16 + $0x18] sm:$0xff]  ;;  %v1802_v35 = vld [vmem:[%s3016_s16 + $0x30] sm:$0xff] }
 0xdd3   : > { %v1649_v38 = vsub.f32 1.0, %v1645_v32  ;;  %v1647_v39 = vmul.f32 %v2244_v43, %v1627_v42  ;;  %2129 = vmatpush3.bf16.msra.mxu0 %v2128_v60  ;;  %v2131_v0 = vpack.c.bf16 %v1799_v30, %v1798_v29  ;;  %v1800_v32 = vld [vmem:[%s3016_s16 + $0x20] sm:$0xff]  ;;  %v1803_v36 = vld [vmem:[%s3016_s16 + $0x38] sm:$0xff] }
 0xdd4   : > { %v1656_v40 = vsub.f32 0.0, %v1648_v33  ;;  %v1650_v47 = vsub.f32 1.0, %v1646_v41  ;;  %2130 = vmatprep.subr.bf16.mxu0 %v2323_v31 }
 0xdd5   : > { %v1657_v1 = vsub.f32 0.0, %v1649_v38  ;;  %v1651_v51 = vsub.f32 1.0, %v1647_v39  ;;  %v1974_v39 = vld [vmem:[%s3014_s14] ss:$0 sm:$0xff] }
 0xdd6   : > { %v1660_v44 = vsel %vm1652_vm3, %v1656_v40, %v1648_v33  ;;  %v1658_v50 = vsub.f32 0.0, %v1650_v47  ;;  %v1801_v33 = vld [vmem:[%s3016_s16 + $0x28] sm:$0xff] }
 0xdd7   : > { %v1661_v48 = vsel %vm1653_vm4, %v1657_v1, %v1649_v38  ;;  %v1664_v52 = vadd.f32 1.0, %v1660_v44  ;;  %v1659_v55 = vsub.f32 0.0, %v1651_v51  ;;  %2132 = vmatpush3.bf16.msra.mxu0 %v2131_v0  ;;  %v2134_v34 = vpack.c.bf16 %v1801_v33, %v1800_v32 }
 0xdd8   : > { %v1662_v53 = vsel %vm1654_vm5, %v1658_v50, %v1650_v47  ;;  %v1665_v54 = vadd.f32 1.0, %v1661_v48  ;;  %2133 = vmatprep.subr.bf16.mxu0 %v2323_v31  ;;  %v2137_v38 = vpack.c.bf16 %v1803_v36, %v1802_v35 }
 0xdd9   : > { %v1666_v21 = vadd.f32 1.0, %v1662_v53  ;;  %v1663_v59 = vsel %vm1655_vm6, %v1659_v55, %v1651_v51  ;;  %v1668_v23 = vmul.f32 %v1664_v52, %v1568_v45  ;;  %v1975_v52 = vld [vmem:[%s3015_s15] ss:$0 sm:$0xff] }
 0xdda   : > { %v1667_v2 = vadd.f32 1.0, %v1663_v59  ;;  %v1669_v3 = vmul.f32 %v1665_v54, %v1569_v13 }
 0xddb   : > { %v1670_v62 = vmul.f32 %v1666_v21, %v1570_v56  ;;  %2135 = vmatpush3.bf16.msra.mxu0 %v2134_v34 }
 0xddc   : > { %v1671_v4 = vmul.f32 %v1667_v2, %v1571_v63  ;;  %2136 = vmatprep.subr.bf16.mxu0 %v2323_v31 }
 0xddd   : > { %v1672_v61 = vpack.c.bf16 %v1670_v62, %v1668_v23 }
 0xdde   : > { %v1673_v18 = vpack.c.bf16 %v1671_v4, %v1669_v3  ;;  %v1804_v4 = vld [vmem:[%s3017_s17] sm:$0x1] }
 0xddf   : > { %2138 = vmatpush3.bf16.msra.mxu0 %v2137_v38 }
 0xde0   : > { %1722 = vmatprep.mubr.bf16.mxu1 %v1673_v18 }
 0xde1   : > { %1723 = vmatmul.mubr.bf16.vlgmr.msra.gmra.mrb[28].mxu1 %v1672_v61 }
 0xeb4   : > { %v2021_v5 = vpop.f32.mrb[28].mxu1 }
 0xeb5   : > { %v2022_v6 = vpop.f32.mrb[29].mxu1 }
 0xeb6   : > { %v2023_v22 = vadd.f32 %v2022_v6, %v2021_v5  ;;  %v2024_v7 = vpop.f32.mrb[30].mxu1 }
 0xeb7   : > { %v2025_v8 = vpop.f32.mrb[31].mxu1 }
 0xeb8   : > { %v1731_v14 = vadd.f32 %v2023_v22, %v2703_v37  ;;  %v2026_v9 = vadd.f32 %v2025_v8, %v2024_v7 }
 0xeba   : > { %v1732_v58 = vadd.f32 %v2026_v9, %v2706_v27  ;;  %v1739_v10 = vadd.f32 %v1973_v20, %v1731_v14 }
 0xebc   : > { %v1743_v11 = vsel %vm612_vm0, %v1739_v10, 0.0  ;;  %v1740_v15 = vadd.f32 %v1973_v20, %v1732_v58 }
 0xebd   : > { %1744 = vadd.xlane.f32.xlu1 %v1743_v11 }
 0xebe   : > { %v1746_v16 = vsel %vm612_vm0, %v1740_v15, 0.0 }
 0xebf   : > { %1747 = vadd.xlane.f32.xlu0 %v1746_v16 }
 0xf4a   : > { %v1745_v17 = vpop.xlane.xlu1 %1744 }
 0xf4b   : > { %v1749_v46 = vmul.f32 0.015625, %v1745_v17 }
 0xf4c   : > { %v1748_v19 = vpop.xlane.xlu0 %1747 }
 0xf4d   : > { %v1751_v49 = vsub.f32 %v1739_v10, %v1749_v46  ;;  %v1750_v12 = vmul.f32 0.015625, %v1748_v19 }
 0xf4f   : > { %v1752_v57 = vsub.f32 %v1740_v15, %v1750_v12  ;;  %v1753_v24 = vmul.f32 %v1751_v49, %v1751_v49 }
 0xf51   : > { %v1755_v37 = vsel %vm612_vm0, %v1753_v24, 0.0  ;;  %v1754_v25 = vmul.f32 %v1752_v57, %v1752_v57 }
 0xf52   : > { %1756 = vadd.xlane.f32.xlu0 %v1755_v37 }
 0xf53   : > { %v1758_v27 = vsel %vm612_vm0, %v1754_v25, 0.0 }
 0xf56   : > { %1759 = vadd.xlane.f32.xlu0 %v1758_v27 }
 0xfdf   : > { %v1757_v40 = vpop.xlane.xlu0 %1756 }
 0xfe0   : > { %v1761_v41 = vmul.f32 0.015625, %v1757_v40 }
 0xfe2   : > { %v1763_v42 = vadd.f32 1e-05, %v1761_v41 }
 0xfe3   : > { %v1760_v43 = vpop.xlane.xlu0 %1759 }
 0xfe4   : > { %2245 = vrsqrt.f32 %v1763_v42  ;;  %v1762_v1 = vmul.f32 0.015625, %v1760_v43 }
 0xfe6   : > { %v1764_v44 = vadd.f32 1e-05, %v1762_v1 }
 0xfe8   : > { %2247 = vrsqrt.f32 %v1764_v44 }
 0xfee   : > { %v2246_v47 = vpop.eup %2245 }
 0xfef   : > { %v1767_v48 = vmul.f32 %v2246_v47, %v1751_v49 }
 0xff1   : > { %v1775_v50 = vmul.f32 %v1974_v39, %v1767_v48 }
 0xff2   : > { %v2248_v51 = vpop.eup %2247 }
 0xff3   : > { %v1768_v45 = vmul.f32 %v2248_v51, %v1752_v57  ;;  %v1783_v53 = vadd.f32 %v1975_v52, %v1775_v50 }
 0xff5   : > { %v1776_v55 = vmul.f32 %v1974_v39, %v1768_v45  ;;  %v1785_v56 = vsel %vm612_vm0, %v1783_v53, 0.0 }
 0xff7   : > { %v1784_v54 = vadd.f32 %v1975_v52, %v1776_v55 }
 0xff9   : > { %v1786_v21 = vsel %vm612_vm0, %v1784_v54, 0.0 }
 0xffa   : > { %v1787_v13 = vadd.f32 %v1786_v21, %v1785_v56 }
 0xffc   : > { %v1788_v59 = vrot.slane %v1787_v13, 4 }
 0xffe   : > { %v1789_v23 = vadd.f32 %v1788_v59, %v1787_v13 }
0x1000   : > { %v1790_v62 = vrot.slane %v1789_v23, 2 }
0x1002   : > { %v1791_v63 = vadd.f32 %v1790_v62, %v1789_v23 }
0x1004   : > { %v1792_v2 = vrot.slane %v1791_v63, 1 }
0x1006   : > { %v1793_v3 = vadd.f32 %v1792_v2, %v1791_v63 }
0x1008   : > { %v1795_v61 = vmul.f32 0.0625, %v1793_v3 }
0x100a   : > { %2125 = vmatmul.mubr.msk.f32.vlgmr.msra.gmra.mrb[28].mxu0 %vm612_vm0, %v1795_v61 }
0x10dd   : > { %v1874_v18 = vpop.f32.mrb[28].mxu0 }
0x10de   : > { %v1875_v5 = vadd.f32 %v1874_v18, %v1804_v4  ;;  %v2126_v6 = vpop.f32.mrb[29].mxu0 }
0x10e0   : > { %1879 = vst.msk [vmem:[%s567_s23] sm:$0x1] %vm1878_vm7, %v1875_v5 }
0x10e1   : > { %2262 = shalt.err (!%p2259_p3)
}
0x10e2   : > { %s2263_s29 = scalar_lea.hbm %s2958_s20, 16  ;;  %s2267_s19 = scalar_lea.hbm %s3018_s18, 32 }
0x10e3   : > { %p2264_p4 = scmp.ne.s32.totalorder %s2958_s20, %s2263_s29  ;;  %p2268_p9 = scmp.lt.u32.totalorder %s2958_s20, %s3018_s18 }
0x10e4   : > { %p2269_p10 = scmp.lt.u32.totalorder %s2267_s19, %s2263_s29  ;;  %p2271_p12 = scmp.lt.u32.totalorder %s2263_s29, %s2958_s20 }
0x10e5   : > { %p2265_p7 = pnand %p2264_p4, %p2458_p5 }
0x10e6   : > { %p2270_p11 = por %p2269_p10, %p2268_p9 }
0x10e7   : > { %p2266_p8 = pneg %p2265_p7 }
0x10e8   : > { %p2272_p13 = por %p2271_p12, %p2270_p11 }
0x10ea   : > { %p2273_p0 = pnand %p2272_p13, %p2266_p8 }
0x10ec   : > { %2276 = shalt.err (!%p2273_p0)
}
0x10ed   : > { %2139 = dma.vmem_to_hbm [thread:$0]  (%p2458_p5), %s2960_s24, 16, %s2958_s20, %s1881_s21  }
0x10ee PF: > { %p2145_p1 = scmp.ge.s32.totalorder %s2311_s30, 2  ;;  %s1905_s22 = sand.u32 1, %s2299_s27  }
0x10ef   : > { %s1906_s25 = scalar_lea.sflag [#allocation3], %s1905_s22 }
0x10f0   : > { %p2142_p2 = pnand %p2145_p1, %p2462_p6 }
0x10f2   : > { %2294 = dma.done.wait (!%p2142_p2), %s1906_s25, 16  }
0x10f3   : > { %2296 = vsyncadd (!%p2142_p2), %s1906_s25, 4294967280  ;;  %s3038_s30 = sld [smem:[#allocation6_spill]]  ;;  %s3039_s29 = sld [smem:[#allocation5_spill]] }
0x10f4   : > { %s3040_s1 = sld [smem:[#allocation7_spill]]  ;;  %s3041_s27 = smov %s2303_s28 }
0x10f9   : > { %p28_p3 = scmp.ge.s32.totalorder %s3038_s30, 4   ;;  %s3042_s28 = smov %s3039_s29 }
0x10fa   : > { %s3043_s29 = smov %s3040_s1 }
0x10fb   :  { %30 = sbr.rel (!%p28_p3) target bundleno = 8 (0x8), region = 127 }
0x1102   :  { %1910 = vsyncpa [#allocation3], 1 }
0x1103   :  { %1912 = vsyncpa [#allocation3 + $0x1], 1 }

// kernel: swin_forward.6
= control target key start
LH: loop header
LB: loop body
LE: loop exit
PB: predicated region body
PF: predicated region fallthrough
CT: control target
= control target key end

     0   :  { %s3146_s27 = smov 0   ;;  %s3787_s0 = inlined_call_operand.vmem [shape: f32[2,64,32], index: 0, kind: input, shape index: {}]   ;;  %s3788_s1 = inlined_call_operand.vmem [shape: f32[4,16,64], index: 1, kind: input, shape index: {}]   ;;  %s3789_s2 = inlined_call_operand.vmem [shape: f32[4,1,32], index: 2, kind: input, shape index: {}]   ;;  %s3790_s3 = inlined_call_operand.vmem [shape: f32[4,1,32], index: 3, kind: input, shape index: {}]   ;;  %s3791_s4 = inlined_call_operand.vmem [shape: f32[4,32,64], index: 4, kind: input, shape index: {}]   ;;  %s3792_s5 = inlined_call_operand.vmem [shape: f32[1,64], index: 5, kind: input, shape index: {}]   ;;  %s3793_s6 = inlined_call_operand.vmem [shape: f32[1,64], index: 6, kind: input, shape index: {}]   ;;  %s3794_s7 = inlined_call_operand.vmem [shape: f32[64,192], index: 7, kind: input, shape index: {}]   ;;  %s3795_s8 = inlined_call_operand.vmem [shape: f32[1,192], index: 8, kind: input, shape index: {}]   ;;  %s3796_s9 = inlined_call_operand.vmem [shape: f32[4,16,16], index: 9, kind: input, shape index: {}]   ;;  %s3797_s10 = inlined_call_operand.vmem [shape: f32[64,64], index: 10, kind: input, shape index: {}]   ;;  %s3798_s11 = inlined_call_operand.vmem [shape: f32[1,64], index: 11, kind: input, shape index: {}]   ;;  %s3799_s12 = inlined_call_operand.vmem [shape: f32[1,64], index: 12, kind: input, shape index: {}]   ;;  %s3800_s13 = inlined_call_operand.vmem [shape: f32[1,64], index: 13, kind: input, shape index: {}]   ;;  %s3801_s14 = inlined_call_operand.vmem [shape: f32[64,256], index: 14, kind: input, shape index: {}]   ;;  %s3802_s15 = inlined_call_operand.vmem [shape: f32[1,256], index: 15, kind: input, shape index: {}]   ;;  %s3803_s16 = inlined_call_operand.vmem [shape: f32[256,64], index: 16, kind: input, shape index: {}]   ;;  %s3804_s17 = inlined_call_operand.vmem [shape: f32[1,64], index: 17, kind: input, shape index: {}]   ;;  %s3805_s18 = inlined_call_operand.vmem [shape: f32[2,16,64], index: 18, kind: output, shape index: {}]  }
   0x1   :  { %3808 = sst [smem:[#allocation2_spill]] %s3787_s0 }
   0x2   :  { %3809 = sst [smem:[#allocation3_spill]] %s3788_s1 }
   0x3   :  { %3810 = sst [smem:[#allocation4_spill]] %s3789_s2 }
   0x4 LB: > { %s2524_s28 = sadd.s32 4294967295, %s3039_s27   ;;  %p2528_p0 = scmp.ge.s32.totalorder %s3039_s27, 1  ;;  %s3039_s27 = sphi %s3146_s27, %s28_s27  }
   0x5   : > { %p512_p1 = scmp.lt.s32.totalorder %s3039_s27, 3 }
   0x7   : > { %p513_p2 = pnand %p2528_p0, %p512_p1 }
   0x8   : > { %p566_p3 = scmp.lt.s32.totalorder (!%p513_p2), %s2524_s28, 1  ;;  %s3811_s0 = sld [smem:[#allocation3_spill]] (!%p513_p2)  ;;  %vm587_vm0 = vcmask (!%p513_p2), 523264   ;;  %vm921_vm1 = vcmask (!%p513_p2), 261120   ;;  %vm3042_vm2 = vmmov (!%p513_p2), 0   ;;  %vm1455_vm3 = vcmask (!%p513_p2), 130048  }
   0x9   : > { %516 = sbr.rel (%p513_p2) target bundleno = 4591 (0x11ef), region = 92  ;;  %s3812_s2 = sld [smem:[#allocation2_spill]] (!%p513_p2) }
   0xa   : > { %s3044_s22 = smov (!%p513_p2), 48   ;;  %s3046_s24 = smov (!%p513_p2), 112  }
   0xb   : > { %s3049_s26 = smov (!%p513_p2), 16   ;;  %s3050_s29 = smov (!%p513_p2), 80  }
   0xe   : > { %v585_v0 = vld [vmem:[%s3811_s0] sm:$0xff] (!%p513_p2)  ;;  %v2535_v1 = vld [vmem:[%s3811_s0 + $0x10] sm:$0xff] (!%p513_p2)  ;;  %v586_v14 = vld [vmem:[%s3811_s0 + $0x8] sm:$0xff] (!%p513_p2) }
   0xf   : > { %2715 = vmatprep.mubr.msk.f32.mxu0 (!%p513_p2), %vm587_vm0, %v585_v0  ;;  %2734 = vmatprep.mubr.msk.f32.mxu1 (!%p513_p2), %vm587_vm0, %v2535_v1  ;;  %v2536_v15 = vld [vmem:[%s3811_s0 + $0x18] sm:$0xff] (!%p513_p2)  ;;  %v2539_v16 = vld [vmem:[%s3811_s0 + $0x20] sm:$0xff] (!%p513_p2)  ;;  %v2543_v17 = vld [vmem:[%s3811_s0 + $0x30] sm:$0xff] (!%p513_p2) }
  0x10   : > { %s3815_s28 = smov (!%p566_p3, %s2524_s28), 1  ;;  %v2540_v18 = vld [vmem:[%s3811_s0 + $0x28] sm:$0xff]  ;;  %v2544_v19 = vld [vmem:[%s3811_s0 + $0x38] sm:$0xff] }
  0x11   : > { %s2599_s20 = sshll.u32 %s3815_s28, 6 }
  0x12   : > { %s570_s23 = scalar_lea.vmem %s3812_s2, %s2599_s20  ;;  %s3813_s2 = sld [smem:[#allocation4_spill]] }
  0x13   : > { %v577_v2 = vld [vmem:[%s570_s23] sm:$0xff]  ;;  %v578_v3 = vld [vmem:[%s570_s23 + $0x8] sm:$0xff]  ;;  %v579_v4 = vld [vmem:[%s570_s23 + $0x10] sm:$0xff] }
  0x14   : > { %v2879_v5 = vpack.c.bf16 %v578_v3, %v577_v2  ;;  %v580_v6 = vld [vmem:[%s570_s23 + $0x18] sm:$0xff]  ;;  %v581_v8 = vld [vmem:[%s570_s23 + $0x20] sm:$0xff]  ;;  %v582_v9 = vld [vmem:[%s570_s23 + $0x28] sm:$0xff] }
  0x15   : > { %v2883_v7 = vpack.c.bf16 %v580_v6, %v579_v4  ;;  %v2887_v10 = vpack.c.bf16 %v582_v9, %v581_v8  ;;  %v583_v11 = vld [vmem:[%s570_s23 + $0x30] sm:$0xff]  ;;  %v584_v12 = vld [vmem:[%s570_s23 + $0x38] sm:$0xff]  ;;  %s3045_s23 = smov 64  }
  0x16   : > { %2880 = vmatprep.subr.bf16.mxu0 %v2879_v5  ;;  %2896 = vmatprep.subr.bf16.mxu1 %v2879_v5  ;;  %v2891_v13 = vpack.c.bf16 %v584_v12, %v583_v11  ;;  %v2553_v12 = vld [vmem:[%s3791_s4 + $0x20] sm:$0xff] }
  0x17   : > { %2882 = vmatpush3.bf16.msra.mxu0 %v2879_v5  ;;  %2898 = vmatpush3.bf16.msra.mxu1 %v2879_v5 }
  0x18   : > { %2884 = vmatprep.subr.bf16.mxu0 %v2883_v7  ;;  %2900 = vmatprep.subr.bf16.mxu1 %v2883_v7 }
  0x1b   : > { %2886 = vmatpush3.bf16.msra.mxu0 %v2883_v7  ;;  %2902 = vmatpush3.bf16.msra.mxu1 %v2883_v7 }
  0x1c   : > { %2888 = vmatprep.subr.bf16.mxu0 %v2887_v10  ;;  %2904 = vmatprep.subr.bf16.mxu1 %v2887_v10 }
  0x1f   : > { %2890 = vmatpush3.bf16.msra.mxu0 %v2887_v10  ;;  %2906 = vmatpush3.bf16.msra.mxu1 %v2887_v10 }
  0x20   : > { %2892 = vmatprep.subr.bf16.mxu0 %v2891_v13  ;;  %2908 = vmatprep.subr.bf16.mxu1 %v2891_v13 }
  0x23   : > { %2894 = vmatpush3.bf16.msra.mxu0 %v2891_v13  ;;  %2910 = vmatpush3.bf16.msra.mxu1 %v2891_v13 }
  0x24   : > { %2912 = vmatprep.subr.bf16.mxu0 %v2879_v5  ;;  %2928 = vmatprep.subr.bf16.mxu1 %v2879_v5 }
  0x26   : > { %2716 = vmatmul.mubr.msk.f32.vlgmr.msra.gmra.mrb[0].mxu0 %vm587_vm0, %v586_v14  ;;  %2735 = vmatmul.mubr.msk.f32.vlgmr.msra.gmra.mrb[0].mxu1 %vm587_vm0, %v2536_v15  ;;  %v2555_v14 = vld [vmem:[%s3791_s4 + $0x30] sm:$0xff]  ;;  %v3041_v15 = vmov 0.0  }
  0x27   : > { %2914 = vmatpush3.bf16.msra.mxu0 %v2879_v5  ;;  %2930 = vmatpush3.bf16.msra.mxu1 %v2879_v5 }
  0x28   : > { %2916 = vmatprep.subr.bf16.mxu0 %v2883_v7  ;;  %2932 = vmatprep.subr.bf16.mxu1 %v2883_v7 }
  0x29   : > { %2753 = vmatprep.mubr.msk.f32.mxu0 %vm587_vm0, %v2539_v16  ;;  %2772 = vmatprep.mubr.msk.f32.mxu1 %vm587_vm0, %v2543_v17  ;;  %v2556_v17 = vld [vmem:[%s3791_s4 + $0x38] sm:$0xff] }
  0x2b   : > { %2918 = vmatpush3.bf16.msra.mxu0 %v2883_v7  ;;  %2934 = vmatpush3.bf16.msra.mxu1 %v2883_v7 }
  0x2c   : > { %2920 = vmatprep.subr.bf16.mxu0 %v2887_v10  ;;  %2936 = vmatprep.subr.bf16.mxu1 %v2887_v10 }
  0x2f   : > { %2922 = vmatpush3.bf16.msra.mxu0 %v2887_v10  ;;  %2938 = vmatpush3.bf16.msra.mxu1 %v2887_v10 }
  0x30   : > { %2924 = vmatprep.subr.bf16.mxu0 %v2891_v13  ;;  %2940 = vmatprep.subr.bf16.mxu1 %v2891_v13 }
  0x33   : > { %2926 = vmatpush3.bf16.msra.mxu0 %v2891_v13  ;;  %2942 = vmatpush3.bf16.msra.mxu1 %v2891_v13  ;;  %v2554_v13 = vld [vmem:[%s3791_s4 + $0x28] sm:$0xff] }
  0x34   : > { %2775 = vmatprep.subr.bf16.mxu0 %v3041_v15  ;;  %v1061_v16 = vpack.c.bf16 %v2554_v13, %v2553_v12 }
  0x36   : > { %2754 = vmatmul.mubr.msk.f32.vlgmr.msra.gmra.mrb[2].mxu0 %vm587_vm0, %v2540_v18  ;;  %2773 = vmatmul.mubr.msk.f32.vlgmr.msra.gmra.mrb[2].mxu1 %vm587_vm0, %v2544_v19  ;;  %v1062_v18 = vpack.c.bf16 %v2556_v17, %v2555_v14  ;;  %v2573_v17 = vld [vmem:[%s3791_s4 + $0x68] sm:$0xff] }
  0x37   : > { %2779 = vmatprep.mubr.msk.bf16.mxu0 %vm3042_vm2, %v3041_v15  ;;  %2776 = vmatpush3.bf16.msra.mxu0 %v1061_v16  ;;  %v2572_v16 = vld [vmem:[%s3791_s4 + $0x60] sm:$0xff] }
  0x38   : > { %2777 = vmatprep.subr.bf16.mxu0 %v3041_v15 }
  0x3b   : > { %2778 = vmatpush3.bf16.msra.mxu0 %v1062_v18  ;;  %v1255_v18 = vpack.c.bf16 %v2573_v17, %v2572_v16  ;;  %v2577_v17 = vld [vmem:[%s3792_s5] ss:$0 sm:$0xff] }
  0x3c   : > { %2783 = vmatprep.subr.bf16.mxu0 %v3041_v15 }
  0xf9   : > { %v2717_v20 = vpop.f32.mrb[0].mxu0  ;;  %v2736_v21 = vpop.f32.mrb[0].mxu1 }
  0xfa   : > { %v660_v22 = vpop.f32.mrb[1].mxu0  ;;  %v931_v23 = vsel %vm921_vm1, %v2736_v21, 0.0  ;;  %v925_v24 = vsel %vm921_vm1, %v2717_v20, 0.0  ;;  %v744_v25 = vpop.f32.mrb[1].mxu1 }
  0xfb   : > { %932 = vadd.xlane.f32.xlu1 %v931_v23  ;;  %926 = vadd.xlane.f32.xlu0 %v925_v24  ;;  %v928_v26 = vsel %vm921_vm1, %v744_v25, 0.0  ;;  %v922_v27 = vsel %vm921_vm1, %v660_v22, 0.0 }
  0xff   : > { %929 = vadd.xlane.f32.xlu1 %v928_v26  ;;  %923 = vadd.xlane.f32.xlu0 %v922_v27 }
 0x109   : > { %v2755_v28 = vpop.f32.mrb[2].mxu0  ;;  %v2774_v29 = vpop.f32.mrb[2].mxu1 }
 0x10a   : > { %v828_v30 = vpop.f32.mrb[3].mxu0  ;;  %v939_v31 = vsel %vm921_vm1, %v2755_v28, 0.0  ;;  %v912_v32 = vpop.f32.mrb[3].mxu1  ;;  %v947_v34 = vsel %vm921_vm1, %v2774_v29, 0.0 }
 0x10b   : > { %940 = vadd.xlane.f32.xlu1 %v939_v31  ;;  %v936_v33 = vsel %vm921_vm1, %v828_v30, 0.0  ;;  %v944_v35 = vsel %vm921_vm1, %v912_v32, 0.0 }
 0x10c   : > { %937 = vadd.xlane.f32.xlu0 %v936_v33 }
 0x10f   : > { %948 = vadd.xlane.f32.xlu1 %v947_v34 }
 0x110   : > { %945 = vadd.xlane.f32.xlu0 %v944_v35 }
 0x188   : > { %v933_v36 = vpop.xlane.xlu1 %932  ;;  %v927_v37 = vpop.xlane.xlu0 %926 }
 0x189   : > { %v935_v41 = vadd.f32 %v933_v36, %v927_v37 }
 0x18c   : > { %v930_v38 = vpop.xlane.xlu1 %929  ;;  %v924_v39 = vpop.xlane.xlu0 %923 }
 0x18d   : > { %v934_v43 = vadd.f32 %v930_v38, %v924_v39  ;;  %v2550_v38 = vld [vmem:[%s3813_s2 + $0x1] ss:$0 sm:$0xff] }
 0x198   : > { %v941_v40 = vpop.xlane.xlu1 %940 }
 0x199   : > { %v938_v42 = vpop.xlane.xlu0 %937  ;;  %v943_v44 = vadd.f32 %v941_v40, %v935_v41 }
 0x19a   : > { %v942_v45 = vadd.f32 %v938_v42, %v934_v43  ;;  %v2552_v42 = vld [vmem:[%s3790_s3 + $0x1] ss:$0 sm:$0xff] }
 0x19c   : > { %v949_v46 = vpop.xlane.xlu1 %948 }
 0x19d   : > { %v951_v47 = vadd.f32 %v949_v46, %v943_v44  ;;  %v946_v48 = vpop.xlane.xlu0 %945  ;;  %v1027_v46 = vld [vmem:[%s3791_s4 + $0x8] sm:$0xff] }
 0x19e   : > { %v950_v49 = vadd.f32 %v946_v48, %v942_v45  ;;  %v1026_v45 = vld [vmem:[%s3791_s4] sm:$0xff] }
 0x19f   : > { %v953_v50 = vmul.f32 0.0078125, %v951_v47 }
 0x1a0   : > { %v952_v51 = vmul.f32 0.0078125, %v950_v49  ;;  %v1031_v49 = vpack.c.bf16 %v1027_v46, %v1026_v45  ;;  %v1306_v46 = vld [vmem:[%s3794_s7 + $0x8] sm:$0xff] }
 0x1a1   : > { %v3200_v52 = vsub.f32 %v2717_v20, %v953_v50  ;;  %v3202_v53 = vsub.f32 %v2736_v21, %v953_v50  ;;  %v3215_v60 = vsub.f32 %v2755_v28, %v953_v50  ;;  %v3225_v2 = vsub.f32 %v2774_v29, %v953_v50 }
 0x1a2   : > { %v3204_v54 = vsub.f32 %v660_v22, %v952_v51  ;;  %v3206_v55 = vsub.f32 %v744_v25, %v952_v51  ;;  %v3220_v63 = vsub.f32 %v828_v30, %v952_v51  ;;  %v3230_v5 = vsub.f32 %v912_v32, %v952_v51  ;;  %v1028_v51 = vld [vmem:[%s3791_s4 + $0x10] sm:$0xff] }
 0x1a3   : > { %v963_v56 = vmul.f32 %v3200_v52, %v3200_v52  ;;  %v971_v59 = vmul.f32 %v3202_v53, %v3202_v53  ;;  %v981_v1 = vmul.f32 %v3215_v60, %v3215_v60  ;;  %v991_v7 = vmul.f32 %v3225_v2, %v3225_v2 }
 0x1a4   : > { %v962_v57 = vmul.f32 %v3204_v54, %v3204_v54  ;;  %v970_v62 = vmul.f32 %v3206_v55, %v3206_v55  ;;  %v980_v4 = vmul.f32 %v3220_v63, %v3220_v63  ;;  %v990_v9 = vmul.f32 %v3230_v5, %v3230_v5 }
 0x1a5   : > { %v967_v58 = vsel %vm921_vm1, %v963_v56, 0.0  ;;  %v975_v0 = vsel %vm921_vm1, %v971_v59, 0.0  ;;  %v985_v6 = vsel %vm921_vm1, %v981_v1, 0.0  ;;  %v995_v10 = vsel %vm921_vm1, %v991_v7, 0.0  ;;  %v2564_v1 = vld [vmem:[%s3791_s4 + $0x48] sm:$0xff]  ;;  %v2566_v7 = vld [vmem:[%s3791_s4 + $0x58] sm:$0xff] }
 0x1a6   : > { %968 = vadd.xlane.f32.xlu1 %v967_v58  ;;  %v964_v61 = vsel %vm921_vm1, %v962_v57, 0.0  ;;  %v972_v3 = vsel %vm921_vm1, %v970_v62, 0.0  ;;  %v982_v8 = vsel %vm921_vm1, %v980_v4, 0.0  ;;  %v992_v11 = vsel %vm921_vm1, %v990_v9, 0.0  ;;  %v2547_v57 = vld [vmem:[%s3813_s2] ss:$0 sm:$0xff] }
 0x1a7   : > { %965 = vadd.xlane.f32.xlu0 %v964_v61 }
 0x1aa   : > { %976 = vadd.xlane.f32.xlu1 %v975_v0  ;;  %v2563_v0 = vld [vmem:[%s3791_s4 + $0x40] sm:$0xff] }
 0x1ab   : > { %973 = vadd.xlane.f32.xlu0 %v972_v3  ;;  %v1179_v3 = vpack.c.bf16 %v2564_v1, %v2563_v0  ;;  %v1315_v0 = vld [vmem:[%s3794_s7 + $0x50] sm:$0xff] }
 0x1ae   : > { %986 = vadd.xlane.f32.xlu1 %v985_v6  ;;  %v2565_v6 = vld [vmem:[%s3791_s4 + $0x50] sm:$0xff] }
 0x1af   : > { %983 = vadd.xlane.f32.xlu0 %v982_v8 }
 0x1b2   : > { %996 = vadd.xlane.f32.xlu1 %v995_v10  ;;  %v2560_v10 = vld [vmem:[%s3813_s2 + $0x2] ss:$0 sm:$0xff] }
 0x1b3   : > { %993 = vadd.xlane.f32.xlu0 %v992_v11  ;;  %v1180_v11 = vpack.c.bf16 %v2566_v7, %v2565_v6  ;;  %v1317_v7 = vld [vmem:[%s3794_s7 + $0x60] sm:$0xff] }
 0x233   : > { %v969_v19 = vpop.xlane.xlu1 %968 }
 0x234   : > { %v966_v20 = vpop.xlane.xlu0 %965 }
 0x237   : > { %v977_v21 = vpop.xlane.xlu1 %976 }
 0x238   : > { %v974_v22 = vpop.xlane.xlu0 %973  ;;  %v979_v24 = vadd.f32 %v977_v21, %v969_v19  ;;  %v2575_v21 = vld [vmem:[%s3791_s4 + $0x78] sm:$0xff] }
 0x239   : > { %v978_v26 = vadd.f32 %v974_v22, %v966_v20  ;;  %v2574_v20 = vld [vmem:[%s3791_s4 + $0x70] sm:$0xff] }
 0x23b   : > { %v987_v23 = vpop.xlane.xlu1 %986 }
 0x23c   : > { %v984_v25 = vpop.xlane.xlu0 %983  ;;  %v989_v27 = vadd.f32 %v987_v23, %v979_v24  ;;  %v2569_v24 = vld [vmem:[%s3813_s2 + $0x3] ss:$0 sm:$0xff] }
 0x23d   : > { %v988_v28 = vadd.f32 %v984_v25, %v978_v26  ;;  %v1256_v25 = vpack.c.bf16 %v2575_v21, %v2574_v20 }
 0x23f   : > { %v997_v29 = vpop.xlane.xlu1 %996 }
 0x240   : > { %v999_v30 = vadd.f32 %v997_v29, %v989_v27  ;;  %v994_v31 = vpop.xlane.xlu0 %993 }
 0x241   : > { %v998_v32 = vadd.f32 %v994_v31, %v988_v28 }
 0x242   : > { %v1001_v33 = vmul.f32 0.0078125, %v999_v30 }
 0x243   : > { %v1000_v34 = vmul.f32 0.0078125, %v998_v32 }
 0x244   : > { %v1003_v35 = vadd.f32 1e-05, %v1001_v33 }
 0x245   : > { %v1002_v36 = vadd.f32 1e-05, %v1000_v34 }
 0x246   : > { %2973 = vrsqrt.f32 %v1003_v35 }
 0x247   : > { %2975 = vrsqrt.f32 %v1002_v36 }
 0x250   : > { %v2974_v37 = vpop.eup %2973 }
 0x251   : > { %v2976_v39 = vpop.eup %2975  ;;  %v1034_v40 = vmul.f32 %v2974_v37, %v3202_v53  ;;  %v1029_v53 = vld [vmem:[%s3791_s4 + $0x18] sm:$0xff]  ;;  %v1007_v56 = vmul.f32 %v2974_v37, %v3200_v52  ;;  %v1152_v9 = vmul.f32 %v2974_v37, %v3215_v60  ;;  %v1228_v23 = vmul.f32 %v2974_v37, %v3225_v2 }
 0x252   : > { %v1033_v41 = vmul.f32 %v2976_v39, %v3206_v55  ;;  %v1006_v55 = vmul.f32 %v2976_v39, %v3204_v54  ;;  %v1032_v58 = vpack.c.bf16 %v1029_v53, %v1028_v51  ;;  %v2548_v54 = vld [vmem:[%s3790_s3] ss:$0 sm:$0xff]  ;;  %v1151_v8 = vmul.f32 %v2976_v39, %v3220_v63  ;;  %v2562_v63 = vld [vmem:[%s3790_s3 + $0x2] ss:$0 sm:$0xff]  ;;  %v1310_v53 = vld [vmem:[%s3794_s7 + $0x28] sm:$0xff] }
 0x253   : > { %v1044_v43 = vmul.f32 %v2550_v38, %v1034_v40  ;;  %v1016_v61 = vmul.f32 %v2547_v57, %v1007_v56  ;;  %v1162_v13 = vmul.f32 %v2560_v10, %v1152_v9  ;;  %v1227_v22 = vmul.f32 %v2976_v39, %v3230_v5  ;;  %v2571_v5 = vld [vmem:[%s3790_s3 + $0x3] ss:$0 sm:$0xff] }
 0x254   : > { %v1043_v44 = vmul.f32 %v2550_v38, %v1033_v41  ;;  %v1015_v59 = vmul.f32 %v2547_v57, %v1006_v55  ;;  %v1161_v12 = vmul.f32 %v2560_v10, %v1151_v8  ;;  %v1238_v27 = vmul.f32 %v2569_v24, %v1228_v23  ;;  %v1312_v55 = vld [vmem:[%s3794_s7 + $0x38] sm:$0xff]  ;;  %v1309_v57 = vld [vmem:[%s3794_s7 + $0x20] sm:$0xff]  ;;  %v1319_v8 = vld [vmem:[%s3794_s7 + $0x70] sm:$0xff] }
 0x255   : > { %v1054_v47 = vadd.f32 %v2552_v42, %v1044_v43  ;;  %v1025_v62 = vadd.f32 %v2548_v54, %v1016_v61  ;;  %v1172_v14 = vadd.f32 %v2562_v63, %v1162_v13  ;;  %v1237_v26 = vmul.f32 %v2569_v24, %v1227_v22  ;;  %v1314_v61 = vld [vmem:[%s3794_s7 + $0x48] sm:$0xff]  ;;  %v2578_v22 = vld [vmem:[%s3793_s6] ss:$0 sm:$0xff] }
 0x256   : > { %v1053_v48 = vadd.f32 %v2552_v42, %v1043_v44  ;;  %v1024_v52 = vadd.f32 %v2548_v54, %v1015_v59  ;;  %v1171_v60 = vadd.f32 %v2562_v63, %v1161_v12  ;;  %v1248_v28 = vadd.f32 %v2571_v5, %v1238_v27  ;;  %v1316_v54 = vld [vmem:[%s3794_s7 + $0x58] sm:$0xff] }
 0x257   : > { %v1247_v2 = vadd.f32 %v2571_v5, %v1237_v26  ;;  %v1386_v56 = vpack.c.bf16 %v1312_v55, %v1310_v53  ;;  %v1389_v9 = vpack.c.bf16 %v1319_v8, %v1317_v7  ;;  %v3043_v10 = vmov 0   ;;  %v1322_v53 = vld [vmem:[%s3796_s9] sm:$0xff] }
 0x258   : > { %v1060_v50 = vpack.c.bf16 %v1054_v47, %v1053_v48  ;;  %v1030_v4 = vpack.c.bf16 %v1025_v62, %v1024_v52  ;;  %v1178_v19 = vpack.c.bf16 %v1172_v14, %v1171_v60  ;;  %v1308_v47 = vld [vmem:[%s3794_s7 + $0x18] sm:$0xff]  ;;  %v1388_v52 = vpack.c.bf16 %v1316_v54, %v1314_v61  ;;  %v1313_v62 = vld [vmem:[%s3794_s7 + $0x40] sm:$0xff]  ;;  %1437 = vmatprep.mubr.bf16.mxu1 %v3043_v10 }
 0x259   : > { %v1254_v29 = vpack.c.bf16 %v1248_v28, %v1247_v2  ;;  %v1384_v48 = vpack.c.bf16 %v1308_v47, %v1306_v46  ;;  %v1387_v1 = vpack.c.bf16 %v1315_v0, %v1313_v62  ;;  %v1392_v27 = vlaneseq  ;;  %v1321_v28 = vld [vmem:[%s3795_s8] sm:$0x3]  ;;  %v1324_v0 = vld [vmem:[%s3796_s9 + $0x10] sm:$0xff] }
 0x25a   : > { %2780 = vmatmul.mubr.msk.bf16.vlgmr.msra.gmra.mrb[4].mxu0 %vm921_vm1, %v1060_v50  ;;  %v1307_v50 = vld [vmem:[%s3794_s7 + $0x10] sm:$0xff] }
 0x25b   : > { %2784 = vmatpush3.bf16.msra.mxu0 %v1031_v49  ;;  %2787 = vmatprep.mubr.msk.bf16.mxu0 %vm3042_vm2, %v3041_v15  ;;  %v1305_v49 = vld [vmem:[%s3794_s7] sm:$0xff]  ;;  %v3414_v5 = vshrl.u32 %v1392_v27, 7 }
 0x25c   : > { %2785 = vmatprep.subr.bf16.mxu0 %v3041_v15  ;;  %v1383_v51 = vpack.c.bf16 %v1307_v50, %v1305_v49  ;;  %1405 = vmatprep.subr.bf16.mxu1 %v1384_v48 }
 0x25d   : > { %v1394_v2 = vsub.s32 0, %v3414_v5 }
 0x25e   : > { %1406 = vmatpush1.bf16.msra.mxu1 %v1383_v51 }
 0x25f   : > { %2786 = vmatpush3.bf16.msra.mxu0 %v1032_v58  ;;  %v1311_v58 = vld [vmem:[%s3794_s7 + $0x30] sm:$0xff]  ;;  %1407 = vmatprep.subr.bf16.mxu1 %v1386_v56  ;;  %v1323_v56 = vld [vmem:[%s3796_s9 + $0x8] sm:$0xff] }
 0x260   : > { %2791 = vmatprep.subr.bf16.mxu0 %v3041_v15  ;;  %v1385_v59 = vpack.c.bf16 %v1311_v58, %v1309_v57 }
 0x262   : > { %1408 = vmatpush1.bf16.msra.mxu1 %v1385_v59 }
 0x263   : > { %1409 = vmatprep.subr.bf16.mxu1 %v1388_v52 }
 0x266   : > { %2788 = vmatmul.mubr.msk.bf16.vlgmr.msra.gmra.mrb[4].mxu0 %vm921_vm1, %v1030_v4  ;;  %1410 = vmatpush1.bf16.msra.mxu1 %v1387_v1  ;;  %v1320_v4 = vld [vmem:[%s3794_s7 + $0x78] sm:$0xff] }
 0x267   : > { %2792 = vmatpush3.bf16.msra.mxu0 %v1179_v3  ;;  %2795 = vmatprep.mubr.msk.bf16.mxu0 %vm3042_vm2, %v3041_v15  ;;  %v1318_v3 = vld [vmem:[%s3794_s7 + $0x68] sm:$0xff] }
 0x268   : > { %2793 = vmatprep.subr.bf16.mxu0 %v3041_v15  ;;  %v1390_v6 = vpack.c.bf16 %v1320_v4, %v1318_v3  ;;  %v1325_v3 = vld [vmem:[%s3796_s9 + $0x18] sm:$0xff] }
 0x26a   : > { %1411 = vmatprep.subr.bf16.mxu1 %v1390_v6 }
 0x26b   : > { %2794 = vmatpush3.bf16.msra.mxu0 %v1180_v11  ;;  %1412 = vmatpush1.bf16.msra.mxu1 %v1389_v9 }
 0x26c   : > { %2799 = vmatprep.subr.bf16.mxu0 %v3041_v15  ;;  %2813 = vmatprep.subr.bf16.mxu1 %v3041_v15 }
 0x272   : > { %2796 = vmatmul.mubr.msk.bf16.vlgmr.msra.gmra.mrb[4].mxu0 %vm921_vm1, %v1178_v19 }
 0x273   : > { %2800 = vmatpush3.bf16.msra.mxu0 %v1255_v18  ;;  %2803 = vmatprep.mubr.msk.bf16.mxu0 %vm3042_vm2, %v3041_v15 }
 0x274   : > { %2801 = vmatprep.subr.bf16.mxu0 %v3041_v15 }
 0x277   : > { %2802 = vmatpush3.bf16.msra.mxu0 %v1256_v25 }
 0x278   : > { %2807 = vmatprep.subr.bf16.mxu0 %v3041_v15 }
 0x27e   : > { %2804 = vmatmul.mubr.msk.bf16.vlgmr.msra.gmra.mrb[4].mxu0 %vm921_vm1, %v1254_v29  ;;  %v1398_v29 = vsub.s32 1, %v3414_v5 }
 0x27f   : > { %2809 = vmatprep.mubr.msk.bf16.mxu0 %vm3042_vm2, %v3041_v15 }
 0x351   : > { %v3343_v30 = vpop.f32.mrb[4].mxu0 }
 0x352   : > { %v2805_v31 = vpop.f32.mrb[5].mxu0  ;;  %v1339_v32 = vsel %vm587_vm0, %v3343_v30, 0.0 }
 0x353   : > { %1340 = vadd.xlane.f32.xlu0 %v1339_v32  ;;  %v3347_v33 = vpop.f32.mrb[6].mxu0  ;;  %v1395_v31 = vrot.slane %v1321_v28, %v1394_v2 }
 0x354   : > { %v2806_v34 = vpop.f32.mrb[7].mxu0  ;;  %v1342_v35 = vsel %vm587_vm0, %v3347_v33, 0.0 }
 0x355   : > { %1343 = vadd.xlane.f32.xlu1 %v1342_v35  ;;  %v1399_v34 = vrot.slane %v1321_v28, %v1398_v29 }
 0x3e0   : > { %v1341_v36 = vpop.xlane.xlu0 %1340 }
 0x3e1   : > { %v1346_v37 = vmul.f32 0.015625, %v1341_v36 }
 0x3e2   : > { %v1344_v38 = vpop.xlane.xlu1 %1343 }
 0x3e3   : > { %v1348_v39 = vsub.f32 %v3343_v30, %v1346_v37  ;;  %v1347_v40 = vmul.f32 0.015625, %v1344_v38 }
 0x3e5   : > { %v1349_v41 = vsub.f32 %v3347_v33, %v1347_v40  ;;  %v1350_v42 = vmul.f32 %v1348_v39, %v1348_v39 }
 0x3e7   : > { %v1352_v43 = vsel %vm587_vm0, %v1350_v42, 0.0  ;;  %v1351_v44 = vmul.f32 %v1349_v41, %v1349_v41 }
 0x3e8   : > { %1353 = vadd.xlane.f32.xlu0 %v1352_v43 }
 0x3e9   : > { %v1355_v45 = vsel %vm587_vm0, %v1351_v44, 0.0 }
 0x3ea   : > { %1356 = vadd.xlane.f32.xlu1 %v1355_v45 }
 0x475   : > { %v1354_v11 = vpop.xlane.xlu0 %1353 }
 0x476   : > { %v1358_v12 = vmul.f32 0.015625, %v1354_v11 }
 0x477   : > { %v1357_v13 = vpop.xlane.xlu1 %1356 }
 0x478   : > { %v1360_v63 = vadd.f32 1e-05, %v1358_v12  ;;  %v1359_v60 = vmul.f32 0.015625, %v1357_v13 }
 0x47a   : > { %2977 = vrsqrt.f32 %v1360_v63  ;;  %v1361_v14 = vadd.f32 1e-05, %v1359_v60 }
 0x47c   : > { %2979 = vrsqrt.f32 %v1361_v14 }
 0x484   : > { %v2978_v16 = vpop.eup %2977 }
 0x485   : > { %v1364_v18 = vmul.f32 %v2978_v16, %v1348_v39 }
 0x486   : > { %v2980_v19 = vpop.eup %2979 }
 0x487   : > { %v1372_v20 = vmul.f32 %v2577_v17, %v1364_v18  ;;  %v1365_v21 = vmul.f32 %v2980_v19, %v1349_v41 }
 0x489   : > { %v1373_v23 = vmul.f32 %v2577_v17, %v1365_v21  ;;  %v1380_v24 = vadd.f32 %v2578_v22, %v1372_v20 }
 0x48b   : > { %v1381_v25 = vadd.f32 %v2578_v22, %v1373_v23 }
 0x48d   : > { %v1382_v26 = vpack.c.bf16 %v1381_v25, %v1380_v24 }
 0x48f   : > { %2579 = vmatmul.mubr.msk.bf16.vlgmr.msra.gmra.mrb[4].mxu1 %vm587_vm0, %v1382_v26 }
 0x490   : > { %2815 = vmatprep.mubr.msk.bf16.mxu1 %vm3042_vm2, %v3041_v15 }
 0x562   : > { %v1439_v32 = vpop.f32.mrb[4].mxu1 }
 0x563   : > { %v1440_v35 = vadd.f32 %v1439_v32, %v1395_v31  ;;  %v1441_v36 = vpop.f32.mrb[5].mxu1 }
 0x564   : > { %v1443_v37 = vpop.f32.mrb[6].mxu1  ;;  %v1442_v40 = vadd.f32 %v1441_v36, %v1399_v34 }
 0x565   : > { %v1444_v38 = vadd.f32 %v1443_v37, %v1395_v31  ;;  %v1445_v39 = vpop.f32.mrb[7].mxu1  ;;  %v1448_v42 = vmul.f32 0.25, %v1440_v35 }
 0x566   : > { %v1446_v41 = vadd.f32 %v1445_v39, %v1399_v34 }
 0x567   : > { %v1449_v43 = vmul.f32 0.25, %v1444_v38  ;;  %v3425_v44 = vpack.c.bf16 %v1444_v38, %v1440_v35 }
 0x568   : > { %v3427_v45 = vpack.c.bf16 %v1446_v41, %v1442_v40 }
 0x569   : > { %v3429_v46 = vpack.c.bf16 %v1449_v43, %v1448_v42  ;;  %1576 = vrot.lane.b32.xlu1 %v3425_v44, %s3044_s22  ;;  %1453 = vrot.lane.b32.xlu0 %v3425_v44, %s3045_s23  ;;  %s3047_s22 = smov 96   ;;  %s3048_s23 = smov 32  }
 0x56a   : > { %2814 = vmatpush3.bf16.msra.mxu1 %v3427_v45 }
 0x56b   : > { %2825 = vmatprep.subr.bf16.mxu1 %v3041_v15 }
 0x56d   : > { %1574 = vrot.lane.b32.xlu1 %v3429_v46, %s3046_s24 }
 0x5db   : > { %v1454_v47 = vpop.permute.xlu0 %1453  ;;  %v1577_v49 = vpop.permute.xlu1 %1576 }
 0x5dc   : > { %v1460_v48 = vsel %vm1455_vm3, %v1454_v47, 0  ;;  %v1582_v50 = vsel %vm1455_vm3, %v1577_v49, 0 }
 0x5dd   : > { %2808 = vmatpush3.bf16.xpose.msra.mxu0 %v1460_v48 }
 0x5de   : > { %2819 = vmatprep.subr.bf16.mxu0 %v3041_v15 }
 0x5df   : > { %v1575_v51 = vpop.permute.xlu1 %1574 }
 0x5e4   : > { %2810 = vmatmul.mubr.msk.bf16.vlgmr.msra.gmra.mrb[8].mxu0 %vm1455_vm3, %v3429_v46 }
 0x5e5   : > { %2820 = vmatpush3.bf16.xpose.msra.mxu0 %v1582_v50  ;;  %2821 = vmatprep.mubr.msk.bf16.mxu0 %vm3042_vm2, %v3041_v15 }
 0x5e6   : > { %2831 = vmatprep.subr.bf16.mxu0 %v3041_v15 }
 0x5ec   : > { %2822 = vmatmul.mubr.msk.bf16.vlgmr.msra.gmra.mrb[12].mxu0 %vm1455_vm3, %v1575_v51 }
 0x5ed   : > { %2833 = vmatprep.mubr.msk.bf16.mxu0 %vm3042_vm2, %v3041_v15 }
 0x6b7   : > { %v1496_v55 = vpop.f32.mrb[8].mxu0 }
 0x6b8   : > { %v1497_v57 = vadd.f32 %v1496_v55, %v1322_v53  ;;  %v2811_v58 = vpop.f32.mrb[9].mxu0  ;;  %v1330_v55 = vld [vmem:[%s3797_s10] sm:$0xff] }
 0x6b9   : > { %v1499_v59 = vpop.f32.mrb[10].mxu0  ;;  %v1332_v58 = vld [vmem:[%s3797_s10 + $0x10] sm:$0xff] }
 0x6ba   : > { %v1500_v61 = vadd.f32 %v1499_v59, %v1323_v56  ;;  %v2812_v54 = vpop.f32.mrb[11].mxu0  ;;  %v1503_v52 = vsel %vm1455_vm3, %v1497_v57, -inf  ;;  %v1331_v56 = vld [vmem:[%s3797_s10 + $0x8] sm:$0xff]  ;;  %v1333_v59 = vld [vmem:[%s3797_s10 + $0x18] sm:$0xff] }
 0x6bb   : > { %1504 = vmax.xlane.f32.xlu1 %v1503_v52 }
 0x6bc   : > { %v1506_v62 = vsel %vm1455_vm3, %v1500_v61, -inf }
 0x6bd   : > { %1507 = vmax.xlane.f32.xlu0 %v1506_v62 }
 0x6bf   : > { %v1618_v1 = vpop.f32.mrb[12].mxu0 }
 0x6c0   : > { %v1619_v4 = vadd.f32 %v1618_v1, %v1324_v0  ;;  %v2823_v6 = vpop.f32.mrb[13].mxu0 }
 0x6c1   : > { %v1621_v7 = vpop.f32.mrb[14].mxu0 }
 0x6c2   : > { %v1622_v8 = vadd.f32 %v1621_v7, %v1325_v3  ;;  %v2824_v9 = vpop.f32.mrb[15].mxu0  ;;  %v1625_v11 = vsel %vm1455_vm3, %v1619_v4, -inf }
 0x6c3   : > { %1626 = vmax.xlane.f32.xlu0 %v1625_v11 }
 0x6c4   : > { %v1628_v12 = vsel %vm1455_vm3, %v1622_v8, -inf }
 0x6c7   : > { %1629 = vmax.xlane.f32.xlu0 %v1628_v12 }
 0x748   : > { %v1505_v13 = vpop.xlane.xlu1 %1504 }
 0x749   : > { %v1509_v63 = vsub.f32 %v1497_v57, %v1505_v13  ;;  %v1572_v57 = vpack.c.bf16 %v1331_v56, %v1330_v55 }
 0x74a   : > { %v1508_v60 = vpop.xlane.xlu0 %1507 }
 0x74b   : > { %v1511_v14 = vmul.f32 1.442695, %v1509_v63  ;;  %v1510_v16 = vsub.f32 %v1500_v61, %v1508_v60  ;;  %v1697_v61 = vpack.c.bf16 %v1333_v59, %v1332_v58  ;;  %v1334_v59 = vld [vmem:[%s3797_s10 + $0x20] sm:$0xff] }
 0x74d   : > { %2981 = vpow2.f32 %v1511_v14  ;;  %v1513_v17 = vmul.f32 1.442695, %v1510_v16  ;;  %2832 = vmatpush3.bf16.msra.mxu0 %v1697_v61  ;;  %v1335_v61 = vld [vmem:[%s3797_s10 + $0x28] sm:$0xff] }
 0x74e   : > { %2843 = vmatprep.subr.bf16.mxu0 %v3041_v15 }
 0x74f   : > { %2983 = vpow2.f32 %v1513_v17 }
 0x750   : > { %v1627_v18 = vpop.xlane.xlu0 %1626 }
 0x751   : > { %v1631_v19 = vsub.f32 %v1619_v4, %v1627_v18 }
 0x753   : > { %v1633_v20 = vmul.f32 1.442695, %v1631_v19 }
 0x754   : > { %v1630_v21 = vpop.xlane.xlu0 %1629 }
 0x755   : > { %2985 = vpow2.f32 %v1633_v20  ;;  %v1632_v22 = vsub.f32 %v1622_v8, %v1630_v21 }
 0x757   : > { %v2982_v23 = vpop.eup %2981  ;;  %v1635_v24 = vmul.f32 1.442695, %v1632_v22  ;;  %v1326_v22 = vld [vmem:[%s3796_s9 + $0x20] sm:$0xff] }
 0x758   : > { %v1515_v25 = vsel %vm1455_vm3, %v2982_v23, 0.0 }
 0x759   : > { %v2984_v26 = vpop.eup %2983  ;;  %2987 = vpow2.f32 %v1635_v24  ;;  %1516 = vadd.xlane.f32.xlu1 %v1515_v25  ;;  %v1327_v24 = vld [vmem:[%s3796_s9 + $0x28] sm:$0xff] }
 0x75a   : > { %v1518_v27 = vsel %vm1455_vm3, %v2984_v26, 0.0 }
 0x75b   : > { %1519 = vadd.xlane.f32.xlu0 %v1518_v27 }
 0x75f   : > { %v2986_v28 = vpop.eup %2985 }
 0x760   : > { %v1637_v31 = vsel %vm1455_vm3, %v2986_v28, 0.0 }
 0x761   : > { %1638 = vadd.xlane.f32.xlu1 %v1637_v31 }
 0x763   : > { %v2988_v32 = vpop.eup %2987 }
 0x764   : > { %v1640_v34 = vsel %vm1455_vm3, %v2988_v32, 0.0 }
 0x765   : > { %1641 = vadd.xlane.f32.xlu0 %v1640_v34 }
 0x772   : > { %1649 = vrot.lane.b32.xlu1 %v3427_v45, %s3046_s24 }
 0x776   : > { %1786 = vrot.lane.b32.xlu1 %v3429_v46, %s3047_s22 }
 0x77b   : > { %1788 = vrot.lane.b32.xlu0 %v3425_v44, %s3048_s23  ;;  %s2600_s23 = sshll.u32 %s3815_s28, 4 }
 0x7e6   : > { %v1517_v35 = vpop.xlane.xlu1 %1516 }
 0x7e7   : > { %2989 = vrcp.f32 %v1517_v35 }
 0x7e8   : > { %v1520_v36 = vpop.xlane.xlu0 %1519 }
 0x7e9   : > { %2991 = vrcp.f32 %v1520_v36 }
 0x7ee   : > { %v1639_v37 = vpop.xlane.xlu1 %1638 }
 0x7ef   : > { %2993 = vrcp.f32 %v1639_v37 }
 0x7f1   : > { %v2990_v38 = vpop.eup %2989 }
 0x7f2   : > { %v1642_v39 = vpop.xlane.xlu0 %1641  ;;  %v1523_v41 = vmul.f32 %v2990_v38, %v2982_v23  ;;  %v1650_v47 = vpop.permute.xlu1 %1649 }
 0x7f3   : > { %v2992_v40 = vpop.eup %2991  ;;  %2995 = vrcp.f32 %v1642_v39 }
 0x7f4   : > { %v1524_v42 = vmul.f32 %v2992_v40, %v2984_v26 }
 0x7f6   : > { %v1525_v43 = vpack.c.bf16 %v1524_v42, %v1523_v41  ;;  %v1789_v6 = vpop.permute.xlu0 %1788  ;;  %v1787_v12 = vpop.permute.xlu1 %1786 }
 0x7f7   : > { %v1794_v11 = vsel %vm1455_vm3, %v1789_v6, 0 }
 0x7f8   : > { %2816 = vmatmul.mubr.msk.bf16.vlgmr.msra.gmra.mrb[8].mxu1 %vm1455_vm3, %v1525_v43 }
 0x7f9   : > { %2826 = vmatpush3.bf16.msra.mxu1 %v1650_v47  ;;  %2827 = vmatprep.mubr.msk.bf16.mxu1 %vm3042_vm2, %v3041_v15  ;;  %v2994_v48 = vpop.eup %2993 }
 0x7fa   : > { %2837 = vmatprep.subr.bf16.mxu1 %v3041_v15  ;;  %v1645_v50 = vmul.f32 %v2994_v48, %v2986_v28 }
 0x7fd   : > { %v2996_v49 = vpop.eup %2995 }
 0x7fe   : > { %v1646_v51 = vmul.f32 %v2996_v49, %v2988_v32 }
 0x800   : > { %v1647_v53 = vpack.c.bf16 %v1646_v51, %v1645_v50 }
 0x802   : > { %2828 = vmatmul.mubr.msk.bf16.vlgmr.msra.gmra.mrb[12].mxu1 %vm1455_vm3, %v1647_v53 }
 0x803   : > { %2839 = vmatprep.mubr.msk.bf16.mxu1 %vm3042_vm2, %v3041_v15  ;;  %2838 = vmatpush3.bf16.msra.mxu1 %v1572_v57 }
 0x804   : > { %2849 = vmatprep.subr.bf16.mxu1 %v3041_v15 }
 0x8cb   : > { %v1564_v54 = vpop.f32.mrb[8].mxu1 }
 0x8cc   : > { %v2817_v52 = vpop.f32.mrb[9].mxu1 }
 0x8cd   : > { %v1567_v62 = vpop.f32.mrb[10].mxu1 }
 0x8ce   : > { %v1571_v0 = vpack.c.bf16 %v1567_v62, %v1564_v54  ;;  %v2818_v1 = vpop.f32.mrb[11].mxu1  ;;  %v1908_v54 = vpack.c.bf16 %v1335_v61, %v1334_v59 }
 0x8d0   : > { %2840 = vmatmul.mubr.msk.bf16.vlgmr.msra.gmra.mrb[16].mxu1 %vm1455_vm3, %v1571_v0 }
 0x8d1   : > { %2851 = vmatprep.mubr.msk.bf16.mxu1 %vm3042_vm2, %v3041_v15 }
 0x8d5   : > { %v1689_v3 = vpop.f32.mrb[12].mxu1 }
 0x8d6   : > { %v2829_v4 = vpop.f32.mrb[13].mxu1 }
 0x8d7   : > { %v1692_v7 = vpop.f32.mrb[14].mxu1  ;;  %v1328_v4 = vld [vmem:[%s3796_s9 + $0x30] sm:$0xff] }
 0x8d8   : > { %v1696_v8 = vpack.c.bf16 %v1692_v7, %v1689_v3  ;;  %v2830_v9 = vpop.f32.mrb[15].mxu1  ;;  %v1329_v7 = vld [vmem:[%s3796_s9 + $0x38] sm:$0xff] }
 0x8da   : > { %2834 = vmatmul.mubr.msk.bf16.vlgmr.msra.gmra.mrb[16].mxu0 %vm1455_vm3, %v1696_v8 }
 0x8db   : > { %2844 = vmatpush3.bf16.xpose.msra.mxu0 %v1794_v11  ;;  %2845 = vmatprep.mubr.msk.bf16.mxu0 %vm3042_vm2, %v3041_v15 }
 0x8dc   : > { %2855 = vmatprep.subr.bf16.mxu0 %v3041_v15 }
 0x8e2   : > { %2846 = vmatmul.mubr.msk.bf16.vlgmr.msra.gmra.mrb[20].mxu0 %vm1455_vm3, %v1787_v12 }
 0x8e3   : > { %2857 = vmatprep.mubr.msk.bf16.mxu0 %vm3042_vm2, %v3041_v15  ;;  %2856 = vmatpush3.bf16.msra.mxu0 %v1908_v54 }
 0x8e4   : > { %2867 = vmatprep.subr.bf16.mxu0 %v3041_v15 }
 0x9a3   : > { %v1779_v13 = vpop.f32.mrb[16].mxu1 }
 0x9a4   : > { %v2841_v63 = vpop.f32.mrb[17].mxu1 }
 0x9a5   : > { %v1782_v60 = vpop.f32.mrb[18].mxu1 }
 0x9a6   : > { %v2842_v14 = vpop.f32.mrb[19].mxu1 }
 0x9ad   : > { %v1735_v16 = vpop.f32.mrb[16].mxu0 }
 0x9ae   : > { %v3505_v17 = vadd.f32 %v1779_v13, %v1735_v16  ;;  %v2835_v18 = vpop.f32.mrb[17].mxu0 }
 0x9af   : > { %v1738_v19 = vpop.f32.mrb[18].mxu0 }
 0x9b0   : > { %v3507_v20 = vadd.f32 %v1782_v60, %v1738_v19  ;;  %v2836_v21 = vpop.f32.mrb[19].mxu0 }
 0x9b5   : > { %v1830_v23 = vpop.f32.mrb[20].mxu0 }
 0x9b6   : > { %v1831_v25 = vadd.f32 %v1830_v23, %v1326_v22  ;;  %v2847_v26 = vpop.f32.mrb[21].mxu0 }
 0x9b7   : > { %v1833_v27 = vpop.f32.mrb[22].mxu0 }
 0x9b8   : > { %v1834_v28 = vadd.f32 %v1833_v27, %v1327_v24  ;;  %v2848_v31 = vpop.f32.mrb[23].mxu0  ;;  %v1837_v32 = vsel %vm1455_vm3, %v1831_v25, -inf  ;;  %v1337_v27 = vld [vmem:[%s3797_s10 + $0x38] sm:$0xff] }
 0x9b9   : > { %1838 = vmax.xlane.f32.xlu1 %v1837_v32 }
 0x9ba   : > { %v1840_v34 = vsel %vm1455_vm3, %v1834_v28, -inf }
 0x9bb   : > { %1841 = vmax.xlane.f32.xlu0 %v1840_v34 }
 0xa46   : > { %v1839_v35 = vpop.xlane.xlu1 %1838 }
 0xa47   : > { %v1843_v36 = vsub.f32 %v1831_v25, %v1839_v35 }
 0xa48   : > { %v1842_v37 = vpop.xlane.xlu0 %1841 }
 0xa49   : > { %v1845_v38 = vmul.f32 1.442695, %v1843_v36  ;;  %v1844_v39 = vsub.f32 %v1834_v28, %v1842_v37 }
 0xa4b   : > { %2997 = vpow2.f32 %v1845_v38  ;;  %v1847_v40 = vmul.f32 1.442695, %v1844_v39 }
 0xa4d   : > { %2999 = vpow2.f32 %v1847_v40 }
 0xa55   : > { %v2998_v41 = vpop.eup %2997 }
 0xa56   : > { %v1849_v42 = vsel %vm1455_vm3, %v2998_v41, 0.0 }
 0xa57   : > { %v3000_v43 = vpop.eup %2999  ;;  %1850 = vadd.xlane.f32.xlu0 %v1849_v42 }
 0xa58   : > { %v1852_v47 = vsel %vm1455_vm3, %v3000_v43, 0.0 }
 0xa59   : > { %1853 = vadd.xlane.f32.xlu1 %v1852_v47 }
 0xa6a   : > { %1957 = vrot.lane.b32.xlu1 %v3425_v44, %s3049_s26 }
 0xa6d   : > { %1860 = vrot.lane.b32.xlu0 %v3427_v45, %s3047_s22  ;;  %s575_s22 = scalar_lea.vmem %s3805_s18, %s2600_s23 }
 0xa6e   : > { %1955 = vrot.lane.b32.xlu1 %v3429_v46, %s3050_s29 }
 0xae4   : > { %v1851_v48 = vpop.xlane.xlu0 %1850 }
 0xae5   : > { %3001 = vrcp.f32 %v1851_v48 }
 0xae6   : > { %v1854_v49 = vpop.xlane.xlu1 %1853 }
 0xae7   : > { %3003 = vrcp.f32 %v1854_v49 }
 0xae8   : > { %v1861_v50 = vpop.permute.xlu0 %1860 }
 0xae9   : > { %2850 = vmatpush3.bf16.msra.mxu1 %v1861_v50 }
 0xaea   : > { %2861 = vmatprep.subr.bf16.mxu1 %v3041_v15  ;;  %v1958_v44 = vpop.permute.xlu1 %1957 }
 0xaeb   : > { %v1963_v58 = vsel %vm1455_vm3, %v1958_v44, 0 }
 0xaee   : > { %v1956_v46 = vpop.permute.xlu1 %1955 }
 0xaef   : > { %v3002_v51 = vpop.eup %3001 }
 0xaf0   : > { %v1857_v55 = vmul.f32 %v3002_v51, %v2998_v41 }
 0xaf1   : > { %v3004_v53 = vpop.eup %3003 }
 0xaf2   : > { %v1858_v56 = vmul.f32 %v3004_v53, %v3000_v43 }
 0xaf4   : > { %v1859_v57 = vpack.c.bf16 %v1858_v56, %v1857_v55  ;;  %v2592_v56 = vld [vmem:[%s3798_s11] ss:$0 sm:$0xff] }
 0xaf6   : > { %2852 = vmatmul.mubr.msk.bf16.vlgmr.msra.gmra.mrb[20].mxu1 %vm1455_vm3, %v1859_v57 }
 0xaf7   : > { %2862 = vmatpush3.bf16.xpose.msra.mxu1 %v1963_v58  ;;  %2863 = vmatprep.mubr.msk.bf16.mxu1 %vm3042_vm2, %v3041_v15 }
 0xaf8   : > { %2873 = vmatprep.subr.bf16.mxu1 %v3041_v15 }
 0xafe   : > { %2864 = vmatmul.mubr.msk.bf16.vlgmr.msra.gmra.mrb[24].mxu1 %vm1455_vm3, %v1956_v46 }
 0xaff   : > { %2875 = vmatprep.mubr.msk.bf16.mxu1 %vm3042_vm2, %v3041_v15 }
 0xbc9   : > { %v1900_v52 = vpop.f32.mrb[20].mxu1 }
 0xbca   : > { %v2853_v62 = vpop.f32.mrb[21].mxu1 }
 0xbcb   : > { %v1903_v0 = vpop.f32.mrb[22].mxu1 }
 0xbcc   : > { %v1907_v1 = vpack.c.bf16 %v1903_v0, %v1900_v52  ;;  %v2854_v3 = vpop.f32.mrb[23].mxu1 }
 0xbce   : > { %2858 = vmatmul.mubr.msk.bf16.vlgmr.msra.gmra.mrb[24].mxu0 %vm1455_vm3, %v1907_v1 }
 0xbcf   : > { %2869 = vmatprep.mubr.msk.bf16.mxu0 %vm3042_vm2, %v3041_v15 }
 0xbd1   : > { %v1999_v6 = vpop.f32.mrb[24].mxu1 }
 0xbd2   : > { %v2000_v8 = vadd.f32 %v1999_v6, %v1328_v4  ;;  %v2865_v9 = vpop.f32.mrb[25].mxu1 }
 0xbd3   : > { %v2002_v11 = vpop.f32.mrb[26].mxu1  ;;  %v2137_v9 = vld [vmem:[%s3801_s14 + $0x8] sm:$0xff] }
 0xbd4   : > { %v2003_v12 = vadd.f32 %v2002_v11, %v1329_v7  ;;  %v2866_v13 = vpop.f32.mrb[27].mxu1  ;;  %v2006_v63 = vsel %vm1455_vm3, %v2000_v8, -inf  ;;  %v2139_v11 = vld [vmem:[%s3801_s14 + $0x18] sm:$0xff] }
 0xbd5   : > { %2007 = vmax.xlane.f32.xlu1 %v2006_v63  ;;  %v2136_v13 = vld [vmem:[%s3801_s14] sm:$0xff]  ;;  %v2138_v63 = vld [vmem:[%s3801_s14 + $0x10] sm:$0xff] }
 0xbd6   : > { %v2009_v60 = vsel %vm1455_vm3, %v2003_v12, -inf }
 0xbd7   : > { %2010 = vmax.xlane.f32.xlu0 %v2009_v60  ;;  %v2229_v60 = vpack.c.bf16 %v2138_v63, %v2136_v13  ;;  %v2159_v13 = vld [vmem:[%s3803_s16 + $0x30] sm:$0xff]  ;;  %v2160_v63 = vld [vmem:[%s3803_s16 + $0x38] sm:$0xff] }
 0xbe6   : > { %2029 = vrot.lane.b32.xlu1 %v3427_v45, %s3050_s29  ;;  %v1336_v45 = vld [vmem:[%s3797_s10 + $0x30] sm:$0xff] }
 0xbe7   : > { %v2077_v28 = vpack.c.bf16 %v1337_v27, %v1336_v45  ;;  %v2149_v27 = vld [vmem:[%s3801_s14 + $0x68] sm:$0xff] }
 0xbe9   : > { %2874 = vmatpush3.bf16.msra.mxu1 %v2077_v28  ;;  %v2151_v28 = vld [vmem:[%s3801_s14 + $0x78] sm:$0xff] }
 0xc62   : > { %v2008_v15 = vpop.xlane.xlu1 %2007 }
 0xc63   : > { %v2012_v14 = vsub.f32 %v2000_v8, %v2008_v15  ;;  %v2141_v15 = vld [vmem:[%s3801_s14 + $0x28] sm:$0xff] }
 0xc64   : > { %v2011_v16 = vpop.xlane.xlu0 %2010 }
 0xc65   : > { %v2014_v18 = vmul.f32 1.442695, %v2012_v14  ;;  %v2013_v19 = vsub.f32 %v2003_v12, %v2011_v16  ;;  %v2230_v12 = vpack.c.bf16 %v2139_v11, %v2137_v9  ;;  %v2143_v14 = vld [vmem:[%s3801_s14 + $0x38] sm:$0xff]  ;;  %v2175_v9 = vld [vmem:[%s3803_s16 + $0xb0] sm:$0xff] }
 0xc66   : > { %v2030_v21 = vpop.permute.xlu1 %2029  ;;  %v2232_v16 = vpack.c.bf16 %v2143_v14, %v2141_v15  ;;  %v2176_v11 = vld [vmem:[%s3803_s16 + $0xb8] sm:$0xff]  ;;  %v2177_v15 = vld [vmem:[%s3803_s16 + $0xc0] sm:$0xff]  ;;  %v2178_v14 = vld [vmem:[%s3803_s16 + $0xc8] sm:$0xff] }
 0xc67   : > { %3005 = vpow2.f32 %v2014_v18  ;;  %v2016_v22 = vmul.f32 1.442695, %v2013_v19  ;;  %2868 = vmatpush3.bf16.msra.mxu0 %v2030_v21  ;;  %v2140_v18 = vld [vmem:[%s3801_s14 + $0x20] sm:$0xff]  ;;  %v2142_v19 = vld [vmem:[%s3801_s14 + $0x30] sm:$0xff] }
 0xc68   : > { %2251 = vmatprep.subr.bf16.mxu0 %v2230_v12  ;;  %v2231_v21 = vpack.c.bf16 %v2142_v19, %v2140_v18  ;;  %v2411_v12 = vpack.c.bf16 %v2176_v11, %v2175_v9  ;;  %v2161_v18 = vld [vmem:[%s3803_s16 + $0x40] sm:$0xff]  ;;  %v2162_v19 = vld [vmem:[%s3803_s16 + $0x48] sm:$0xff] }
 0xc69   : > { %3007 = vpow2.f32 %v2016_v22  ;;  %v2145_v22 = vld [vmem:[%s3801_s14 + $0x48] sm:$0xff] }
 0xc71   : > { %v3006_v23 = vpop.eup %3005 }
 0xc72   : > { %v2018_v24 = vsel %vm1455_vm3, %v3006_v23, 0.0 }
 0xc73   : > { %v3008_v25 = vpop.eup %3007  ;;  %2019 = vadd.xlane.f32.xlu0 %v2018_v24 }
 0xc74   : > { %v2021_v26 = vsel %vm1455_vm3, %v3008_v25, 0.0 }
 0xc77   : > { %2022 = vadd.xlane.f32.xlu0 %v2021_v26  ;;  %v2146_v26 = vld [vmem:[%s3801_s14 + $0x50] sm:$0xff] }
 0xca1   : > { %v1946_v31 = vpop.f32.mrb[24].mxu0 }
 0xca2   : > { %v1953_v32 = vadd.f32 %v1946_v31, %v3505_v17  ;;  %v2859_v34 = vpop.f32.mrb[25].mxu0  ;;  %v2148_v31 = vld [vmem:[%s3801_s14 + $0x60] sm:$0xff] }
 0xca3   : > { %v1949_v35 = vpop.f32.mrb[26].mxu0  ;;  %v2150_v34 = vld [vmem:[%s3801_s14 + $0x70] sm:$0xff] }
 0xca4   : > { %v1954_v36 = vadd.f32 %v1949_v35, %v3507_v20  ;;  %v2860_v37 = vpop.f32.mrb[27].mxu0  ;;  %v2235_v35 = vpack.c.bf16 %v2150_v34, %v2148_v31  ;;  %v2166_v34 = vld [vmem:[%s3803_s16 + $0x68] sm:$0xff] }
 0xd00   : > { %v2020_v38 = vpop.xlane.xlu0 %2019 }
 0xd01   : > { %3009 = vrcp.f32 %v2020_v38 }
 0xd04   : > { %v2023_v39 = vpop.xlane.xlu0 %2022 }
 0xd05   : > { %3011 = vrcp.f32 %v2023_v39 }
 0xd0b   : > { %v3010_v40 = vpop.eup %3009 }
 0xd0c   : > { %v2026_v42 = vmul.f32 %v3010_v40, %v3006_v23  ;;  %v2147_v23 = vld [vmem:[%s3801_s14 + $0x58] sm:$0xff] }
 0xd0d   : > { %v2234_v24 = vpack.c.bf16 %v2147_v23, %v2145_v22  ;;  %v2179_v22 = vld [vmem:[%s3803_s16 + $0xd0] sm:$0xff]  ;;  %v2180_v23 = vld [vmem:[%s3803_s16 + $0xd8] sm:$0xff] }
 0xd0f   : > { %v3012_v41 = vpop.eup %3011 }
 0xd10   : > { %v2027_v43 = vmul.f32 %v3012_v41, %v3008_v25  ;;  %v2144_v25 = vld [vmem:[%s3801_s14 + $0x40] sm:$0xff] }
 0xd11   : > { %v2233_v45 = vpack.c.bf16 %v2146_v26, %v2144_v25  ;;  %v2163_v25 = vld [vmem:[%s3803_s16 + $0x50] sm:$0xff]  ;;  %v2164_v26 = vld [vmem:[%s3803_s16 + $0x58] sm:$0xff] }
 0xd12   : > { %v2028_v47 = vpack.c.bf16 %v2027_v43, %v2026_v42 }
 0xd14   : > { %2870 = vmatmul.mubr.msk.bf16.vlgmr.msra.gmra.mrb[28].mxu0 %vm1455_vm3, %v2028_v47  ;;  %v2593_v47 = vld [vmem:[%s3799_s12] ss:$0 sm:$0xff] }
 0xd15   : > { %2283 = vmatprep.mubr.bf16.mxu0 %v3043_v10  ;;  %2252 = vmatpush1.bf16.msra.mxu0 %v2229_v60  ;;  %v2403_v60 = vpack.c.bf16 %v2160_v63, %v2159_v13 }
 0xd16   : > { %2253 = vmatprep.subr.bf16.mxu0 %v2232_v16  ;;  %v2412_v16 = vpack.c.bf16 %v2178_v14, %v2177_v15 }
 0xd19   : > { %2254 = vmatpush1.bf16.msra.mxu0 %v2231_v21  ;;  %v2404_v21 = vpack.c.bf16 %v2162_v19, %v2161_v18 }
 0xd1a   : > { %2255 = vmatprep.subr.bf16.mxu0 %v2234_v24  ;;  %v2413_v24 = vpack.c.bf16 %v2180_v23, %v2179_v22 }
 0xd1d   : > { %2256 = vmatpush1.bf16.msra.mxu0 %v2233_v45  ;;  %v2405_v45 = vpack.c.bf16 %v2164_v26, %v2163_v25 }
 0xde7   : > { %v2069_v48 = vpop.f32.mrb[28].mxu0 }
 0xde8   : > { %v2871_v17 = vpop.f32.mrb[29].mxu0 }
 0xde9   : > { %v2072_v49 = vpop.f32.mrb[30].mxu0 }
 0xdea   : > { %v2076_v50 = vpack.c.bf16 %v2072_v49, %v2069_v48  ;;  %v2872_v51 = vpop.f32.mrb[31].mxu0 }
 0xdec   : > { %2876 = vmatmul.mubr.msk.bf16.vlgmr.msra.gmra.mrb[28].mxu1 %vm1455_vm3, %v2076_v50  ;;  %v2594_v50 = vld [vmem:[%s3800_s13] ss:$0 sm:$0xff] }
 0xebf   : > { %v2115_v20 = vpop.f32.mrb[28].mxu1 }
 0xec0   : > { %v2122_v53 = vadd.f32 %v2115_v20, %v1953_v32  ;;  %v2877_v55 = vpop.f32.mrb[29].mxu1  ;;  %v2236_v32 = vpack.c.bf16 %v2151_v28, %v2149_v27  ;;  %v2181_v27 = vld [vmem:[%s3803_s16 + $0xe0] sm:$0xff]  ;;  %v2182_v28 = vld [vmem:[%s3803_s16 + $0xe8] sm:$0xff] }
 0xec1   : > { %v2118_v44 = vpop.f32.mrb[30].mxu1  ;;  %v2414_v31 = vpack.c.bf16 %v2182_v28, %v2181_v27 }
 0xec2   : > { %v2124_v57 = vadd.f32 %v2122_v53, %v3343_v30  ;;  %v2123_v58 = vadd.f32 %v2118_v44, %v1954_v36  ;;  %v2878_v46 = vpop.f32.mrb[31].mxu1  ;;  %2257 = vmatprep.subr.bf16.mxu0 %v2236_v32  ;;  %v2170_v44 = vld [vmem:[%s3803_s16 + $0x88] sm:$0xff]  ;;  %v2165_v32 = vld [vmem:[%s3803_s16 + $0x60] sm:$0xff] }
 0xec3   : > { %2258 = vmatpush1.bf16.msra.mxu0 %v2235_v35  ;;  %v2154_v46 = vld [vmem:[%s3803_s16 + $0x8] sm:$0xff]  ;;  %v2406_v35 = vpack.c.bf16 %v2166_v34, %v2165_v32 }
 0xec4   : > { %v3570_v10 = vadd.f32 %v2592_v56, %v2124_v57  ;;  %v2125_v59 = vadd.f32 %v2123_v58, %v3347_v33  ;;  %v2153_v58 = vld [vmem:[%s3803_s16] sm:$0xff] }
 0xec6   : > { %v3573_v61 = vadd.f32 %v2592_v56, %v2125_v59  ;;  %v2186_v54 = vsel %vm587_vm0, %v3570_v10, 0.0  ;;  %v2169_v56 = vld [vmem:[%s3803_s16 + $0x80] sm:$0xff]  ;;  %v2400_v59 = vpack.c.bf16 %v2154_v46, %v2153_v58 }
 0xec7   : > { %2187 = vadd.xlane.f32.xlu0 %v2186_v54  ;;  %v2408_v57 = vpack.c.bf16 %v2170_v44, %v2169_v56  ;;  %v2171_v54 = vld [vmem:[%s3803_s16 + $0x90] sm:$0xff] }
 0xec8   : > { %v2189_v52 = vsel %vm587_vm0, %v3573_v61, 0.0 }
 0xec9   : > { %2677 = vmatprep.subr.bf16.mxu1 %v2408_v57 }
 0xeca   : > { %2678 = vmatpush3.bf16.msra.mxu1 %v2400_v59 }
 0xecb   : > { %2190 = vadd.xlane.f32.xlu0 %v2189_v52  ;;  %v2172_v52 = vld [vmem:[%s3803_s16 + $0x98] sm:$0xff] }
 0xf54   : > { %v2188_v62 = vpop.xlane.xlu0 %2187 }
 0xf55   : > { %v2192_v0 = vmul.f32 0.015625, %v2188_v62  ;;  %v2409_v62 = vpack.c.bf16 %v2172_v52, %v2171_v54 }
 0xf57   : > { %v2194_v30 = vsub.f32 %v3570_v10, %v2192_v0  ;;  %v2155_v0 = vld [vmem:[%s3803_s16 + $0x10] sm:$0xff]  ;;  %2679 = vmatprep.subr.bf16.mxu1 %v2409_v62 }
 0xf58   : > { %v2191_v1 = vpop.xlane.xlu0 %2190 }
 0xf59   : > { %v2193_v3 = vmul.f32 0.015625, %v2191_v1  ;;  %v2196_v4 = vmul.f32 %v2194_v30, %v2194_v30 }
 0xf5b   : > { %v2195_v6 = vsub.f32 %v3573_v61, %v2193_v3  ;;  %v2198_v33 = vsel %vm587_vm0, %v2196_v4, 0.0  ;;  %v2173_v3 = vld [vmem:[%s3803_s16 + $0xa0] sm:$0xff]  ;;  %v2174_v4 = vld [vmem:[%s3803_s16 + $0xa8] sm:$0xff] }
 0xf5c   : > { %2199 = vadd.xlane.f32.xlu0 %v2198_v33  ;;  %v2157_v33 = vld [vmem:[%s3803_s16 + $0x20] sm:$0xff] }
 0xf5d   : > { %v2197_v7 = vmul.f32 %v2195_v6, %v2195_v6 }
 0xf5f   : > { %v2201_v8 = vsel %vm587_vm0, %v2197_v7, 0.0  ;;  %v2158_v7 = vld [vmem:[%s3803_s16 + $0x28] sm:$0xff] }
 0xf60   : > { %2202 = vadd.xlane.f32.xlu0 %v2201_v8  ;;  %v2402_v8 = vpack.c.bf16 %v2158_v7, %v2157_v33 }
 0xfe9   : > { %v2200_v36 = vpop.xlane.xlu0 %2199 }
 0xfea   : > { %v2204_v37 = vmul.f32 0.015625, %v2200_v36  ;;  %v2183_v36 = vld [vmem:[%s3803_s16 + $0xf0] sm:$0xff] }
 0xfec   : > { %v2206_v38 = vadd.f32 1e-05, %v2204_v37  ;;  %v2184_v37 = vld [vmem:[%s3803_s16 + $0xf8] sm:$0xff] }
 0xfed   : > { %v2203_v39 = vpop.xlane.xlu0 %2202 }
 0xfee   : > { %3013 = vrsqrt.f32 %v2206_v38  ;;  %v2205_v40 = vmul.f32 0.015625, %v2203_v39  ;;  %v2415_v38 = vpack.c.bf16 %v2184_v37, %v2183_v36  ;;  %v2167_v39 = vld [vmem:[%s3803_s16 + $0x70] sm:$0xff] }
 0xff0   : > { %v2207_v41 = vadd.f32 1e-05, %v2205_v40  ;;  %v2168_v40 = vld [vmem:[%s3803_s16 + $0x78] sm:$0xff] }
 0xff2   : > { %3015 = vrsqrt.f32 %v2207_v41  ;;  %v2407_v41 = vpack.c.bf16 %v2168_v40, %v2167_v39 }
 0xff8   : > { %v3014_v42 = vpop.eup %3013 }
 0xff9   : > { %v2210_v43 = vmul.f32 %v3014_v42, %v2194_v30  ;;  %v2156_v30 = vld [vmem:[%s3803_s16 + $0x18] sm:$0xff]  ;;  %v2152_v42 = vld [vmem:[%s3802_s15] sm:$0x3] }
 0xffa   : > { %v2401_v1 = vpack.c.bf16 %v2156_v30, %v2155_v0 }
 0xffb   : > { %v2218_v17 = vmul.f32 %v2593_v47, %v2210_v43  ;;  %v2241_v43 = vrot.slane %v2152_v42, %v1394_v2 }
 0xffc   : > { %v3016_v48 = vpop.eup %3015  ;;  %2680 = vmatpush3.bf16.msra.mxu1 %v2401_v1 }
 0xffd   : > { %v2211_v49 = vmul.f32 %v3016_v48, %v2195_v6  ;;  %v2226_v20 = vadd.f32 %v2594_v50, %v2218_v17  ;;  %v2410_v6 = vpack.c.bf16 %v2174_v4, %v2173_v3 }
 0xfff   : > { %v2219_v51 = vmul.f32 %v2593_v47, %v2211_v49  ;;  %2681 = vmatprep.subr.bf16.mxu1 %v2410_v6  ;;  %v2245_v47 = vrot.slane %v2152_v42, %v1398_v29 }
0x1000   : > { %2682 = vmatpush3.bf16.msra.mxu1 %v2402_v8 }
0x1001   : > { %v2227_v53 = vadd.f32 %v2594_v50, %v2219_v51  ;;  %2683 = vmatprep.subr.bf16.mxu1 %v2411_v12 }
0x1003   : > { %v2228_v55 = vpack.c.bf16 %v2227_v53, %v2226_v20 }
0x1004   : > { %2684 = vmatpush3.bf16.msra.mxu1 %v2403_v60 }
0x1005   : > { %2595 = vmatmul.mubr.msk.bf16.vlgmr.msra.gmra.mrb[32].mxu0 %vm587_vm0, %v2228_v55  ;;  %2685 = vmatprep.subr.bf16.mxu1 %v2412_v16 }
0x1008   : > { %2686 = vmatpush3.bf16.msra.mxu1 %v2404_v21 }
0x1009   : > { %2687 = vmatprep.subr.bf16.mxu1 %v2413_v24 }
0x100c   : > { %2688 = vmatpush3.bf16.msra.mxu1 %v2405_v45 }
0x100d   : > { %2689 = vmatprep.subr.bf16.mxu1 %v2414_v31 }
0x1010   : > { %2690 = vmatpush3.bf16.msra.mxu1 %v2406_v35 }
0x1011   : > { %2691 = vmatprep.subr.bf16.mxu1 %v2415_v38 }
0x1014   : > { %2692 = vmatpush3.bf16.msra.mxu1 %v2407_v41 }
0x10d8   : > { %v2285_v48 = vpop.f32.mrb[32].mxu0 }
0x10d9   : > { %v3741_v17 = vadd.f32 %v2285_v48, %v2241_v43  ;;  %v2287_v49 = vpop.f32.mrb[33].mxu0 }
0x10da   : > { %v3743_v50 = vadd.f32 %v2287_v49, %v2245_v47  ;;  %v2289_v51 = vpop.f32.mrb[34].mxu0 }
0x10db   : > { %v3746_v20 = vmul.f32 0.70710677, %v3741_v17  ;;  %v3748_v53 = vadd.f32 %v2289_v51, %v2241_v43  ;;  %v2291_v55 = vpop.f32.mrb[35].mxu0 }
0x10dc   : > { %v3751_v56 = vmul.f32 0.70710677, %v3743_v50  ;;  %v3753_v2 = vadd.f32 %v2291_v55, %v2245_v47 }
0x10dd   : > { %v2302_v5 = vand.u32 2147483647, %v3746_v20  ;;  %v3757_v29 = vmul.f32 0.70710677, %v3748_v53  ;;  %vm2378_vm4 = vcmp.lt.f32.partialorder %v3746_v20, 0.0 }
0x10de   : > { %v2303_v44 = vand.u32 2147483647, %v3751_v56  ;;  %v3761_v57 = vmul.f32 0.70710677, %v3753_v2  ;;  %vm2379_vm5 = vcmp.lt.f32.partialorder %v3751_v56, 0.0 }
0x10df   : > { %v2306_v58 = vmul.f32 0.3275911, %v2302_v5  ;;  %v2304_v46 = vand.u32 2147483647, %v3757_v29  ;;  %v2354_v4 = vsub.f32 0.0, %v2302_v5  ;;  %vm2380_vm6 = vcmp.lt.f32.partialorder %v3757_v29, 0.0 }
0x10e0   : > { %v2307_v59 = vmul.f32 0.3275911, %v2303_v44  ;;  %v2305_v54 = vand.u32 2147483647, %v3761_v57  ;;  %v2355_v6 = vsub.f32 0.0, %v2303_v44  ;;  %vm2381_vm7 = vcmp.lt.f32.partialorder %v3761_v57, 0.0 }
0x10e1   : > { %v2310_v52 = vadd.f32 1.0, %v2306_v58  ;;  %v2308_v62 = vmul.f32 0.3275911, %v2304_v46  ;;  %v2358_v7 = vmul.f32 %v2354_v4, %v2302_v5  ;;  %v2356_v8 = vsub.f32 0.0, %v2304_v46 }
0x10e2   : > { %v2311_v0 = vadd.f32 1.0, %v2307_v59  ;;  %v2309_v30 = vmul.f32 0.3275911, %v2305_v54  ;;  %v2359_v12 = vmul.f32 %v2355_v6, %v2303_v44  ;;  %v2357_v63 = vsub.f32 0.0, %v2305_v54 }
0x10e3   : > { %3017 = vrcp.f32 %v2310_v52  ;;  %v2312_v1 = vadd.f32 1.0, %v2308_v62  ;;  %v2362_v14 = vmul.f32 1.442695, %v2358_v7  ;;  %v2360_v18 = vmul.f32 %v2356_v8, %v2304_v46 }
0x10e4   : > { %3019 = vrcp.f32 %v2311_v0  ;;  %v2313_v3 = vadd.f32 1.0, %v2309_v30  ;;  %v2364_v21 = vmul.f32 1.442695, %v2359_v12  ;;  %v2361_v25 = vmul.f32 %v2357_v63, %v2305_v54 }
0x10e5   : > { %3021 = vrcp.f32 %v2312_v1  ;;  %v2366_v31 = vmul.f32 1.442695, %v2360_v18 }
0x10e6   : > { %3023 = vrcp.f32 %v2313_v3  ;;  %v2368_v37 = vmul.f32 1.442695, %v2361_v25  ;;  %v2296_v25 = vmul.f32 0.5, %v3748_v53 }
0x10e7   : > { %3025 = vpow2.f32 %v2362_v14 }
0x10e8   : > { %3027 = vpow2.f32 %v2364_v21 }
0x10e9   : > { %3029 = vpow2.f32 %v2366_v31 }
0x10ea   : > { %3031 = vpow2.f32 %v2368_v37 }
0x10ed   : > { %v3018_v33 = vpop.eup %3017 }
0x10ee   : > { %v3020_v9 = vpop.eup %3019  ;;  %v2318_v11 = vmul.f32 1.0614054, %v3018_v33 }
0x10ef   : > { %v2319_v13 = vmul.f32 1.0614054, %v3020_v9  ;;  %v3022_v15 = vpop.eup %3021 }
0x10f0   : > { %v2322_v60 = vadd.f32 -1.4531521, %v2318_v11  ;;  %v2320_v22 = vmul.f32 1.0614054, %v3022_v15  ;;  %v3024_v23 = vpop.eup %3023 }
0x10f1   : > { %v2323_v16 = vadd.f32 -1.4531521, %v2319_v13  ;;  %v2321_v27 = vmul.f32 1.0614054, %v3024_v23  ;;  %v3026_v59 = vpop.eup %3025 }
0x10f2   : > { %v2326_v19 = vmul.f32 %v3018_v33, %v2322_v60  ;;  %v2324_v45 = vadd.f32 -1.4531521, %v2320_v22  ;;  %v3028_v52 = vpop.eup %3027 }
0x10f3   : > { %v2327_v24 = vmul.f32 %v3020_v9, %v2323_v16  ;;  %v2325_v35 = vadd.f32 -1.4531521, %v2321_v27  ;;  %v3030_v7 = vpop.eup %3029 }
0x10f4   : > { %v2330_v26 = vadd.f32 1.4214138, %v2326_v19  ;;  %v2328_v34 = vmul.f32 %v3022_v15, %v2324_v45  ;;  %v3032_v63 = vpop.eup %3031 }
0x10f5   : > { %v2331_v28 = vadd.f32 1.4214138, %v2327_v24  ;;  %v2329_v40 = vmul.f32 %v3024_v23, %v2325_v35 }
0x10f6   : > { %v2334_v32 = vmul.f32 %v3018_v33, %v2330_v26  ;;  %v2332_v39 = vadd.f32 1.4214138, %v2328_v34  ;;  %v2295_v26 = vmul.f32 0.5, %v3743_v50  ;;  %v2596_v50 = vld [vmem:[%s3804_s17] ss:$0 sm:$0xff] }
0x10f7   : > { %v2335_v36 = vmul.f32 %v3020_v9, %v2331_v28  ;;  %v2333_v47 = vadd.f32 1.4214138, %v2329_v40  ;;  %v2297_v28 = vmul.f32 0.5, %v3753_v2 }
0x10f8   : > { %v2338_v38 = vadd.f32 -0.28449672, %v2334_v32  ;;  %v2336_v43 = vmul.f32 %v3022_v15, %v2332_v39 }
0x10f9   : > { %v2339_v41 = vadd.f32 -0.28449672, %v2335_v36  ;;  %v2337_v55 = vmul.f32 %v3024_v23, %v2333_v47 }
0x10fa   : > { %v2342_v42 = vmul.f32 %v3018_v33, %v2338_v38  ;;  %v2340_v51 = vadd.f32 -0.28449672, %v2336_v43 }
0x10fb   : > { %v2343_v48 = vmul.f32 %v3020_v9, %v2339_v41  ;;  %v2341_v46 = vadd.f32 -0.28449672, %v2337_v55 }
0x10fc   : > { %v2346_v49 = vadd.f32 0.2548296, %v2342_v42  ;;  %v2344_v58 = vmul.f32 %v3022_v15, %v2340_v51 }
0x10fd   : > { %v2347_v5 = vadd.f32 0.2548296, %v2343_v48  ;;  %v2345_v30 = vmul.f32 %v3024_v23, %v2341_v46 }
0x10fe   : > { %v2350_v44 = vmul.f32 %v3018_v33, %v2346_v49  ;;  %v2348_v0 = vadd.f32 0.2548296, %v2344_v58 }
0x10ff   : > { %v2351_v54 = vmul.f32 %v3020_v9, %v2347_v5  ;;  %v2349_v6 = vadd.f32 0.2548296, %v2345_v30 }
0x1100   : > { %v2370_v62 = vmul.f32 %v3026_v59, %v2350_v44  ;;  %v2352_v4 = vmul.f32 %v3022_v15, %v2348_v0  ;;  %v2294_v15 = vmul.f32 0.5, %v3741_v17 }
0x1101   : > { %v2371_v1 = vmul.f32 %v3028_v52, %v2351_v54  ;;  %v2353_v13 = vmul.f32 %v3024_v23, %v2349_v6 }
0x1102   : > { %v2374_v3 = vsub.f32 1.0, %v2370_v62  ;;  %v2372_v12 = vmul.f32 %v3030_v7, %v2352_v4 }
0x1103   : > { %v2375_v8 = vsub.f32 1.0, %v2371_v1  ;;  %v2373_v9 = vmul.f32 %v3032_v63, %v2353_v13 }
0x1104   : > { %v2382_v11 = vsub.f32 0.0, %v2374_v3  ;;  %v2376_v14 = vsub.f32 1.0, %v2372_v12 }
0x1105   : > { %v2383_v33 = vsub.f32 0.0, %v2375_v8  ;;  %v2377_v19 = vsub.f32 1.0, %v2373_v9 }
0x1106   : > { %v2386_v60 = vsel %vm2378_vm4, %v2382_v11, %v2374_v3  ;;  %v2384_v18 = vsub.f32 0.0, %v2376_v14 }
0x1107   : > { %v2387_v16 = vsel %vm2379_vm5, %v2383_v33, %v2375_v8  ;;  %v2390_v21 = vadd.f32 1.0, %v2386_v60  ;;  %v2385_v24 = vsub.f32 0.0, %v2377_v19 }
0x1108   : > { %v2388_v22 = vsel %vm2380_vm6, %v2384_v18, %v2376_v14  ;;  %v2391_v23 = vadd.f32 1.0, %v2387_v16 }
0x1109   : > { %v2392_v20 = vadd.f32 1.0, %v2388_v22  ;;  %v2389_v56 = vsel %vm2381_vm7, %v2385_v24, %v2377_v19  ;;  %v2394_v45 = vmul.f32 %v2390_v21, %v2294_v15 }
0x110a   : > { %v2393_v31 = vadd.f32 1.0, %v2389_v56  ;;  %v2395_v29 = vmul.f32 %v2391_v23, %v2295_v26 }
0x110b   : > { %v2396_v27 = vmul.f32 %v2392_v20, %v2296_v25 }
0x110c   : > { %v2397_v17 = vmul.f32 %v2393_v31, %v2297_v28 }
0x110d   : > { %v2398_v32 = vpack.c.bf16 %v2396_v27, %v2394_v45 }
0x110e   : > { %v2399_v34 = vpack.c.bf16 %v2397_v17, %v2395_v29 }
0x1110   : > { %2448 = vmatprep.mubr.bf16.mxu1 %v2399_v34 }
0x1111   : > { %2449 = vmatmul.mubr.bf16.vlgmr.msra.gmra.mrb[32].mxu1 %v2398_v32 }
0x11e4   : > { %v2693_v35 = vpop.f32.mrb[32].mxu1 }
0x11e5   : > { %v2694_v53 = vpop.f32.mrb[33].mxu1 }
0x11e6   : > { %v2695_v36 = vadd.f32 %v2694_v53, %v2693_v35  ;;  %v2696_v37 = vpop.f32.mrb[34].mxu1 }
0x11e7   : > { %v2697_v57 = vpop.f32.mrb[35].mxu1 }
0x11e8   : > { %v2457_v38 = vadd.f32 %v2695_v36, %v3570_v10  ;;  %v2698_v2 = vadd.f32 %v2697_v57, %v2696_v37 }
0x11ea   : > { %v2465_v39 = vadd.f32 %v2596_v50, %v2457_v38  ;;  %v2458_v40 = vadd.f32 %v2698_v2, %v3573_v61 }
0x11ec   : > { %2467 = vst.msk [vmem:[%s575_s22] sm:$0xff] %vm587_vm0, %v2465_v39  ;;  %v2466_v41 = vadd.f32 %v2596_v50, %v2458_v40 }
0x11ee   : > { %2468 = vst.msk [vmem:[%s575_s22 + $0x8] sm:$0xff] %vm587_vm0, %v2466_v41 }
0x11ef PF: > { %s28_s27 = sadd.s32 1, %s3039_s27  }
0x11f0   : > { %p25_p4 = scmp.ge.s32.totalorder %s28_s27, 4  }
0x11f2   :  { %27 = sbr.rel (!%p25_p4) target bundleno = 4 (0x4), region = 134 }

// kernel: swin_forward.4
= control target key start
LH: loop header
LB: loop body
LE: loop exit
PB: predicated region body
PF: predicated region fallthrough
CT: control target
= control target key end

     0   :  { %s4344_s0 = inlined_call_operand.vmem [shape: f32[2,64,32], index: 0, kind: input, shape index: {}]   ;;  %s4345_s1 = inlined_call_operand.vmem [shape: f32[32,32], index: 1, kind: input, shape index: {}]   ;;  %s4346_s2 = inlined_call_operand.vmem [shape: f32[1,32], index: 2, kind: input, shape index: {}]   ;;  %s4347_s3 = inlined_call_operand.vmem [shape: f32[1,32], index: 3, kind: input, shape index: {}]   ;;  %s4348_s4 = inlined_call_operand.vmem [shape: f32[1,32], index: 4, kind: input, shape index: {}]   ;;  %s4349_s5 = inlined_call_operand.vmem [shape: f32[64,64], index: 5, kind: input, shape index: {}]   ;;  %s4350_s6 = inlined_call_operand.vmem [shape: f32[64,64], index: 6, kind: input, shape index: {}]   ;;  %s4351_s7 = inlined_call_operand.vmem [shape: f32[1,32], index: 7, kind: input, shape index: {}]   ;;  %s4352_s8 = inlined_call_operand.vmem [shape: f32[1,32], index: 8, kind: input, shape index: {}]   ;;  %s4353_s9 = inlined_call_operand.vmem [shape: f32[32,96], index: 9, kind: input, shape index: {}]   ;;  %s4354_s10 = inlined_call_operand.vmem [shape: f32[1,96], index: 10, kind: input, shape index: {}]   ;;  %s4355_s11 = inlined_call_operand.vmem [shape: f32[2,64,64], index: 11, kind: input, shape index: {}]   ;;  %s4356_s12 = inlined_call_operand.vmem [shape: f32[32,32], index: 12, kind: input, shape index: {}]   ;;  %s4357_s13 = inlined_call_operand.vmem [shape: f32[1,32], index: 13, kind: input, shape index: {}]   ;;  %s4358_s14 = inlined_call_operand.vmem [shape: f32[1,32], index: 14, kind: input, shape index: {}]   ;;  %s4359_s15 = inlined_call_operand.vmem [shape: f32[1,32], index: 15, kind: input, shape index: {}]   ;;  %s4360_s16 = inlined_call_operand.vmem [shape: f32[32,128], index: 16, kind: input, shape index: {}]   ;;  %s4361_s17 = inlined_call_operand.vmem [shape: f32[1,128], index: 17, kind: input, shape index: {}]   ;;  %s4362_s18 = inlined_call_operand.vmem [shape: f32[128,32], index: 18, kind: input, shape index: {}]   ;;  %s4363_s19 = inlined_call_operand.vmem [shape: f32[1,32], index: 19, kind: input, shape index: {}]   ;;  %s4364_s20 = inlined_call_operand.vmem [shape: f32[2,64,32], index: 20, kind: output, shape index: {}]  }
   0x1   :  { %4366 = sst [smem:[#allocation2_spill]] %s4344_s0 }
   0x2   :  { %4367 = sst [smem:[#allocation3_spill]] %s4345_s1  ;;  %s3486_s1 = smov 0  }
   0x3   :  { %4368 = sst [smem:[#allocation4_spill]] %s4346_s2 }
   0x4   :  { %4369 = sst [smem:[#allocation5_spill]] %s4347_s3 }
   0x5   :  { %4370 = sst [smem:[#allocation6_spill]] %s4348_s4 }
   0x6 LB: > { %s2783_s22 = sadd.s32 4294967295, %s3374_s1   ;;  %p2787_p0 = scmp.ge.s32.totalorder %s3374_s1, 1  ;;  %s3374_s1 = sphi %s3486_s1, %s30_s1  }
   0x7   : > { %p562_p1 = scmp.lt.s32.totalorder %s3374_s1, 3 }
   0x9   : > { %p563_p2 = pnand %p2787_p0, %p562_p1 }
   0xa   : > { %s4371_s2 = sld [smem:[#allocation3_spill]] (!%p563_p2)  ;;  %p620_p3 = scmp.lt.s32.totalorder (!%p563_p2), %s2783_s22, 1  ;;  %vm656_vm0 = vcmask (!%p563_p2), 261120   ;;  %vm877_vm1 = vcmask (!%p563_p2), 523264   ;;  %vm1284_vm2 = vcmask (!%p563_p2), 130048  }
   0xb   : > { %566 = sbr.rel (%p563_p2) target bundleno = 4195 (0x1063), region = 100  ;;  %s4372_s21 = sld [smem:[#allocation2_spill]] (!%p563_p2) }
   0xc   : > { %s4373_s3 = sld [smem:[#allocation4_spill]] (!%p563_p2)  ;;  %s4374_s30 = sld [smem:[#allocation5_spill]] (!%p563_p2) }
   0xd   : > { %s3376_s4 = smov (!%p563_p2), 96   ;;  %s3377_s0 = smov (!%p563_p2), 64  }
   0xe   : > { %s3379_s26 = smov (!%p563_p2), 112  }
  0x10   : > { %v639_v0 = vld [vmem:[%s4371_s2] sm:$0xff] (!%p563_p2)  ;;  %v640_v1 = vld [vmem:[%s4371_s2 + $0x8] sm:$0xff] (!%p563_p2)  ;;  %v641_v2 = vld [vmem:[%s4371_s2 + $0x10] sm:$0xff] (!%p563_p2) }
  0x11   : > { %v647_v3 = vpack.c.bf16 (!%p563_p2), %v640_v1, %v639_v0  ;;  %v642_v4 = vld [vmem:[%s4371_s2 + $0x18] sm:$0xff] (!%p563_p2) }
  0x12   : > { %v648_v5 = vpack.c.bf16 %v642_v4, %v641_v2  ;;  %s4377_s22 = smov (!%p620_p3, %s2783_s22), 1  ;;  %v2792_v18 = vld [vmem:[%s4373_s3] ss:$0 sm:$0xff]  ;;  %s3378_s3 = smov 80  }
  0x13   : > { %2963 = vmatprep.subr.bf16.mxu0 %v647_v3  ;;  %s2857_s29 = sshll.u32 %s4377_s22, 6 }
  0x14   : > { %2964 = vmatpush3.bf16.msra.mxu0 %v647_v3  ;;  %s624_s23 = scalar_lea.vmem %s4372_s21, %s2857_s29  ;;  %s3380_s21 = smov 48  }
  0x15   : > { %2965 = vmatprep.subr.bf16.mxu0 %v648_v5  ;;  %v631_v6 = vld [vmem:[%s624_s23] sm:$0xff]  ;;  %v632_v7 = vld [vmem:[%s624_s23 + $0x8] sm:$0xff]  ;;  %v633_v8 = vld [vmem:[%s624_s23 + $0x10] sm:$0xff] }
  0x16   : > { %v643_v9 = vpack.c.bf16 %v632_v7, %v631_v6  ;;  %v634_v10 = vld [vmem:[%s624_s23 + $0x18] sm:$0xff]  ;;  %v635_v11 = vld [vmem:[%s624_s23 + $0x20] sm:$0xff]  ;;  %v636_v12 = vld [vmem:[%s624_s23 + $0x28] sm:$0xff] }
  0x17   : > { %v644_v13 = vpack.c.bf16 %v634_v10, %v633_v8  ;;  %v645_v14 = vpack.c.bf16 %v636_v12, %v635_v11  ;;  %v637_v15 = vld [vmem:[%s624_s23 + $0x30] sm:$0xff]  ;;  %v638_v16 = vld [vmem:[%s624_s23 + $0x38] sm:$0xff]  ;;  %s4375_s23 = sld [smem:[#allocation6_spill]] }
  0x18   : > { %2966 = vmatpush3.bf16.msra.mxu0 %v648_v5  ;;  %2967 = vmatprep.mubr.msk.bf16.mxu0 %vm656_vm0, %v643_v9  ;;  %v646_v17 = vpack.c.bf16 %v638_v16, %v637_v15 }
  0x1b   : > { %2968 = vmatmul.mubr.msk.bf16.vlgmr.msra.gmra.mrb[0].mxu0 %vm656_vm0, %v644_v13 }
  0x1c   : > { %2971 = vmatprep.mubr.msk.bf16.mxu0 %vm656_vm0, %v645_v14 }
  0x23   : > { %2972 = vmatmul.mubr.msk.bf16.gmra.mrb[4].mxu0 %vm656_vm0, %v646_v17 }
  0xee   : > { %v2969_v19 = vpop.f32.mrb[0].mxu0 }
  0xef   : > { %v712_v20 = vadd.f32 %v2969_v19, %v2792_v18  ;;  %v703_v21 = vpop.f32.mrb[1].mxu0  ;;  %v869_v19 = vld [vmem:[%s4349_s5] sm:$0xff] }
  0xf0   : > { %v704_v22 = vadd.f32 %v2792_v18, %v703_v21  ;;  %v2970_v23 = vpop.f32.mrb[2].mxu0  ;;  %2991 = vmatprep.mubr.msk.f32.mxu1 %vm877_vm1, %v869_v19 }
  0xf1   : > { %v715_v24 = vadd.f32 %v2970_v23, %v2792_v18  ;;  %v706_v25 = vpop.f32.mrb[3].mxu0  ;;  %v742_v26 = vsel %vm656_vm0, %v712_v20, 0.0 }
  0xf2   : > { %v707_v27 = vadd.f32 %v2792_v18, %v706_v25  ;;  %743 = vadd.xlane.f32.xlu1 %v742_v26  ;;  %v736_v28 = vsel %vm656_vm0, %v704_v22, 0.0 }
  0xf3   : > { %737 = vadd.xlane.f32.xlu0 %v736_v28  ;;  %v745_v29 = vsel %vm656_vm0, %v715_v24, 0.0 }
  0xf4   : > { %v739_v31 = vsel %vm656_vm0, %v707_v27, 0.0 }
  0xf6   : > { %746 = vadd.xlane.f32.xlu1 %v745_v29  ;;  %v2973_v30 = vpop.f32.mrb[4].mxu0 }
  0xf7   : > { %v719_v32 = vpop.f32.mrb[5].mxu0  ;;  %740 = vadd.xlane.f32.xlu0 %v739_v31  ;;  %v728_v36 = vadd.f32 %v2973_v30, %v2792_v18 }
  0xf8   : > { %v720_v33 = vadd.f32 %v2792_v18, %v719_v32  ;;  %v2974_v34 = vpop.f32.mrb[6].mxu0 }
  0xf9   : > { %v722_v35 = vpop.f32.mrb[7].mxu0  ;;  %v731_v39 = vadd.f32 %v2974_v34, %v2792_v18  ;;  %v754_v41 = vsel %vm656_vm0, %v728_v36, 0.0 }
  0xfa   : > { %v723_v37 = vadd.f32 %v2792_v18, %v722_v35  ;;  %v748_v38 = vsel %vm656_vm0, %v720_v33, 0.0 }
  0xfb   : > { %749 = vadd.xlane.f32.xlu0 %v748_v38  ;;  %v757_v42 = vsel %vm656_vm0, %v731_v39, 0.0 }
  0xfc   : > { %v751_v40 = vsel %vm656_vm0, %v723_v37, 0.0 }
  0xfd   : > { %752 = vadd.xlane.f32.xlu1 %v751_v40 }
  0xff   : > { %755 = vadd.xlane.f32.xlu0 %v754_v41 }
 0x101   : > { %758 = vadd.xlane.f32.xlu1 %v757_v42 }
 0x17f   : > { %v744_v43 = vpop.xlane.xlu1 %743 }
 0x180   : > { %v763_v44 = vmul.f32 0.03125, %v744_v43  ;;  %v738_v45 = vpop.xlane.xlu0 %737 }
 0x181   : > { %v761_v46 = vmul.f32 0.03125, %v738_v45  ;;  %v2797_v45 = vld [vmem:[%s4374_s30] ss:$0 sm:$0xff] }
 0x182   : > { %v3529_v47 = vsub.f32 %v712_v20, %v763_v44 }
 0x183   : > { %v3531_v48 = vsub.f32 %v704_v22, %v761_v46  ;;  %v747_v49 = vpop.xlane.xlu1 %746 }
 0x184   : > { %v764_v50 = vmul.f32 0.03125, %v747_v49  ;;  %v741_v51 = vpop.xlane.xlu0 %740  ;;  %v779_v57 = vmul.f32 %v3529_v47, %v3529_v47 }
 0x185   : > { %v762_v52 = vmul.f32 0.03125, %v741_v51  ;;  %v777_v53 = vmul.f32 %v3531_v48, %v3531_v48 }
 0x186   : > { %v3535_v54 = vsub.f32 %v715_v24, %v764_v50  ;;  %v791_v1 = vsel %vm656_vm0, %v779_v57, 0.0 }
 0x187   : > { %v3537_v55 = vsub.f32 %v707_v27, %v762_v52  ;;  %v785_v56 = vsel %vm656_vm0, %v777_v53, 0.0  ;;  %v2798_v53 = vld [vmem:[%s4375_s23] ss:$0 sm:$0xff] }
 0x188   : > { %786 = vadd.xlane.f32.xlu0 %v785_v56  ;;  %v750_v58 = vpop.xlane.xlu0 %749  ;;  %v780_v62 = vmul.f32 %v3535_v54, %v3535_v54 }
 0x189   : > { %v765_v59 = vmul.f32 0.03125, %v750_v58  ;;  %v778_v60 = vmul.f32 %v3537_v55, %v3537_v55 }
 0x18a   : > { %v753_v61 = vpop.xlane.xlu1 %752  ;;  %v794_v8 = vsel %vm656_vm0, %v780_v62, 0.0 }
 0x18b   : > { %v3546_v63 = vsub.f32 %v720_v33, %v765_v59  ;;  %v766_v0 = vmul.f32 0.03125, %v753_v61  ;;  %v788_v2 = vsel %vm656_vm0, %v778_v60, 0.0 }
 0x18c   : > { %792 = vadd.xlane.f32.xlu0 %v791_v1  ;;  %789 = vadd.xlane.f32.xlu1 %v788_v2  ;;  %v756_v3 = vpop.xlane.xlu0 %755 }
 0x18d   : > { %v3550_v4 = vsub.f32 %v723_v37, %v766_v0  ;;  %v767_v5 = vmul.f32 0.03125, %v756_v3  ;;  %v781_v6 = vmul.f32 %v3546_v63, %v3546_v63 }
 0x18e   : > { %v759_v7 = vpop.xlane.xlu1 %758 }
 0x18f   : > { %v3555_v9 = vsub.f32 %v728_v36, %v767_v5  ;;  %v768_v10 = vmul.f32 0.03125, %v759_v7  ;;  %v797_v11 = vsel %vm656_vm0, %v781_v6, 0.0  ;;  %v782_v12 = vmul.f32 %v3550_v4, %v3550_v4 }
 0x190   : > { %795 = vadd.xlane.f32.xlu1 %v794_v8  ;;  %798 = vadd.xlane.f32.xlu0 %v797_v11 }
 0x191   : > { %v3560_v13 = vsub.f32 %v731_v39, %v768_v10  ;;  %v783_v14 = vmul.f32 %v3555_v9, %v3555_v9  ;;  %v800_v15 = vsel %vm656_vm0, %v782_v12, 0.0 }
 0x193   : > { %v803_v16 = vsel %vm656_vm0, %v783_v14, 0.0  ;;  %v784_v17 = vmul.f32 %v3560_v13, %v3560_v13 }
 0x194   : > { %801 = vadd.xlane.f32.xlu1 %v800_v15  ;;  %804 = vadd.xlane.f32.xlu0 %v803_v16 }
 0x195   : > { %v806_v18 = vsel %vm656_vm0, %v784_v17, 0.0 }
 0x198   : > { %807 = vadd.xlane.f32.xlu1 %v806_v18 }
 0x215   : > { %v787_v20 = vpop.xlane.xlu0 %786 }
 0x216   : > { %v809_v21 = vmul.f32 0.03125, %v787_v20  ;;  %v871_v20 = vld [vmem:[%s4349_s5 + $0x10] sm:$0xff] }
 0x218   : > { %v817_v22 = vadd.f32 1e-05, %v809_v21  ;;  %v873_v21 = vld [vmem:[%s4349_s5 + $0x20] sm:$0xff] }
 0x219   : > { %v790_v23 = vpop.xlane.xlu1 %789  ;;  %v793_v24 = vpop.xlane.xlu0 %792 }
 0x21a   : > { %3224 = vrsqrt.f32 %v817_v22  ;;  %v810_v25 = vmul.f32 0.03125, %v790_v23  ;;  %v811_v26 = vmul.f32 0.03125, %v793_v24  ;;  %v874_v22 = vld [vmem:[%s4349_s5 + $0x28] sm:$0xff]  ;;  %v875_v23 = vld [vmem:[%s4349_s5 + $0x30] sm:$0xff]  ;;  %v876_v24 = vld [vmem:[%s4349_s5 + $0x38] sm:$0xff] }
 0x21c   : > { %v818_v27 = vadd.f32 1e-05, %v810_v25  ;;  %v819_v28 = vadd.f32 1e-05, %v811_v26 }
 0x21d   : > { %v796_v29 = vpop.xlane.xlu1 %795  ;;  %v799_v30 = vpop.xlane.xlu0 %798 }
 0x21e   : > { %3226 = vrsqrt.f32 %v818_v27  ;;  %v812_v31 = vmul.f32 0.03125, %v796_v29  ;;  %v813_v32 = vmul.f32 0.03125, %v799_v30 }
 0x21f   : > { %3228 = vrsqrt.f32 %v819_v28 }
 0x220   : > { %v820_v33 = vadd.f32 1e-05, %v812_v31  ;;  %v821_v34 = vadd.f32 1e-05, %v813_v32 }
 0x221   : > { %v802_v35 = vpop.xlane.xlu1 %801  ;;  %v805_v36 = vpop.xlane.xlu0 %804 }
 0x222   : > { %3230 = vrsqrt.f32 %v820_v33  ;;  %v814_v37 = vmul.f32 0.03125, %v802_v35  ;;  %v815_v38 = vmul.f32 0.03125, %v805_v36 }
 0x223   : > { %3232 = vrsqrt.f32 %v821_v34 }
 0x224   : > { %v3225_v39 = vpop.eup %3224  ;;  %v822_v40 = vadd.f32 1e-05, %v814_v37  ;;  %v823_v41 = vadd.f32 1e-05, %v815_v38 }
 0x225   : > { %v808_v42 = vpop.xlane.xlu1 %807  ;;  %v833_v43 = vmul.f32 %v3225_v39, %v3531_v48 }
 0x226   : > { %3234 = vrsqrt.f32 %v822_v40  ;;  %v816_v44 = vmul.f32 0.03125, %v808_v42 }
 0x227   : > { %3236 = vrsqrt.f32 %v823_v41  ;;  %v847_v52 = vmul.f32 %v2797_v45, %v833_v43 }
 0x228   : > { %v3227_v46 = vpop.eup %3226  ;;  %v824_v49 = vadd.f32 1e-05, %v816_v44 }
 0x229   : > { %v3229_v50 = vpop.eup %3228  ;;  %v834_v51 = vmul.f32 %v3227_v46, %v3537_v55  ;;  %v861_v59 = vadd.f32 %v2798_v53, %v847_v52 }
 0x22a   : > { %3238 = vrsqrt.f32 %v824_v49  ;;  %v835_v48 = vmul.f32 %v3229_v50, %v3529_v47 }
 0x22b   : > { %v848_v56 = vmul.f32 %v2797_v45, %v834_v51 }
 0x22c   : > { %v3231_v57 = vpop.eup %3230  ;;  %v849_v62 = vmul.f32 %v2797_v45, %v835_v48 }
 0x22d   : > { %v3233_v58 = vpop.eup %3232  ;;  %v862_v60 = vadd.f32 %v2798_v53, %v848_v56  ;;  %v836_v61 = vmul.f32 %v3231_v57, %v3535_v54 }
 0x22e   : > { %v837_v0 = vmul.f32 %v3233_v58, %v3546_v63  ;;  %v863_v5 = vadd.f32 %v2798_v53, %v849_v62 }
 0x22f   : > { %v3163_v1 = vpack.c.bf16 %v862_v60, %v861_v59  ;;  %v850_v55 = vmul.f32 %v2797_v45, %v836_v61 }
 0x230   : > { %v3235_v2 = vpop.eup %3234  ;;  %v851_v47 = vmul.f32 %v2797_v45, %v837_v0 }
 0x231   : > { %v3237_v3 = vpop.eup %3236  ;;  %3164 = vmatprep.subr.bf16.mxu1 %v3163_v1  ;;  %v864_v6 = vadd.f32 %v2798_v53, %v850_v55  ;;  %v838_v7 = vmul.f32 %v3235_v2, %v3550_v4 }
 0x232   : > { %3166 = vmatpush3.bf16.msra.mxu1 %v3163_v1  ;;  %v839_v8 = vmul.f32 %v3237_v3, %v3555_v9  ;;  %v865_v54 = vadd.f32 %v2798_v53, %v851_v47  ;;  %v870_v9 = vld [vmem:[%s4349_s5 + $0x8] sm:$0xff] }
 0x233   : > { %v3167_v10 = vpack.c.bf16 %v864_v6, %v863_v5  ;;  %v852_v11 = vmul.f32 %v2797_v45, %v838_v7 }
 0x234   : > { %v3239_v12 = vpop.eup %3238  ;;  %v853_v15 = vmul.f32 %v2797_v45, %v839_v8 }
 0x235   : > { %3168 = vmatprep.subr.bf16.mxu1 %v3167_v10  ;;  %v866_v14 = vadd.f32 %v2798_v53, %v852_v11  ;;  %v840_v63 = vmul.f32 %v3239_v12, %v3560_v13  ;;  %v872_v13 = vld [vmem:[%s4349_s5 + $0x18] sm:$0xff] }
 0x236   : > { %3170 = vmatpush3.bf16.msra.mxu1 %v3167_v10  ;;  %v867_v18 = vadd.f32 %v2798_v53, %v853_v15 }
 0x237   : > { %v3171_v16 = vpack.c.bf16 %v866_v14, %v865_v54  ;;  %v854_v17 = vmul.f32 %v2797_v45, %v840_v63 }
 0x239   : > { %3172 = vmatprep.subr.bf16.mxu1 %v3171_v16  ;;  %v868_v19 = vadd.f32 %v2798_v53, %v854_v17 }
 0x23a   : > { %3174 = vmatpush3.bf16.msra.mxu1 %v3171_v16 }
 0x23b   : > { %v3175_v4 = vpack.c.bf16 %v868_v19, %v867_v18 }
 0x23d   : > { %3176 = vmatprep.subr.bf16.mxu1 %v3175_v4 }
 0x23e   : > { %3178 = vmatpush3.bf16.msra.mxu1 %v3175_v4  ;;  %v1009_v4 = vld [vmem:[%s4353_s9] sm:$0xff] }
 0x241   : > { %2992 = vmatmul.mubr.msk.f32.vlgmr.msra.gmra.mrb[0].mxu1 %vm877_vm1, %v870_v9  ;;  %v1010_v9 = vld [vmem:[%s4353_s9 + $0x8] sm:$0xff] }
 0x242   : > { %2994 = vmatprep.mubr.msk.f32.mxu1 %vm877_vm1, %v871_v20  ;;  %v1171_v20 = vpack.c.bf16 %v1010_v9, %v1009_v4 }
 0x244   : > { %3003 = vmatprep.subr.bf16.mxu0 %v1171_v20 }
 0x245   : > { %2995 = vmatmul.mubr.msk.f32.gmra.mrb[2].mxu1 %vm877_vm1, %v872_v13  ;;  %3004 = vmatpush3.bf16.msra.mxu0 %v1171_v20  ;;  %v1011_v13 = vld [vmem:[%s4353_s9 + $0x10] sm:$0xff] }
 0x246   : > { %2997 = vmatprep.mubr.msk.f32.mxu1 %vm877_vm1, %v873_v21  ;;  %v1012_v21 = vld [vmem:[%s4353_s9 + $0x18] sm:$0xff] }
 0x249   : > { %2998 = vmatmul.mubr.msk.f32.gmra.mrb[4].mxu1 %vm877_vm1, %v874_v22  ;;  %v1172_v22 = vpack.c.bf16 %v1012_v21, %v1011_v13 }
 0x24a   : > { %3000 = vmatprep.mubr.msk.f32.mxu1 %vm877_vm1, %v875_v23 }
 0x24b   : > { %3005 = vmatprep.subr.bf16.mxu0 %v1172_v22 }
 0x24c   : > { %3006 = vmatpush3.bf16.msra.mxu0 %v1172_v22 }
 0x24d   : > { %3001 = vmatmul.mubr.msk.f32.gmra.mrb[6].mxu1 %vm877_vm1, %v876_v24 }
 0x314   : > { %v3615_v25 = vpop.f32.mrb[0].mxu1 }
 0x315   : > { %v3617_v26 = vpop.f32.mrb[1].mxu1  ;;  %v1038_v27 = vsel %vm656_vm0, %v3615_v25, 0.0 }
 0x316   : > { %1039 = vadd.xlane.f32.xlu1 %v1038_v27  ;;  %v1035_v28 = vsel %vm656_vm0, %v3617_v26, 0.0 }
 0x317   : > { %1036 = vadd.xlane.f32.xlu0 %v1035_v28 }
 0x318   : > { %v3623_v29 = vpop.f32.mrb[2].mxu1 }
 0x319   : > { %v3625_v30 = vpop.f32.mrb[3].mxu1  ;;  %v1044_v31 = vsel %vm656_vm0, %v3623_v29, 0.0 }
 0x31a   : > { %1045 = vadd.xlane.f32.xlu1 %v1044_v31  ;;  %v1041_v32 = vsel %vm656_vm0, %v3625_v30, 0.0 }
 0x31b   : > { %1042 = vadd.xlane.f32.xlu0 %v1041_v32 }
 0x31c   : > { %v3631_v33 = vpop.f32.mrb[4].mxu1 }
 0x31d   : > { %v3633_v34 = vpop.f32.mrb[5].mxu1  ;;  %v1050_v35 = vsel %vm656_vm0, %v3631_v33, 0.0 }
 0x31e   : > { %1051 = vadd.xlane.f32.xlu1 %v1050_v35  ;;  %v1047_v36 = vsel %vm656_vm0, %v3633_v34, 0.0 }
 0x31f   : > { %1048 = vadd.xlane.f32.xlu0 %v1047_v36 }
 0x320   : > { %v3639_v37 = vpop.f32.mrb[6].mxu1 }
 0x321   : > { %v3641_v38 = vpop.f32.mrb[7].mxu1  ;;  %v1056_v39 = vsel %vm656_vm0, %v3639_v37, 0.0 }
 0x322   : > { %1057 = vadd.xlane.f32.xlu1 %v1056_v39  ;;  %v1053_v40 = vsel %vm656_vm0, %v3641_v38, 0.0 }
 0x323   : > { %1054 = vadd.xlane.f32.xlu0 %v1053_v40 }
 0x3a3   : > { %v1040_v41 = vpop.xlane.xlu1 %1039 }
 0x3a4   : > { %v1060_v42 = vmul.f32 0.03125, %v1040_v41  ;;  %v1037_v43 = vpop.xlane.xlu0 %1036 }
 0x3a5   : > { %v1059_v44 = vmul.f32 0.03125, %v1037_v43 }
 0x3a6   : > { %v3648_v45 = vsub.f32 %v3615_v25, %v1060_v42 }
 0x3a7   : > { %v3651_v46 = vsub.f32 %v3617_v26, %v1059_v44  ;;  %v1046_v49 = vpop.xlane.xlu1 %1045 }
 0x3a8   : > { %v1062_v50 = vmul.f32 0.03125, %v1046_v49  ;;  %v1043_v51 = vpop.xlane.xlu0 %1042  ;;  %v1076_v52 = vmul.f32 %v3648_v45, %v3648_v45 }
 0x3a9   : > { %v1061_v53 = vmul.f32 0.03125, %v1043_v51  ;;  %v1075_v48 = vmul.f32 %v3651_v46, %v3651_v46 }
 0x3aa   : > { %v3658_v56 = vsub.f32 %v3623_v29, %v1062_v50  ;;  %v1086_v57 = vsel %vm656_vm0, %v1076_v52, 0.0 }
 0x3ab   : > { %v3662_v58 = vsub.f32 %v3625_v30, %v1061_v53  ;;  %v1052_v59 = vpop.xlane.xlu1 %1051  ;;  %1087 = vadd.xlane.f32.xlu1 %v1086_v57  ;;  %v1083_v60 = vsel %vm656_vm0, %v1075_v48, 0.0 }
 0x3ac   : > { %v1064_v61 = vmul.f32 0.03125, %v1052_v59  ;;  %v1049_v62 = vpop.xlane.xlu0 %1048  ;;  %1084 = vadd.xlane.f32.xlu0 %v1083_v60  ;;  %v1078_v0 = vmul.f32 %v3658_v56, %v3658_v56 }
 0x3ad   : > { %v1063_v1 = vmul.f32 0.03125, %v1049_v62  ;;  %v1077_v55 = vmul.f32 %v3662_v58, %v3662_v58 }
 0x3ae   : > { %v3670_v2 = vsub.f32 %v3631_v33, %v1064_v61  ;;  %v1092_v3 = vsel %vm656_vm0, %v1078_v0, 0.0  ;;  %v2807_v61 = vld [vmem:[%s4351_s7] ss:$0 sm:$0xff] }
 0x3af   : > { %v3674_v5 = vsub.f32 %v3633_v34, %v1063_v1  ;;  %1093 = vadd.xlane.f32.xlu1 %v1092_v3  ;;  %v1058_v6 = vpop.xlane.xlu1 %1057  ;;  %v1089_v7 = vsel %vm656_vm0, %v1077_v55, 0.0 }
 0x3b0   : > { %v1066_v47 = vmul.f32 0.03125, %v1058_v6  ;;  %1090 = vadd.xlane.f32.xlu0 %v1089_v7  ;;  %v1055_v8 = vpop.xlane.xlu0 %1054  ;;  %v1080_v10 = vmul.f32 %v3670_v2, %v3670_v2  ;;  %v2808_v6 = vld [vmem:[%s4352_s8] ss:$0 sm:$0xff] }
 0x3b1   : > { %v1065_v11 = vmul.f32 0.03125, %v1055_v8  ;;  %v1079_v12 = vmul.f32 %v3674_v5, %v3674_v5 }
 0x3b2   : > { %v3682_v54 = vsub.f32 %v3639_v37, %v1066_v47  ;;  %v1098_v14 = vsel %vm656_vm0, %v1080_v10, 0.0 }
 0x3b3   : > { %v3686_v63 = vsub.f32 %v3641_v38, %v1065_v11  ;;  %1099 = vadd.xlane.f32.xlu1 %v1098_v14  ;;  %v1095_v15 = vsel %vm656_vm0, %v1079_v12, 0.0 }
 0x3b4   : > { %1096 = vadd.xlane.f32.xlu0 %v1095_v15  ;;  %v1082_v16 = vmul.f32 %v3682_v54, %v3682_v54 }
 0x3b5   : > { %v1081_v17 = vmul.f32 %v3686_v63, %v3686_v63 }
 0x3b6   : > { %v1104_v18 = vsel %vm656_vm0, %v1082_v16, 0.0 }
 0x3b7   : > { %1105 = vadd.xlane.f32.xlu1 %v1104_v18  ;;  %v1101_v19 = vsel %vm656_vm0, %v1081_v17, 0.0 }
 0x3b8   : > { %1102 = vadd.xlane.f32.xlu0 %v1101_v19 }
 0x438   : > { %v1088_v23 = vpop.xlane.xlu1 %1087 }
 0x439   : > { %v1108_v24 = vmul.f32 0.03125, %v1088_v23  ;;  %v1085_v27 = vpop.xlane.xlu0 %1084 }
 0x43a   : > { %v1107_v28 = vmul.f32 0.03125, %v1085_v27 }
 0x43b   : > { %v1116_v31 = vadd.f32 1e-05, %v1108_v24 }
 0x43c   : > { %v1115_v32 = vadd.f32 1e-05, %v1107_v28  ;;  %v1094_v35 = vpop.xlane.xlu1 %1093 }
 0x43d   : > { %3240 = vrsqrt.f32 %v1116_v31  ;;  %v1110_v36 = vmul.f32 0.03125, %v1094_v35  ;;  %v1091_v39 = vpop.xlane.xlu0 %1090 }
 0x43e   : > { %3242 = vrsqrt.f32 %v1115_v32  ;;  %v1109_v40 = vmul.f32 0.03125, %v1091_v39 }
 0x43f   : > { %v1118_v41 = vadd.f32 1e-05, %v1110_v36 }
 0x440   : > { %v1117_v42 = vadd.f32 1e-05, %v1109_v40  ;;  %v1100_v43 = vpop.xlane.xlu1 %1099 }
 0x441   : > { %3244 = vrsqrt.f32 %v1118_v41  ;;  %v1112_v44 = vmul.f32 0.03125, %v1100_v43  ;;  %v1097_v49 = vpop.xlane.xlu0 %1096 }
 0x442   : > { %3246 = vrsqrt.f32 %v1117_v42  ;;  %v1111_v50 = vmul.f32 0.03125, %v1097_v49 }
 0x443   : > { %v1120_v51 = vadd.f32 1e-05, %v1112_v44 }
 0x444   : > { %v1119_v52 = vadd.f32 1e-05, %v1111_v50  ;;  %v1106_v53 = vpop.xlane.xlu1 %1105 }
 0x445   : > { %3248 = vrsqrt.f32 %v1120_v51  ;;  %v1114_v48 = vmul.f32 0.03125, %v1106_v53  ;;  %v1103_v57 = vpop.xlane.xlu0 %1102 }
 0x446   : > { %3250 = vrsqrt.f32 %v1119_v52  ;;  %v1113_v59 = vmul.f32 0.03125, %v1103_v57 }
 0x447   : > { %v3241_v60 = vpop.eup %3240  ;;  %v1122_v62 = vadd.f32 1e-05, %v1114_v48 }
 0x448   : > { %v3243_v0 = vpop.eup %3242  ;;  %v1132_v1 = vmul.f32 %v3241_v60, %v3648_v45  ;;  %v1121_v55 = vadd.f32 1e-05, %v1113_v59 }
 0x449   : > { %v1131_v3 = vmul.f32 %v3243_v0, %v3651_v46  ;;  %3252 = vrsqrt.f32 %v1122_v62 }
 0x44a   : > { %3254 = vrsqrt.f32 %v1121_v55  ;;  %v1146_v7 = vmul.f32 %v2807_v61, %v1132_v1 }
 0x44b   : > { %v3245_v47 = vpop.eup %3244  ;;  %v1145_v8 = vmul.f32 %v2807_v61, %v1131_v3 }
 0x44c   : > { %v3247_v10 = vpop.eup %3246  ;;  %v1134_v11 = vmul.f32 %v3245_v47, %v3658_v56  ;;  %v1160_v12 = vadd.f32 %v2808_v6, %v1146_v7 }
 0x44d   : > { %v1133_v14 = vmul.f32 %v3247_v10, %v3662_v58  ;;  %v1159_v15 = vadd.f32 %v2808_v6, %v1145_v8 }
 0x44e   : > { %v1148_v45 = vmul.f32 %v2807_v61, %v1134_v11 }
 0x44f   : > { %v3249_v16 = vpop.eup %3248  ;;  %v1147_v17 = vmul.f32 %v2807_v61, %v1133_v14  ;;  %v1167_v46 = vpack.c.bf16 %v1160_v12, %v1159_v15 }
 0x450   : > { %v3251_v18 = vpop.eup %3250  ;;  %v1162_v19 = vadd.f32 %v2808_v6, %v1148_v45  ;;  %v1136_v4 = vmul.f32 %v3249_v16, %v3670_v2 }
 0x451   : > { %v1161_v9 = vadd.f32 %v2808_v6, %v1147_v17  ;;  %v1135_v20 = vmul.f32 %v3251_v18, %v3674_v5  ;;  %3007 = vmatprep.mubr.msk.bf16.mxu0 %vm656_vm0, %v1167_v46 }
 0x452   : > { %v1150_v13 = vmul.f32 %v2807_v61, %v1136_v4 }
 0x453   : > { %v3253_v21 = vpop.eup %3252  ;;  %v1168_v56 = vpack.c.bf16 %v1162_v19, %v1161_v9  ;;  %v1149_v22 = vmul.f32 %v2807_v61, %v1135_v20 }
 0x454   : > { %v3255_v23 = vpop.eup %3254  ;;  %v1138_v58 = vmul.f32 %v3253_v21, %v3682_v54  ;;  %v1164_v24 = vadd.f32 %v2808_v6, %v1150_v13  ;;  %v2809_v54 = vld [vmem:[%s4354_s10] ss:$0 sm:$0xff]  ;;  %v1016_v13 = vld [vmem:[%s4355_s11 + $0x10] sm:$0xff] }
 0x455   : > { %v1137_v27 = vmul.f32 %v3255_v23, %v3686_v63  ;;  %3008 = vmatmul.mubr.msk.bf16.vlgmr.msra.gmra.mrb[8].mxu0 %vm656_vm0, %v1168_v56  ;;  %v1163_v28 = vadd.f32 %v2808_v6, %v1149_v22  ;;  %v1014_v56 = vld [vmem:[%s4355_s11] sm:$0xff] }
 0x456   : > { %v1152_v31 = vmul.f32 %v2807_v61, %v1138_v58  ;;  %v1015_v58 = vld [vmem:[%s4355_s11 + $0x8] sm:$0xff] }
 0x457   : > { %v1169_v2 = vpack.c.bf16 %v1164_v24, %v1163_v28  ;;  %v1151_v32 = vmul.f32 %v2807_v61, %v1137_v27 }
 0x458   : > { %v1166_v35 = vadd.f32 %v2808_v6, %v1152_v31 }
 0x459   : > { %3011 = vmatprep.mubr.msk.bf16.mxu0 %vm656_vm0, %v1169_v2  ;;  %v1165_v5 = vadd.f32 %v2808_v6, %v1151_v32  ;;  %v1017_v2 = vld [vmem:[%s4355_s11 + $0x18] sm:$0xff] }
 0x45b   : > { %v1170_v36 = vpack.c.bf16 %v1166_v35, %v1165_v5 }
 0x45d   : > { %3012 = vmatmul.mubr.msk.bf16.gmra.mrb[12].mxu0 %vm656_vm0, %v1170_v36 }
 0x528   : > { %v3009_v39 = vpop.f32.mrb[8].mxu0 }
 0x529   : > { %v1234_v40 = vadd.f32 %v3009_v39, %v2809_v54  ;;  %v1225_v63 = vpop.f32.mrb[9].mxu0 }
 0x52a   : > { %v1226_v41 = vadd.f32 %v2809_v54, %v1225_v63  ;;  %v3010_v42 = vpop.f32.mrb[10].mxu0 }
 0x52b   : > { %v1237_v43 = vadd.f32 %v3010_v42, %v2809_v54  ;;  %v1228_v44 = vpop.f32.mrb[11].mxu0  ;;  %v1258_v50 = vmul.f32 0.25, %v1234_v40 }
 0x52c   : > { %v1229_v49 = vadd.f32 %v2809_v54, %v1228_v44  ;;  %v1256_v53 = vmul.f32 0.25, %v1226_v41  ;;  %v1018_v44 = vld [vmem:[%s4355_s11 + $0x20] sm:$0xff] }
 0x52d   : > { %v1259_v51 = vmul.f32 0.25, %v1237_v43  ;;  %v3728_v52 = vpack.c.bf16 %v1237_v43, %v1234_v40 }
 0x52e   : > { %v1257_v48 = vmul.f32 0.25, %v1229_v49  ;;  %v3730_v57 = vpack.c.bf16 %v1229_v49, %v1226_v41 }
 0x52f   : > { %v3732_v59 = vpack.c.bf16 %v1259_v51, %v1258_v50  ;;  %1278 = vrot.lane.b32.xlu1 %v3728_v52, %s3376_s4 }
 0x530   : > { %v3735_v60 = vpack.c.bf16 %v1257_v48, %v1256_v53  ;;  %1276 = vrot.lane.b32.xlu0 %v3730_v57, %s3376_s4  ;;  %v3013_v61 = vpop.f32.mrb[12].mxu0  ;;  %v1021_v53 = vld [vmem:[%s4355_s11 + $0x38] sm:$0xff] }
 0x531   : > { %v1250_v62 = vadd.f32 %v3013_v61, %v2809_v54  ;;  %v1241_v0 = vpop.f32.mrb[13].mxu0  ;;  %v1019_v61 = vld [vmem:[%s4355_s11 + $0x28] sm:$0xff] }
 0x532   : > { %v1242_v1 = vadd.f32 %v2809_v54, %v1241_v0  ;;  %v3014_v55 = vpop.f32.mrb[14].mxu0  ;;  %3023 = vmatprep.mubr.msk.bf16.mxu1 %vm1284_vm2, %v3735_v60 }
 0x533   : > { %v1253_v3 = vadd.f32 %v3014_v55, %v2809_v54  ;;  %v1244_v6 = vpop.f32.mrb[15].mxu0  ;;  %v1262_v47 = vmul.f32 0.25, %v1250_v62 }
 0x534   : > { %v1245_v7 = vadd.f32 %v2809_v54, %v1244_v6  ;;  %v1260_v11 = vmul.f32 0.25, %v1242_v1  ;;  %v1020_v54 = vld [vmem:[%s4355_s11 + $0x30] sm:$0xff] }
 0x535   : > { %v1263_v8 = vmul.f32 0.25, %v1253_v3  ;;  %v3740_v10 = vpack.c.bf16 %v1253_v3, %v1250_v62 }
 0x536   : > { %v1261_v12 = vmul.f32 0.25, %v1245_v7  ;;  %v3742_v14 = vpack.c.bf16 %v1245_v7, %v1242_v1 }
 0x537   : > { %v3744_v15 = vpack.c.bf16 %v1263_v8, %v1262_v47 }
 0x538   : > { %v3746_v45 = vpack.c.bf16 %v1261_v12, %v1260_v11  ;;  %1280 = vrot.lane.b32.xlu1 %v3742_v14, %s3376_s4 }
 0x53c   : > { %1282 = vrot.lane.b32.xlu1 %v3740_v10, %s3376_s4 }
 0x5a1   : > { %v1279_v46 = vpop.permute.xlu1 %1278 }
 0x5a2   : > { %v1277_v16 = vpop.permute.xlu0 %1276  ;;  %v1301_v18 = vsel %vm1284_vm2, %v1279_v46, 0 }
 0x5a3   : > { %v1298_v17 = vsel %vm1284_vm2, %v1277_v16, 0  ;;  %3203 = vmatprep.subr.msk.bf16.mxu1 %vm1284_vm2, %v1277_v16 }
 0x5a4   : > { %3016 = vmatpush3.bf16.xpose.msra.mxu1 %v1298_v17 }
 0x5a5   : > { %3204 = vmatprep.subr.msk.bf16.mxu1 %vm1284_vm2, %v1279_v46 }
 0x5aa   : > { %v1281_v19 = vpop.permute.xlu1 %1280 }
 0x5ab   : > { %v1304_v4 = vsel %vm1284_vm2, %v1281_v19, 0 }
 0x5ac   : > { %3018 = vmatpush3.bf16.xpose.msra.mxu1 %v1301_v18 }
 0x5ad   : > { %3205 = vmatprep.subr.msk.bf16.mxu1 %vm1284_vm2, %v1281_v19 }
 0x5ae   : > { %v1283_v9 = vpop.permute.xlu1 %1282 }
 0x5af   : > { %v1307_v20 = vsel %vm1284_vm2, %v1283_v9, 0 }
 0x5b4   : > { %3020 = vmatpush3.bf16.xpose.msra.mxu1 %v1304_v4 }
 0x5b5   : > { %3206 = vmatprep.subr.msk.bf16.mxu1 %vm1284_vm2, %v1283_v9 }
 0x5bc   : > { %3022 = vmatpush3.bf16.xpose.msra.mxu1 %v1307_v20 }
 0x5c3   : > { %3024 = vmatmul.mubr.msk.bf16.vlgmr.msra.gmra.mrb[8].mxu1 %vm1284_vm2, %v3732_v59 }
 0x5c4   : > { %3027 = vmatprep.mubr.msk.bf16.mxu1 %vm1284_vm2, %v3746_v45 }
 0x5cb   : > { %3028 = vmatmul.mubr.msk.bf16.gmra.mrb[12].mxu1 %vm1284_vm2, %v3744_v15 }
 0x696   : > { %v3025_v21 = vpop.f32.mrb[8].mxu1 }
 0x697   : > { %v1352_v22 = vadd.f32 %v3025_v21, %v1016_v13  ;;  %v1343_v23 = vpop.f32.mrb[9].mxu1 }
 0x698   : > { %v3026_v24 = vpop.f32.mrb[10].mxu1  ;;  %v1344_v27 = vadd.f32 %v1343_v23, %v1014_v56 }
 0x699   : > { %v1346_v28 = vpop.f32.mrb[11].mxu1  ;;  %v1380_v31 = vsel %vm877_vm1, %v1352_v22, -inf  ;;  %v1355_v5 = vadd.f32 %v3026_v24, %v1017_v2 }
 0x69a   : > { %v1347_v32 = vadd.f32 %v1346_v28, %v1015_v58  ;;  %1381 = vmax.xlane.f32.xlu0 %v1380_v31  ;;  %v1374_v36 = vsel %vm877_vm1, %v1344_v27, -inf }
 0x69b   : > { %v1383_v43 = vsel %vm877_vm1, %v1355_v5, -inf }
 0x69c   : > { %v1377_v35 = vsel %vm877_vm1, %v1347_v32, -inf }
 0x69d   : > { %1378 = vmax.xlane.f32.xlu1 %v1377_v35 }
 0x69e   : > { %v3029_v39 = vpop.f32.mrb[12].mxu1  ;;  %1375 = vmax.xlane.f32.xlu0 %v1374_v36 }
 0x69f   : > { %v1359_v40 = vpop.f32.mrb[13].mxu1  ;;  %v1368_v41 = vadd.f32 %v3029_v39, %v1020_v54 }
 0x6a0   : > { %v3030_v63 = vpop.f32.mrb[14].mxu1  ;;  %v1360_v49 = vadd.f32 %v1359_v40, %v1018_v44 }
 0x6a1   : > { %v1362_v42 = vpop.f32.mrb[15].mxu1  ;;  %v1392_v50 = vsel %vm877_vm1, %v1368_v41, -inf  ;;  %v3794_v48 = vadd.f32 %v3030_v63, %v1021_v53 }
 0x6a2   : > { %1384 = vmax.xlane.f32.xlu0 %v1383_v43  ;;  %v1386_v51 = vsel %vm877_vm1, %v1360_v49, -inf  ;;  %v3799_v62 = vadd.f32 %v1362_v42, %v1019_v61 }
 0x6a3   : > { %v1395_v0 = vsel %vm877_vm1, %v3794_v48, -inf }
 0x6a4   : > { %v1389_v1 = vsel %vm877_vm1, %v3799_v62, -inf }
 0x6a6   : > { %1393 = vmax.xlane.f32.xlu0 %v1392_v50 }
 0x6aa   : > { %1387 = vmax.xlane.f32.xlu0 %v1386_v51 }
 0x6ae   : > { %1468 = vrot.lane.b32.xlu1 %v3728_v52, %s3377_s0 }
 0x6b2   : > { %1470 = vrot.lane.b32.xlu1 %v3742_v14, %s3377_s0 }
 0x6c0   : > { %1466 = vrot.lane.b32.xlu0 %v3730_v57, %s3377_s0 }
 0x6d6   : > { %1396 = vmax.xlane.f32.xlu1 %v1395_v0 }
 0x6da   : > { %1390 = vmax.xlane.f32.xlu1 %v1389_v1 }
 0x6eb   : > { %1472 = vrot.lane.b32.xlu1 %v3740_v10, %s3377_s0 }
 0x727   : > { %v1382_v55 = vpop.xlane.xlu0 %1381 }
 0x728   : > { %v1400_v3 = vsub.f32 %v1352_v22, %v1382_v55 }
 0x72a   : > { %v1410_v6 = vmul.f32 1.442695, %v1400_v3  ;;  %v1379_v7 = vpop.xlane.xlu1 %1378 }
 0x72b   : > { %v1376_v47 = vpop.xlane.xlu0 %1375  ;;  %v1399_v11 = vsub.f32 %v1347_v32, %v1379_v7 }
 0x72c   : > { %3256 = vpow2.f32 %v1410_v6  ;;  %v1398_v8 = vsub.f32 %v1344_v27, %v1376_v47 }
 0x72d   : > { %v1408_v46 = vmul.f32 1.442695, %v1399_v11 }
 0x72e   : > { %v1406_v12 = vmul.f32 1.442695, %v1398_v8  ;;  %v1469_v58 = vpop.permute.xlu1 %1468 }
 0x72f   : > { %v1385_v16 = vpop.xlane.xlu0 %1384 }
 0x730   : > { %3258 = vpow2.f32 %v1406_v12  ;;  %v1401_v17 = vsub.f32 %v1355_v5, %v1385_v16 }
 0x732   : > { %v1412_v18 = vmul.f32 1.442695, %v1401_v17  ;;  %v1471_v32 = vpop.permute.xlu1 %1470 }
 0x733   : > { %v1394_v19 = vpop.xlane.xlu0 %1393 }
 0x734   : > { %3260 = vpow2.f32 %v1412_v18  ;;  %v1404_v4 = vsub.f32 %v1368_v41, %v1394_v19 }
 0x735   : > { %3262 = vpow2.f32 %v1408_v46 }
 0x736   : > { %v3806_v9 = vpop.eup %3256  ;;  %v1418_v20 = vmul.f32 1.442695, %v1404_v4 }
 0x737   : > { %v1388_v13 = vpop.xlane.xlu0 %1387  ;;  %v1428_v21 = vsel %vm877_vm1, %v3806_v9, 0.0 }
 0x738   : > { %3264 = vpow2.f32 %v1418_v20  ;;  %v1402_v56 = vsub.f32 %v1360_v49, %v1388_v13  ;;  %1429 = vadd.xlane.f32.xlu0 %v1428_v21 }
 0x73a   : > { %v3810_v22 = vpop.eup %3258  ;;  %v1414_v23 = vmul.f32 1.442695, %v1402_v56 }
 0x73b   : > { %v1467_v24 = vpop.permute.xlu0 %1466  ;;  %v1422_v27 = vsel %vm877_vm1, %v3810_v22, 0.0 }
 0x73c   : > { %3266 = vpow2.f32 %v1414_v23  ;;  %1423 = vadd.xlane.f32.xlu0 %v1422_v27  ;;  %3031 = vmatprep.subr.bf16.mxu0 %v1467_v24 }
 0x73d   : > { %3032 = vmatpush3.bf16.msra.mxu0 %v1467_v24 }
 0x73e   : > { %v3261_v28 = vpop.eup %3260  ;;  %3033 = vmatprep.subr.bf16.mxu0 %v1469_v58 }
 0x73f   : > { %v1431_v31 = vsel %vm877_vm1, %v3261_v28, 0.0  ;;  %v3263_v2 = vpop.eup %3262 }
 0x740   : > { %1432 = vadd.xlane.f32.xlu1 %v1431_v31  ;;  %v1425_v5 = vsel %vm877_vm1, %v3263_v2, 0.0 }
 0x741   : > { %3034 = vmatpush3.bf16.msra.mxu0 %v1469_v58 }
 0x742   : > { %v3815_v35 = vpop.eup %3264  ;;  %3035 = vmatprep.subr.bf16.mxu0 %v1471_v32 }
 0x743   : > { %v1440_v36 = vsel %vm877_vm1, %v3815_v35, 0.0 }
 0x744   : > { %1426 = vadd.xlane.f32.xlu1 %v1425_v5  ;;  %1441 = vadd.xlane.f32.xlu0 %v1440_v36 }
 0x745   : > { %3036 = vmatpush3.bf16.msra.mxu0 %v1471_v32 }
 0x746   : > { %v3820_v54 = vpop.eup %3266 }
 0x747   : > { %v1434_v39 = vsel %vm877_vm1, %v3820_v54, 0.0 }
 0x748   : > { %1435 = vadd.xlane.f32.xlu0 %v1434_v39 }
 0x755   : > { %1574 = vrot.lane.b32.xlu1 %v3728_v52, %s3378_s3 }
 0x759   : > { %1576 = vrot.lane.b32.xlu1 %v3742_v14, %s3378_s3 }
 0x763   : > { %v1397_v40 = vpop.xlane.xlu1 %1396 }
 0x764   : > { %v1405_v63 = vsub.f32 %v3794_v48, %v1397_v40 }
 0x766   : > { %v1420_v41 = vmul.f32 1.442695, %v1405_v63 }
 0x767   : > { %v1391_v42 = vpop.xlane.xlu1 %1390 }
 0x768   : > { %3268 = vpow2.f32 %v1420_v41  ;;  %v1403_v43 = vsub.f32 %v3799_v62, %v1391_v42 }
 0x76a   : > { %v1416_v44 = vmul.f32 1.442695, %v1403_v43 }
 0x76b   : > { %v1473_v49 = vpop.permute.xlu1 %1472 }
 0x76c   : > { %3037 = vmatprep.subr.bf16.mxu0 %v1473_v49  ;;  %3270 = vpow2.f32 %v1416_v44 }
 0x76d   : > { %3038 = vmatpush3.bf16.msra.mxu0 %v1473_v49 }
 0x772   : > { %v3269_v50 = vpop.eup %3268 }
 0x773   : > { %v1443_v51 = vsel %vm877_vm1, %v3269_v50, 0.0 }
 0x774   : > { %1444 = vadd.xlane.f32.xlu0 %v1443_v51 }
 0x776   : > { %v3271_v53 = vpop.eup %3270 }
 0x777   : > { %v1437_v61 = vsel %vm877_vm1, %v3271_v53, 0.0 }
 0x77d   : > { %1438 = vadd.xlane.f32.xlu1 %v1437_v61 }
 0x78a   : > { %1572 = vrot.lane.b32.xlu0 %v3730_v57, %s3378_s3 }
 0x78e   : > { %1578 = vrot.lane.b32.xlu1 %v3740_v10, %s3378_s3  ;;  %1564 = vrot.lane.b32.xlu0 %v3735_v60, %s3379_s26 }
 0x792   : > { %1566 = vrot.lane.b32.xlu1 %v3732_v59, %s3379_s26  ;;  %1568 = vrot.lane.b32.xlu0 %v3746_v45, %s3379_s26 }
 0x796   : > { %1570 = vrot.lane.b32.xlu1 %v3744_v15, %s3379_s26 }
 0x7c5   : > { %v1430_v48 = vpop.xlane.xlu0 %1429 }
 0x7c9   : > { %v1424_v62 = vpop.xlane.xlu0 %1423 }
 0x7cd   : > { %v1433_v0 = vpop.xlane.xlu1 %1432 }
 0x7ce   : > { %3272 = vrcp.f32 %v1433_v0  ;;  %v1024_v0 = vld [vmem:[%s4355_s11 + $0x50] sm:$0xff] }
 0x7cf   : > { %3274 = vrcp.f32 %v1424_v62 }
 0x7d0   : > { %3276 = vrcp.f32 %v1430_v48  ;;  %v1022_v48 = vld [vmem:[%s4355_s11 + $0x40] sm:$0xff] }
 0x7d1   : > { %v1427_v1 = vpop.xlane.xlu1 %1426  ;;  %v1442_v11 = vpop.xlane.xlu0 %1441 }
 0x7d2   : > { %3278 = vrcp.f32 %v1427_v1 }
 0x7d5   : > { %v1436_v12 = vpop.xlane.xlu0 %1435  ;;  %v1575_v16 = vpop.permute.xlu1 %1574 }
 0x7d8   : > { %v3273_v55 = vpop.eup %3272 }
 0x7d9   : > { %v3275_v3 = vpop.eup %3274  ;;  %v1457_v47 = vmul.f32 %v3273_v55, %v3261_v28  ;;  %v1577_v18 = vpop.permute.xlu1 %1576  ;;  %v1023_v55 = vld [vmem:[%s4355_s11 + $0x48] sm:$0xff] }
 0x7da   : > { %v3277_v6 = vpop.eup %3276  ;;  %v1454_v60 = vmul.f32 %v3275_v3, %v3810_v22  ;;  %v1599_v23 = vsel %vm1284_vm2, %v1577_v18, 0 }
 0x7db   : > { %v1456_v45 = vmul.f32 %v3277_v6, %v3806_v9  ;;  %v1596_v9 = vsel %vm1284_vm2, %v1575_v16, 0 }
 0x7dc   : > { %v3279_v7 = vpop.eup %3278 }
 0x7dd   : > { %v1455_v59 = vmul.f32 %v3279_v7, %v3263_v2  ;;  %v1463_v15 = vpack.c.bf16 %v1457_v47, %v1456_v45  ;;  %v1025_v45 = vld [vmem:[%s4355_s11 + $0x58] sm:$0xff] }
 0x7df   : > { %v1462_v8 = vpack.c.bf16 %v1455_v59, %v1454_v60 }
 0x7e1   : > { %3039 = vmatprep.mubr.msk.bf16.mxu0 %vm877_vm1, %v1462_v8 }
 0x7e2   : > { %3040 = vmatmul.mubr.msk.bf16.vlgmr.msra.gmra.mrb[16].mxu0 %vm877_vm1, %v1463_v15 }
 0x801   : > { %v1445_v17 = vpop.xlane.xlu0 %1444 }
 0x802   : > { %3280 = vrcp.f32 %v1445_v17  ;;  %v1026_v17 = vld [vmem:[%s4355_s11 + $0x60] sm:$0xff] }
 0x803   : > { %3282 = vrcp.f32 %v1436_v12 }
 0x804   : > { %3284 = vrcp.f32 %v1442_v11 }
 0x805   : > { %v1573_v46 = vpop.permute.xlu0 %1572 }
 0x806   : > { %v1593_v19 = vsel %vm1284_vm2, %v1573_v46, 0  ;;  %3207 = vmatprep.subr.msk.bf16.mxu0 %vm1284_vm2, %v1573_v46  ;;  %v1027_v46 = vld [vmem:[%s4355_s11 + $0x68] sm:$0xff] }
 0x807   : > { %3048 = vmatpush3.bf16.xpose.msra.mxu0 %v1593_v19  ;;  %v1029_v19 = vld [vmem:[%s4355_s11 + $0x78] sm:$0xff] }
 0x808   : > { %3208 = vmatprep.subr.msk.bf16.mxu0 %vm1284_vm2, %v1575_v16 }
 0x809   : > { %v1565_v32 = vpop.permute.xlu0 %1564 }
 0x80a   : > { %v1439_v4 = vpop.xlane.xlu1 %1438 }
 0x80b   : > { %3286 = vrcp.f32 %v1439_v4 }
 0x80c   : > { %v3281_v20 = vpop.eup %3280 }
 0x80d   : > { %v3283_v13 = vpop.eup %3282  ;;  %v1461_v22 = vmul.f32 %v3281_v20, %v3269_v50 }
 0x80e   : > { %v3285_v21 = vpop.eup %3284  ;;  %v1458_v58 = vmul.f32 %v3283_v13, %v3820_v54  ;;  %v1579_v27 = vpop.permute.xlu1 %1578 }
 0x80f   : > { %3050 = vmatpush3.bf16.xpose.msra.mxu0 %v1596_v9  ;;  %v1460_v28 = vmul.f32 %v3285_v21, %v3815_v35  ;;  %v1602_v5 = vsel %vm1284_vm2, %v1579_v27, 0  ;;  %v1569_v54 = vpop.permute.xlu0 %1568  ;;  %v1028_v21 = vld [vmem:[%s4355_s11 + $0x70] sm:$0xff] }
 0x810   : > { %3209 = vmatprep.subr.msk.bf16.mxu0 %vm1284_vm2, %v1577_v18 }
 0x811   : > { %v1465_v2 = vpack.c.bf16 %v1461_v22, %v1460_v28 }
 0x812   : > { %v1567_v36 = vpop.permute.xlu1 %1566 }
 0x815   : > { %v3287_v56 = vpop.eup %3286 }
 0x816   : > { %v1459_v24 = vmul.f32 %v3287_v56, %v3271_v53  ;;  %v1571_v35 = vpop.permute.xlu1 %1570 }
 0x817   : > { %3052 = vmatpush3.bf16.xpose.msra.mxu0 %v1599_v23 }
 0x818   : > { %3210 = vmatprep.subr.msk.bf16.mxu0 %vm1284_vm2, %v1579_v27  ;;  %v1464_v31 = vpack.c.bf16 %v1459_v24, %v1458_v58 }
 0x81a   : > { %3043 = vmatprep.mubr.msk.bf16.mxu0 %vm877_vm1, %v1464_v31 }
 0x81b   : > { %3044 = vmatmul.mubr.msk.bf16.gmra.mrb[20].mxu0 %vm877_vm1, %v1465_v2 }
 0x81c   : > { %3055 = vmatprep.mubr.msk.bf16.mxu0 %vm1284_vm2, %v1565_v32 }
 0x81f   : > { %3054 = vmatpush3.bf16.xpose.msra.mxu0 %v1602_v5 }
 0x826   : > { %3056 = vmatmul.mubr.msk.bf16.vlgmr.msra.gmra.mrb[24].mxu0 %vm1284_vm2, %v1567_v36 }
 0x827   : > { %3059 = vmatprep.mubr.msk.bf16.mxu0 %vm1284_vm2, %v1569_v54 }
 0x82e   : > { %3060 = vmatmul.mubr.msk.bf16.gmra.mrb[28].mxu0 %vm1284_vm2, %v1571_v35 }
 0x8b5   : > { %v3856_v39 = vpop.f32.mrb[16].mxu0 }
 0x8b6   : > { %v3858_v40 = vpop.f32.mrb[17].mxu0 }
 0x8b7   : > { %v3860_v63 = vpop.f32.mrb[18].mxu0 }
 0x8b8   : > { %v1556_v41 = vpack.c.bf16 %v3860_v63, %v3856_v39  ;;  %v3864_v42 = vpop.f32.mrb[19].mxu0 }
 0x8b9   : > { %v1555_v43 = vpack.c.bf16 %v3864_v42, %v3858_v40  ;;  %v2838_v40 = vld [vmem:[%s4357_s13] ss:$0 sm:$0xff] }
 0x8ee   : > { %v3868_v44 = vpop.f32.mrb[20].mxu0 }
 0x8ef   : > { %v3870_v49 = vpop.f32.mrb[21].mxu0 }
 0x8f0   : > { %v3872_v50 = vpop.f32.mrb[22].mxu0 }
 0x8f1   : > { %v1558_v51 = vpack.c.bf16 %v3872_v50, %v3868_v44  ;;  %v3876_v53 = vpop.f32.mrb[23].mxu0 }
 0x8f2   : > { %v1557_v61 = vpack.c.bf16 %v3876_v53, %v3870_v49 }
 0x8f9   : > { %v3057_v62 = vpop.f32.mrb[24].mxu0 }
 0x8fa   : > { %v1638_v1 = vpop.f32.mrb[25].mxu0  ;;  %v1647_v47 = vadd.f32 %v3057_v62, %v1024_v0 }
 0x8fb   : > { %v1639_v3 = vadd.f32 %v1638_v1, %v1022_v48  ;;  %v3058_v6 = vpop.f32.mrb[26].mxu0 }
 0x8fc   : > { %v1641_v7 = vpop.f32.mrb[27].mxu0  ;;  %v1650_v15 = vadd.f32 %v3058_v6, %v1025_v45  ;;  %v1675_v12 = vsel %vm877_vm1, %v1647_v47, -inf }
 0x8fd   : > { %v1642_v60 = vadd.f32 %v1641_v7, %v1023_v55  ;;  %v1669_v59 = vsel %vm877_vm1, %v1639_v3, -inf }
 0x8fe   : > { %1670 = vmax.xlane.f32.xlu0 %v1669_v59  ;;  %v1678_v13 = vsel %vm877_vm1, %v1650_v15, -inf }
 0x8ff   : > { %v1672_v8 = vsel %vm877_vm1, %v1642_v60, -inf }
 0x900   : > { %1673 = vmax.xlane.f32.xlu1 %v1672_v8 }
 0x901   : > { %v3061_v11 = vpop.f32.mrb[28].mxu0 }
 0x902   : > { %1676 = vmax.xlane.f32.xlu0 %v1675_v12  ;;  %v1654_v16 = vpop.f32.mrb[29].mxu0  ;;  %v1663_v23 = vadd.f32 %v3061_v11, %v1028_v21 }
 0x903   : > { %v3062_v18 = vpop.f32.mrb[30].mxu0  ;;  %v1655_v9 = vadd.f32 %v1654_v16, %v1026_v17 }
 0x904   : > { %v1657_v4 = vpop.f32.mrb[31].mxu0  ;;  %v1666_v56 = vadd.f32 %v3062_v18, %v1029_v19  ;;  %v1687_v27 = vsel %vm877_vm1, %v1663_v23, -inf }
 0x905   : > { %v3904_v20 = vadd.f32 %v1657_v4, %v1027_v46  ;;  %v1681_v58 = vsel %vm877_vm1, %v1655_v9, -inf }
 0x906   : > { %1679 = vmax.xlane.f32.xlu0 %v1678_v13  ;;  %v1690_v24 = vsel %vm877_vm1, %v1666_v56, -inf }
 0x907   : > { %v1684_v22 = vsel %vm877_vm1, %v3904_v20, -inf }
 0x908   : > { %1685 = vmax.xlane.f32.xlu1 %v1684_v22 }
 0x90a   : > { %1682 = vmax.xlane.f32.xlu0 %v1681_v58 }
 0x90c   : > { %1691 = vmax.xlane.f32.xlu1 %v1690_v24 }
 0x90e   : > { %1688 = vmax.xlane.f32.xlu0 %v1687_v27 }
 0x98b   : > { %v1671_v28 = vpop.xlane.xlu0 %1670 }
 0x98c   : > { %v1693_v31 = vsub.f32 %v1639_v3, %v1671_v28 }
 0x98d   : > { %v1674_v2 = vpop.xlane.xlu1 %1673 }
 0x98e   : > { %v1701_v36 = vmul.f32 1.442695, %v1693_v31  ;;  %v1694_v54 = vsub.f32 %v1642_v60, %v1674_v2 }
 0x98f   : > { %v1677_v32 = vpop.xlane.xlu0 %1676 }
 0x990   : > { %v1695_v5 = vsub.f32 %v1647_v47, %v1677_v32  ;;  %v1703_v0 = vmul.f32 1.442695, %v1694_v54 }
 0x992   : > { %v1705_v35 = vmul.f32 1.442695, %v1695_v5 }
 0x993   : > { %v1680_v48 = vpop.xlane.xlu0 %1679 }
 0x994   : > { %3288 = vpow2.f32 %v1705_v35  ;;  %v1696_v62 = vsub.f32 %v1650_v15, %v1680_v48 }
 0x995   : > { %3290 = vpow2.f32 %v1701_v36 }
 0x996   : > { %v1707_v1 = vmul.f32 1.442695, %v1696_v62 }
 0x997   : > { %v1683_v55 = vpop.xlane.xlu0 %1682 }
 0x998   : > { %3292 = vpow2.f32 %v1707_v1  ;;  %v1697_v6 = vsub.f32 %v1655_v9, %v1683_v55  ;;  %v1686_v9 = vpop.xlane.xlu1 %1685 }
 0x999   : > { %3294 = vpow2.f32 %v1703_v0  ;;  %v1698_v22 = vsub.f32 %v3904_v20, %v1686_v9 }
 0x99a   : > { %v1709_v3 = vmul.f32 1.442695, %v1697_v6  ;;  %v1032_v6 = vld [vmem:[%s4356_s12 + $0x10] sm:$0xff] }
 0x99b   : > { %v1689_v7 = vpop.xlane.xlu0 %1688  ;;  %v1711_v58 = vmul.f32 1.442695, %v1698_v22 }
 0x99c   : > { %v1699_v59 = vsub.f32 %v1663_v23, %v1689_v7  ;;  %v1692_v13 = vpop.xlane.xlu1 %1691  ;;  %v1033_v7 = vld [vmem:[%s4356_s12 + $0x18] sm:$0xff] }
 0x99d   : > { %v1700_v21 = vsub.f32 %v1666_v56, %v1692_v13 }
 0x99e   : > { %v3915_v45 = vpop.eup %3288  ;;  %v1713_v8 = vmul.f32 1.442695, %v1699_v59 }
 0x99f   : > { %v1723_v47 = vsel %vm877_vm1, %v3915_v45, 0.0  ;;  %v3291_v60 = vpop.eup %3290  ;;  %v1715_v23 = vmul.f32 1.442695, %v1700_v21 }
 0x9a0   : > { %3296 = vpow2.f32 %v1713_v8  ;;  %1724 = vadd.xlane.f32.xlu0 %v1723_v47  ;;  %v1717_v11 = vsel %vm877_vm1, %v3291_v60, 0.0  ;;  %v1854_v8 = vpack.c.bf16 %v1033_v7, %v1032_v6 }
 0x9a1   : > { %3298 = vpow2.f32 %v1709_v3 }
 0x9a2   : > { %v3919_v15 = vpop.eup %3292  ;;  %3300 = vpow2.f32 %v1715_v23  ;;  %v1031_v23 = vld [vmem:[%s4356_s12 + $0x8] sm:$0xff] }
 0x9a3   : > { %v1726_v12 = vsel %vm877_vm1, %v3919_v15, 0.0  ;;  %v3295_v16 = vpop.eup %3294  ;;  %3302 = vpow2.f32 %v1711_v58 }
 0x9a4   : > { %1718 = vadd.xlane.f32.xlu0 %v1717_v11  ;;  %1727 = vadd.xlane.f32.xlu1 %v1726_v12  ;;  %v1720_v17 = vsel %vm877_vm1, %v3295_v16, 0.0 }
 0x9a8   : > { %1721 = vadd.xlane.f32.xlu1 %v1720_v17 }
 0x9aa   : > { %v3925_v46 = vpop.eup %3296 }
 0x9ab   : > { %v1735_v18 = vsel %vm877_vm1, %v3925_v46, 0.0  ;;  %v3929_v19 = vpop.eup %3298 }
 0x9ac   : > { %1736 = vadd.xlane.f32.xlu0 %v1735_v18  ;;  %v1729_v4 = vsel %vm877_vm1, %v3929_v19, 0.0  ;;  %v3301_v24 = vpop.eup %3300 }
 0x9ad   : > { %v1738_v27 = vsel %vm877_vm1, %v3301_v24, 0.0  ;;  %v3303_v28 = vpop.eup %3302 }
 0x9b0   : > { %1730 = vadd.xlane.f32.xlu0 %v1729_v4 }
 0x9b9   : > { %1763 = vrot.lane.b32.xlu1 %v3728_v52, %s3380_s21  ;;  %v1732_v52 = vsel %vm877_vm1, %v3303_v28, 0.0 }
 0x9bd   : > { %1765 = vrot.lane.b32.xlu1 %v3742_v14, %s3380_s21 }
 0x9c6   : > { %1761 = vrot.lane.b32.xlu0 %v3730_v57, %s3380_s21 }
 0x9e1   : > { %1739 = vadd.xlane.f32.xlu1 %v1738_v27 }
 0x9e5   : > { %1733 = vadd.xlane.f32.xlu1 %v1732_v52 }
 0x9f6   : > { %1767 = vrot.lane.b32.xlu1 %v3740_v10, %s3380_s21  ;;  %s629_s21 = scalar_lea.vmem %s4364_s20, %s2857_s29 }
 0xa2d   : > { %v1725_v14 = vpop.xlane.xlu0 %1724 }
 0xa31   : > { %v1728_v57 = vpop.xlane.xlu1 %1727  ;;  %v1719_v31 = vpop.xlane.xlu0 %1718 }
 0xa32   : > { %3304 = vrcp.f32 %v1719_v31 }
 0xa35   : > { %v1722_v56 = vpop.xlane.xlu1 %1721 }
 0xa36   : > { %3306 = vrcp.f32 %v1722_v56 }
 0xa37   : > { %3308 = vrcp.f32 %v1728_v57 }
 0xa38   : > { %3310 = vrcp.f32 %v1725_v14 }
 0xa39   : > { %v1737_v20 = vpop.xlane.xlu0 %1736  ;;  %v1764_v36 = vpop.permute.xlu1 %1763 }
 0xa3c   : > { %v3305_v32 = vpop.eup %3304 }
 0xa3d   : > { %v1731_v2 = vpop.xlane.xlu0 %1730  ;;  %v1749_v35 = vmul.f32 %v3305_v32, %v3291_v60  ;;  %v1766_v10 = vpop.permute.xlu1 %1765 }
 0xa40   : > { %v3307_v5 = vpop.eup %3306 }
 0xa41   : > { %v1762_v54 = vpop.permute.xlu0 %1761  ;;  %v1750_v48 = vmul.f32 %v3307_v5, %v3295_v16  ;;  %v3309_v1 = vpop.eup %3308 }
 0xa42   : > { %3063 = vmatprep.subr.bf16.mxu1 %v1762_v54  ;;  %v3311_v59 = vpop.eup %3310  ;;  %v1752_v3 = vmul.f32 %v3309_v1, %v3919_v15 }
 0xa43   : > { %3064 = vmatpush3.bf16.msra.mxu1 %v1762_v54  ;;  %v1757_v62 = vpack.c.bf16 %v1750_v48, %v1749_v35  ;;  %v1751_v60 = vmul.f32 %v3311_v59, %v3915_v45  ;;  %v1030_v45 = vld [vmem:[%s4356_s12] sm:$0xff] }
 0xa44   : > { %3065 = vmatprep.subr.bf16.mxu1 %v1764_v36  ;;  %v1559_v58 = vpack.c.bf16 %v1031_v23, %v1030_v45 }
 0xa45   : > { %3071 = vmatprep.mubr.msk.bf16.mxu1 %vm877_vm1, %v1757_v62  ;;  %v1758_v11 = vpack.c.bf16 %v1752_v3, %v1751_v60 }
 0xa47   : > { %3066 = vmatpush3.bf16.msra.mxu1 %v1764_v36 }
 0xa48   : > { %3067 = vmatprep.subr.bf16.mxu1 %v1766_v10 }
 0xa4b   : > { %3068 = vmatpush3.bf16.msra.mxu1 %v1766_v10 }
 0xa6e   : > { %v1740_v0 = vpop.xlane.xlu1 %1739 }
 0xa6f   : > { %3312 = vrcp.f32 %v1740_v0 }
 0xa70   : > { %3314 = vrcp.f32 %v1731_v2 }
 0xa71   : > { %3316 = vrcp.f32 %v1737_v20 }
 0xa72   : > { %v1734_v55 = vpop.xlane.xlu1 %1733 }
 0xa73   : > { %3318 = vrcp.f32 %v1734_v55 }
 0xa76   : > { %v1768_v47 = vpop.permute.xlu1 %1767 }
 0xa77   : > { %3069 = vmatprep.subr.bf16.mxu1 %v1768_v47 }
 0xa78   : > { %3070 = vmatpush3.bf16.msra.mxu1 %v1768_v47 }
 0xa79   : > { %3079 = vmatprep.subr.bf16.mxu1 %v1854_v8  ;;  %v3313_v12 = vpop.eup %3312 }
 0xa7a   : > { %v3315_v16 = vpop.eup %3314  ;;  %v1756_v4 = vmul.f32 %v3313_v12, %v3301_v24 }
 0xa7b   : > { %3072 = vmatmul.mubr.msk.bf16.vlgmr.msra.gmra.mrb[16].mxu1 %vm877_vm1, %v1758_v11  ;;  %v3317_v17 = vpop.eup %3316  ;;  %v1753_v9 = vmul.f32 %v3315_v16, %v3929_v19 }
 0xa7c   : > { %3080 = vmatpush3.bf16.msra.mxu1 %v1854_v8  ;;  %v1755_v15 = vmul.f32 %v3317_v17, %v3925_v46 }
 0xa7d   : > { %v3319_v18 = vpop.eup %3318  ;;  %3089 = vmatprep.subr.bf16.mxu1 %v1559_v58 }
 0xa7e   : > { %v1754_v13 = vmul.f32 %v3319_v18, %v3303_v28  ;;  %v1760_v22 = vpack.c.bf16 %v1756_v4, %v1755_v15 }
 0xa80   : > { %v1759_v21 = vpack.c.bf16 %v1754_v13, %v1753_v9 }
 0xa82   : > { %3075 = vmatprep.mubr.msk.bf16.mxu1 %vm877_vm1, %v1759_v21 }
 0xa83   : > { %3076 = vmatmul.mubr.msk.bf16.gmra.mrb[20].mxu1 %vm877_vm1, %v1760_v22 }
 0xb4e   : > { %v3073_v19 = vpop.f32.mrb[16].mxu1 }
 0xb4f   : > { %v1819_v24 = vpop.f32.mrb[17].mxu1 }
 0xb50   : > { %v3074_v27 = vpop.f32.mrb[18].mxu1 }
 0xb51   : > { %v1851_v46 = vpack.c.bf16 %v3074_v27, %v3073_v19  ;;  %v1822_v28 = vpop.f32.mrb[19].mxu1 }
 0xb52   : > { %v1850_v52 = vpack.c.bf16 %v1822_v28, %v1819_v24 }
 0xb54   : > { %3081 = vmatprep.mubr.msk.bf16.mxu1 %vm1284_vm2, %v1850_v52 }
 0xb55   : > { %3082 = vmatmul.mubr.msk.bf16.vlgmr.msra.gmra.mrb[24].mxu1 %vm1284_vm2, %v1851_v46 }
 0xb56   : > { %v3077_v14 = vpop.f32.mrb[20].mxu1  ;;  %3090 = vmatpush3.bf16.msra.mxu1 %v1559_v58 }
 0xb57   : > { %v1835_v57 = vpop.f32.mrb[21].mxu1 }
 0xb58   : > { %v3078_v31 = vpop.f32.mrb[22].mxu1 }
 0xb59   : > { %v1853_v56 = vpack.c.bf16 %v3078_v31, %v3077_v14  ;;  %v1838_v20 = vpop.f32.mrb[23].mxu1 }
 0xb5a   : > { %v1852_v2 = vpack.c.bf16 %v1838_v20, %v1835_v57 }
 0xb5c   : > { %3085 = vmatprep.mubr.msk.bf16.mxu1 %vm1284_vm2, %v1852_v2 }
 0xb5d   : > { %3086 = vmatmul.mubr.msk.bf16.gmra.mrb[28].mxu1 %vm1284_vm2, %v1853_v56 }
 0xb5e   : > { %3091 = vmatprep.mubr.msk.bf16.mxu1 %vm1284_vm2, %v1555_v43 }
 0xb65   : > { %3092 = vmatmul.mubr.msk.bf16.vlgmr.msra.gmra.mrb[24].mxu1 %vm1284_vm2, %v1556_v41 }
 0xb66   : > { %3095 = vmatprep.mubr.msk.bf16.mxu1 %vm1284_vm2, %v1557_v61 }
 0xb6d   : > { %3096 = vmatmul.mubr.msk.bf16.gmra.mrb[28].mxu1 %vm1284_vm2, %v1558_v51 }
 0xc38   : > { %v3093_v32 = vpop.f32.mrb[24].mxu1 }
 0xc39   : > { %v2011_v42 = vadd.f32 %v3093_v32, %v3625_v30  ;;  %v1978_v39 = vpop.f32.mrb[25].mxu1 }
 0xc3a   : > { %v2009_v63 = vadd.f32 %v1978_v39, %v3617_v26  ;;  %v3094_v41 = vpop.f32.mrb[26].mxu1 }
 0xc3b   : > { %v2012_v43 = vadd.f32 %v3094_v41, %v3623_v29  ;;  %v1981_v49 = vpop.f32.mrb[27].mxu1  ;;  %v3989_v50 = vadd.f32 %v2838_v40, %v2011_v42 }
 0xc3c   : > { %v3986_v53 = vadd.f32 %v2838_v40, %v2009_v63  ;;  %v2010_v44 = vadd.f32 %v3615_v25, %v1981_v49 }
 0xc3d   : > { %v3998_v36 = vadd.f32 %v2838_v40, %v2012_v43  ;;  %v2061_v35 = vsel %vm656_vm0, %v3989_v50, 0.0 }
 0xc3e   : > { %v3991_v51 = vadd.f32 %v2838_v40, %v2010_v44  ;;  %v2055_v61 = vsel %vm656_vm0, %v3986_v53, 0.0 }
 0xc3f   : > { %2056 = vadd.xlane.f32.xlu0 %v2055_v61  ;;  %v2033_v61 = vld [vmem:[%s4360_s16] sm:$0xff] }
 0xc40   : > { %v3097_v30 = vpop.f32.mrb[28].mxu1  ;;  %v2058_v26 = vsel %vm656_vm0, %v3991_v51, 0.0 }
 0xc41   : > { %v2015_v5 = vadd.f32 %v3097_v30, %v3641_v38  ;;  %2059 = vadd.xlane.f32.xlu1 %v2058_v26  ;;  %v1994_v29 = vpop.f32.mrb[29].mxu1  ;;  %v2064_v38 = vsel %vm656_vm0, %v3998_v36, 0.0  ;;  %v2034_v30 = vld [vmem:[%s4360_s16 + $0x8] sm:$0xff] }
 0xc42   : > { %v2013_v25 = vadd.f32 %v1994_v29, %v3633_v34  ;;  %v3098_v54 = vpop.f32.mrb[30].mxu1  ;;  %v2191_v26 = vpack.c.bf16 %v2034_v30, %v2033_v61  ;;  %v2036_v29 = vld [vmem:[%s4360_s16 + $0x18] sm:$0xff] }
 0xc43   : > { %v2016_v48 = vadd.f32 %v3098_v54, %v3639_v37  ;;  %2062 = vadd.xlane.f32.xlu0 %v2061_v35  ;;  %v1997_v62 = vpop.f32.mrb[31].mxu1  ;;  %v4015_v6 = vadd.f32 %v2838_v40, %v2015_v5  ;;  %v2035_v5 = vld [vmem:[%s4360_s16 + $0x10] sm:$0xff] }
 0xc44   : > { %v2014_v10 = vadd.f32 %v3631_v33, %v1997_v62  ;;  %v4005_v0 = vadd.f32 %v2838_v40, %v2013_v25  ;;  %3099 = vmatprep.subr.bf16.mxu0 %v2191_v26  ;;  %v2192_v25 = vpack.c.bf16 %v2036_v29, %v2035_v5 }
 0xc45   : > { %v4011_v55 = vadd.f32 %v2838_v40, %v2016_v48  ;;  %v2073_v7 = vsel %vm656_vm0, %v4015_v6, 0.0  ;;  %3100 = vmatpush3.bf16.msra.mxu0 %v2191_v26 }
 0xc46   : > { %v4007_v1 = vadd.f32 %v2838_v40, %v2014_v10  ;;  %v2067_v37 = vsel %vm656_vm0, %v4005_v0, 0.0  ;;  %3101 = vmatprep.subr.bf16.mxu0 %v2192_v25 }
 0xc47   : > { %2065 = vadd.xlane.f32.xlu0 %v2064_v38  ;;  %v2076_v33 = vsel %vm656_vm0, %v4011_v55, 0.0 }
 0xc48   : > { %v2070_v34 = vsel %vm656_vm0, %v4007_v1, 0.0 }
 0xc49   : > { %2071 = vadd.xlane.f32.xlu1 %v2070_v34  ;;  %3102 = vmatpush3.bf16.msra.mxu0 %v2192_v25 }
 0xc4b   : > { %2068 = vadd.xlane.f32.xlu0 %v2067_v37 }
 0xc4d   : > { %2077 = vadd.xlane.f32.xlu1 %v2076_v33 }
 0xc4f   : > { %2074 = vadd.xlane.f32.xlu0 %v2073_v7 }
 0xccc   : > { %v2057_v59 = vpop.xlane.xlu0 %2056 }
 0xccd   : > { %v2079_v3 = vmul.f32 0.03125, %v2057_v59 }
 0xcce   : > { %v2060_v8 = vpop.xlane.xlu1 %2059 }
 0xccf   : > { %v4024_v47 = vsub.f32 %v3986_v53, %v2079_v3  ;;  %v2080_v60 = vmul.f32 0.03125, %v2060_v8 }
 0xcd0   : > { %v2063_v11 = vpop.xlane.xlu0 %2062 }
 0xcd1   : > { %v4027_v12 = vsub.f32 %v3991_v51, %v2080_v60  ;;  %v2081_v16 = vmul.f32 0.03125, %v2063_v11  ;;  %v2095_v17 = vmul.f32 %v4024_v47, %v4024_v47 }
 0xcd3   : > { %v4032_v18 = vsub.f32 %v3989_v50, %v2081_v16  ;;  %v2103_v4 = vsel %vm656_vm0, %v2095_v17, 0.0  ;;  %v2096_v9 = vmul.f32 %v4027_v12, %v4027_v12 }
 0xcd4   : > { %v2066_v13 = vpop.xlane.xlu0 %2065  ;;  %2104 = vadd.xlane.f32.xlu0 %v2103_v4  ;;  %v2839_v4 = vld [vmem:[%s4358_s14] ss:$0 sm:$0xff] }
 0xcd5   : > { %v2082_v15 = vmul.f32 0.03125, %v2066_v13  ;;  %v2106_v21 = vsel %vm656_vm0, %v2096_v9, 0.0  ;;  %v2097_v22 = vmul.f32 %v4032_v18, %v4032_v18 }
 0xcd6   : > { %2107 = vadd.xlane.f32.xlu1 %v2106_v21  ;;  %v2072_v45 = vpop.xlane.xlu1 %2071 }
 0xcd7   : > { %v4041_v23 = vsub.f32 %v3998_v36, %v2082_v15  ;;  %v2084_v58 = vmul.f32 0.03125, %v2072_v45  ;;  %v2109_v19 = vsel %vm656_vm0, %v2097_v22, 0.0 }
 0xcd8   : > { %2110 = vadd.xlane.f32.xlu0 %v2109_v19  ;;  %v2069_v24 = vpop.xlane.xlu0 %2068 }
 0xcd9   : > { %v4045_v27 = vsub.f32 %v4007_v1, %v2084_v58  ;;  %v2083_v46 = vmul.f32 0.03125, %v2069_v24  ;;  %v2098_v28 = vmul.f32 %v4041_v23, %v4041_v23 }
 0xcda   : > { %v2078_v52 = vpop.xlane.xlu1 %2077 }
 0xcdb   : > { %v4050_v14 = vsub.f32 %v4005_v0, %v2083_v46  ;;  %v2086_v57 = vmul.f32 0.03125, %v2078_v52  ;;  %v2112_v31 = vsel %vm656_vm0, %v2098_v28, 0.0  ;;  %v2100_v56 = vmul.f32 %v4045_v27, %v4045_v27  ;;  %v2840_v52 = vld [vmem:[%s4359_s15] ss:$0 sm:$0xff] }
 0xcdc   : > { %v2075_v20 = vpop.xlane.xlu0 %2074  ;;  %2113 = vadd.xlane.f32.xlu1 %v2112_v31 }
 0xcdd   : > { %v4056_v2 = vsub.f32 %v4011_v55, %v2086_v57  ;;  %v2085_v32 = vmul.f32 0.03125, %v2075_v20  ;;  %v2099_v40 = vmul.f32 %v4050_v14, %v4050_v14  ;;  %v2118_v63 = vsel %vm656_vm0, %v2100_v56, 0.0 }
 0xcdf   : > { %v4061_v42 = vsub.f32 %v4015_v6, %v2085_v32  ;;  %v2115_v39 = vsel %vm656_vm0, %v2099_v40, 0.0  ;;  %v2102_v41 = vmul.f32 %v4056_v2, %v4056_v2 }
 0xce0   : > { %2116 = vadd.xlane.f32.xlu0 %v2115_v39  ;;  %2119 = vadd.xlane.f32.xlu1 %v2118_v63 }
 0xce1   : > { %v2101_v43 = vmul.f32 %v4061_v42, %v4061_v42  ;;  %v2124_v44 = vsel %vm656_vm0, %v2102_v41, 0.0 }
 0xce3   : > { %v2121_v49 = vsel %vm656_vm0, %v2101_v43, 0.0 }
 0xce4   : > { %2122 = vadd.xlane.f32.xlu0 %v2121_v49  ;;  %2125 = vadd.xlane.f32.xlu1 %v2124_v44 }
 0xd61   : > { %v2105_v54 = vpop.xlane.xlu0 %2104 }
 0xd62   : > { %v2127_v35 = vmul.f32 0.03125, %v2105_v54 }
 0xd63   : > { %v2108_v48 = vpop.xlane.xlu1 %2107 }
 0xd64   : > { %v2135_v62 = vadd.f32 1e-05, %v2127_v35  ;;  %v2128_v10 = vmul.f32 0.03125, %v2108_v48 }
 0xd65   : > { %v2111_v38 = vpop.xlane.xlu0 %2110 }
 0xd66   : > { %3320 = vrsqrt.f32 %v2135_v62  ;;  %v2136_v34 = vadd.f32 1e-05, %v2128_v10  ;;  %v2129_v37 = vmul.f32 0.03125, %v2111_v38 }
 0xd68   : > { %3322 = vrsqrt.f32 %v2136_v34  ;;  %v2137_v33 = vadd.f32 1e-05, %v2129_v37 }
 0xd69   : > { %v2114_v7 = vpop.xlane.xlu1 %2113 }
 0xd6a   : > { %3324 = vrsqrt.f32 %v2137_v33  ;;  %v2130_v59 = vmul.f32 0.03125, %v2114_v7  ;;  %v2039_v33 = vld [vmem:[%s4362_s18 + $0x8] sm:$0xff]  ;;  %v2040_v7 = vld [vmem:[%s4362_s18 + $0x10] sm:$0xff] }
 0xd6c   : > { %v2138_v3 = vadd.f32 1e-05, %v2130_v59  ;;  %v2041_v59 = vld [vmem:[%s4362_s18 + $0x18] sm:$0xff] }
 0xd6d   : > { %v2117_v8 = vpop.xlane.xlu0 %2116  ;;  %v2120_v60 = vpop.xlane.xlu1 %2119 }
 0xd6e   : > { %3326 = vrsqrt.f32 %v2138_v3  ;;  %v2131_v11 = vmul.f32 0.03125, %v2117_v8  ;;  %v2132_v16 = vmul.f32 0.03125, %v2120_v60  ;;  %v2489_v3 = vpack.c.bf16 %v2041_v59, %v2040_v7  ;;  %v2042_v8 = vld [vmem:[%s4362_s18 + $0x20] sm:$0xff]  ;;  %v2043_v60 = vld [vmem:[%s4362_s18 + $0x28] sm:$0xff] }
 0xd70   : > { %v3321_v17 = vpop.eup %3320  ;;  %v2139_v9 = vadd.f32 1e-05, %v2131_v11  ;;  %v2140_v13 = vadd.f32 1e-05, %v2132_v16  ;;  %v2490_v11 = vpack.c.bf16 %v2043_v60, %v2042_v8  ;;  %v2044_v16 = vld [vmem:[%s4362_s18 + $0x30] sm:$0xff] }
 0xd71   : > { %v2151_v15 = vmul.f32 %v3321_v17, %v4024_v47  ;;  %v2123_v21 = vpop.xlane.xlu0 %2122  ;;  %v2126_v22 = vpop.xlane.xlu1 %2125  ;;  %v2045_v17 = vld [vmem:[%s4362_s18 + $0x38] sm:$0xff] }
 0xd72   : > { %v3323_v45 = vpop.eup %3322  ;;  %3328 = vrsqrt.f32 %v2139_v9  ;;  %v2133_v58 = vmul.f32 0.03125, %v2123_v21  ;;  %v2134_v19 = vmul.f32 0.03125, %v2126_v22  ;;  %v2046_v9 = vld [vmem:[%s4362_s18 + $0x40] sm:$0xff]  ;;  %v2048_v21 = vld [vmem:[%s4362_s18 + $0x50] sm:$0xff]  ;;  %v2049_v22 = vld [vmem:[%s4362_s18 + $0x58] sm:$0xff] }
 0xd73   : > { %v2152_v24 = vmul.f32 %v3323_v45, %v4027_v12  ;;  %3330 = vrsqrt.f32 %v2140_v13  ;;  %v2165_v46 = vmul.f32 %v2839_v4, %v2151_v15  ;;  %v2047_v13 = vld [vmem:[%s4362_s18 + $0x48] sm:$0xff]  ;;  %v2493_v45 = vpack.c.bf16 %v2049_v22, %v2048_v21 }
 0xd74   : > { %v3325_v28 = vpop.eup %3324  ;;  %v2141_v57 = vadd.f32 1e-05, %v2133_v58  ;;  %v2142_v31 = vadd.f32 1e-05, %v2134_v19  ;;  %v2492_v15 = vpack.c.bf16 %v2047_v13, %v2046_v9  ;;  %v2050_v58 = vld [vmem:[%s4362_s18 + $0x60] sm:$0xff]  ;;  %v2051_v19 = vld [vmem:[%s4362_s18 + $0x68] sm:$0xff] }
 0xd75   : > { %v2153_v56 = vmul.f32 %v3325_v28, %v4032_v18  ;;  %v2166_v47 = vmul.f32 %v2839_v4, %v2152_v24  ;;  %v2179_v20 = vadd.f32 %v2840_v52, %v2165_v46  ;;  %v2494_v24 = vpack.c.bf16 %v2051_v19, %v2050_v58  ;;  %v2052_v46 = vld [vmem:[%s4362_s18 + $0x70] sm:$0xff]  ;;  %v2053_v28 = vld [vmem:[%s4362_s18 + $0x78] sm:$0xff] }
 0xd76   : > { %3332 = vrsqrt.f32 %v2141_v57  ;;  %v2841_v57 = vld [vmem:[%s4361_s17] ss:$0 sm:$0xff] }
 0xd77   : > { %3334 = vrsqrt.f32 %v2142_v31  ;;  %v2180_v32 = vadd.f32 %v2840_v52, %v2166_v47  ;;  %v2167_v39 = vmul.f32 %v2839_v4, %v2153_v56 }
 0xd78   : > { %v3327_v40 = vpop.eup %3326 }
 0xd79   : > { %v2154_v12 = vmul.f32 %v3327_v40, %v4041_v23  ;;  %v2187_v63 = vpack.c.bf16 %v2180_v32, %v2179_v20  ;;  %v2181_v44 = vadd.f32 %v2840_v52, %v2167_v39 }
 0xd7b   : > { %v2168_v41 = vmul.f32 %v2839_v4, %v2154_v12  ;;  %3103 = vmatprep.mubr.msk.bf16.mxu0 %vm656_vm0, %v2187_v63 }
 0xd7c   : > { %v3329_v43 = vpop.eup %3328 }
 0xd7d   : > { %v3331_v49 = vpop.eup %3330  ;;  %v2182_v61 = vadd.f32 %v2840_v52, %v2168_v41  ;;  %v2155_v30 = vmul.f32 %v3329_v43, %v4050_v14 }
 0xd7e   : > { %v2156_v18 = vmul.f32 %v3331_v49, %v4045_v27 }
 0xd7f   : > { %v2188_v26 = vpack.c.bf16 %v2182_v61, %v2181_v44  ;;  %v2169_v5 = vmul.f32 %v2839_v4, %v2155_v30 }
 0xd80   : > { %v3333_v29 = vpop.eup %3332  ;;  %v2170_v25 = vmul.f32 %v2839_v4, %v2156_v18 }
 0xd81   : > { %v3335_v54 = vpop.eup %3334  ;;  %v2157_v35 = vmul.f32 %v3333_v29, %v4061_v42  ;;  %3104 = vmatmul.mubr.msk.bf16.vlgmr.msra.gmra.mrb[32].mxu0 %vm656_vm0, %v2188_v26  ;;  %v2183_v23 = vadd.f32 %v2840_v52, %v2169_v5  ;;  %v2038_v42 = vld [vmem:[%s4362_s18] sm:$0xff] }
 0xd82   : > { %v2158_v48 = vmul.f32 %v3335_v54, %v4056_v2  ;;  %v2184_v62 = vadd.f32 %v2840_v52, %v2170_v25  ;;  %v2488_v2 = vpack.c.bf16 %v2039_v33, %v2038_v42 }
 0xd83   : > { %v2171_v10 = vmul.f32 %v2839_v4, %v2157_v35 }
 0xd84   : > { %v2189_v38 = vpack.c.bf16 %v2184_v62, %v2183_v23  ;;  %v2172_v34 = vmul.f32 %v2839_v4, %v2158_v48  ;;  %3111 = vmatprep.subr.bf16.mxu0 %v2488_v2  ;;  %v2491_v4 = vpack.c.bf16 %v2045_v17, %v2044_v16 }
 0xd85   : > { %v2185_v37 = vadd.f32 %v2840_v52, %v2171_v10  ;;  %3112 = vmatpush3.bf16.msra.mxu0 %v2488_v2 }
 0xd86   : > { %3107 = vmatprep.mubr.msk.bf16.mxu0 %vm656_vm0, %v2189_v38  ;;  %v2186_v27 = vadd.f32 %v2840_v52, %v2172_v34  ;;  %3113 = vmatprep.subr.bf16.mxu0 %v2489_v3  ;;  %v2495_v52 = vpack.c.bf16 %v2053_v28, %v2052_v46 }
 0xd88   : > { %v2190_v14 = vpack.c.bf16 %v2186_v27, %v2185_v37 }
 0xd89   : > { %3114 = vmatpush3.bf16.msra.mxu0 %v2489_v3 }
 0xd8a   : > { %3108 = vmatmul.mubr.msk.bf16.gmra.mrb[36].mxu0 %vm656_vm0, %v2190_v14  ;;  %3115 = vmatprep.subr.bf16.mxu0 %v2490_v11 }
 0xd8d   : > { %3116 = vmatpush3.bf16.msra.mxu0 %v2490_v11 }
 0xd8e   : > { %3117 = vmatprep.subr.bf16.mxu0 %v2491_v4 }
 0xd91   : > { %3118 = vmatpush3.bf16.msra.mxu0 %v2491_v4 }
 0xd92   : > { %3119 = vmatprep.subr.bf16.mxu0 %v2492_v15 }
 0xd95   : > { %3120 = vmatpush3.bf16.msra.mxu0 %v2492_v15 }
 0xd96   : > { %3121 = vmatprep.subr.bf16.mxu0 %v2493_v45 }
 0xd99   : > { %3122 = vmatpush3.bf16.msra.mxu0 %v2493_v45 }
 0xd9a   : > { %3123 = vmatprep.subr.bf16.mxu0 %v2494_v24 }
 0xd9d   : > { %3124 = vmatpush3.bf16.msra.mxu0 %v2494_v24 }
 0xd9e   : > { %3125 = vmatprep.subr.bf16.mxu0 %v2495_v52 }
 0xda1   : > { %3126 = vmatpush3.bf16.msra.mxu0 %v2495_v52 }
 0xe54   : > { %v3105_v31 = vpop.f32.mrb[32].mxu0 }
 0xe55   : > { %v2254_v56 = vadd.f32 %v3105_v31, %v2841_v57  ;;  %v2245_v47 = vpop.f32.mrb[33].mxu0 }
 0xe56   : > { %v4152_v20 = vadd.f32 %v2841_v57, %v2245_v47  ;;  %v3106_v32 = vpop.f32.mrb[34].mxu0 }
 0xe57   : > { %v4154_v40 = vmul.f32 0.70710677, %v2254_v56  ;;  %v4156_v39 = vadd.f32 %v3106_v32, %v2841_v57  ;;  %v2248_v12 = vpop.f32.mrb[35].mxu0  ;;  %v4196_v13 = vmul.f32 0.5, %v2254_v56 }
 0xe58   : > { %v4159_v63 = vmul.f32 0.70710677, %v4152_v20  ;;  %v4161_v41 = vadd.f32 %v2841_v57, %v2248_v12 }
 0xe59   : > { %v2294_v43 = vand.u32 2147483647, %v4154_v40  ;;  %v4165_v49 = vmul.f32 0.70710677, %v4156_v39  ;;  %vm2446_vm3 = vcmp.lt.f32.partialorder %v4154_v40, 0.0 }
 0xe5a   : > { %v2292_v44 = vand.u32 2147483647, %v4159_v63  ;;  %v4169_v61 = vmul.f32 0.70710677, %v4161_v41  ;;  %vm2444_vm4 = vcmp.lt.f32.partialorder %v4159_v63, 0.0 }
 0xe5b   : > { %v2302_v30 = vmul.f32 0.3275911, %v2294_v43  ;;  %v2295_v18 = vand.u32 2147483647, %v4165_v49  ;;  %v2398_v2 = vsub.f32 0.0, %v2294_v43  ;;  %vm2447_vm5 = vcmp.lt.f32.partialorder %v4165_v49, 0.0 }
 0xe5c   : > { %v2300_v26 = vmul.f32 0.3275911, %v2292_v44  ;;  %v2293_v5 = vand.u32 2147483647, %v4169_v61  ;;  %v2396_v3 = vsub.f32 0.0, %v2292_v44  ;;  %vm2445_vm6 = vcmp.lt.f32.partialorder %v4169_v61, 0.0 }
 0xe5d   : > { %v2310_v29 = vadd.f32 1.0, %v2302_v30  ;;  %v2303_v25 = vmul.f32 0.3275911, %v2295_v18  ;;  %v3109_v54 = vpop.f32.mrb[36].mxu0  ;;  %v2399_v60 = vsub.f32 0.0, %v2295_v18  ;;  %v2406_v15 = vmul.f32 %v2398_v2, %v2294_v43 }
 0xe5e   : > { %v2308_v35 = vadd.f32 1.0, %v2300_v26  ;;  %v2301_v23 = vmul.f32 0.3275911, %v2293_v5  ;;  %v2261_v48 = vpop.f32.mrb[37].mxu0  ;;  %v4173_v37 = vadd.f32 %v3109_v54, %v2841_v57  ;;  %v2397_v11 = vsub.f32 0.0, %v2293_v5 }
 0xe5f   : > { %3336 = vrcp.f32 %v2310_v29  ;;  %v2311_v62 = vadd.f32 1.0, %v2303_v25  ;;  %v3110_v10 = vpop.f32.mrb[38].mxu0  ;;  %v4175_v27 = vadd.f32 %v2841_v57, %v2261_v48  ;;  %v2404_v58 = vmul.f32 %v2396_v3, %v2292_v44 }
 0xe60   : > { %3338 = vrcp.f32 %v2308_v35  ;;  %v2264_v38 = vpop.f32.mrb[39].mxu0  ;;  %v2309_v34 = vadd.f32 1.0, %v2301_v23  ;;  %v4177_v14 = vadd.f32 %v3110_v10, %v2841_v57  ;;  %v4180_v42 = vmul.f32 0.70710677, %v4173_v37 }
 0xe61   : > { %3340 = vrcp.f32 %v2311_v62  ;;  %v4182_v33 = vadd.f32 %v2841_v57, %v2264_v38  ;;  %v4185_v7 = vmul.f32 0.70710677, %v4175_v27  ;;  %v2407_v57 = vmul.f32 %v2399_v60, %v2295_v18 }
 0xe62   : > { %v4188_v59 = vmul.f32 0.70710677, %v4177_v14  ;;  %3342 = vrcp.f32 %v2309_v34  ;;  %v2298_v8 = vand.u32 2147483647, %v4180_v42  ;;  %v2405_v31 = vmul.f32 %v2397_v11, %v2293_v5 }
 0xe63   : > { %v2296_v16 = vand.u32 2147483647, %v4185_v7  ;;  %v4194_v9 = vmul.f32 0.70710677, %v4182_v33  ;;  %v2416_v30 = vmul.f32 1.442695, %v2406_v15 }
 0xe64   : > { %v2299_v17 = vand.u32 2147483647, %v4188_v59  ;;  %v2306_v4 = vmul.f32 0.3275911, %v2298_v8  ;;  %v2402_v24 = vsub.f32 0.0, %v2298_v8  ;;  %vm2450_vm7 = vcmp.lt.f32.partialorder %v4180_v42, 0.0 }
 0xe65   : > { %v2304_v21 = vmul.f32 0.3275911, %v2296_v16  ;;  %v2297_v46 = vand.u32 2147483647, %v4194_v9  ;;  %v2400_v32 = vsub.f32 0.0, %v2296_v16  ;;  %vm2451_vm8 = vcmp.lt.f32.partialorder %v4188_v59, 0.0 }
 0xe66   : > { %v2307_v22 = vmul.f32 0.3275911, %v2299_v17  ;;  %v2314_v19 = vadd.f32 1.0, %v2306_v4  ;;  %v2412_v25 = vmul.f32 1.442695, %v2404_v58  ;;  %v2410_v54 = vmul.f32 %v2402_v24, %v2298_v8 }
 0xe67   : > { %v2312_v47 = vadd.f32 1.0, %v2304_v21  ;;  %v2305_v44 = vmul.f32 0.3275911, %v2297_v46  ;;  %v2403_v35 = vsub.f32 0.0, %v2299_v17  ;;  %v2418_v5 = vmul.f32 1.442695, %v2407_v57 }
 0xe68   : > { %3344 = vrcp.f32 %v2314_v19  ;;  %v2315_v12 = vadd.f32 1.0, %v2307_v22  ;;  %v2414_v38 = vmul.f32 1.442695, %v2405_v31  ;;  %v2408_v34 = vmul.f32 %v2400_v32, %v2296_v16 }
 0xe69   : > { %v4198_v45 = vpop.eup %3336  ;;  %3346 = vrcp.f32 %v2312_v47  ;;  %v2313_v48 = vadd.f32 1.0, %v2305_v44  ;;  %v2424_v11 = vmul.f32 1.442695, %v2410_v54  ;;  %v2411_v4 = vmul.f32 %v2403_v35, %v2299_v17 }
 0xe6a   : > { %v4201_v28 = vpop.eup %3338  ;;  %v2326_v52 = vmul.f32 1.0614054, %v4198_v45  ;;  %3348 = vrcp.f32 %v2315_v12  ;;  %v2420_v16 = vmul.f32 1.442695, %v2408_v34  ;;  %v2401_v19 = vsub.f32 0.0, %v2297_v46 }
 0xe6b   : > { %v2324_v56 = vmul.f32 1.0614054, %v4201_v28  ;;  %v4205_v26 = vpop.eup %3340  ;;  %3350 = vpow2.f32 %v2416_v30  ;;  %v4220_v17 = vmul.f32 0.5, %v4152_v20  ;;  %vm2448_vm9 = vcmp.lt.f32.partialorder %v4185_v7, 0.0 }
 0xe6c   : > { %v2334_v43 = vadd.f32 -1.4531521, %v2326_v52  ;;  %v2327_v18 = vmul.f32 1.0614054, %v4205_v26  ;;  %v4209_v62 = vpop.eup %3342  ;;  %3352 = vrcp.f32 %v2313_v48  ;;  %v2409_v54 = vmul.f32 %v2401_v19, %v2297_v46 }
 0xe6d   : > { %v2332_v29 = vadd.f32 -1.4531521, %v2324_v56  ;;  %v2325_v60 = vmul.f32 1.0614054, %v4209_v62  ;;  %3354 = vpow2.f32 %v2412_v25  ;;  %v2426_v56 = vmul.f32 1.442695, %v2411_v4 }
 0xe6e   : > { %v2342_v23 = vmul.f32 %v4198_v45, %v2334_v43  ;;  %v2335_v3 = vadd.f32 -1.4531521, %v2327_v18  ;;  %3356 = vpow2.f32 %v2418_v5  ;;  %vm2449_vm10 = vcmp.lt.f32.partialorder %v4194_v9, 0.0 }
 0xe6f   : > { %v2340_v10 = vmul.f32 %v4201_v28, %v2332_v29  ;;  %v2333_v22 = vadd.f32 -1.4531521, %v2325_v60  ;;  %3358 = vpow2.f32 %v2414_v38  ;;  %v2280_v59 = vmul.f32 0.5, %v4175_v27  ;;  %v2846_v27 = vld [vmem:[%s4363_s19] ss:$0 sm:$0xff] }
 0xe70   : > { %v2350_v2 = vadd.f32 1.4214138, %v2342_v23  ;;  %v2343_v21 = vmul.f32 %v4205_v26, %v2335_v3  ;;  %3360 = vpow2.f32 %v2424_v11 }
 0xe71   : > { %v2348_v8 = vadd.f32 1.4214138, %v2340_v10  ;;  %v2341_v57 = vmul.f32 %v4209_v62, %v2333_v22  ;;  %3362 = vpow2.f32 %v2420_v16  ;;  %v4234_v10 = vmul.f32 0.5, %v4156_v39 }
 0xe72   : > { %v2358_v15 = vmul.f32 %v4198_v45, %v2350_v2  ;;  %v2351_v52 = vadd.f32 1.4214138, %v2343_v21  ;;  %v4217_v31 = vpop.eup %3344  ;;  %3364 = vpow2.f32 %v2426_v56 }
 0xe73   : > { %v2356_v58 = vmul.f32 %v4201_v28, %v2348_v8  ;;  %v4222_v32 = vpop.eup %3346  ;;  %v2349_v30 = vadd.f32 1.4214138, %v2341_v57  ;;  %v2330_v44 = vmul.f32 1.0614054, %v4217_v31 }
 0xe74   : > { %v2366_v24 = vadd.f32 -0.28449672, %v2358_v15  ;;  %v2359_v43 = vmul.f32 %v4205_v26, %v2351_v52  ;;  %v2328_v25 = vmul.f32 1.0614054, %v4222_v32  ;;  %v4230_v5 = vpop.eup %3348  ;;  %v2422_v15 = vmul.f32 1.442695, %v2409_v54 }
 0xe75   : > { %v2364_v47 = vadd.f32 -0.28449672, %v2356_v58  ;;  %v2357_v23 = vmul.f32 %v4209_v62, %v2349_v30  ;;  %v2338_v18 = vadd.f32 -1.4531521, %v2330_v44  ;;  %v3351_v34 = vpop.eup %3350  ;;  %v2331_v39 = vmul.f32 1.0614054, %v4230_v5 }
 0xe76   : > { %v2374_v12 = vmul.f32 %v4198_v45, %v2366_v24  ;;  %v2367_v35 = vadd.f32 -0.28449672, %v2359_v43  ;;  %v2336_v38 = vadd.f32 -1.4531521, %v2328_v25  ;;  %v4240_v8 = vpop.eup %3352  ;;  %3366 = vpow2.f32 %v2422_v15 }
 0xe77   : > { %v2372_v29 = vmul.f32 %v4201_v28, %v2364_v47  ;;  %v2365_v3 = vadd.f32 -0.28449672, %v2357_v23  ;;  %v2346_v60 = vmul.f32 %v4217_v31, %v2338_v18  ;;  %v3355_v21 = vpop.eup %3354  ;;  %v2339_v57 = vadd.f32 -1.4531521, %v2331_v39 }
 0xe78   : > { %v2382_v20 = vadd.f32 0.2548296, %v2374_v12  ;;  %v2375_v46 = vmul.f32 %v4205_v26, %v2367_v35  ;;  %v2344_v4 = vmul.f32 %v4222_v32, %v2336_v38  ;;  %v3357_v19 = vpop.eup %3356  ;;  %v2329_v47 = vmul.f32 1.0614054, %v4240_v8 }
 0xe79   : > { %v2380_v48 = vadd.f32 0.2548296, %v2372_v29  ;;  %v2354_v16 = vadd.f32 1.4214138, %v2346_v60  ;;  %v2347_v54 = vmul.f32 %v4230_v5, %v2339_v57 }
 0xe7a   : > { %v2390_v2 = vmul.f32 %v4198_v45, %v2382_v20  ;;  %v2383_v58 = vadd.f32 0.2548296, %v2375_v46  ;;  %v2373_v45 = vmul.f32 %v4209_v62, %v2365_v3  ;;  %v2352_v52 = vadd.f32 1.4214138, %v2344_v4 }
 0xe7b   : > { %v2388_v11 = vmul.f32 %v4201_v28, %v2380_v48  ;;  %v3359_v28 = vpop.eup %3358  ;;  %v2362_v30 = vmul.f32 %v4217_v31, %v2354_v16  ;;  %v2337_v20 = vadd.f32 -1.4531521, %v2329_v47  ;;  %v2355_v46 = vadd.f32 1.4214138, %v2347_v54 }
 0xe7c   : > { %v2430_v22 = vmul.f32 %v3351_v34, %v2390_v2  ;;  %v2391_v12 = vmul.f32 %v4205_v26, %v2383_v58  ;;  %v2381_v43 = vadd.f32 0.2548296, %v2373_v45  ;;  %v3361_v44 = vpop.eup %3360  ;;  %v2360_v25 = vmul.f32 %v4222_v32, %v2352_v52 }
 0xe7d   : > { %v2428_v24 = vmul.f32 %v3355_v21, %v2388_v11  ;;  %v2370_v48 = vadd.f32 -0.28449672, %v2362_v30  ;;  %v3363_v38 = vpop.eup %3362  ;;  %v2345_v26 = vmul.f32 %v4240_v8, %v2337_v20 }
 0xe7e   : > { %v2438_v56 = vsub.f32 1.0, %v2430_v22  ;;  %v2431_v23 = vmul.f32 %v3357_v19, %v2391_v12  ;;  %v2389_v18 = vmul.f32 %v4209_v62, %v2381_v43  ;;  %v2368_v2 = vadd.f32 -0.28449672, %v2360_v25  ;;  %v3365_v39 = vpop.eup %3364 }
 0xe7f   : > { %v2436_v29 = vsub.f32 1.0, %v2428_v24  ;;  %v2378_v4 = vmul.f32 %v4217_v31, %v2370_v48  ;;  %v2363_v22 = vmul.f32 %v4230_v5, %v2355_v46  ;;  %v2353_v52 = vadd.f32 1.4214138, %v2345_v26 }
 0xe80   : > { %v2454_v35 = vsub.f32 0.0, %v2438_v56  ;;  %v2439_v60 = vsub.f32 1.0, %v2431_v23  ;;  %v2429_v11 = vmul.f32 %v3359_v28, %v2389_v18  ;;  %v2376_v62 = vmul.f32 %v4222_v32, %v2368_v2 }
 0xe81   : > { %v2452_v34 = vsub.f32 0.0, %v2436_v29  ;;  %v2386_v19 = vadd.f32 0.2548296, %v2378_v4  ;;  %v2371_v24 = vadd.f32 -0.28449672, %v2363_v22  ;;  %v2361_v30 = vmul.f32 %v4240_v8, %v2353_v52 }
 0xe82   : > { %v2462_v3 = vsel %vm2446_vm3, %v2454_v35, %v2438_v56  ;;  %v2455_v45 = vsub.f32 0.0, %v2439_v60  ;;  %v2437_v16 = vsub.f32 1.0, %v2429_v11  ;;  %v2384_v40 = vadd.f32 0.2548296, %v2376_v62 }
 0xe83   : > { %v2460_v21 = vsel %vm2444_vm4, %v2452_v34, %v2436_v29  ;;  %v2470_v58 = vadd.f32 1.0, %v2462_v3  ;;  %v2394_v28 = vmul.f32 %v4217_v31, %v2386_v19  ;;  %v2379_v43 = vmul.f32 %v4230_v5, %v2371_v24 }
 0xe84   : > { %v2468_v57 = vadd.f32 1.0, %v2460_v21  ;;  %v2463_v47 = vsel %vm2447_vm5, %v2455_v45, %v2439_v60  ;;  %v2453_v63 = vsub.f32 0.0, %v2437_v16  ;;  %v2392_v12 = vmul.f32 %v4222_v32, %v2384_v40 }
 0xe85   : > { %v2471_v56 = vadd.f32 1.0, %v2463_v47  ;;  %v2478_v29 = vmul.f32 %v2470_v58, %v4196_v13  ;;  %v2277_v25 = vmul.f32 0.5, %v4161_v41  ;;  %v2434_v54 = vmul.f32 %v3361_v44, %v2394_v28  ;;  %v3367_v44 = vpop.eup %3366 }
 0xe86   : > { %v2461_v15 = vsel %vm2445_vm6, %v2453_v63, %v2437_v16  ;;  %v2432_v35 = vmul.f32 %v3363_v38, %v2392_v12  ;;  %v2387_v31 = vadd.f32 0.2548296, %v2379_v43  ;;  %v2369_v18 = vadd.f32 -0.28449672, %v2361_v30 }
 0xe87   : > { %v2479_v49 = vmul.f32 %v2471_v56, %v4234_v10  ;;  %v2469_v20 = vadd.f32 1.0, %v2461_v15  ;;  %v2442_v23 = vsub.f32 1.0, %v2434_v54  ;;  %v2476_v32 = vmul.f32 %v2468_v57, %v4220_v17 }
 0xe88   : > { %v2395_v2 = vmul.f32 %v4230_v5, %v2387_v31  ;;  %v2440_v46 = vsub.f32 1.0, %v2432_v35  ;;  %v2377_v41 = vmul.f32 %v4240_v8, %v2369_v18  ;;  %v2282_v21 = vmul.f32 0.5, %v4173_v37 }
 0xe89   : > { %v2485_v48 = vpack.c.bf16 %v2479_v49, %v2478_v29  ;;  %v2477_v34 = vmul.f32 %v2469_v20, %v2277_v25  ;;  %v2458_v13 = vsub.f32 0.0, %v2442_v23  ;;  %v2283_v62 = vmul.f32 0.5, %v4177_v14  ;;  %v2583_v14 = vld [vmem:[%s4350_s6] sm:$0xff] }
 0xe8a   : > { %v2435_v61 = vmul.f32 %v3365_v39, %v2395_v2  ;;  %v2385_v10 = vadd.f32 0.2548296, %v2377_v41  ;;  %v2456_v60 = vsub.f32 0.0, %v2440_v46  ;;  %v2281_v37 = vmul.f32 0.5, %v4182_v33  ;;  %3151 = vmatprep.mubr.msk.f32.mxu1 %vm877_vm1, %v2583_v14  ;;  %v2588_v41 = vld [vmem:[%s4350_s6 + $0x28] sm:$0xff] }
 0xe8b   : > { %v2484_v26 = vpack.c.bf16 %v2477_v34, %v2476_v32  ;;  %v2466_v38 = vsel %vm2450_vm7, %v2458_v13, %v2442_v23 }
 0xe8c   : > { %v2443_v3 = vsub.f32 1.0, %v2435_v61  ;;  %v2393_v17 = vmul.f32 %v4240_v8, %v2385_v10  ;;  %v2474_v4 = vadd.f32 1.0, %v2466_v38  ;;  %v2464_v42 = vsel %vm2448_vm9, %v2456_v60, %v2440_v46  ;;  %v2589_v61 = vld [vmem:[%s4350_s6 + $0x30] sm:$0xff] }
 0xe8d   : > { %3127 = vmatprep.mubr.bf16.mxu0 %v2484_v26  ;;  %v2472_v8 = vadd.f32 1.0, %v2464_v42  ;;  %v2590_v26 = vld [vmem:[%s4350_s6 + $0x38] sm:$0xff] }
 0xe8e   : > { %3128 = vmatmul.mubr.bf16.vlgmr.msra.gmra.mrb[40].mxu0 %v2485_v48  ;;  %v2459_v11 = vsub.f32 0.0, %v2443_v3  ;;  %v2433_v5 = vmul.f32 %v3367_v44, %v2393_v17  ;;  %v2482_v45 = vmul.f32 %v2474_v4, %v2282_v21 }
 0xe8f   : > { %v2480_v7 = vmul.f32 %v2472_v8, %v2280_v59 }
 0xe90   : > { %v2467_v39 = vsel %vm2451_vm8, %v2459_v11, %v2443_v3  ;;  %v2441_v58 = vsub.f32 1.0, %v2433_v5 }
 0xe91   : > { %v2475_v22 = vadd.f32 1.0, %v2467_v39 }
 0xe92   : > { %v2457_v19 = vsub.f32 0.0, %v2441_v58 }
 0xe93   : > { %v2483_v16 = vmul.f32 %v2475_v22, %v2283_v62 }
 0xe94   : > { %v2465_v40 = vsel %vm2449_vm10, %v2457_v19, %v2441_v58 }
 0xe95   : > { %v2487_v24 = vpack.c.bf16 %v2483_v16, %v2482_v45  ;;  %v2473_v52 = vadd.f32 1.0, %v2465_v40 }
 0xe97   : > { %v2481_v57 = vmul.f32 %v2473_v52, %v2281_v37 }
 0xe99   : > { %v2486_v47 = vpack.c.bf16 %v2481_v57, %v2480_v7 }
 0xe9b   : > { %3131 = vmatprep.mubr.bf16.mxu0 %v2486_v47 }
 0xe9c   : > { %3132 = vmatmul.mubr.bf16.gmra.mrb[44].mxu0 %v2487_v24 }
 0xf61   : > { %v3129_v63 = vpop.f32.mrb[40].mxu0 }
 0xf62   : > { %v2563_v9 = vadd.f32 %v3129_v63, %v3989_v50  ;;  %v2530_v28 = vpop.f32.mrb[41].mxu0 }
 0xf63   : > { %v2561_v33 = vadd.f32 %v2530_v28, %v3986_v53  ;;  %v3130_v56 = vpop.f32.mrb[42].mxu0 }
 0xf64   : > { %v2564_v12 = vadd.f32 %v3130_v56, %v3998_v36  ;;  %v2533_v43 = vpop.f32.mrb[43].mxu0  ;;  %v2577_v29 = vadd.f32 %v2846_v27, %v2563_v9 }
 0xf65   : > { %v2562_v30 = vadd.f32 %v2533_v43, %v3991_v51  ;;  %v2575_v15 = vadd.f32 %v2846_v27, %v2561_v33 }
 0xf66   : > { %v2578_v25 = vadd.f32 %v2846_v27, %v2564_v12 }
 0xf67   : > { %v2576_v54 = vadd.f32 %v2846_v27, %v2562_v30 }
 0xf68   : > { %v3183_v49 = vpack.c.bf16 %v2578_v25, %v2577_v29 }
 0xf69   : > { %v3179_v20 = vpack.c.bf16 %v2576_v54, %v2575_v15 }
 0xf6b   : > { %3180 = vmatprep.subr.bf16.mxu1 %v3179_v20 }
 0xf6c   : > { %3182 = vmatpush3.bf16.msra.mxu1 %v3179_v20 }
 0xf6d   : > { %3184 = vmatprep.subr.bf16.mxu1 %v3183_v49 }
 0xf6f   : > { %v3133_v50 = vpop.f32.mrb[44].mxu0 }
 0xf70   : > { %3186 = vmatpush3.bf16.msra.mxu1 %v3183_v49  ;;  %v2567_v35 = vadd.f32 %v3133_v50, %v4015_v6  ;;  %v2546_v53 = vpop.f32.mrb[45].mxu0  ;;  %v2587_v6 = vld [vmem:[%s4350_s6 + $0x20] sm:$0xff] }
 0xf71   : > { %v2565_v31 = vadd.f32 %v2546_v53, %v4005_v0  ;;  %v3134_v36 = vpop.f32.mrb[46].mxu0  ;;  %v2584_v0 = vld [vmem:[%s4350_s6 + $0x8] sm:$0xff] }
 0xf72   : > { %v2568_v23 = vadd.f32 %v3134_v36, %v4011_v55  ;;  %v2549_v51 = vpop.f32.mrb[47].mxu0  ;;  %v2581_v32 = vadd.f32 %v2846_v27, %v2567_v35  ;;  %v2585_v55 = vld [vmem:[%s4350_s6 + $0x10] sm:$0xff] }
 0xf73   : > { %v2566_v18 = vadd.f32 %v2549_v51, %v4007_v1  ;;  %v2579_v34 = vadd.f32 %v2846_v27, %v2565_v31  ;;  %v2586_v1 = vld [vmem:[%s4350_s6 + $0x18] sm:$0xff] }
 0xf74   : > { %v2582_v48 = vadd.f32 %v2846_v27, %v2568_v23 }
 0xf75   : > { %v2580_v2 = vadd.f32 %v2846_v27, %v2566_v18 }
 0xf76   : > { %v3191_v13 = vpack.c.bf16 %v2582_v48, %v2581_v32 }
 0xf77   : > { %v3187_v46 = vpack.c.bf16 %v2580_v2, %v2579_v34 }
 0xf79   : > { %3188 = vmatprep.subr.bf16.mxu1 %v3187_v46 }
 0xf7a   : > { %3190 = vmatpush3.bf16.msra.mxu1 %v3187_v46 }
 0xf7b   : > { %3192 = vmatprep.subr.bf16.mxu1 %v3191_v13 }
 0xf7e   : > { %3194 = vmatpush3.bf16.msra.mxu1 %v3191_v13 }
 0xf81   : > { %3152 = vmatmul.mubr.msk.f32.vlgmr.msra.gmra.mrb[32].mxu1 %vm877_vm1, %v2584_v0 }
 0xf82   : > { %3154 = vmatprep.mubr.msk.f32.mxu1 %vm877_vm1, %v2585_v55 }
 0xf85   : > { %3155 = vmatmul.mubr.msk.f32.gmra.mrb[34].mxu1 %vm877_vm1, %v2586_v1 }
 0xf86   : > { %3157 = vmatprep.mubr.msk.f32.mxu1 %vm877_vm1, %v2587_v6 }
 0xf89   : > { %3158 = vmatmul.mubr.msk.f32.gmra.mrb[36].mxu1 %vm877_vm1, %v2588_v41 }
 0xf8a   : > { %3160 = vmatprep.mubr.msk.f32.mxu1 %vm877_vm1, %v2589_v61 }
 0xf8d   : > { %3161 = vmatmul.mubr.msk.f32.gmra.mrb[38].mxu1 %vm877_vm1, %v2590_v26 }
0x1054   : > { %v3153_v10 = vpop.f32.mrb[32].mxu1 }
0x1055   : > { %2721 = vst.msk [vmem:[%s629_s21 + $0x8] sm:$0xff] %vm656_vm0, %v3153_v10  ;;  %v2681_v44 = vpop.f32.mrb[33].mxu1 }
0x1056   : > { %2720 = vst.msk [vmem:[%s629_s21] sm:$0xff] %vm656_vm0, %v2681_v44 }
0x1058   : > { %v3156_v38 = vpop.f32.mrb[34].mxu1 }
0x1059   : > { %2723 = vst.msk [vmem:[%s629_s21 + $0x18] sm:$0xff] %vm656_vm0, %v3156_v38  ;;  %v2691_v3 = vpop.f32.mrb[35].mxu1 }
0x105a   : > { %2722 = vst.msk [vmem:[%s629_s21 + $0x10] sm:$0xff] %vm656_vm0, %v2691_v3 }
0x105c   : > { %v3159_v60 = vpop.f32.mrb[36].mxu1 }
0x105d   : > { %2725 = vst.msk [vmem:[%s629_s21 + $0x28] sm:$0xff] %vm656_vm0, %v3159_v60  ;;  %v2701_v17 = vpop.f32.mrb[37].mxu1 }
0x105e   : > { %2724 = vst.msk [vmem:[%s629_s21 + $0x20] sm:$0xff] %vm656_vm0, %v2701_v17 }
0x1060   : > { %v3162_v11 = vpop.f32.mrb[38].mxu1 }
0x1061   : > { %2727 = vst.msk [vmem:[%s629_s21 + $0x38] sm:$0xff] %vm656_vm0, %v3162_v11  ;;  %v2711_v4 = vpop.f32.mrb[39].mxu1 }
0x1062   : > { %2726 = vst.msk [vmem:[%s629_s21 + $0x30] sm:$0xff] %vm656_vm0, %v2711_v4 }
0x1063 PF: > { %s30_s1 = sadd.s32 1, %s3374_s1  }
0x1064   : > { %p27_p4 = scmp.ge.s32.totalorder %s30_s1, 4  }
0x1066   :  { %29 = sbr.rel (!%p27_p4) target bundleno = 6 (0x6), region = 130 }

</bundles_post_ra>
